<compile_context>
chip_gen: v7x
topology: tpu7x:2x2x1
jax: 0.10.0
libtpu: 0.0.40
codegen_flags: <defaults>
</compile_context>

<pallas_src>
import functools

import numpy as np
import jax
import jax.numpy as jnp
from jax import lax
from jax.experimental import pallas as pl
from jax.experimental.pallas import tpu as pltpu


# ----------------------------- geometry constants ---------------------------------

_IN_C, _IN_HW = 4, 84          # input channels / spatial, pinned by LayerNorm([512])
_P1 = 20                       # pooled1 spatial: 84 -> conv1(k4,s2) 41 -> maxpool(2,2) 20
_P2 = 4                        # pooled2 spatial: 20 -> conv2(k4,s2) 9  -> avgpool(2,2) 4
_WIN = 6                       # 6x6 window covers both 2x2-pool corners of a k=4,s=2 conv
_NTAP = _WIN * _WIN            # 36 taps of the stage-2 window
_NQ = _P2 * _P2                # 16 pooled2 pixels per image
_K1 = _WIN * _WIN * _IN_C      # 144 = stage-1 window size
_C1, _C2 = 16, 32              # conv channel counts
_FEAT = _C2 * _NQ              # 512 flattened CNN features


# ----------------------------- Pallas kernel ---------------------------------------


def _layernorm(x, g, b, eps):
    """PyTorch LayerNorm over the last dim (biased variance)."""
    mean = jnp.mean(x, axis=-1, keepdims=True)
    var = jnp.mean((x - mean) ** 2, axis=-1, keepdims=True)
    return (x - mean) * lax.rsqrt(var + eps) * g + b


def _fused_forward_kernel(*refs, n_hidden, eps, bound):
    """Whole TD3CNNPolicyNet forward for ONE sample (one grid step).

    conv1+ReLU+MaxPool and conv2+ReLU+AvgPool are fused per stage-2 window tap:
    each tap t computes the 16 pooled1 pixels it needs (one lane-dense corner-concat
    matmul + max over 4 lane groups) and immediately accumulates their conv2
    contribution ((16,16)@(16,128) corner-concat matmul).  Then LN(512) -> hidden
    Linear+ReLU stack -> fc_out -> LN -> clip(-6,6) -> tanh -> *bound.
    """
    win_ref, w1_ref, b1_ref, w2_ref, b2_ref, g1_ref, be1_ref = refs[:7]
    hid_refs = refs[7:7 + 2 * n_hidden]
    wout_ref, bout_ref, g2_ref, be2_ref, o_ref, feat_ref = refs[7 + 2 * n_hidden:]

    w1 = w1_ref[...]                                  # (144, 64) bf16, 4 corners concat
    b1 = b1_ref[...]                                  # (1, 64)   f32
    b2 = b2_ref[...]                                  # (1, 128)  f32

    acc = jnp.zeros((_NQ, 4 * _C2), jnp.float32)      # (16, 128) conv2 pre-bias accumulator
    for t in range(_NTAP):
        a = win_ref[0, t * _NQ:(t + 1) * _NQ, :]                           # (16, 144) bf16
        z = jnp.dot(a, w1, preferred_element_type=jnp.float32) + b1        # conv1 (+bias)
        z = jnp.maximum(z, 0.0)                                            # ReLU
        p = jnp.maximum(jnp.maximum(z[:, 0:16], z[:, 16:32]),
                        jnp.maximum(z[:, 32:48], z[:, 48:64]))             # MaxPool2d(2,2)
        acc = acc + jnp.dot(p.astype(jnp.bfloat16),
                            w2_ref[t * _C1:(t + 1) * _C1, :],
                            preferred_element_type=jnp.float32)            # conv2 tap t
    z2 = jnp.maximum(acc + b2, 0.0)                                        # conv2 bias + ReLU
    pooled2 = 0.25 * (z2[:, 0:32] + z2[:, 32:64]
                      + z2[:, 64:96] + z2[:, 96:128])                      # AvgPool2d(2,2)

    # Flatten (16 pixels, 32 ch) -> (1, 512) through a VMEM scratch row; the NCHW
    # nn.Flatten() permutation is baked into ln1 / hidden[0] at convert time.
    for q in range(_NQ):
        feat_ref[0:1, q * _C2:(q + 1) * _C2] = pooled2[q:q + 1, :]

    h = _layernorm(feat_ref[...], g1_ref[...], be1_ref[...], eps)          # cnn_out_ln
    for i in range(n_hidden):
        w = hid_refs[2 * i][...]
        b = hid_refs[2 * i + 1][...]
        h = jnp.maximum(jnp.dot(h, w, preferred_element_type=jnp.float32) + b, 0.0)
    z = jnp.dot(h, wout_ref[...], preferred_element_type=jnp.float32) + bout_ref[...]
    z = _layernorm(z, g2_ref[...], be2_ref[...], eps)                      # final_ln
    o_ref[0] = jnp.tanh(jnp.clip(z, -6.0, 6.0)) * bound


# ----------------------------- XLA glue (shape plumbing only) ----------------------


def _extract_pool_windows(x_nhwc, out_hw, win=_WIN, stride=4):
    """(N,H,W,C) -> (N, out_hw*out_hw, win*win*C); row R*out_hw+C is the win x win x C
    input window starting at (stride*R, stride*C) flattened as (wa, wb, c)."""
    n, h, w, c = x_nhwc.shape
    hi = stride * (out_hw - 1) + 1
    cols = [x_nhwc[:, a:a + hi:stride, b:b + hi:stride, :]
            for a in range(win) for b in range(win)]
    t = jnp.stack(cols, axis=3)                       # (N, out_hw, out_hw, win*win, C)
    return t.reshape(n, out_hw * out_hw, win * win * c)


def _win_gather_indices():
    """Reorder the 400 stage-1 windows into 576 rows (t*16+q) so that tap t of the
    stage-2 window reads a contiguous 16-row block: row t*16+q is the stage-1 window of
    pooled1 pixel (4u+a, 4v+b), t=a*6+b, q=u*4+v."""
    idx = np.empty((_NTAP * _NQ,), np.int32)
    for a in range(_WIN):
        for b in range(_WIN):
            t = a * _WIN + b
            for u in range(_P2):
                for v in range(_P2):
                    idx[t * _NQ + u * _P2 + v] = (4 * u + a) * _P1 + (4 * v + b)
    return idx


_WIN_IDX = _win_gather_indices()


def _resident_spec(arr):
    """Full-array VMEM-resident BlockSpec (constant block index across the batch grid)."""
    nd = arr.ndim

    def imap(i):
        return (0,) * nd

    return pl.BlockSpec(arr.shape, imap)


# ----------------------------- parameters ------------------------------------------


def init_torch_params(key, hidden_layers_dim, action_dim):
    """Random parameters in native PyTorch layouts (Conv2d: (Cout,Cin,KH,KW); Linear: (out,in))."""
    ks = jax.random.split(key, 6 + len(hidden_layers_dim))

    def nrm(k, shape, scale=0.05):
        return jax.random.normal(k, shape, jnp.float32) * scale

    p = {
        "conv1_w": nrm(ks[0], (16, 4, 4, 4)),  "conv1_b": nrm(ks[1], (16,)),
        "conv2_w": nrm(ks[2], (32, 16, 4, 4)), "conv2_b": nrm(ks[3], (32,)),
        "ln1_g": jnp.ones((_FEAT,), jnp.float32), "ln1_b": jnp.zeros((_FEAT,), jnp.float32),
        "hidden": [],
        "ln2_g": jnp.ones((action_dim,), jnp.float32),
        "ln2_b": jnp.zeros((action_dim,), jnp.float32),
    }
    dims = [_FEAT] + list(hidden_layers_dim)
    for i, hdim in enumerate(hidden_layers_dim):
        kw, kb = jax.random.split(ks[4 + i])
        p["hidden"].append((nrm(kw, (hdim, dims[i])), nrm(kb, (hdim,))))
    kw, kb = jax.random.split(ks[4 + len(hidden_layers_dim)])
    p["fc_out_w"] = nrm(kw, (action_dim, hidden_layers_dim[-1]))
    p["fc_out_b"] = nrm(kb, (action_dim,))
    return p


def _embed_conv_corner(w_torch, di, dj, win=_WIN):
    """Zero-embed a (Cout,Cin,4,4) conv weight at pool-corner offset (2*di, 2*dj) inside a
    win x win window, flattened to (win*win*Cin, Cout) matching _extract_pool_windows()."""
    cout, cin, kh, kw = w_torch.shape
    w = jnp.zeros((win, win, cin, cout), jnp.float32)
    w = w.at[2 * di:2 * di + kh, 2 * dj:2 * dj + kw].set(jnp.transpose(w_torch, (2, 3, 1, 0)))
    return w.reshape(win * win * cin, cout)


def convert_params(tp):
    """One-time conversion of PyTorch-layout params into kernel layouts."""
    p = {}
    # Corner-concatenated, zero-embedded conv weights -> one lane-dense matmul per stage;
    # bf16 MXU operands, biases stay f32.
    p["w1"] = jnp.concatenate([_embed_conv_corner(tp["conv1_w"], di, dj)
                               for di in (0, 1) for dj in (0, 1)],
                              axis=1).astype(jnp.bfloat16)            # (144, 64)
    p["b1"] = jnp.tile(tp["conv1_b"], 4).reshape(1, 4 * _C1)
    p["w2"] = jnp.concatenate([_embed_conv_corner(tp["conv2_w"], di, dj)
                               for di in (0, 1) for dj in (0, 1)],
                              axis=1).astype(jnp.bfloat16)            # (576, 128)
    p["b2"] = jnp.tile(tp["conv2_b"], 4).reshape(1, 4 * _C2)

    # In-kernel flatten order is f' = q*32 + c; PyTorch's NCHW nn.Flatten() is f = c*16 + q.
    # Bake that permutation into ln1 and the first hidden weight (no runtime transpose).
    m = jnp.arange(_FEAT)
    perm = (m % _C2) * _NQ + (m // _C2)
    p["ln1_g"] = tp["ln1_g"][perm].reshape(1, _FEAT)
    p["ln1_b"] = tp["ln1_b"][perm].reshape(1, _FEAT)

    hidden = []
    for i, (w_t, b_t) in enumerate(tp["hidden"]):
        w = w_t.T                                                     # (in, out), f32 tail
        if i == 0:
            w = w[perm, :]
        hidden.append((w, b_t.reshape(1, -1)))
    p["hidden"] = hidden
    p["w_out"] = tp["fc_out_w"].T
    p["b_out"] = tp["fc_out_b"].reshape(1, -1)
    p["ln2_g"] = tp["ln2_g"].reshape(1, -1)
    p["ln2_b"] = tp["ln2_b"].reshape(1, -1)
    return p


# ----------------------------- forward ----------------------------------------------


def td3_cnn_policy_forward(params, state_nchw, action_bound=1.0):
    # forward(): state.unsqueeze(0) if 3-D
    if state_nchw.ndim == 3:
        state_nchw = state_nchw[None]
    n, c, hh, ww = state_nchw.shape
    if (c, hh, ww) != (_IN_C, _IN_HW, _IN_HW):
        raise ValueError(f"TD3CNNPolicyNet expects (*, 4, 84, 84) input, got {state_nchw.shape}")
    action_dim = params["w_out"].shape[1]
    n_hidden = len(params["hidden"])

    # XLA glue: NCHW -> NHWC, bf16 cast (halves the only batch-scaled HBM transfer),
    # im2col-style 6x6 window extraction, reordered so each stage-2 tap is contiguous.
    x = jnp.transpose(state_nchw, (0, 2, 3, 1)).astype(jnp.bfloat16)
    win_all = _extract_pool_windows(x, out_hw=_P1)                 # (N, 400, 144) bf16
    win1 = jnp.take(win_all, _WIN_IDX, axis=1)                     # (N, 576, 144) bf16

    inputs = [win1, params["w1"], params["b1"], params["w2"], params["b2"],
              params["ln1_g"], params["ln1_b"]]
    for (wh, bh) in params["hidden"]:
        inputs += [wh, bh]
    inputs += [params["w_out"], params["b_out"], params["ln2_g"], params["ln2_b"]]

    in_specs = [pl.BlockSpec((1, _NTAP * _NQ, _K1), lambda i: (i, 0, 0))]
    in_specs += [_resident_spec(a) for a in inputs[1:]]

    flops = 2 * n * (_NTAP * _NQ * _K1 * 4 * _C1 + _NQ * _NTAP * _C1 * 4 * _C2)
    dims = [_FEAT] + [wh.shape[1] for (wh, _) in params["hidden"]] + [action_dim]
    for d_in, d_out in zip(dims[:-1], dims[1:]):
        flops += 2 * n * d_in * d_out
    bytes_accessed = int(sum(int(np.prod(a.shape)) * a.dtype.itemsize for a in inputs)
                         + n * action_dim * 4)

    out = pl.pallas_call(
        functools.partial(_fused_forward_kernel, n_hidden=n_hidden, eps=1e-5,
                          bound=float(action_bound)),
        out_shape=jax.ShapeDtypeStruct((n, 1, action_dim), jnp.float32),
        grid=(n,),
        in_specs=in_specs,
        out_specs=pl.BlockSpec((1, 1, action_dim), lambda i: (i, 0, 0)),
        scratch_shapes=[pltpu.VMEM((1, _FEAT), jnp.float32)],
        compiler_params=pltpu.CompilerParams(
            dimension_semantics=("parallel",),
            vmem_limit_bytes=32 * 1024 * 1024),
        cost_estimate=pl.CostEstimate(flops=flops,
                                      transcendentals=n * (action_dim + 4),
                                      bytes_accessed=bytes_accessed),
    )(*inputs)
    # TODO(synk): the gym action-space rescale branch (low_high_flag=True / max_min_scale)
    # is not implemented; this is the plain `tanh * action_bound` path.
    return out.reshape(n, action_dim)


# ----------------------------- pure-JAX reference (for self-check) ------------------


def reference_forward(tp, state_nchw, action_bound=1.0):
    """Faithful JAX port of the PyTorch module, with the kernel's bf16 MXU operand
    rounding mirrored on the conv path so the comparison isolates structural errors."""
    q = lambda a: a.astype(jnp.bfloat16).astype(jnp.float32)
    dn = ("NCHW", "OIHW", "NCHW")
    x = q(state_nchw.astype(jnp.float32))
    y = lax.conv_general_dilated(x, q(tp["conv1_w"]), (2, 2), "VALID",
                                 dimension_numbers=dn, precision=lax.Precision.HIGHEST)
    y = jnp.maximum(y + tp["conv1_b"][None, :, None, None], 0.0)
    y = lax.reduce_window(y, -jnp.inf, lax.max, (1, 1, 2, 2), (1, 1, 2, 2), "VALID")
    y = q(y)
    y = lax.conv_general_dilated(y, q(tp["conv2_w"]), (2, 2), "VALID",
                                 dimension_numbers=dn, precision=lax.Precision.HIGHEST)
    y = jnp.maximum(y + tp["conv2_b"][None, :, None, None], 0.0)
    y = lax.reduce_window(y, 0.0, lax.add, (1, 1, 2, 2), (1, 1, 2, 2), "VALID") * 0.25
    f = y.reshape(y.shape[0], -1)                                  # nn.Flatten (NCHW order)

    def ln(v, g, b):
        m = v.mean(-1, keepdims=True)
        var = ((v - m) ** 2).mean(-1, keepdims=True)
        return (v - m) * lax.rsqrt(var + 1e-5) * g + b

    h = ln(f, tp["ln1_g"], tp["ln1_b"])
    for w, b in tp["hidden"]:
        h = jnp.maximum(h @ w.T + b, 0.0)
    z = h @ tp["fc_out_w"].T + tp["fc_out_b"]
    z = ln(z, tp["ln2_g"], tp["ln2_b"])
    return jnp.tanh(jnp.clip(z, -6.0, 6.0)) * action_bound


# ----------------------------- main --------------------------------------------------


if __name__ == "__main__":
    key = jax.random.PRNGKey(0)
    k_param, k_state = jax.random.split(key)

    hidden_layers_dim = [64, 32]
    action_dim = 4
    torch_params = init_torch_params(k_param, hidden_layers_dim, action_dim)
    params = convert_params(torch_params)

    # Input implied by the module: 4-channel 84x84 frames (LayerNorm([512]) pins 84x84), batch 2.
    state = jax.random.normal(k_state, (2, _IN_C, _IN_HW, _IN_HW), jnp.float32)

    fwd = jax.jit(td3_cnn_policy_forward, static_argnames=("action_bound",))
    act = jax.block_until_ready(fwd(params, state, action_bound=1.0))
    ref = jax.block_until_ready(reference_forward(torch_params, state, 1.0))

    assert act.shape == (2, action_dim), act.shape
    assert bool(jnp.all(jnp.isfinite(act)))
    assert bool(jnp.all(jnp.abs(act) <= 1.0 + 1e-6))     # tanh * 1.0 bound
    err = float(jnp.max(jnp.abs(act - ref)))
    # bf16 conv-path rounding + accumulation-order differences; structural bugs give O(1) errors.
    assert err < 5e-2, f"max |pallas - reference| = {err}"
    print("KERNEL_OK")
</pallas_src>

<mosaic_0001>
module attributes {stable_mosaic.version = 11 : i64} {
  func.func @_fused_forward_kernel(%arg0: i32, %arg1: memref<1x576x144xbf16, #tpu.memory_space<vmem>>, %arg2: memref<144x64xbf16, #tpu.memory_space<vmem>>, %arg3: memref<1x64xf32, #tpu.memory_space<vmem>>, %arg4: memref<576x128xbf16, #tpu.memory_space<vmem>>, %arg5: memref<1x128xf32, #tpu.memory_space<vmem>>, %arg6: memref<1x512xf32, #tpu.memory_space<vmem>>, %arg7: memref<1x512xf32, #tpu.memory_space<vmem>>, %arg8: memref<512x64xf32, #tpu.memory_space<vmem>>, %arg9: memref<1x64xf32, #tpu.memory_space<vmem>>, %arg10: memref<64x32xf32, #tpu.memory_space<vmem>>, %arg11: memref<1x32xf32, #tpu.memory_space<vmem>>, %arg12: memref<32x4xf32, #tpu.memory_space<vmem>>, %arg13: memref<1x4xf32, #tpu.memory_space<vmem>>, %arg14: memref<1x4xf32, #tpu.memory_space<vmem>>, %arg15: memref<1x4xf32, #tpu.memory_space<vmem>>, %arg16: memref<1x1x4xf32, #tpu.memory_space<vmem>>, %arg17: memref<1x512xf32, #tpu.memory_space<vmem>>) attributes {dimension_semantics = [#tpu.dimension_semantics<parallel>], iteration_bounds = array<i64: 2>, scalar_prefetch = 0 : i64, scratch_operands = 1 : i64, tpu.core_type = #tpu.core_type<tc>, window_params = [{transform_indices = @transform_0, window_bounds = array<i64: 1, 576, 144>}, {pipeline_mode = #tpu.pipeline_mode<synchronous>, transform_indices = @transform_1, window_bounds = array<i64: 144, 64>}, {pipeline_mode = #tpu.pipeline_mode<synchronous>, transform_indices = @transform_2, window_bounds = array<i64: 1, 64>}, {pipeline_mode = #tpu.pipeline_mode<synchronous>, transform_indices = @transform_3, window_bounds = array<i64: 576, 128>}, {pipeline_mode = #tpu.pipeline_mode<synchronous>, transform_indices = @transform_4, window_bounds = array<i64: 1, 128>}, {pipeline_mode = #tpu.pipeline_mode<synchronous>, transform_indices = @transform_5, window_bounds = array<i64: 1, 512>}, {pipeline_mode = #tpu.pipeline_mode<synchronous>, transform_indices = @transform_6, window_bounds = array<i64: 1, 512>}, {pipeline_mode = #tpu.pipeline_mode<synchronous>, transform_indices = @transform_7, window_bounds = array<i64: 512, 64>}, {pipeline_mode = #tpu.pipeline_mode<synchronous>, transform_indices = @transform_8, window_bounds = array<i64: 1, 64>}, {pipeline_mode = #tpu.pipeline_mode<synchronous>, transform_indices = @transform_9, window_bounds = array<i64: 64, 32>}, {pipeline_mode = #tpu.pipeline_mode<synchronous>, transform_indices = @transform_10, window_bounds = array<i64: 1, 32>}, {pipeline_mode = #tpu.pipeline_mode<synchronous>, transform_indices = @transform_11, window_bounds = array<i64: 32, 4>}, {pipeline_mode = #tpu.pipeline_mode<synchronous>, transform_indices = @transform_12, window_bounds = array<i64: 1, 4>}, {pipeline_mode = #tpu.pipeline_mode<synchronous>, transform_indices = @transform_13, window_bounds = array<i64: 1, 4>}, {pipeline_mode = #tpu.pipeline_mode<synchronous>, transform_indices = @transform_14, window_bounds = array<i64: 1, 4>}, {transform_indices = @transform_15, window_bounds = array<i64: 1, 1, 4>}]} {
    %c0 = arith.constant 0 : index
    %c0_0 = arith.constant 0 : index
    %0 = vector.load %arg2[%c0, %c0_0] : memref<144x64xbf16, #tpu.memory_space<vmem>>, vector<144x64xbf16>
    %c0_1 = arith.constant 0 : index
    %c0_2 = arith.constant 0 : index
    %1 = vector.load %arg3[%c0_1, %c0_2] : memref<1x64xf32, #tpu.memory_space<vmem>>, vector<1x64xf32>
    %c0_3 = arith.constant 0 : index
    %c0_4 = arith.constant 0 : index
    %2 = vector.load %arg5[%c0_3, %c0_4] : memref<1x128xf32, #tpu.memory_space<vmem>>, vector<1x128xf32>
    %cst = arith.constant 0.000000e+00 : f32
    %3 = vector.broadcast %cst : f32 to vector<16x128xf32>
    %c0_5 = arith.constant 0 : index
    %c0_6 = arith.constant 0 : index
    %c0_7 = arith.constant 0 : index
    %4 = vector.load %arg1[%c0_5, %c0_6, %c0_7] : memref<1x576x144xbf16, #tpu.memory_space<vmem>>, vector<1x16x144xbf16>
    %5 = vector.shape_cast %4 : vector<1x16x144xbf16> to vector<16x144xbf16>
    %cst_8 = arith.constant dense<0.000000e+00> : vector<16x64xf32>
    %6 = tpu.matmul %5, %0, %cst_8 {dimension_numbers = #tpu.dot_dimension_numbers<[1], [0], [0], [1], [0, 0, 1, 1], [], []>} : vector<16x144xbf16>, vector<144x64xbf16>, vector<16x64xf32> -> vector<16x64xf32>
    %7 = vector.broadcast %1 : vector<1x64xf32> to vector<16x64xf32>
    %8 = arith.addf %6, %7 : vector<16x64xf32>
    %cst_9 = arith.constant 0.000000e+00 : f32
    %9 = vector.broadcast %cst_9 : f32 to vector<16x64xf32>
    %10 = arith.maximumf %8, %9 : vector<16x64xf32>
    %11 = vector.extract_strided_slice %10 {offsets = [0, 0], sizes = [16, 16], strides = [1, 1]} : vector<16x64xf32> to vector<16x16xf32>
    %12 = vector.extract_strided_slice %10 {offsets = [0, 16], sizes = [16, 16], strides = [1, 1]} : vector<16x64xf32> to vector<16x16xf32>
    %13 = arith.maximumf %11, %12 : vector<16x16xf32>
    %14 = vector.extract_strided_slice %10 {offsets = [0, 32], sizes = [16, 16], strides = [1, 1]} : vector<16x64xf32> to vector<16x16xf32>
    %15 = vector.extract_strided_slice %10 {offsets = [0, 48], sizes = [16, 16], strides = [1, 1]} : vector<16x64xf32> to vector<16x16xf32>
    %16 = arith.maximumf %14, %15 : vector<16x16xf32>
    %17 = arith.maximumf %13, %16 : vector<16x16xf32>
    %18 = arith.truncf %17 : vector<16x16xf32> to vector<16x16xbf16>
    %c0_10 = arith.constant 0 : index
    %c0_11 = arith.constant 0 : index
    %19 = vector.load %arg4[%c0_10, %c0_11] : memref<576x128xbf16, #tpu.memory_space<vmem>>, vector<16x128xbf16>
    %cst_12 = arith.constant dense<0.000000e+00> : vector<16x128xf32>
    %20 = tpu.matmul %18, %19, %cst_12 {dimension_numbers = #tpu.dot_dimension_numbers<[1], [0], [0], [1], [0, 0, 1, 1], [], []>} : vector<16x16xbf16>, vector<16x128xbf16>, vector<16x128xf32> -> vector<16x128xf32>
    %21 = arith.addf %3, %20 : vector<16x128xf32>
    %c0_13 = arith.constant 0 : index
    %c16 = arith.constant 16 : index
    %c0_14 = arith.constant 0 : index
    %22 = vector.load %arg1[%c0_13, %c16, %c0_14] : memref<1x576x144xbf16, #tpu.memory_space<vmem>>, vector<1x16x144xbf16>
    %23 = vector.shape_cast %22 : vector<1x16x144xbf16> to vector<16x144xbf16>
    %cst_15 = arith.constant dense<0.000000e+00> : vector<16x64xf32>
    %24 = tpu.matmul %23, %0, %cst_15 {dimension_numbers = #tpu.dot_dimension_numbers<[1], [0], [0], [1], [0, 0, 1, 1], [], []>} : vector<16x144xbf16>, vector<144x64xbf16>, vector<16x64xf32> -> vector<16x64xf32>
    %25 = vector.broadcast %1 : vector<1x64xf32> to vector<16x64xf32>
    %26 = arith.addf %24, %25 : vector<16x64xf32>
    %cst_16 = arith.constant 0.000000e+00 : f32
    %27 = vector.broadcast %cst_16 : f32 to vector<16x64xf32>
    %28 = arith.maximumf %26, %27 : vector<16x64xf32>
    %29 = vector.extract_strided_slice %28 {offsets = [0, 0], sizes = [16, 16], strides = [1, 1]} : vector<16x64xf32> to vector<16x16xf32>
    %30 = vector.extract_strided_slice %28 {offsets = [0, 16], sizes = [16, 16], strides = [1, 1]} : vector<16x64xf32> to vector<16x16xf32>
    %31 = arith.maximumf %29, %30 : vector<16x16xf32>
    %32 = vector.extract_strided_slice %28 {offsets = [0, 32], sizes = [16, 16], strides = [1, 1]} : vector<16x64xf32> to vector<16x16xf32>
    %33 = vector.extract_strided_slice %28 {offsets = [0, 48], sizes = [16, 16], strides = [1, 1]} : vector<16x64xf32> to vector<16x16xf32>
    %34 = arith.maximumf %32, %33 : vector<16x16xf32>
    %35 = arith.maximumf %31, %34 : vector<16x16xf32>
    %36 = arith.truncf %35 : vector<16x16xf32> to vector<16x16xbf16>
    %c16_17 = arith.constant 16 : index
    %c0_18 = arith.constant 0 : index
    %37 = vector.load %arg4[%c16_17, %c0_18] : memref<576x128xbf16, #tpu.memory_space<vmem>>, vector<16x128xbf16>
    %cst_19 = arith.constant dense<0.000000e+00> : vector<16x128xf32>
    %38 = tpu.matmul %36, %37, %cst_19 {dimension_numbers = #tpu.dot_dimension_numbers<[1], [0], [0], [1], [0, 0, 1, 1], [], []>} : vector<16x16xbf16>, vector<16x128xbf16>, vector<16x128xf32> -> vector<16x128xf32>
    %39 = arith.addf %21, %38 : vector<16x128xf32>
    %c0_20 = arith.constant 0 : index
    %c32 = arith.constant 32 : index
    %c0_21 = arith.constant 0 : index
    %40 = vector.load %arg1[%c0_20, %c32, %c0_21] : memref<1x576x144xbf16, #tpu.memory_space<vmem>>, vector<1x16x144xbf16>
    %41 = vector.shape_cast %40 : vector<1x16x144xbf16> to vector<16x144xbf16>
    %cst_22 = arith.constant dense<0.000000e+00> : vector<16x64xf32>
    %42 = tpu.matmul %41, %0, %cst_22 {dimension_numbers = #tpu.dot_dimension_numbers<[1], [0], [0], [1], [0, 0, 1, 1], [], []>} : vector<16x144xbf16>, vector<144x64xbf16>, vector<16x64xf32> -> vector<16x64xf32>
    %43 = vector.broadcast %1 : vector<1x64xf32> to vector<16x64xf32>
    %44 = arith.addf %42, %43 : vector<16x64xf32>
    %cst_23 = arith.constant 0.000000e+00 : f32
    %45 = vector.broadcast %cst_23 : f32 to vector<16x64xf32>
    %46 = arith.maximumf %44, %45 : vector<16x64xf32>
    %47 = vector.extract_strided_slice %46 {offsets = [0, 0], sizes = [16, 16], strides = [1, 1]} : vector<16x64xf32> to vector<16x16xf32>
    %48 = vector.extract_strided_slice %46 {offsets = [0, 16], sizes = [16, 16], strides = [1, 1]} : vector<16x64xf32> to vector<16x16xf32>
    %49 = arith.maximumf %47, %48 : vector<16x16xf32>
    %50 = vector.extract_strided_slice %46 {offsets = [0, 32], sizes = [16, 16], strides = [1, 1]} : vector<16x64xf32> to vector<16x16xf32>
    %51 = vector.extract_strided_slice %46 {offsets = [0, 48], sizes = [16, 16], strides = [1, 1]} : vector<16x64xf32> to vector<16x16xf32>
    %52 = arith.maximumf %50, %51 : vector<16x16xf32>
    %53 = arith.maximumf %49, %52 : vector<16x16xf32>
    %54 = arith.truncf %53 : vector<16x16xf32> to vector<16x16xbf16>
    %c32_24 = arith.constant 32 : index
    %c0_25 = arith.constant 0 : index
    %55 = vector.load %arg4[%c32_24, %c0_25] : memref<576x128xbf16, #tpu.memory_space<vmem>>, vector<16x128xbf16>
    %cst_26 = arith.constant dense<0.000000e+00> : vector<16x128xf32>
    %56 = tpu.matmul %54, %55, %cst_26 {dimension_numbers = #tpu.dot_dimension_numbers<[1], [0], [0], [1], [0, 0, 1, 1], [], []>} : vector<16x16xbf16>, vector<16x128xbf16>, vector<16x128xf32> -> vector<16x128xf32>
    %57 = arith.addf %39, %56 : vector<16x128xf32>
    %c0_27 = arith.constant 0 : index
    %c48 = arith.constant 48 : index
    %c0_28 = arith.constant 0 : index
    %58 = vector.load %arg1[%c0_27, %c48, %c0_28] : memref<1x576x144xbf16, #tpu.memory_space<vmem>>, vector<1x16x144xbf16>
    %59 = vector.shape_cast %58 : vector<1x16x144xbf16> to vector<16x144xbf16>
    %cst_29 = arith.constant dense<0.000000e+00> : vector<16x64xf32>
    %60 = tpu.matmul %59, %0, %cst_29 {dimension_numbers = #tpu.dot_dimension_numbers<[1], [0], [0], [1], [0, 0, 1, 1], [], []>} : vector<16x144xbf16>, vector<144x64xbf16>, vector<16x64xf32> -> vector<16x64xf32>
    %61 = vector.broadcast %1 : vector<1x64xf32> to vector<16x64xf32>
    %62 = arith.addf %60, %61 : vector<16x64xf32>
    %cst_30 = arith.constant 0.000000e+00 : f32
    %63 = vector.broadcast %cst_30 : f32 to vector<16x64xf32>
    %64 = arith.maximumf %62, %63 : vector<16x64xf32>
    %65 = vector.extract_strided_slice %64 {offsets = [0, 0], sizes = [16, 16], strides = [1, 1]} : vector<16x64xf32> to vector<16x16xf32>
    %66 = vector.extract_strided_slice %64 {offsets = [0, 16], sizes = [16, 16], strides = [1, 1]} : vector<16x64xf32> to vector<16x16xf32>
    %67 = arith.maximumf %65, %66 : vector<16x16xf32>
    %68 = vector.extract_strided_slice %64 {offsets = [0, 32], sizes = [16, 16], strides = [1, 1]} : vector<16x64xf32> to vector<16x16xf32>
    %69 = vector.extract_strided_slice %64 {offsets = [0, 48], sizes = [16, 16], strides = [1, 1]} : vector<16x64xf32> to vector<16x16xf32>
    %70 = arith.maximumf %68, %69 : vector<16x16xf32>
    %71 = arith.maximumf %67, %70 : vector<16x16xf32>
    %72 = arith.truncf %71 : vector<16x16xf32> to vector<16x16xbf16>
    %c48_31 = arith.constant 48 : index
    %c0_32 = arith.constant 0 : index
    %73 = vector.load %arg4[%c48_31, %c0_32] : memref<576x128xbf16, #tpu.memory_space<vmem>>, vector<16x128xbf16>
    %cst_33 = arith.constant dense<0.000000e+00> : vector<16x128xf32>
    %74 = tpu.matmul %72, %73, %cst_33 {dimension_numbers = #tpu.dot_dimension_numbers<[1], [0], [0], [1], [0, 0, 1, 1], [], []>} : vector<16x16xbf16>, vector<16x128xbf16>, vector<16x128xf32> -> vector<16x128xf32>
    %75 = arith.addf %57, %74 : vector<16x128xf32>
    %c0_34 = arith.constant 0 : index
    %c64 = arith.constant 64 : index
    %c0_35 = arith.constant 0 : index
    %76 = vector.load %arg1[%c0_34, %c64, %c0_35] : memref<1x576x144xbf16, #tpu.memory_space<vmem>>, vector<1x16x144xbf16>
    %77 = vector.shape_cast %76 : vector<1x16x144xbf16> to vector<16x144xbf16>
    %cst_36 = arith.constant dense<0.000000e+00> : vector<16x64xf32>
    %78 = tpu.matmul %77, %0, %cst_36 {dimension_numbers = #tpu.dot_dimension_numbers<[1], [0], [0], [1], [0, 0, 1, 1], [], []>} : vector<16x144xbf16>, vector<144x64xbf16>, vector<16x64xf32> -> vector<16x64xf32>
    %79 = vector.broadcast %1 : vector<1x64xf32> to vector<16x64xf32>
    %80 = arith.addf %78, %79 : vector<16x64xf32>
    %cst_37 = arith.constant 0.000000e+00 : f32
    %81 = vector.broadcast %cst_37 : f32 to vector<16x64xf32>
    %82 = arith.maximumf %80, %81 : vector<16x64xf32>
    %83 = vector.extract_strided_slice %82 {offsets = [0, 0], sizes = [16, 16], strides = [1, 1]} : vector<16x64xf32> to vector<16x16xf32>
    %84 = vector.extract_strided_slice %82 {offsets = [0, 16], sizes = [16, 16], strides = [1, 1]} : vector<16x64xf32> to vector<16x16xf32>
    %85 = arith.maximumf %83, %84 : vector<16x16xf32>
    %86 = vector.extract_strided_slice %82 {offsets = [0, 32], sizes = [16, 16], strides = [1, 1]} : vector<16x64xf32> to vector<16x16xf32>
    %87 = vector.extract_strided_slice %82 {offsets = [0, 48], sizes = [16, 16], strides = [1, 1]} : vector<16x64xf32> to vector<16x16xf32>
    %88 = arith.maximumf %86, %87 : vector<16x16xf32>
    %89 = arith.maximumf %85, %88 : vector<16x16xf32>
    %90 = arith.truncf %89 : vector<16x16xf32> to vector<16x16xbf16>
    %c64_38 = arith.constant 64 : index
    %c0_39 = arith.constant 0 : index
    %91 = vector.load %arg4[%c64_38, %c0_39] : memref<576x128xbf16, #tpu.memory_space<vmem>>, vector<16x128xbf16>
    %cst_40 = arith.constant dense<0.000000e+00> : vector<16x128xf32>
    %92 = tpu.matmul %90, %91, %cst_40 {dimension_numbers = #tpu.dot_dimension_numbers<[1], [0], [0], [1], [0, 0, 1, 1], [], []>} : vector<16x16xbf16>, vector<16x128xbf16>, vector<16x128xf32> -> vector<16x128xf32>
    %93 = arith.addf %75, %92 : vector<16x128xf32>
    %c0_41 = arith.constant 0 : index
    %c80 = arith.constant 80 : index
    %c0_42 = arith.constant 0 : index
    %94 = vector.load %arg1[%c0_41, %c80, %c0_42] : memref<1x576x144xbf16, #tpu.memory_space<vmem>>, vector<1x16x144xbf16>
    %95 = vector.shape_cast %94 : vector<1x16x144xbf16> to vector<16x144xbf16>
    %cst_43 = arith.constant dense<0.000000e+00> : vector<16x64xf32>
    %96 = tpu.matmul %95, %0, %cst_43 {dimension_numbers = #tpu.dot_dimension_numbers<[1], [0], [0], [1], [0, 0, 1, 1], [], []>} : vector<16x144xbf16>, vector<144x64xbf16>, vector<16x64xf32> -> vector<16x64xf32>
    %97 = vector.broadcast %1 : vector<1x64xf32> to vector<16x64xf32>
    %98 = arith.addf %96, %97 : vector<16x64xf32>
    %cst_44 = arith.constant 0.000000e+00 : f32
    %99 = vector.broadcast %cst_44 : f32 to vector<16x64xf32>
    %100 = arith.maximumf %98, %99 : vector<16x64xf32>
    %101 = vector.extract_strided_slice %100 {offsets = [0, 0], sizes = [16, 16], strides = [1, 1]} : vector<16x64xf32> to vector<16x16xf32>
    %102 = vector.extract_strided_slice %100 {offsets = [0, 16], sizes = [16, 16], strides = [1, 1]} : vector<16x64xf32> to vector<16x16xf32>
    %103 = arith.maximumf %101, %102 : vector<16x16xf32>
    %104 = vector.extract_strided_slice %100 {offsets = [0, 32], sizes = [16, 16], strides = [1, 1]} : vector<16x64xf32> to vector<16x16xf32>
    %105 = vector.extract_strided_slice %100 {offsets = [0, 48], sizes = [16, 16], strides = [1, 1]} : vector<16x64xf32> to vector<16x16xf32>
    %106 = arith.maximumf %104, %105 : vector<16x16xf32>
    %107 = arith.maximumf %103, %106 : vector<16x16xf32>
    %108 = arith.truncf %107 : vector<16x16xf32> to vector<16x16xbf16>
    %c80_45 = arith.constant 80 : index
    %c0_46 = arith.constant 0 : index
    %109 = vector.load %arg4[%c80_45, %c0_46] : memref<576x128xbf16, #tpu.memory_space<vmem>>, vector<16x128xbf16>
    %cst_47 = arith.constant dense<0.000000e+00> : vector<16x128xf32>
    %110 = tpu.matmul %108, %109, %cst_47 {dimension_numbers = #tpu.dot_dimension_numbers<[1], [0], [0], [1], [0, 0, 1, 1], [], []>} : vector<16x16xbf16>, vector<16x128xbf16>, vector<16x128xf32> -> vector<16x128xf32>
    %111 = arith.addf %93, %110 : vector<16x128xf32>
    %c0_48 = arith.constant 0 : index
    %c96 = arith.constant 96 : index
    %c0_49 = arith.constant 0 : index
    %112 = vector.load %arg1[%c0_48, %c96, %c0_49] : memref<1x576x144xbf16, #tpu.memory_space<vmem>>, vector<1x16x144xbf16>
    %113 = vector.shape_cast %112 : vector<1x16x144xbf16> to vector<16x144xbf16>
    %cst_50 = arith.constant dense<0.000000e+00> : vector<16x64xf32>
    %114 = tpu.matmul %113, %0, %cst_50 {dimension_numbers = #tpu.dot_dimension_numbers<[1], [0], [0], [1], [0, 0, 1, 1], [], []>} : vector<16x144xbf16>, vector<144x64xbf16>, vector<16x64xf32> -> vector<16x64xf32>
    %115 = vector.broadcast %1 : vector<1x64xf32> to vector<16x64xf32>
    %116 = arith.addf %114, %115 : vector<16x64xf32>
    %cst_51 = arith.constant 0.000000e+00 : f32
    %117 = vector.broadcast %cst_51 : f32 to vector<16x64xf32>
    %118 = arith.maximumf %116, %117 : vector<16x64xf32>
    %119 = vector.extract_strided_slice %118 {offsets = [0, 0], sizes = [16, 16], strides = [1, 1]} : vector<16x64xf32> to vector<16x16xf32>
    %120 = vector.extract_strided_slice %118 {offsets = [0, 16], sizes = [16, 16], strides = [1, 1]} : vector<16x64xf32> to vector<16x16xf32>
    %121 = arith.maximumf %119, %120 : vector<16x16xf32>
    %122 = vector.extract_strided_slice %118 {offsets = [0, 32], sizes = [16, 16], strides = [1, 1]} : vector<16x64xf32> to vector<16x16xf32>
    %123 = vector.extract_strided_slice %118 {offsets = [0, 48], sizes = [16, 16], strides = [1, 1]} : vector<16x64xf32> to vector<16x16xf32>
    %124 = arith.maximumf %122, %123 : vector<16x16xf32>
    %125 = arith.maximumf %121, %124 : vector<16x16xf32>
    %126 = arith.truncf %125 : vector<16x16xf32> to vector<16x16xbf16>
    %c96_52 = arith.constant 96 : index
    %c0_53 = arith.constant 0 : index
    %127 = vector.load %arg4[%c96_52, %c0_53] : memref<576x128xbf16, #tpu.memory_space<vmem>>, vector<16x128xbf16>
    %cst_54 = arith.constant dense<0.000000e+00> : vector<16x128xf32>
    %128 = tpu.matmul %126, %127, %cst_54 {dimension_numbers = #tpu.dot_dimension_numbers<[1], [0], [0], [1], [0, 0, 1, 1], [], []>} : vector<16x16xbf16>, vector<16x128xbf16>, vector<16x128xf32> -> vector<16x128xf32>
    %129 = arith.addf %111, %128 : vector<16x128xf32>
    %c0_55 = arith.constant 0 : index
    %c112 = arith.constant 112 : index
    %c0_56 = arith.constant 0 : index
    %130 = vector.load %arg1[%c0_55, %c112, %c0_56] : memref<1x576x144xbf16, #tpu.memory_space<vmem>>, vector<1x16x144xbf16>
    %131 = vector.shape_cast %130 : vector<1x16x144xbf16> to vector<16x144xbf16>
    %cst_57 = arith.constant dense<0.000000e+00> : vector<16x64xf32>
    %132 = tpu.matmul %131, %0, %cst_57 {dimension_numbers = #tpu.dot_dimension_numbers<[1], [0], [0], [1], [0, 0, 1, 1], [], []>} : vector<16x144xbf16>, vector<144x64xbf16>, vector<16x64xf32> -> vector<16x64xf32>
    %133 = vector.broadcast %1 : vector<1x64xf32> to vector<16x64xf32>
    %134 = arith.addf %132, %133 : vector<16x64xf32>
    %cst_58 = arith.constant 0.000000e+00 : f32
    %135 = vector.broadcast %cst_58 : f32 to vector<16x64xf32>
    %136 = arith.maximumf %134, %135 : vector<16x64xf32>
    %137 = vector.extract_strided_slice %136 {offsets = [0, 0], sizes = [16, 16], strides = [1, 1]} : vector<16x64xf32> to vector<16x16xf32>
    %138 = vector.extract_strided_slice %136 {offsets = [0, 16], sizes = [16, 16], strides = [1, 1]} : vector<16x64xf32> to vector<16x16xf32>
    %139 = arith.maximumf %137, %138 : vector<16x16xf32>
    %140 = vector.extract_strided_slice %136 {offsets = [0, 32], sizes = [16, 16], strides = [1, 1]} : vector<16x64xf32> to vector<16x16xf32>
    %141 = vector.extract_strided_slice %136 {offsets = [0, 48], sizes = [16, 16], strides = [1, 1]} : vector<16x64xf32> to vector<16x16xf32>
    %142 = arith.maximumf %140, %141 : vector<16x16xf32>
    %143 = arith.maximumf %139, %142 : vector<16x16xf32>
    %144 = arith.truncf %143 : vector<16x16xf32> to vector<16x16xbf16>
    %c112_59 = arith.constant 112 : index
    %c0_60 = arith.constant 0 : index
    %145 = vector.load %arg4[%c112_59, %c0_60] : memref<576x128xbf16, #tpu.memory_space<vmem>>, vector<16x128xbf16>
    %cst_61 = arith.constant dense<0.000000e+00> : vector<16x128xf32>
    %146 = tpu.matmul %144, %145, %cst_61 {dimension_numbers = #tpu.dot_dimension_numbers<[1], [0], [0], [1], [0, 0, 1, 1], [], []>} : vector<16x16xbf16>, vector<16x128xbf16>, vector<16x128xf32> -> vector<16x128xf32>
    %147 = arith.addf %129, %146 : vector<16x128xf32>
    %c0_62 = arith.constant 0 : index
    %c128 = arith.constant 128 : index
    %c0_63 = arith.constant 0 : index
    %148 = vector.load %arg1[%c0_62, %c128, %c0_63] : memref<1x576x144xbf16, #tpu.memory_space<vmem>>, vector<1x16x144xbf16>
    %149 = vector.shape_cast %148 : vector<1x16x144xbf16> to vector<16x144xbf16>
    %cst_64 = arith.constant dense<0.000000e+00> : vector<16x64xf32>
    %150 = tpu.matmul %149, %0, %cst_64 {dimension_numbers = #tpu.dot_dimension_numbers<[1], [0], [0], [1], [0, 0, 1, 1], [], []>} : vector<16x144xbf16>, vector<144x64xbf16>, vector<16x64xf32> -> vector<16x64xf32>
    %151 = vector.broadcast %1 : vector<1x64xf32> to vector<16x64xf32>
    %152 = arith.addf %150, %151 : vector<16x64xf32>
    %cst_65 = arith.constant 0.000000e+00 : f32
    %153 = vector.broadcast %cst_65 : f32 to vector<16x64xf32>
    %154 = arith.maximumf %152, %153 : vector<16x64xf32>
    %155 = vector.extract_strided_slice %154 {offsets = [0, 0], sizes = [16, 16], strides = [1, 1]} : vector<16x64xf32> to vector<16x16xf32>
    %156 = vector.extract_strided_slice %154 {offsets = [0, 16], sizes = [16, 16], strides = [1, 1]} : vector<16x64xf32> to vector<16x16xf32>
    %157 = arith.maximumf %155, %156 : vector<16x16xf32>
    %158 = vector.extract_strided_slice %154 {offsets = [0, 32], sizes = [16, 16], strides = [1, 1]} : vector<16x64xf32> to vector<16x16xf32>
    %159 = vector.extract_strided_slice %154 {offsets = [0, 48], sizes = [16, 16], strides = [1, 1]} : vector<16x64xf32> to vector<16x16xf32>
    %160 = arith.maximumf %158, %159 : vector<16x16xf32>
    %161 = arith.maximumf %157, %160 : vector<16x16xf32>
    %162 = arith.truncf %161 : vector<16x16xf32> to vector<16x16xbf16>
    %c128_66 = arith.constant 128 : index
    %c0_67 = arith.constant 0 : index
    %163 = vector.load %arg4[%c128_66, %c0_67] : memref<576x128xbf16, #tpu.memory_space<vmem>>, vector<16x128xbf16>
    %cst_68 = arith.constant dense<0.000000e+00> : vector<16x128xf32>
    %164 = tpu.matmul %162, %163, %cst_68 {dimension_numbers = #tpu.dot_dimension_numbers<[1], [0], [0], [1], [0, 0, 1, 1], [], []>} : vector<16x16xbf16>, vector<16x128xbf16>, vector<16x128xf32> -> vector<16x128xf32>
    %165 = arith.addf %147, %164 : vector<16x128xf32>
    %c0_69 = arith.constant 0 : index
    %c144 = arith.constant 144 : index
    %c0_70 = arith.constant 0 : index
    %166 = vector.load %arg1[%c0_69, %c144, %c0_70] : memref<1x576x144xbf16, #tpu.memory_space<vmem>>, vector<1x16x144xbf16>
    %167 = vector.shape_cast %166 : vector<1x16x144xbf16> to vector<16x144xbf16>
    %cst_71 = arith.constant dense<0.000000e+00> : vector<16x64xf32>
    %168 = tpu.matmul %167, %0, %cst_71 {dimension_numbers = #tpu.dot_dimension_numbers<[1], [0], [0], [1], [0, 0, 1, 1], [], []>} : vector<16x144xbf16>, vector<144x64xbf16>, vector<16x64xf32> -> vector<16x64xf32>
    %169 = vector.broadcast %1 : vector<1x64xf32> to vector<16x64xf32>
    %170 = arith.addf %168, %169 : vector<16x64xf32>
    %cst_72 = arith.constant 0.000000e+00 : f32
    %171 = vector.broadcast %cst_72 : f32 to vector<16x64xf32>
    %172 = arith.maximumf %170, %171 : vector<16x64xf32>
    %173 = vector.extract_strided_slice %172 {offsets = [0, 0], sizes = [16, 16], strides = [1, 1]} : vector<16x64xf32> to vector<16x16xf32>
    %174 = vector.extract_strided_slice %172 {offsets = [0, 16], sizes = [16, 16], strides = [1, 1]} : vector<16x64xf32> to vector<16x16xf32>
    %175 = arith.maximumf %173, %174 : vector<16x16xf32>
    %176 = vector.extract_strided_slice %172 {offsets = [0, 32], sizes = [16, 16], strides = [1, 1]} : vector<16x64xf32> to vector<16x16xf32>
    %177 = vector.extract_strided_slice %172 {offsets = [0, 48], sizes = [16, 16], strides = [1, 1]} : vector<16x64xf32> to vector<16x16xf32>
    %178 = arith.maximumf %176, %177 : vector<16x16xf32>
    %179 = arith.maximumf %175, %178 : vector<16x16xf32>
    %180 = arith.truncf %179 : vector<16x16xf32> to vector<16x16xbf16>
    %c144_73 = arith.constant 144 : index
    %c0_74 = arith.constant 0 : index
    %181 = vector.load %arg4[%c144_73, %c0_74] : memref<576x128xbf16, #tpu.memory_space<vmem>>, vector<16x128xbf16>
    %cst_75 = arith.constant dense<0.000000e+00> : vector<16x128xf32>
    %182 = tpu.matmul %180, %181, %cst_75 {dimension_numbers = #tpu.dot_dimension_numbers<[1], [0], [0], [1], [0, 0, 1, 1], [], []>} : vector<16x16xbf16>, vector<16x128xbf16>, vector<16x128xf32> -> vector<16x128xf32>
    %183 = arith.addf %165, %182 : vector<16x128xf32>
    %c0_76 = arith.constant 0 : index
    %c160 = arith.constant 160 : index
    %c0_77 = arith.constant 0 : index
    %184 = vector.load %arg1[%c0_76, %c160, %c0_77] : memref<1x576x144xbf16, #tpu.memory_space<vmem>>, vector<1x16x144xbf16>
    %185 = vector.shape_cast %184 : vector<1x16x144xbf16> to vector<16x144xbf16>
    %cst_78 = arith.constant dense<0.000000e+00> : vector<16x64xf32>
    %186 = tpu.matmul %185, %0, %cst_78 {dimension_numbers = #tpu.dot_dimension_numbers<[1], [0], [0], [1], [0, 0, 1, 1], [], []>} : vector<16x144xbf16>, vector<144x64xbf16>, vector<16x64xf32> -> vector<16x64xf32>
    %187 = vector.broadcast %1 : vector<1x64xf32> to vector<16x64xf32>
    %188 = arith.addf %186, %187 : vector<16x64xf32>
    %cst_79 = arith.constant 0.000000e+00 : f32
    %189 = vector.broadcast %cst_79 : f32 to vector<16x64xf32>
    %190 = arith.maximumf %188, %189 : vector<16x64xf32>
    %191 = vector.extract_strided_slice %190 {offsets = [0, 0], sizes = [16, 16], strides = [1, 1]} : vector<16x64xf32> to vector<16x16xf32>
    %192 = vector.extract_strided_slice %190 {offsets = [0, 16], sizes = [16, 16], strides = [1, 1]} : vector<16x64xf32> to vector<16x16xf32>
    %193 = arith.maximumf %191, %192 : vector<16x16xf32>
    %194 = vector.extract_strided_slice %190 {offsets = [0, 32], sizes = [16, 16], strides = [1, 1]} : vector<16x64xf32> to vector<16x16xf32>
    %195 = vector.extract_strided_slice %190 {offsets = [0, 48], sizes = [16, 16], strides = [1, 1]} : vector<16x64xf32> to vector<16x16xf32>
    %196 = arith.maximumf %194, %195 : vector<16x16xf32>
    %197 = arith.maximumf %193, %196 : vector<16x16xf32>
    %198 = arith.truncf %197 : vector<16x16xf32> to vector<16x16xbf16>
    %c160_80 = arith.constant 160 : index
    %c0_81 = arith.constant 0 : index
    %199 = vector.load %arg4[%c160_80, %c0_81] : memref<576x128xbf16, #tpu.memory_space<vmem>>, vector<16x128xbf16>
    %cst_82 = arith.constant dense<0.000000e+00> : vector<16x128xf32>
    %200 = tpu.matmul %198, %199, %cst_82 {dimension_numbers = #tpu.dot_dimension_numbers<[1], [0], [0], [1], [0, 0, 1, 1], [], []>} : vector<16x16xbf16>, vector<16x128xbf16>, vector<16x128xf32> -> vector<16x128xf32>
    %201 = arith.addf %183, %200 : vector<16x128xf32>
    %c0_83 = arith.constant 0 : index
    %c176 = arith.constant 176 : index
    %c0_84 = arith.constant 0 : index
    %202 = vector.load %arg1[%c0_83, %c176, %c0_84] : memref<1x576x144xbf16, #tpu.memory_space<vmem>>, vector<1x16x144xbf16>
    %203 = vector.shape_cast %202 : vector<1x16x144xbf16> to vector<16x144xbf16>
    %cst_85 = arith.constant dense<0.000000e+00> : vector<16x64xf32>
    %204 = tpu.matmul %203, %0, %cst_85 {dimension_numbers = #tpu.dot_dimension_numbers<[1], [0], [0], [1], [0, 0, 1, 1], [], []>} : vector<16x144xbf16>, vector<144x64xbf16>, vector<16x64xf32> -> vector<16x64xf32>
    %205 = vector.broadcast %1 : vector<1x64xf32> to vector<16x64xf32>
    %206 = arith.addf %204, %205 : vector<16x64xf32>
    %cst_86 = arith.constant 0.000000e+00 : f32
    %207 = vector.broadcast %cst_86 : f32 to vector<16x64xf32>
    %208 = arith.maximumf %206, %207 : vector<16x64xf32>
    %209 = vector.extract_strided_slice %208 {offsets = [0, 0], sizes = [16, 16], strides = [1, 1]} : vector<16x64xf32> to vector<16x16xf32>
    %210 = vector.extract_strided_slice %208 {offsets = [0, 16], sizes = [16, 16], strides = [1, 1]} : vector<16x64xf32> to vector<16x16xf32>
    %211 = arith.maximumf %209, %210 : vector<16x16xf32>
    %212 = vector.extract_strided_slice %208 {offsets = [0, 32], sizes = [16, 16], strides = [1, 1]} : vector<16x64xf32> to vector<16x16xf32>
    %213 = vector.extract_strided_slice %208 {offsets = [0, 48], sizes = [16, 16], strides = [1, 1]} : vector<16x64xf32> to vector<16x16xf32>
    %214 = arith.maximumf %212, %213 : vector<16x16xf32>
    %215 = arith.maximumf %211, %214 : vector<16x16xf32>
    %216 = arith.truncf %215 : vector<16x16xf32> to vector<16x16xbf16>
    %c176_87 = arith.constant 176 : index
    %c0_88 = arith.constant 0 : index
    %217 = vector.load %arg4[%c176_87, %c0_88] : memref<576x128xbf16, #tpu.memory_space<vmem>>, vector<16x128xbf16>
    %cst_89 = arith.constant dense<0.000000e+00> : vector<16x128xf32>
    %218 = tpu.matmul %216, %217, %cst_89 {dimension_numbers = #tpu.dot_dimension_numbers<[1], [0], [0], [1], [0, 0, 1, 1], [], []>} : vector<16x16xbf16>, vector<16x128xbf16>, vector<16x128xf32> -> vector<16x128xf32>
    %219 = arith.addf %201, %218 : vector<16x128xf32>
    %c0_90 = arith.constant 0 : index
    %c192 = arith.constant 192 : index
    %c0_91 = arith.constant 0 : index
    %220 = vector.load %arg1[%c0_90, %c192, %c0_91] : memref<1x576x144xbf16, #tpu.memory_space<vmem>>, vector<1x16x144xbf16>
    %221 = vector.shape_cast %220 : vector<1x16x144xbf16> to vector<16x144xbf16>
    %cst_92 = arith.constant dense<0.000000e+00> : vector<16x64xf32>
    %222 = tpu.matmul %221, %0, %cst_92 {dimension_numbers = #tpu.dot_dimension_numbers<[1], [0], [0], [1], [0, 0, 1, 1], [], []>} : vector<16x144xbf16>, vector<144x64xbf16>, vector<16x64xf32> -> vector<16x64xf32>
    %223 = vector.broadcast %1 : vector<1x64xf32> to vector<16x64xf32>
    %224 = arith.addf %222, %223 : vector<16x64xf32>
    %cst_93 = arith.constant 0.000000e+00 : f32
    %225 = vector.broadcast %cst_93 : f32 to vector<16x64xf32>
    %226 = arith.maximumf %224, %225 : vector<16x64xf32>
    %227 = vector.extract_strided_slice %226 {offsets = [0, 0], sizes = [16, 16], strides = [1, 1]} : vector<16x64xf32> to vector<16x16xf32>
    %228 = vector.extract_strided_slice %226 {offsets = [0, 16], sizes = [16, 16], strides = [1, 1]} : vector<16x64xf32> to vector<16x16xf32>
    %229 = arith.maximumf %227, %228 : vector<16x16xf32>
    %230 = vector.extract_strided_slice %226 {offsets = [0, 32], sizes = [16, 16], strides = [1, 1]} : vector<16x64xf32> to vector<16x16xf32>
    %231 = vector.extract_strided_slice %226 {offsets = [0, 48], sizes = [16, 16], strides = [1, 1]} : vector<16x64xf32> to vector<16x16xf32>
    %232 = arith.maximumf %230, %231 : vector<16x16xf32>
    %233 = arith.maximumf %229, %232 : vector<16x16xf32>
    %234 = arith.truncf %233 : vector<16x16xf32> to vector<16x16xbf16>
    %c192_94 = arith.constant 192 : index
    %c0_95 = arith.constant 0 : index
    %235 = vector.load %arg4[%c192_94, %c0_95] : memref<576x128xbf16, #tpu.memory_space<vmem>>, vector<16x128xbf16>
    %cst_96 = arith.constant dense<0.000000e+00> : vector<16x128xf32>
    %236 = tpu.matmul %234, %235, %cst_96 {dimension_numbers = #tpu.dot_dimension_numbers<[1], [0], [0], [1], [0, 0, 1, 1], [], []>} : vector<16x16xbf16>, vector<16x128xbf16>, vector<16x128xf32> -> vector<16x128xf32>
    %237 = arith.addf %219, %236 : vector<16x128xf32>
    %c0_97 = arith.constant 0 : index
    %c208 = arith.constant 208 : index
    %c0_98 = arith.constant 0 : index
    %238 = vector.load %arg1[%c0_97, %c208, %c0_98] : memref<1x576x144xbf16, #tpu.memory_space<vmem>>, vector<1x16x144xbf16>
    %239 = vector.shape_cast %238 : vector<1x16x144xbf16> to vector<16x144xbf16>
    %cst_99 = arith.constant dense<0.000000e+00> : vector<16x64xf32>
    %240 = tpu.matmul %239, %0, %cst_99 {dimension_numbers = #tpu.dot_dimension_numbers<[1], [0], [0], [1], [0, 0, 1, 1], [], []>} : vector<16x144xbf16>, vector<144x64xbf16>, vector<16x64xf32> -> vector<16x64xf32>
    %241 = vector.broadcast %1 : vector<1x64xf32> to vector<16x64xf32>
    %242 = arith.addf %240, %241 : vector<16x64xf32>
    %cst_100 = arith.constant 0.000000e+00 : f32
    %243 = vector.broadcast %cst_100 : f32 to vector<16x64xf32>
    %244 = arith.maximumf %242, %243 : vector<16x64xf32>
    %245 = vector.extract_strided_slice %244 {offsets = [0, 0], sizes = [16, 16], strides = [1, 1]} : vector<16x64xf32> to vector<16x16xf32>
    %246 = vector.extract_strided_slice %244 {offsets = [0, 16], sizes = [16, 16], strides = [1, 1]} : vector<16x64xf32> to vector<16x16xf32>
    %247 = arith.maximumf %245, %246 : vector<16x16xf32>
    %248 = vector.extract_strided_slice %244 {offsets = [0, 32], sizes = [16, 16], strides = [1, 1]} : vector<16x64xf32> to vector<16x16xf32>
    %249 = vector.extract_strided_slice %244 {offsets = [0, 48], sizes = [16, 16], strides = [1, 1]} : vector<16x64xf32> to vector<16x16xf32>
    %250 = arith.maximumf %248, %249 : vector<16x16xf32>
    %251 = arith.maximumf %247, %250 : vector<16x16xf32>
    %252 = arith.truncf %251 : vector<16x16xf32> to vector<16x16xbf16>
    %c208_101 = arith.constant 208 : index
    %c0_102 = arith.constant 0 : index
    %253 = vector.load %arg4[%c208_101, %c0_102] : memref<576x128xbf16, #tpu.memory_space<vmem>>, vector<16x128xbf16>
    %cst_103 = arith.constant dense<0.000000e+00> : vector<16x128xf32>
    %254 = tpu.matmul %252, %253, %cst_103 {dimension_numbers = #tpu.dot_dimension_numbers<[1], [0], [0], [1], [0, 0, 1, 1], [], []>} : vector<16x16xbf16>, vector<16x128xbf16>, vector<16x128xf32> -> vector<16x128xf32>
    %255 = arith.addf %237, %254 : vector<16x128xf32>
    %c0_104 = arith.constant 0 : index
    %c224 = arith.constant 224 : index
    %c0_105 = arith.constant 0 : index
    %256 = vector.load %arg1[%c0_104, %c224, %c0_105] : memref<1x576x144xbf16, #tpu.memory_space<vmem>>, vector<1x16x144xbf16>
    %257 = vector.shape_cast %256 : vector<1x16x144xbf16> to vector<16x144xbf16>
    %cst_106 = arith.constant dense<0.000000e+00> : vector<16x64xf32>
    %258 = tpu.matmul %257, %0, %cst_106 {dimension_numbers = #tpu.dot_dimension_numbers<[1], [0], [0], [1], [0, 0, 1, 1], [], []>} : vector<16x144xbf16>, vector<144x64xbf16>, vector<16x64xf32> -> vector<16x64xf32>
    %259 = vector.broadcast %1 : vector<1x64xf32> to vector<16x64xf32>
    %260 = arith.addf %258, %259 : vector<16x64xf32>
    %cst_107 = arith.constant 0.000000e+00 : f32
    %261 = vector.broadcast %cst_107 : f32 to vector<16x64xf32>
    %262 = arith.maximumf %260, %261 : vector<16x64xf32>
    %263 = vector.extract_strided_slice %262 {offsets = [0, 0], sizes = [16, 16], strides = [1, 1]} : vector<16x64xf32> to vector<16x16xf32>
    %264 = vector.extract_strided_slice %262 {offsets = [0, 16], sizes = [16, 16], strides = [1, 1]} : vector<16x64xf32> to vector<16x16xf32>
    %265 = arith.maximumf %263, %264 : vector<16x16xf32>
    %266 = vector.extract_strided_slice %262 {offsets = [0, 32], sizes = [16, 16], strides = [1, 1]} : vector<16x64xf32> to vector<16x16xf32>
    %267 = vector.extract_strided_slice %262 {offsets = [0, 48], sizes = [16, 16], strides = [1, 1]} : vector<16x64xf32> to vector<16x16xf32>
    %268 = arith.maximumf %266, %267 : vector<16x16xf32>
    %269 = arith.maximumf %265, %268 : vector<16x16xf32>
    %270 = arith.truncf %269 : vector<16x16xf32> to vector<16x16xbf16>
    %c224_108 = arith.constant 224 : index
    %c0_109 = arith.constant 0 : index
    %271 = vector.load %arg4[%c224_108, %c0_109] : memref<576x128xbf16, #tpu.memory_space<vmem>>, vector<16x128xbf16>
    %cst_110 = arith.constant dense<0.000000e+00> : vector<16x128xf32>
    %272 = tpu.matmul %270, %271, %cst_110 {dimension_numbers = #tpu.dot_dimension_numbers<[1], [0], [0], [1], [0, 0, 1, 1], [], []>} : vector<16x16xbf16>, vector<16x128xbf16>, vector<16x128xf32> -> vector<16x128xf32>
    %273 = arith.addf %255, %272 : vector<16x128xf32>
    %c0_111 = arith.constant 0 : index
    %c240 = arith.constant 240 : index
    %c0_112 = arith.constant 0 : index
    %274 = vector.load %arg1[%c0_111, %c240, %c0_112] : memref<1x576x144xbf16, #tpu.memory_space<vmem>>, vector<1x16x144xbf16>
    %275 = vector.shape_cast %274 : vector<1x16x144xbf16> to vector<16x144xbf16>
    %cst_113 = arith.constant dense<0.000000e+00> : vector<16x64xf32>
    %276 = tpu.matmul %275, %0, %cst_113 {dimension_numbers = #tpu.dot_dimension_numbers<[1], [0], [0], [1], [0, 0, 1, 1], [], []>} : vector<16x144xbf16>, vector<144x64xbf16>, vector<16x64xf32> -> vector<16x64xf32>
    %277 = vector.broadcast %1 : vector<1x64xf32> to vector<16x64xf32>
    %278 = arith.addf %276, %277 : vector<16x64xf32>
    %cst_114 = arith.constant 0.000000e+00 : f32
    %279 = vector.broadcast %cst_114 : f32 to vector<16x64xf32>
    %280 = arith.maximumf %278, %279 : vector<16x64xf32>
    %281 = vector.extract_strided_slice %280 {offsets = [0, 0], sizes = [16, 16], strides = [1, 1]} : vector<16x64xf32> to vector<16x16xf32>
    %282 = vector.extract_strided_slice %280 {offsets = [0, 16], sizes = [16, 16], strides = [1, 1]} : vector<16x64xf32> to vector<16x16xf32>
    %283 = arith.maximumf %281, %282 : vector<16x16xf32>
    %284 = vector.extract_strided_slice %280 {offsets = [0, 32], sizes = [16, 16], strides = [1, 1]} : vector<16x64xf32> to vector<16x16xf32>
    %285 = vector.extract_strided_slice %280 {offsets = [0, 48], sizes = [16, 16], strides = [1, 1]} : vector<16x64xf32> to vector<16x16xf32>
    %286 = arith.maximumf %284, %285 : vector<16x16xf32>
    %287 = arith.maximumf %283, %286 : vector<16x16xf32>
    %288 = arith.truncf %287 : vector<16x16xf32> to vector<16x16xbf16>
    %c240_115 = arith.constant 240 : index
    %c0_116 = arith.constant 0 : index
    %289 = vector.load %arg4[%c240_115, %c0_116] : memref<576x128xbf16, #tpu.memory_space<vmem>>, vector<16x128xbf16>
    %cst_117 = arith.constant dense<0.000000e+00> : vector<16x128xf32>
    %290 = tpu.matmul %288, %289, %cst_117 {dimension_numbers = #tpu.dot_dimension_numbers<[1], [0], [0], [1], [0, 0, 1, 1], [], []>} : vector<16x16xbf16>, vector<16x128xbf16>, vector<16x128xf32> -> vector<16x128xf32>
    %291 = arith.addf %273, %290 : vector<16x128xf32>
    %c0_118 = arith.constant 0 : index
    %c256 = arith.constant 256 : index
    %c0_119 = arith.constant 0 : index
    %292 = vector.load %arg1[%c0_118, %c256, %c0_119] : memref<1x576x144xbf16, #tpu.memory_space<vmem>>, vector<1x16x144xbf16>
    %293 = vector.shape_cast %292 : vector<1x16x144xbf16> to vector<16x144xbf16>
    %cst_120 = arith.constant dense<0.000000e+00> : vector<16x64xf32>
    %294 = tpu.matmul %293, %0, %cst_120 {dimension_numbers = #tpu.dot_dimension_numbers<[1], [0], [0], [1], [0, 0, 1, 1], [], []>} : vector<16x144xbf16>, vector<144x64xbf16>, vector<16x64xf32> -> vector<16x64xf32>
    %295 = vector.broadcast %1 : vector<1x64xf32> to vector<16x64xf32>
    %296 = arith.addf %294, %295 : vector<16x64xf32>
    %cst_121 = arith.constant 0.000000e+00 : f32
    %297 = vector.broadcast %cst_121 : f32 to vector<16x64xf32>
    %298 = arith.maximumf %296, %297 : vector<16x64xf32>
    %299 = vector.extract_strided_slice %298 {offsets = [0, 0], sizes = [16, 16], strides = [1, 1]} : vector<16x64xf32> to vector<16x16xf32>
    %300 = vector.extract_strided_slice %298 {offsets = [0, 16], sizes = [16, 16], strides = [1, 1]} : vector<16x64xf32> to vector<16x16xf32>
    %301 = arith.maximumf %299, %300 : vector<16x16xf32>
    %302 = vector.extract_strided_slice %298 {offsets = [0, 32], sizes = [16, 16], strides = [1, 1]} : vector<16x64xf32> to vector<16x16xf32>
    %303 = vector.extract_strided_slice %298 {offsets = [0, 48], sizes = [16, 16], strides = [1, 1]} : vector<16x64xf32> to vector<16x16xf32>
    %304 = arith.maximumf %302, %303 : vector<16x16xf32>
    %305 = arith.maximumf %301, %304 : vector<16x16xf32>
    %306 = arith.truncf %305 : vector<16x16xf32> to vector<16x16xbf16>
    %c256_122 = arith.constant 256 : index
    %c0_123 = arith.constant 0 : index
    %307 = vector.load %arg4[%c256_122, %c0_123] : memref<576x128xbf16, #tpu.memory_space<vmem>>, vector<16x128xbf16>
    %cst_124 = arith.constant dense<0.000000e+00> : vector<16x128xf32>
    %308 = tpu.matmul %306, %307, %cst_124 {dimension_numbers = #tpu.dot_dimension_numbers<[1], [0], [0], [1], [0, 0, 1, 1], [], []>} : vector<16x16xbf16>, vector<16x128xbf16>, vector<16x128xf32> -> vector<16x128xf32>
    %309 = arith.addf %291, %308 : vector<16x128xf32>
    %c0_125 = arith.constant 0 : index
    %c272 = arith.constant 272 : index
    %c0_126 = arith.constant 0 : index
    %310 = vector.load %arg1[%c0_125, %c272, %c0_126] : memref<1x576x144xbf16, #tpu.memory_space<vmem>>, vector<1x16x144xbf16>
    %311 = vector.shape_cast %310 : vector<1x16x144xbf16> to vector<16x144xbf16>
    %cst_127 = arith.constant dense<0.000000e+00> : vector<16x64xf32>
    %312 = tpu.matmul %311, %0, %cst_127 {dimension_numbers = #tpu.dot_dimension_numbers<[1], [0], [0], [1], [0, 0, 1, 1], [], []>} : vector<16x144xbf16>, vector<144x64xbf16>, vector<16x64xf32> -> vector<16x64xf32>
    %313 = vector.broadcast %1 : vector<1x64xf32> to vector<16x64xf32>
    %314 = arith.addf %312, %313 : vector<16x64xf32>
    %cst_128 = arith.constant 0.000000e+00 : f32
    %315 = vector.broadcast %cst_128 : f32 to vector<16x64xf32>
    %316 = arith.maximumf %314, %315 : vector<16x64xf32>
    %317 = vector.extract_strided_slice %316 {offsets = [0, 0], sizes = [16, 16], strides = [1, 1]} : vector<16x64xf32> to vector<16x16xf32>
    %318 = vector.extract_strided_slice %316 {offsets = [0, 16], sizes = [16, 16], strides = [1, 1]} : vector<16x64xf32> to vector<16x16xf32>
    %319 = arith.maximumf %317, %318 : vector<16x16xf32>
    %320 = vector.extract_strided_slice %316 {offsets = [0, 32], sizes = [16, 16], strides = [1, 1]} : vector<16x64xf32> to vector<16x16xf32>
    %321 = vector.extract_strided_slice %316 {offsets = [0, 48], sizes = [16, 16], strides = [1, 1]} : vector<16x64xf32> to vector<16x16xf32>
    %322 = arith.maximumf %320, %321 : vector<16x16xf32>
    %323 = arith.maximumf %319, %322 : vector<16x16xf32>
    %324 = arith.truncf %323 : vector<16x16xf32> to vector<16x16xbf16>
    %c272_129 = arith.constant 272 : index
    %c0_130 = arith.constant 0 : index
    %325 = vector.load %arg4[%c272_129, %c0_130] : memref<576x128xbf16, #tpu.memory_space<vmem>>, vector<16x128xbf16>
    %cst_131 = arith.constant dense<0.000000e+00> : vector<16x128xf32>
    %326 = tpu.matmul %324, %325, %cst_131 {dimension_numbers = #tpu.dot_dimension_numbers<[1], [0], [0], [1], [0, 0, 1, 1], [], []>} : vector<16x16xbf16>, vector<16x128xbf16>, vector<16x128xf32> -> vector<16x128xf32>
    %327 = arith.addf %309, %326 : vector<16x128xf32>
    %c0_132 = arith.constant 0 : index
    %c288 = arith.constant 288 : index
    %c0_133 = arith.constant 0 : index
    %328 = vector.load %arg1[%c0_132, %c288, %c0_133] : memref<1x576x144xbf16, #tpu.memory_space<vmem>>, vector<1x16x144xbf16>
    %329 = vector.shape_cast %328 : vector<1x16x144xbf16> to vector<16x144xbf16>
    %cst_134 = arith.constant dense<0.000000e+00> : vector<16x64xf32>
    %330 = tpu.matmul %329, %0, %cst_134 {dimension_numbers = #tpu.dot_dimension_numbers<[1], [0], [0], [1], [0, 0, 1, 1], [], []>} : vector<16x144xbf16>, vector<144x64xbf16>, vector<16x64xf32> -> vector<16x64xf32>
    %331 = vector.broadcast %1 : vector<1x64xf32> to vector<16x64xf32>
    %332 = arith.addf %330, %331 : vector<16x64xf32>
    %cst_135 = arith.constant 0.000000e+00 : f32
    %333 = vector.broadcast %cst_135 : f32 to vector<16x64xf32>
    %334 = arith.maximumf %332, %333 : vector<16x64xf32>
    %335 = vector.extract_strided_slice %334 {offsets = [0, 0], sizes = [16, 16], strides = [1, 1]} : vector<16x64xf32> to vector<16x16xf32>
    %336 = vector.extract_strided_slice %334 {offsets = [0, 16], sizes = [16, 16], strides = [1, 1]} : vector<16x64xf32> to vector<16x16xf32>
    %337 = arith.maximumf %335, %336 : vector<16x16xf32>
    %338 = vector.extract_strided_slice %334 {offsets = [0, 32], sizes = [16, 16], strides = [1, 1]} : vector<16x64xf32> to vector<16x16xf32>
    %339 = vector.extract_strided_slice %334 {offsets = [0, 48], sizes = [16, 16], strides = [1, 1]} : vector<16x64xf32> to vector<16x16xf32>
    %340 = arith.maximumf %338, %339 : vector<16x16xf32>
    %341 = arith.maximumf %337, %340 : vector<16x16xf32>
    %342 = arith.truncf %341 : vector<16x16xf32> to vector<16x16xbf16>
    %c288_136 = arith.constant 288 : index
    %c0_137 = arith.constant 0 : index
    %343 = vector.load %arg4[%c288_136, %c0_137] : memref<576x128xbf16, #tpu.memory_space<vmem>>, vector<16x128xbf16>
    %cst_138 = arith.constant dense<0.000000e+00> : vector<16x128xf32>
    %344 = tpu.matmul %342, %343, %cst_138 {dimension_numbers = #tpu.dot_dimension_numbers<[1], [0], [0], [1], [0, 0, 1, 1], [], []>} : vector<16x16xbf16>, vector<16x128xbf16>, vector<16x128xf32> -> vector<16x128xf32>
    %345 = arith.addf %327, %344 : vector<16x128xf32>
    %c0_139 = arith.constant 0 : index
    %c304 = arith.constant 304 : index
    %c0_140 = arith.constant 0 : index
    %346 = vector.load %arg1[%c0_139, %c304, %c0_140] : memref<1x576x144xbf16, #tpu.memory_space<vmem>>, vector<1x16x144xbf16>
    %347 = vector.shape_cast %346 : vector<1x16x144xbf16> to vector<16x144xbf16>
    %cst_141 = arith.constant dense<0.000000e+00> : vector<16x64xf32>
    %348 = tpu.matmul %347, %0, %cst_141 {dimension_numbers = #tpu.dot_dimension_numbers<[1], [0], [0], [1], [0, 0, 1, 1], [], []>} : vector<16x144xbf16>, vector<144x64xbf16>, vector<16x64xf32> -> vector<16x64xf32>
    %349 = vector.broadcast %1 : vector<1x64xf32> to vector<16x64xf32>
    %350 = arith.addf %348, %349 : vector<16x64xf32>
    %cst_142 = arith.constant 0.000000e+00 : f32
    %351 = vector.broadcast %cst_142 : f32 to vector<16x64xf32>
    %352 = arith.maximumf %350, %351 : vector<16x64xf32>
    %353 = vector.extract_strided_slice %352 {offsets = [0, 0], sizes = [16, 16], strides = [1, 1]} : vector<16x64xf32> to vector<16x16xf32>
    %354 = vector.extract_strided_slice %352 {offsets = [0, 16], sizes = [16, 16], strides = [1, 1]} : vector<16x64xf32> to vector<16x16xf32>
    %355 = arith.maximumf %353, %354 : vector<16x16xf32>
    %356 = vector.extract_strided_slice %352 {offsets = [0, 32], sizes = [16, 16], strides = [1, 1]} : vector<16x64xf32> to vector<16x16xf32>
    %357 = vector.extract_strided_slice %352 {offsets = [0, 48], sizes = [16, 16], strides = [1, 1]} : vector<16x64xf32> to vector<16x16xf32>
    %358 = arith.maximumf %356, %357 : vector<16x16xf32>
    %359 = arith.maximumf %355, %358 : vector<16x16xf32>
    %360 = arith.truncf %359 : vector<16x16xf32> to vector<16x16xbf16>
    %c304_143 = arith.constant 304 : index
    %c0_144 = arith.constant 0 : index
    %361 = vector.load %arg4[%c304_143, %c0_144] : memref<576x128xbf16, #tpu.memory_space<vmem>>, vector<16x128xbf16>
    %cst_145 = arith.constant dense<0.000000e+00> : vector<16x128xf32>
    %362 = tpu.matmul %360, %361, %cst_145 {dimension_numbers = #tpu.dot_dimension_numbers<[1], [0], [0], [1], [0, 0, 1, 1], [], []>} : vector<16x16xbf16>, vector<16x128xbf16>, vector<16x128xf32> -> vector<16x128xf32>
    %363 = arith.addf %345, %362 : vector<16x128xf32>
    %c0_146 = arith.constant 0 : index
    %c320 = arith.constant 320 : index
    %c0_147 = arith.constant 0 : index
    %364 = vector.load %arg1[%c0_146, %c320, %c0_147] : memref<1x576x144xbf16, #tpu.memory_space<vmem>>, vector<1x16x144xbf16>
    %365 = vector.shape_cast %364 : vector<1x16x144xbf16> to vector<16x144xbf16>
    %cst_148 = arith.constant dense<0.000000e+00> : vector<16x64xf32>
    %366 = tpu.matmul %365, %0, %cst_148 {dimension_numbers = #tpu.dot_dimension_numbers<[1], [0], [0], [1], [0, 0, 1, 1], [], []>} : vector<16x144xbf16>, vector<144x64xbf16>, vector<16x64xf32> -> vector<16x64xf32>
    %367 = vector.broadcast %1 : vector<1x64xf32> to vector<16x64xf32>
    %368 = arith.addf %366, %367 : vector<16x64xf32>
    %cst_149 = arith.constant 0.000000e+00 : f32
    %369 = vector.broadcast %cst_149 : f32 to vector<16x64xf32>
    %370 = arith.maximumf %368, %369 : vector<16x64xf32>
    %371 = vector.extract_strided_slice %370 {offsets = [0, 0], sizes = [16, 16], strides = [1, 1]} : vector<16x64xf32> to vector<16x16xf32>
    %372 = vector.extract_strided_slice %370 {offsets = [0, 16], sizes = [16, 16], strides = [1, 1]} : vector<16x64xf32> to vector<16x16xf32>
    %373 = arith.maximumf %371, %372 : vector<16x16xf32>
    %374 = vector.extract_strided_slice %370 {offsets = [0, 32], sizes = [16, 16], strides = [1, 1]} : vector<16x64xf32> to vector<16x16xf32>
    %375 = vector.extract_strided_slice %370 {offsets = [0, 48], sizes = [16, 16], strides = [1, 1]} : vector<16x64xf32> to vector<16x16xf32>
    %376 = arith.maximumf %374, %375 : vector<16x16xf32>
    %377 = arith.maximumf %373, %376 : vector<16x16xf32>
    %378 = arith.truncf %377 : vector<16x16xf32> to vector<16x16xbf16>
    %c320_150 = arith.constant 320 : index
    %c0_151 = arith.constant 0 : index
    %379 = vector.load %arg4[%c320_150, %c0_151] : memref<576x128xbf16, #tpu.memory_space<vmem>>, vector<16x128xbf16>
    %cst_152 = arith.constant dense<0.000000e+00> : vector<16x128xf32>
    %380 = tpu.matmul %378, %379, %cst_152 {dimension_numbers = #tpu.dot_dimension_numbers<[1], [0], [0], [1], [0, 0, 1, 1], [], []>} : vector<16x16xbf16>, vector<16x128xbf16>, vector<16x128xf32> -> vector<16x128xf32>
    %381 = arith.addf %363, %380 : vector<16x128xf32>
    %c0_153 = arith.constant 0 : index
    %c336 = arith.constant 336 : index
    %c0_154 = arith.constant 0 : index
    %382 = vector.load %arg1[%c0_153, %c336, %c0_154] : memref<1x576x144xbf16, #tpu.memory_space<vmem>>, vector<1x16x144xbf16>
    %383 = vector.shape_cast %382 : vector<1x16x144xbf16> to vector<16x144xbf16>
    %cst_155 = arith.constant dense<0.000000e+00> : vector<16x64xf32>
    %384 = tpu.matmul %383, %0, %cst_155 {dimension_numbers = #tpu.dot_dimension_numbers<[1], [0], [0], [1], [0, 0, 1, 1], [], []>} : vector<16x144xbf16>, vector<144x64xbf16>, vector<16x64xf32> -> vector<16x64xf32>
    %385 = vector.broadcast %1 : vector<1x64xf32> to vector<16x64xf32>
    %386 = arith.addf %384, %385 : vector<16x64xf32>
    %cst_156 = arith.constant 0.000000e+00 : f32
    %387 = vector.broadcast %cst_156 : f32 to vector<16x64xf32>
    %388 = arith.maximumf %386, %387 : vector<16x64xf32>
    %389 = vector.extract_strided_slice %388 {offsets = [0, 0], sizes = [16, 16], strides = [1, 1]} : vector<16x64xf32> to vector<16x16xf32>
    %390 = vector.extract_strided_slice %388 {offsets = [0, 16], sizes = [16, 16], strides = [1, 1]} : vector<16x64xf32> to vector<16x16xf32>
    %391 = arith.maximumf %389, %390 : vector<16x16xf32>
    %392 = vector.extract_strided_slice %388 {offsets = [0, 32], sizes = [16, 16], strides = [1, 1]} : vector<16x64xf32> to vector<16x16xf32>
    %393 = vector.extract_strided_slice %388 {offsets = [0, 48], sizes = [16, 16], strides = [1, 1]} : vector<16x64xf32> to vector<16x16xf32>
    %394 = arith.maximumf %392, %393 : vector<16x16xf32>
    %395 = arith.maximumf %391, %394 : vector<16x16xf32>
    %396 = arith.truncf %395 : vector<16x16xf32> to vector<16x16xbf16>
    %c336_157 = arith.constant 336 : index
    %c0_158 = arith.constant 0 : index
    %397 = vector.load %arg4[%c336_157, %c0_158] : memref<576x128xbf16, #tpu.memory_space<vmem>>, vector<16x128xbf16>
    %cst_159 = arith.constant dense<0.000000e+00> : vector<16x128xf32>
    %398 = tpu.matmul %396, %397, %cst_159 {dimension_numbers = #tpu.dot_dimension_numbers<[1], [0], [0], [1], [0, 0, 1, 1], [], []>} : vector<16x16xbf16>, vector<16x128xbf16>, vector<16x128xf32> -> vector<16x128xf32>
    %399 = arith.addf %381, %398 : vector<16x128xf32>
    %c0_160 = arith.constant 0 : index
    %c352 = arith.constant 352 : index
    %c0_161 = arith.constant 0 : index
    %400 = vector.load %arg1[%c0_160, %c352, %c0_161] : memref<1x576x144xbf16, #tpu.memory_space<vmem>>, vector<1x16x144xbf16>
    %401 = vector.shape_cast %400 : vector<1x16x144xbf16> to vector<16x144xbf16>
    %cst_162 = arith.constant dense<0.000000e+00> : vector<16x64xf32>
    %402 = tpu.matmul %401, %0, %cst_162 {dimension_numbers = #tpu.dot_dimension_numbers<[1], [0], [0], [1], [0, 0, 1, 1], [], []>} : vector<16x144xbf16>, vector<144x64xbf16>, vector<16x64xf32> -> vector<16x64xf32>
    %403 = vector.broadcast %1 : vector<1x64xf32> to vector<16x64xf32>
    %404 = arith.addf %402, %403 : vector<16x64xf32>
    %cst_163 = arith.constant 0.000000e+00 : f32
    %405 = vector.broadcast %cst_163 : f32 to vector<16x64xf32>
    %406 = arith.maximumf %404, %405 : vector<16x64xf32>
    %407 = vector.extract_strided_slice %406 {offsets = [0, 0], sizes = [16, 16], strides = [1, 1]} : vector<16x64xf32> to vector<16x16xf32>
    %408 = vector.extract_strided_slice %406 {offsets = [0, 16], sizes = [16, 16], strides = [1, 1]} : vector<16x64xf32> to vector<16x16xf32>
    %409 = arith.maximumf %407, %408 : vector<16x16xf32>
    %410 = vector.extract_strided_slice %406 {offsets = [0, 32], sizes = [16, 16], strides = [1, 1]} : vector<16x64xf32> to vector<16x16xf32>
    %411 = vector.extract_strided_slice %406 {offsets = [0, 48], sizes = [16, 16], strides = [1, 1]} : vector<16x64xf32> to vector<16x16xf32>
    %412 = arith.maximumf %410, %411 : vector<16x16xf32>
    %413 = arith.maximumf %409, %412 : vector<16x16xf32>
    %414 = arith.truncf %413 : vector<16x16xf32> to vector<16x16xbf16>
    %c352_164 = arith.constant 352 : index
    %c0_165 = arith.constant 0 : index
    %415 = vector.load %arg4[%c352_164, %c0_165] : memref<576x128xbf16, #tpu.memory_space<vmem>>, vector<16x128xbf16>
    %cst_166 = arith.constant dense<0.000000e+00> : vector<16x128xf32>
    %416 = tpu.matmul %414, %415, %cst_166 {dimension_numbers = #tpu.dot_dimension_numbers<[1], [0], [0], [1], [0, 0, 1, 1], [], []>} : vector<16x16xbf16>, vector<16x128xbf16>, vector<16x128xf32> -> vector<16x128xf32>
    %417 = arith.addf %399, %416 : vector<16x128xf32>
    %c0_167 = arith.constant 0 : index
    %c368 = arith.constant 368 : index
    %c0_168 = arith.constant 0 : index
    %418 = vector.load %arg1[%c0_167, %c368, %c0_168] : memref<1x576x144xbf16, #tpu.memory_space<vmem>>, vector<1x16x144xbf16>
    %419 = vector.shape_cast %418 : vector<1x16x144xbf16> to vector<16x144xbf16>
    %cst_169 = arith.constant dense<0.000000e+00> : vector<16x64xf32>
    %420 = tpu.matmul %419, %0, %cst_169 {dimension_numbers = #tpu.dot_dimension_numbers<[1], [0], [0], [1], [0, 0, 1, 1], [], []>} : vector<16x144xbf16>, vector<144x64xbf16>, vector<16x64xf32> -> vector<16x64xf32>
    %421 = vector.broadcast %1 : vector<1x64xf32> to vector<16x64xf32>
    %422 = arith.addf %420, %421 : vector<16x64xf32>
    %cst_170 = arith.constant 0.000000e+00 : f32
    %423 = vector.broadcast %cst_170 : f32 to vector<16x64xf32>
    %424 = arith.maximumf %422, %423 : vector<16x64xf32>
    %425 = vector.extract_strided_slice %424 {offsets = [0, 0], sizes = [16, 16], strides = [1, 1]} : vector<16x64xf32> to vector<16x16xf32>
    %426 = vector.extract_strided_slice %424 {offsets = [0, 16], sizes = [16, 16], strides = [1, 1]} : vector<16x64xf32> to vector<16x16xf32>
    %427 = arith.maximumf %425, %426 : vector<16x16xf32>
    %428 = vector.extract_strided_slice %424 {offsets = [0, 32], sizes = [16, 16], strides = [1, 1]} : vector<16x64xf32> to vector<16x16xf32>
    %429 = vector.extract_strided_slice %424 {offsets = [0, 48], sizes = [16, 16], strides = [1, 1]} : vector<16x64xf32> to vector<16x16xf32>
    %430 = arith.maximumf %428, %429 : vector<16x16xf32>
    %431 = arith.maximumf %427, %430 : vector<16x16xf32>
    %432 = arith.truncf %431 : vector<16x16xf32> to vector<16x16xbf16>
    %c368_171 = arith.constant 368 : index
    %c0_172 = arith.constant 0 : index
    %433 = vector.load %arg4[%c368_171, %c0_172] : memref<576x128xbf16, #tpu.memory_space<vmem>>, vector<16x128xbf16>
    %cst_173 = arith.constant dense<0.000000e+00> : vector<16x128xf32>
    %434 = tpu.matmul %432, %433, %cst_173 {dimension_numbers = #tpu.dot_dimension_numbers<[1], [0], [0], [1], [0, 0, 1, 1], [], []>} : vector<16x16xbf16>, vector<16x128xbf16>, vector<16x128xf32> -> vector<16x128xf32>
    %435 = arith.addf %417, %434 : vector<16x128xf32>
    %c0_174 = arith.constant 0 : index
    %c384 = arith.constant 384 : index
    %c0_175 = arith.constant 0 : index
    %436 = vector.load %arg1[%c0_174, %c384, %c0_175] : memref<1x576x144xbf16, #tpu.memory_space<vmem>>, vector<1x16x144xbf16>
    %437 = vector.shape_cast %436 : vector<1x16x144xbf16> to vector<16x144xbf16>
    %cst_176 = arith.constant dense<0.000000e+00> : vector<16x64xf32>
    %438 = tpu.matmul %437, %0, %cst_176 {dimension_numbers = #tpu.dot_dimension_numbers<[1], [0], [0], [1], [0, 0, 1, 1], [], []>} : vector<16x144xbf16>, vector<144x64xbf16>, vector<16x64xf32> -> vector<16x64xf32>
    %439 = vector.broadcast %1 : vector<1x64xf32> to vector<16x64xf32>
    %440 = arith.addf %438, %439 : vector<16x64xf32>
    %cst_177 = arith.constant 0.000000e+00 : f32
    %441 = vector.broadcast %cst_177 : f32 to vector<16x64xf32>
    %442 = arith.maximumf %440, %441 : vector<16x64xf32>
    %443 = vector.extract_strided_slice %442 {offsets = [0, 0], sizes = [16, 16], strides = [1, 1]} : vector<16x64xf32> to vector<16x16xf32>
    %444 = vector.extract_strided_slice %442 {offsets = [0, 16], sizes = [16, 16], strides = [1, 1]} : vector<16x64xf32> to vector<16x16xf32>
    %445 = arith.maximumf %443, %444 : vector<16x16xf32>
    %446 = vector.extract_strided_slice %442 {offsets = [0, 32], sizes = [16, 16], strides = [1, 1]} : vector<16x64xf32> to vector<16x16xf32>
    %447 = vector.extract_strided_slice %442 {offsets = [0, 48], sizes = [16, 16], strides = [1, 1]} : vector<16x64xf32> to vector<16x16xf32>
    %448 = arith.maximumf %446, %447 : vector<16x16xf32>
    %449 = arith.maximumf %445, %448 : vector<16x16xf32>
    %450 = arith.truncf %449 : vector<16x16xf32> to vector<16x16xbf16>
    %c384_178 = arith.constant 384 : index
    %c0_179 = arith.constant 0 : index
    %451 = vector.load %arg4[%c384_178, %c0_179] : memref<576x128xbf16, #tpu.memory_space<vmem>>, vector<16x128xbf16>
    %cst_180 = arith.constant dense<0.000000e+00> : vector<16x128xf32>
    %452 = tpu.matmul %450, %451, %cst_180 {dimension_numbers = #tpu.dot_dimension_numbers<[1], [0], [0], [1], [0, 0, 1, 1], [], []>} : vector<16x16xbf16>, vector<16x128xbf16>, vector<16x128xf32> -> vector<16x128xf32>
    %453 = arith.addf %435, %452 : vector<16x128xf32>
    %c0_181 = arith.constant 0 : index
    %c400 = arith.constant 400 : index
    %c0_182 = arith.constant 0 : index
    %454 = vector.load %arg1[%c0_181, %c400, %c0_182] : memref<1x576x144xbf16, #tpu.memory_space<vmem>>, vector<1x16x144xbf16>
    %455 = vector.shape_cast %454 : vector<1x16x144xbf16> to vector<16x144xbf16>
    %cst_183 = arith.constant dense<0.000000e+00> : vector<16x64xf32>
    %456 = tpu.matmul %455, %0, %cst_183 {dimension_numbers = #tpu.dot_dimension_numbers<[1], [0], [0], [1], [0, 0, 1, 1], [], []>} : vector<16x144xbf16>, vector<144x64xbf16>, vector<16x64xf32> -> vector<16x64xf32>
    %457 = vector.broadcast %1 : vector<1x64xf32> to vector<16x64xf32>
    %458 = arith.addf %456, %457 : vector<16x64xf32>
    %cst_184 = arith.constant 0.000000e+00 : f32
    %459 = vector.broadcast %cst_184 : f32 to vector<16x64xf32>
    %460 = arith.maximumf %458, %459 : vector<16x64xf32>
    %461 = vector.extract_strided_slice %460 {offsets = [0, 0], sizes = [16, 16], strides = [1, 1]} : vector<16x64xf32> to vector<16x16xf32>
    %462 = vector.extract_strided_slice %460 {offsets = [0, 16], sizes = [16, 16], strides = [1, 1]} : vector<16x64xf32> to vector<16x16xf32>
    %463 = arith.maximumf %461, %462 : vector<16x16xf32>
    %464 = vector.extract_strided_slice %460 {offsets = [0, 32], sizes = [16, 16], strides = [1, 1]} : vector<16x64xf32> to vector<16x16xf32>
    %465 = vector.extract_strided_slice %460 {offsets = [0, 48], sizes = [16, 16], strides = [1, 1]} : vector<16x64xf32> to vector<16x16xf32>
    %466 = arith.maximumf %464, %465 : vector<16x16xf32>
    %467 = arith.maximumf %463, %466 : vector<16x16xf32>
    %468 = arith.truncf %467 : vector<16x16xf32> to vector<16x16xbf16>
    %c400_185 = arith.constant 400 : index
    %c0_186 = arith.constant 0 : index
    %469 = vector.load %arg4[%c400_185, %c0_186] : memref<576x128xbf16, #tpu.memory_space<vmem>>, vector<16x128xbf16>
    %cst_187 = arith.constant dense<0.000000e+00> : vector<16x128xf32>
    %470 = tpu.matmul %468, %469, %cst_187 {dimension_numbers = #tpu.dot_dimension_numbers<[1], [0], [0], [1], [0, 0, 1, 1], [], []>} : vector<16x16xbf16>, vector<16x128xbf16>, vector<16x128xf32> -> vector<16x128xf32>
    %471 = arith.addf %453, %470 : vector<16x128xf32>
    %c0_188 = arith.constant 0 : index
    %c416 = arith.constant 416 : index
    %c0_189 = arith.constant 0 : index
    %472 = vector.load %arg1[%c0_188, %c416, %c0_189] : memref<1x576x144xbf16, #tpu.memory_space<vmem>>, vector<1x16x144xbf16>
    %473 = vector.shape_cast %472 : vector<1x16x144xbf16> to vector<16x144xbf16>
    %cst_190 = arith.constant dense<0.000000e+00> : vector<16x64xf32>
    %474 = tpu.matmul %473, %0, %cst_190 {dimension_numbers = #tpu.dot_dimension_numbers<[1], [0], [0], [1], [0, 0, 1, 1], [], []>} : vector<16x144xbf16>, vector<144x64xbf16>, vector<16x64xf32> -> vector<16x64xf32>
    %475 = vector.broadcast %1 : vector<1x64xf32> to vector<16x64xf32>
    %476 = arith.addf %474, %475 : vector<16x64xf32>
    %cst_191 = arith.constant 0.000000e+00 : f32
    %477 = vector.broadcast %cst_191 : f32 to vector<16x64xf32>
    %478 = arith.maximumf %476, %477 : vector<16x64xf32>
    %479 = vector.extract_strided_slice %478 {offsets = [0, 0], sizes = [16, 16], strides = [1, 1]} : vector<16x64xf32> to vector<16x16xf32>
    %480 = vector.extract_strided_slice %478 {offsets = [0, 16], sizes = [16, 16], strides = [1, 1]} : vector<16x64xf32> to vector<16x16xf32>
    %481 = arith.maximumf %479, %480 : vector<16x16xf32>
    %482 = vector.extract_strided_slice %478 {offsets = [0, 32], sizes = [16, 16], strides = [1, 1]} : vector<16x64xf32> to vector<16x16xf32>
    %483 = vector.extract_strided_slice %478 {offsets = [0, 48], sizes = [16, 16], strides = [1, 1]} : vector<16x64xf32> to vector<16x16xf32>
    %484 = arith.maximumf %482, %483 : vector<16x16xf32>
    %485 = arith.maximumf %481, %484 : vector<16x16xf32>
    %486 = arith.truncf %485 : vector<16x16xf32> to vector<16x16xbf16>
    %c416_192 = arith.constant 416 : index
    %c0_193 = arith.constant 0 : index
    %487 = vector.load %arg4[%c416_192, %c0_193] : memref<576x128xbf16, #tpu.memory_space<vmem>>, vector<16x128xbf16>
    %cst_194 = arith.constant dense<0.000000e+00> : vector<16x128xf32>
    %488 = tpu.matmul %486, %487, %cst_194 {dimension_numbers = #tpu.dot_dimension_numbers<[1], [0], [0], [1], [0, 0, 1, 1], [], []>} : vector<16x16xbf16>, vector<16x128xbf16>, vector<16x128xf32> -> vector<16x128xf32>
    %489 = arith.addf %471, %488 : vector<16x128xf32>
    %c0_195 = arith.constant 0 : index
    %c432 = arith.constant 432 : index
    %c0_196 = arith.constant 0 : index
    %490 = vector.load %arg1[%c0_195, %c432, %c0_196] : memref<1x576x144xbf16, #tpu.memory_space<vmem>>, vector<1x16x144xbf16>
    %491 = vector.shape_cast %490 : vector<1x16x144xbf16> to vector<16x144xbf16>
    %cst_197 = arith.constant dense<0.000000e+00> : vector<16x64xf32>
    %492 = tpu.matmul %491, %0, %cst_197 {dimension_numbers = #tpu.dot_dimension_numbers<[1], [0], [0], [1], [0, 0, 1, 1], [], []>} : vector<16x144xbf16>, vector<144x64xbf16>, vector<16x64xf32> -> vector<16x64xf32>
    %493 = vector.broadcast %1 : vector<1x64xf32> to vector<16x64xf32>
    %494 = arith.addf %492, %493 : vector<16x64xf32>
    %cst_198 = arith.constant 0.000000e+00 : f32
    %495 = vector.broadcast %cst_198 : f32 to vector<16x64xf32>
    %496 = arith.maximumf %494, %495 : vector<16x64xf32>
    %497 = vector.extract_strided_slice %496 {offsets = [0, 0], sizes = [16, 16], strides = [1, 1]} : vector<16x64xf32> to vector<16x16xf32>
    %498 = vector.extract_strided_slice %496 {offsets = [0, 16], sizes = [16, 16], strides = [1, 1]} : vector<16x64xf32> to vector<16x16xf32>
    %499 = arith.maximumf %497, %498 : vector<16x16xf32>
    %500 = vector.extract_strided_slice %496 {offsets = [0, 32], sizes = [16, 16], strides = [1, 1]} : vector<16x64xf32> to vector<16x16xf32>
    %501 = vector.extract_strided_slice %496 {offsets = [0, 48], sizes = [16, 16], strides = [1, 1]} : vector<16x64xf32> to vector<16x16xf32>
    %502 = arith.maximumf %500, %501 : vector<16x16xf32>
    %503 = arith.maximumf %499, %502 : vector<16x16xf32>
    %504 = arith.truncf %503 : vector<16x16xf32> to vector<16x16xbf16>
    %c432_199 = arith.constant 432 : index
    %c0_200 = arith.constant 0 : index
    %505 = vector.load %arg4[%c432_199, %c0_200] : memref<576x128xbf16, #tpu.memory_space<vmem>>, vector<16x128xbf16>
    %cst_201 = arith.constant dense<0.000000e+00> : vector<16x128xf32>
    %506 = tpu.matmul %504, %505, %cst_201 {dimension_numbers = #tpu.dot_dimension_numbers<[1], [0], [0], [1], [0, 0, 1, 1], [], []>} : vector<16x16xbf16>, vector<16x128xbf16>, vector<16x128xf32> -> vector<16x128xf32>
    %507 = arith.addf %489, %506 : vector<16x128xf32>
    %c0_202 = arith.constant 0 : index
    %c448 = arith.constant 448 : index
    %c0_203 = arith.constant 0 : index
    %508 = vector.load %arg1[%c0_202, %c448, %c0_203] : memref<1x576x144xbf16, #tpu.memory_space<vmem>>, vector<1x16x144xbf16>
    %509 = vector.shape_cast %508 : vector<1x16x144xbf16> to vector<16x144xbf16>
    %cst_204 = arith.constant dense<0.000000e+00> : vector<16x64xf32>
    %510 = tpu.matmul %509, %0, %cst_204 {dimension_numbers = #tpu.dot_dimension_numbers<[1], [0], [0], [1], [0, 0, 1, 1], [], []>} : vector<16x144xbf16>, vector<144x64xbf16>, vector<16x64xf32> -> vector<16x64xf32>
    %511 = vector.broadcast %1 : vector<1x64xf32> to vector<16x64xf32>
    %512 = arith.addf %510, %511 : vector<16x64xf32>
    %cst_205 = arith.constant 0.000000e+00 : f32
    %513 = vector.broadcast %cst_205 : f32 to vector<16x64xf32>
    %514 = arith.maximumf %512, %513 : vector<16x64xf32>
    %515 = vector.extract_strided_slice %514 {offsets = [0, 0], sizes = [16, 16], strides = [1, 1]} : vector<16x64xf32> to vector<16x16xf32>
    %516 = vector.extract_strided_slice %514 {offsets = [0, 16], sizes = [16, 16], strides = [1, 1]} : vector<16x64xf32> to vector<16x16xf32>
    %517 = arith.maximumf %515, %516 : vector<16x16xf32>
    %518 = vector.extract_strided_slice %514 {offsets = [0, 32], sizes = [16, 16], strides = [1, 1]} : vector<16x64xf32> to vector<16x16xf32>
    %519 = vector.extract_strided_slice %514 {offsets = [0, 48], sizes = [16, 16], strides = [1, 1]} : vector<16x64xf32> to vector<16x16xf32>
    %520 = arith.maximumf %518, %519 : vector<16x16xf32>
    %521 = arith.maximumf %517, %520 : vector<16x16xf32>
    %522 = arith.truncf %521 : vector<16x16xf32> to vector<16x16xbf16>
    %c448_206 = arith.constant 448 : index
    %c0_207 = arith.constant 0 : index
    %523 = vector.load %arg4[%c448_206, %c0_207] : memref<576x128xbf16, #tpu.memory_space<vmem>>, vector<16x128xbf16>
    %cst_208 = arith.constant dense<0.000000e+00> : vector<16x128xf32>
    %524 = tpu.matmul %522, %523, %cst_208 {dimension_numbers = #tpu.dot_dimension_numbers<[1], [0], [0], [1], [0, 0, 1, 1], [], []>} : vector<16x16xbf16>, vector<16x128xbf16>, vector<16x128xf32> -> vector<16x128xf32>
    %525 = arith.addf %507, %524 : vector<16x128xf32>
    %c0_209 = arith.constant 0 : index
    %c464 = arith.constant 464 : index
    %c0_210 = arith.constant 0 : index
    %526 = vector.load %arg1[%c0_209, %c464, %c0_210] : memref<1x576x144xbf16, #tpu.memory_space<vmem>>, vector<1x16x144xbf16>
    %527 = vector.shape_cast %526 : vector<1x16x144xbf16> to vector<16x144xbf16>
    %cst_211 = arith.constant dense<0.000000e+00> : vector<16x64xf32>
    %528 = tpu.matmul %527, %0, %cst_211 {dimension_numbers = #tpu.dot_dimension_numbers<[1], [0], [0], [1], [0, 0, 1, 1], [], []>} : vector<16x144xbf16>, vector<144x64xbf16>, vector<16x64xf32> -> vector<16x64xf32>
    %529 = vector.broadcast %1 : vector<1x64xf32> to vector<16x64xf32>
    %530 = arith.addf %528, %529 : vector<16x64xf32>
    %cst_212 = arith.constant 0.000000e+00 : f32
    %531 = vector.broadcast %cst_212 : f32 to vector<16x64xf32>
    %532 = arith.maximumf %530, %531 : vector<16x64xf32>
    %533 = vector.extract_strided_slice %532 {offsets = [0, 0], sizes = [16, 16], strides = [1, 1]} : vector<16x64xf32> to vector<16x16xf32>
    %534 = vector.extract_strided_slice %532 {offsets = [0, 16], sizes = [16, 16], strides = [1, 1]} : vector<16x64xf32> to vector<16x16xf32>
    %535 = arith.maximumf %533, %534 : vector<16x16xf32>
    %536 = vector.extract_strided_slice %532 {offsets = [0, 32], sizes = [16, 16], strides = [1, 1]} : vector<16x64xf32> to vector<16x16xf32>
    %537 = vector.extract_strided_slice %532 {offsets = [0, 48], sizes = [16, 16], strides = [1, 1]} : vector<16x64xf32> to vector<16x16xf32>
    %538 = arith.maximumf %536, %537 : vector<16x16xf32>
    %539 = arith.maximumf %535, %538 : vector<16x16xf32>
    %540 = arith.truncf %539 : vector<16x16xf32> to vector<16x16xbf16>
    %c464_213 = arith.constant 464 : index
    %c0_214 = arith.constant 0 : index
    %541 = vector.load %arg4[%c464_213, %c0_214] : memref<576x128xbf16, #tpu.memory_space<vmem>>, vector<16x128xbf16>
    %cst_215 = arith.constant dense<0.000000e+00> : vector<16x128xf32>
    %542 = tpu.matmul %540, %541, %cst_215 {dimension_numbers = #tpu.dot_dimension_numbers<[1], [0], [0], [1], [0, 0, 1, 1], [], []>} : vector<16x16xbf16>, vector<16x128xbf16>, vector<16x128xf32> -> vector<16x128xf32>
    %543 = arith.addf %525, %542 : vector<16x128xf32>
    %c0_216 = arith.constant 0 : index
    %c480 = arith.constant 480 : index
    %c0_217 = arith.constant 0 : index
    %544 = vector.load %arg1[%c0_216, %c480, %c0_217] : memref<1x576x144xbf16, #tpu.memory_space<vmem>>, vector<1x16x144xbf16>
    %545 = vector.shape_cast %544 : vector<1x16x144xbf16> to vector<16x144xbf16>
    %cst_218 = arith.constant dense<0.000000e+00> : vector<16x64xf32>
    %546 = tpu.matmul %545, %0, %cst_218 {dimension_numbers = #tpu.dot_dimension_numbers<[1], [0], [0], [1], [0, 0, 1, 1], [], []>} : vector<16x144xbf16>, vector<144x64xbf16>, vector<16x64xf32> -> vector<16x64xf32>
    %547 = vector.broadcast %1 : vector<1x64xf32> to vector<16x64xf32>
    %548 = arith.addf %546, %547 : vector<16x64xf32>
    %cst_219 = arith.constant 0.000000e+00 : f32
    %549 = vector.broadcast %cst_219 : f32 to vector<16x64xf32>
    %550 = arith.maximumf %548, %549 : vector<16x64xf32>
    %551 = vector.extract_strided_slice %550 {offsets = [0, 0], sizes = [16, 16], strides = [1, 1]} : vector<16x64xf32> to vector<16x16xf32>
    %552 = vector.extract_strided_slice %550 {offsets = [0, 16], sizes = [16, 16], strides = [1, 1]} : vector<16x64xf32> to vector<16x16xf32>
    %553 = arith.maximumf %551, %552 : vector<16x16xf32>
    %554 = vector.extract_strided_slice %550 {offsets = [0, 32], sizes = [16, 16], strides = [1, 1]} : vector<16x64xf32> to vector<16x16xf32>
    %555 = vector.extract_strided_slice %550 {offsets = [0, 48], sizes = [16, 16], strides = [1, 1]} : vector<16x64xf32> to vector<16x16xf32>
    %556 = arith.maximumf %554, %555 : vector<16x16xf32>
    %557 = arith.maximumf %553, %556 : vector<16x16xf32>
    %558 = arith.truncf %557 : vector<16x16xf32> to vector<16x16xbf16>
    %c480_220 = arith.constant 480 : index
    %c0_221 = arith.constant 0 : index
    %559 = vector.load %arg4[%c480_220, %c0_221] : memref<576x128xbf16, #tpu.memory_space<vmem>>, vector<16x128xbf16>
    %cst_222 = arith.constant dense<0.000000e+00> : vector<16x128xf32>
    %560 = tpu.matmul %558, %559, %cst_222 {dimension_numbers = #tpu.dot_dimension_numbers<[1], [0], [0], [1], [0, 0, 1, 1], [], []>} : vector<16x16xbf16>, vector<16x128xbf16>, vector<16x128xf32> -> vector<16x128xf32>
    %561 = arith.addf %543, %560 : vector<16x128xf32>
    %c0_223 = arith.constant 0 : index
    %c496 = arith.constant 496 : index
    %c0_224 = arith.constant 0 : index
    %562 = vector.load %arg1[%c0_223, %c496, %c0_224] : memref<1x576x144xbf16, #tpu.memory_space<vmem>>, vector<1x16x144xbf16>
    %563 = vector.shape_cast %562 : vector<1x16x144xbf16> to vector<16x144xbf16>
    %cst_225 = arith.constant dense<0.000000e+00> : vector<16x64xf32>
    %564 = tpu.matmul %563, %0, %cst_225 {dimension_numbers = #tpu.dot_dimension_numbers<[1], [0], [0], [1], [0, 0, 1, 1], [], []>} : vector<16x144xbf16>, vector<144x64xbf16>, vector<16x64xf32> -> vector<16x64xf32>
    %565 = vector.broadcast %1 : vector<1x64xf32> to vector<16x64xf32>
    %566 = arith.addf %564, %565 : vector<16x64xf32>
    %cst_226 = arith.constant 0.000000e+00 : f32
    %567 = vector.broadcast %cst_226 : f32 to vector<16x64xf32>
    %568 = arith.maximumf %566, %567 : vector<16x64xf32>
    %569 = vector.extract_strided_slice %568 {offsets = [0, 0], sizes = [16, 16], strides = [1, 1]} : vector<16x64xf32> to vector<16x16xf32>
    %570 = vector.extract_strided_slice %568 {offsets = [0, 16], sizes = [16, 16], strides = [1, 1]} : vector<16x64xf32> to vector<16x16xf32>
    %571 = arith.maximumf %569, %570 : vector<16x16xf32>
    %572 = vector.extract_strided_slice %568 {offsets = [0, 32], sizes = [16, 16], strides = [1, 1]} : vector<16x64xf32> to vector<16x16xf32>
    %573 = vector.extract_strided_slice %568 {offsets = [0, 48], sizes = [16, 16], strides = [1, 1]} : vector<16x64xf32> to vector<16x16xf32>
    %574 = arith.maximumf %572, %573 : vector<16x16xf32>
    %575 = arith.maximumf %571, %574 : vector<16x16xf32>
    %576 = arith.truncf %575 : vector<16x16xf32> to vector<16x16xbf16>
    %c496_227 = arith.constant 496 : index
    %c0_228 = arith.constant 0 : index
    %577 = vector.load %arg4[%c496_227, %c0_228] : memref<576x128xbf16, #tpu.memory_space<vmem>>, vector<16x128xbf16>
    %cst_229 = arith.constant dense<0.000000e+00> : vector<16x128xf32>
    %578 = tpu.matmul %576, %577, %cst_229 {dimension_numbers = #tpu.dot_dimension_numbers<[1], [0], [0], [1], [0, 0, 1, 1], [], []>} : vector<16x16xbf16>, vector<16x128xbf16>, vector<16x128xf32> -> vector<16x128xf32>
    %579 = arith.addf %561, %578 : vector<16x128xf32>
    %c0_230 = arith.constant 0 : index
    %c512 = arith.constant 512 : index
    %c0_231 = arith.constant 0 : index
    %580 = vector.load %arg1[%c0_230, %c512, %c0_231] : memref<1x576x144xbf16, #tpu.memory_space<vmem>>, vector<1x16x144xbf16>
    %581 = vector.shape_cast %580 : vector<1x16x144xbf16> to vector<16x144xbf16>
    %cst_232 = arith.constant dense<0.000000e+00> : vector<16x64xf32>
    %582 = tpu.matmul %581, %0, %cst_232 {dimension_numbers = #tpu.dot_dimension_numbers<[1], [0], [0], [1], [0, 0, 1, 1], [], []>} : vector<16x144xbf16>, vector<144x64xbf16>, vector<16x64xf32> -> vector<16x64xf32>
    %583 = vector.broadcast %1 : vector<1x64xf32> to vector<16x64xf32>
    %584 = arith.addf %582, %583 : vector<16x64xf32>
    %cst_233 = arith.constant 0.000000e+00 : f32
    %585 = vector.broadcast %cst_233 : f32 to vector<16x64xf32>
    %586 = arith.maximumf %584, %585 : vector<16x64xf32>
    %587 = vector.extract_strided_slice %586 {offsets = [0, 0], sizes = [16, 16], strides = [1, 1]} : vector<16x64xf32> to vector<16x16xf32>
    %588 = vector.extract_strided_slice %586 {offsets = [0, 16], sizes = [16, 16], strides = [1, 1]} : vector<16x64xf32> to vector<16x16xf32>
    %589 = arith.maximumf %587, %588 : vector<16x16xf32>
    %590 = vector.extract_strided_slice %586 {offsets = [0, 32], sizes = [16, 16], strides = [1, 1]} : vector<16x64xf32> to vector<16x16xf32>
    %591 = vector.extract_strided_slice %586 {offsets = [0, 48], sizes = [16, 16], strides = [1, 1]} : vector<16x64xf32> to vector<16x16xf32>
    %592 = arith.maximumf %590, %591 : vector<16x16xf32>
    %593 = arith.maximumf %589, %592 : vector<16x16xf32>
    %594 = arith.truncf %593 : vector<16x16xf32> to vector<16x16xbf16>
    %c512_234 = arith.constant 512 : index
    %c0_235 = arith.constant 0 : index
    %595 = vector.load %arg4[%c512_234, %c0_235] : memref<576x128xbf16, #tpu.memory_space<vmem>>, vector<16x128xbf16>
    %cst_236 = arith.constant dense<0.000000e+00> : vector<16x128xf32>
    %596 = tpu.matmul %594, %595, %cst_236 {dimension_numbers = #tpu.dot_dimension_numbers<[1], [0], [0], [1], [0, 0, 1, 1], [], []>} : vector<16x16xbf16>, vector<16x128xbf16>, vector<16x128xf32> -> vector<16x128xf32>
    %597 = arith.addf %579, %596 : vector<16x128xf32>
    %c0_237 = arith.constant 0 : index
    %c528 = arith.constant 528 : index
    %c0_238 = arith.constant 0 : index
    %598 = vector.load %arg1[%c0_237, %c528, %c0_238] : memref<1x576x144xbf16, #tpu.memory_space<vmem>>, vector<1x16x144xbf16>
    %599 = vector.shape_cast %598 : vector<1x16x144xbf16> to vector<16x144xbf16>
    %cst_239 = arith.constant dense<0.000000e+00> : vector<16x64xf32>
    %600 = tpu.matmul %599, %0, %cst_239 {dimension_numbers = #tpu.dot_dimension_numbers<[1], [0], [0], [1], [0, 0, 1, 1], [], []>} : vector<16x144xbf16>, vector<144x64xbf16>, vector<16x64xf32> -> vector<16x64xf32>
    %601 = vector.broadcast %1 : vector<1x64xf32> to vector<16x64xf32>
    %602 = arith.addf %600, %601 : vector<16x64xf32>
    %cst_240 = arith.constant 0.000000e+00 : f32
    %603 = vector.broadcast %cst_240 : f32 to vector<16x64xf32>
    %604 = arith.maximumf %602, %603 : vector<16x64xf32>
    %605 = vector.extract_strided_slice %604 {offsets = [0, 0], sizes = [16, 16], strides = [1, 1]} : vector<16x64xf32> to vector<16x16xf32>
    %606 = vector.extract_strided_slice %604 {offsets = [0, 16], sizes = [16, 16], strides = [1, 1]} : vector<16x64xf32> to vector<16x16xf32>
    %607 = arith.maximumf %605, %606 : vector<16x16xf32>
    %608 = vector.extract_strided_slice %604 {offsets = [0, 32], sizes = [16, 16], strides = [1, 1]} : vector<16x64xf32> to vector<16x16xf32>
    %609 = vector.extract_strided_slice %604 {offsets = [0, 48], sizes = [16, 16], strides = [1, 1]} : vector<16x64xf32> to vector<16x16xf32>
    %610 = arith.maximumf %608, %609 : vector<16x16xf32>
    %611 = arith.maximumf %607, %610 : vector<16x16xf32>
    %612 = arith.truncf %611 : vector<16x16xf32> to vector<16x16xbf16>
    %c528_241 = arith.constant 528 : index
    %c0_242 = arith.constant 0 : index
    %613 = vector.load %arg4[%c528_241, %c0_242] : memref<576x128xbf16, #tpu.memory_space<vmem>>, vector<16x128xbf16>
    %cst_243 = arith.constant dense<0.000000e+00> : vector<16x128xf32>
    %614 = tpu.matmul %612, %613, %cst_243 {dimension_numbers = #tpu.dot_dimension_numbers<[1], [0], [0], [1], [0, 0, 1, 1], [], []>} : vector<16x16xbf16>, vector<16x128xbf16>, vector<16x128xf32> -> vector<16x128xf32>
    %615 = arith.addf %597, %614 : vector<16x128xf32>
    %c0_244 = arith.constant 0 : index
    %c544 = arith.constant 544 : index
    %c0_245 = arith.constant 0 : index
    %616 = vector.load %arg1[%c0_244, %c544, %c0_245] : memref<1x576x144xbf16, #tpu.memory_space<vmem>>, vector<1x16x144xbf16>
    %617 = vector.shape_cast %616 : vector<1x16x144xbf16> to vector<16x144xbf16>
    %cst_246 = arith.constant dense<0.000000e+00> : vector<16x64xf32>
    %618 = tpu.matmul %617, %0, %cst_246 {dimension_numbers = #tpu.dot_dimension_numbers<[1], [0], [0], [1], [0, 0, 1, 1], [], []>} : vector<16x144xbf16>, vector<144x64xbf16>, vector<16x64xf32> -> vector<16x64xf32>
    %619 = vector.broadcast %1 : vector<1x64xf32> to vector<16x64xf32>
    %620 = arith.addf %618, %619 : vector<16x64xf32>
    %cst_247 = arith.constant 0.000000e+00 : f32
    %621 = vector.broadcast %cst_247 : f32 to vector<16x64xf32>
    %622 = arith.maximumf %620, %621 : vector<16x64xf32>
    %623 = vector.extract_strided_slice %622 {offsets = [0, 0], sizes = [16, 16], strides = [1, 1]} : vector<16x64xf32> to vector<16x16xf32>
    %624 = vector.extract_strided_slice %622 {offsets = [0, 16], sizes = [16, 16], strides = [1, 1]} : vector<16x64xf32> to vector<16x16xf32>
    %625 = arith.maximumf %623, %624 : vector<16x16xf32>
    %626 = vector.extract_strided_slice %622 {offsets = [0, 32], sizes = [16, 16], strides = [1, 1]} : vector<16x64xf32> to vector<16x16xf32>
    %627 = vector.extract_strided_slice %622 {offsets = [0, 48], sizes = [16, 16], strides = [1, 1]} : vector<16x64xf32> to vector<16x16xf32>
    %628 = arith.maximumf %626, %627 : vector<16x16xf32>
    %629 = arith.maximumf %625, %628 : vector<16x16xf32>
    %630 = arith.truncf %629 : vector<16x16xf32> to vector<16x16xbf16>
    %c544_248 = arith.constant 544 : index
    %c0_249 = arith.constant 0 : index
    %631 = vector.load %arg4[%c544_248, %c0_249] : memref<576x128xbf16, #tpu.memory_space<vmem>>, vector<16x128xbf16>
    %cst_250 = arith.constant dense<0.000000e+00> : vector<16x128xf32>
    %632 = tpu.matmul %630, %631, %cst_250 {dimension_numbers = #tpu.dot_dimension_numbers<[1], [0], [0], [1], [0, 0, 1, 1], [], []>} : vector<16x16xbf16>, vector<16x128xbf16>, vector<16x128xf32> -> vector<16x128xf32>
    %633 = arith.addf %615, %632 : vector<16x128xf32>
    %c0_251 = arith.constant 0 : index
    %c560 = arith.constant 560 : index
    %c0_252 = arith.constant 0 : index
    %634 = vector.load %arg1[%c0_251, %c560, %c0_252] : memref<1x576x144xbf16, #tpu.memory_space<vmem>>, vector<1x16x144xbf16>
    %635 = vector.shape_cast %634 : vector<1x16x144xbf16> to vector<16x144xbf16>
    %cst_253 = arith.constant dense<0.000000e+00> : vector<16x64xf32>
    %636 = tpu.matmul %635, %0, %cst_253 {dimension_numbers = #tpu.dot_dimension_numbers<[1], [0], [0], [1], [0, 0, 1, 1], [], []>} : vector<16x144xbf16>, vector<144x64xbf16>, vector<16x64xf32> -> vector<16x64xf32>
    %637 = vector.broadcast %1 : vector<1x64xf32> to vector<16x64xf32>
    %638 = arith.addf %636, %637 : vector<16x64xf32>
    %cst_254 = arith.constant 0.000000e+00 : f32
    %639 = vector.broadcast %cst_254 : f32 to vector<16x64xf32>
    %640 = arith.maximumf %638, %639 : vector<16x64xf32>
    %641 = vector.extract_strided_slice %640 {offsets = [0, 0], sizes = [16, 16], strides = [1, 1]} : vector<16x64xf32> to vector<16x16xf32>
    %642 = vector.extract_strided_slice %640 {offsets = [0, 16], sizes = [16, 16], strides = [1, 1]} : vector<16x64xf32> to vector<16x16xf32>
    %643 = arith.maximumf %641, %642 : vector<16x16xf32>
    %644 = vector.extract_strided_slice %640 {offsets = [0, 32], sizes = [16, 16], strides = [1, 1]} : vector<16x64xf32> to vector<16x16xf32>
    %645 = vector.extract_strided_slice %640 {offsets = [0, 48], sizes = [16, 16], strides = [1, 1]} : vector<16x64xf32> to vector<16x16xf32>
    %646 = arith.maximumf %644, %645 : vector<16x16xf32>
    %647 = arith.maximumf %643, %646 : vector<16x16xf32>
    %648 = arith.truncf %647 : vector<16x16xf32> to vector<16x16xbf16>
    %c560_255 = arith.constant 560 : index
    %c0_256 = arith.constant 0 : index
    %649 = vector.load %arg4[%c560_255, %c0_256] : memref<576x128xbf16, #tpu.memory_space<vmem>>, vector<16x128xbf16>
    %cst_257 = arith.constant dense<0.000000e+00> : vector<16x128xf32>
    %650 = tpu.matmul %648, %649, %cst_257 {dimension_numbers = #tpu.dot_dimension_numbers<[1], [0], [0], [1], [0, 0, 1, 1], [], []>} : vector<16x16xbf16>, vector<16x128xbf16>, vector<16x128xf32> -> vector<16x128xf32>
    %651 = arith.addf %633, %650 : vector<16x128xf32>
    %652 = vector.broadcast %2 : vector<1x128xf32> to vector<16x128xf32>
    %653 = arith.addf %651, %652 : vector<16x128xf32>
    %cst_258 = arith.constant 0.000000e+00 : f32
    %654 = vector.broadcast %cst_258 : f32 to vector<16x128xf32>
    %655 = arith.maximumf %653, %654 : vector<16x128xf32>
    %656 = vector.extract_strided_slice %655 {offsets = [0, 0], sizes = [16, 32], strides = [1, 1]} : vector<16x128xf32> to vector<16x32xf32>
    %657 = vector.extract_strided_slice %655 {offsets = [0, 32], sizes = [16, 32], strides = [1, 1]} : vector<16x128xf32> to vector<16x32xf32>
    %658 = arith.addf %656, %657 : vector<16x32xf32>
    %659 = vector.extract_strided_slice %655 {offsets = [0, 64], sizes = [16, 32], strides = [1, 1]} : vector<16x128xf32> to vector<16x32xf32>
    %660 = arith.addf %658, %659 : vector<16x32xf32>
    %661 = vector.extract_strided_slice %655 {offsets = [0, 96], sizes = [16, 32], strides = [1, 1]} : vector<16x128xf32> to vector<16x32xf32>
    %662 = arith.addf %660, %661 : vector<16x32xf32>
    %cst_259 = arith.constant 2.500000e-01 : f32
    %663 = vector.broadcast %cst_259 : f32 to vector<16x32xf32>
    %664 = arith.mulf %663, %662 : vector<16x32xf32>
    %665 = vector.extract_strided_slice %664 {offsets = [0, 0], sizes = [1, 32], strides = [1, 1]} : vector<16x32xf32> to vector<1x32xf32>
    %c0_260 = arith.constant 0 : index
    %c0_261 = arith.constant 0 : index
    %666 = vector.load %arg17[%c0_260, %c0_261] : memref<1x512xf32, #tpu.memory_space<vmem>>, vector<1x32xf32>
    tpu.vector_store %arg17[%c0_260, %c0_261], %665 {strides = array<i32>} : memref<1x512xf32, #tpu.memory_space<vmem>>, vector<1x32xf32>,
    %667 = vector.extract_strided_slice %664 {offsets = [1, 0], sizes = [1, 32], strides = [1, 1]} : vector<16x32xf32> to vector<1x32xf32>
    %c0_262 = arith.constant 0 : index
    %c32_263 = arith.constant 32 : index
    %668 = vector.load %arg17[%c0_262, %c32_263] : memref<1x512xf32, #tpu.memory_space<vmem>>, vector<1x32xf32>
    tpu.vector_store %arg17[%c0_262, %c32_263], %667 {strides = array<i32>} : memref<1x512xf32, #tpu.memory_space<vmem>>, vector<1x32xf32>,
    %669 = vector.extract_strided_slice %664 {offsets = [2, 0], sizes = [1, 32], strides = [1, 1]} : vector<16x32xf32> to vector<1x32xf32>
    %c0_264 = arith.constant 0 : index
    %c64_265 = arith.constant 64 : index
    %670 = vector.load %arg17[%c0_264, %c64_265] : memref<1x512xf32, #tpu.memory_space<vmem>>, vector<1x32xf32>
    tpu.vector_store %arg17[%c0_264, %c64_265], %669 {strides = array<i32>} : memref<1x512xf32, #tpu.memory_space<vmem>>, vector<1x32xf32>,
    %671 = vector.extract_strided_slice %664 {offsets = [3, 0], sizes = [1, 32], strides = [1, 1]} : vector<16x32xf32> to vector<1x32xf32>
    %c0_266 = arith.constant 0 : index
    %c96_267 = arith.constant 96 : index
    %672 = vector.load %arg17[%c0_266, %c96_267] : memref<1x512xf32, #tpu.memory_space<vmem>>, vector<1x32xf32>
    tpu.vector_store %arg17[%c0_266, %c96_267], %671 {strides = array<i32>} : memref<1x512xf32, #tpu.memory_space<vmem>>, vector<1x32xf32>,
    %673 = vector.extract_strided_slice %664 {offsets = [4, 0], sizes = [1, 32], strides = [1, 1]} : vector<16x32xf32> to vector<1x32xf32>
    %c0_268 = arith.constant 0 : index
    %c128_269 = arith.constant 128 : index
    %674 = vector.load %arg17[%c0_268, %c128_269] : memref<1x512xf32, #tpu.memory_space<vmem>>, vector<1x32xf32>
    tpu.vector_store %arg17[%c0_268, %c128_269], %673 {strides = array<i32>} : memref<1x512xf32, #tpu.memory_space<vmem>>, vector<1x32xf32>,
    %675 = vector.extract_strided_slice %664 {offsets = [5, 0], sizes = [1, 32], strides = [1, 1]} : vector<16x32xf32> to vector<1x32xf32>
    %c0_270 = arith.constant 0 : index
    %c160_271 = arith.constant 160 : index
    %676 = vector.load %arg17[%c0_270, %c160_271] : memref<1x512xf32, #tpu.memory_space<vmem>>, vector<1x32xf32>
    tpu.vector_store %arg17[%c0_270, %c160_271], %675 {strides = array<i32>} : memref<1x512xf32, #tpu.memory_space<vmem>>, vector<1x32xf32>,
    %677 = vector.extract_strided_slice %664 {offsets = [6, 0], sizes = [1, 32], strides = [1, 1]} : vector<16x32xf32> to vector<1x32xf32>
    %c0_272 = arith.constant 0 : index
    %c192_273 = arith.constant 192 : index
    %678 = vector.load %arg17[%c0_272, %c192_273] : memref<1x512xf32, #tpu.memory_space<vmem>>, vector<1x32xf32>
    tpu.vector_store %arg17[%c0_272, %c192_273], %677 {strides = array<i32>} : memref<1x512xf32, #tpu.memory_space<vmem>>, vector<1x32xf32>,
    %679 = vector.extract_strided_slice %664 {offsets = [7, 0], sizes = [1, 32], strides = [1, 1]} : vector<16x32xf32> to vector<1x32xf32>
    %c0_274 = arith.constant 0 : index
    %c224_275 = arith.constant 224 : index
    %680 = vector.load %arg17[%c0_274, %c224_275] : memref<1x512xf32, #tpu.memory_space<vmem>>, vector<1x32xf32>
    tpu.vector_store %arg17[%c0_274, %c224_275], %679 {strides = array<i32>} : memref<1x512xf32, #tpu.memory_space<vmem>>, vector<1x32xf32>,
    %681 = vector.extract_strided_slice %664 {offsets = [8, 0], sizes = [1, 32], strides = [1, 1]} : vector<16x32xf32> to vector<1x32xf32>
    %c0_276 = arith.constant 0 : index
    %c256_277 = arith.constant 256 : index
    %682 = vector.load %arg17[%c0_276, %c256_277] : memref<1x512xf32, #tpu.memory_space<vmem>>, vector<1x32xf32>
    tpu.vector_store %arg17[%c0_276, %c256_277], %681 {strides = array<i32>} : memref<1x512xf32, #tpu.memory_space<vmem>>, vector<1x32xf32>,
    %683 = vector.extract_strided_slice %664 {offsets = [9, 0], sizes = [1, 32], strides = [1, 1]} : vector<16x32xf32> to vector<1x32xf32>
    %c0_278 = arith.constant 0 : index
    %c288_279 = arith.constant 288 : index
    %684 = vector.load %arg17[%c0_278, %c288_279] : memref<1x512xf32, #tpu.memory_space<vmem>>, vector<1x32xf32>
    tpu.vector_store %arg17[%c0_278, %c288_279], %683 {strides = array<i32>} : memref<1x512xf32, #tpu.memory_space<vmem>>, vector<1x32xf32>,
    %685 = vector.extract_strided_slice %664 {offsets = [10, 0], sizes = [1, 32], strides = [1, 1]} : vector<16x32xf32> to vector<1x32xf32>
    %c0_280 = arith.constant 0 : index
    %c320_281 = arith.constant 320 : index
    %686 = vector.load %arg17[%c0_280, %c320_281] : memref<1x512xf32, #tpu.memory_space<vmem>>, vector<1x32xf32>
    tpu.vector_store %arg17[%c0_280, %c320_281], %685 {strides = array<i32>} : memref<1x512xf32, #tpu.memory_space<vmem>>, vector<1x32xf32>,
    %687 = vector.extract_strided_slice %664 {offsets = [11, 0], sizes = [1, 32], strides = [1, 1]} : vector<16x32xf32> to vector<1x32xf32>
    %c0_282 = arith.constant 0 : index
    %c352_283 = arith.constant 352 : index
    %688 = vector.load %arg17[%c0_282, %c352_283] : memref<1x512xf32, #tpu.memory_space<vmem>>, vector<1x32xf32>
    tpu.vector_store %arg17[%c0_282, %c352_283], %687 {strides = array<i32>} : memref<1x512xf32, #tpu.memory_space<vmem>>, vector<1x32xf32>,
    %689 = vector.extract_strided_slice %664 {offsets = [12, 0], sizes = [1, 32], strides = [1, 1]} : vector<16x32xf32> to vector<1x32xf32>
    %c0_284 = arith.constant 0 : index
    %c384_285 = arith.constant 384 : index
    %690 = vector.load %arg17[%c0_284, %c384_285] : memref<1x512xf32, #tpu.memory_space<vmem>>, vector<1x32xf32>
    tpu.vector_store %arg17[%c0_284, %c384_285], %689 {strides = array<i32>} : memref<1x512xf32, #tpu.memory_space<vmem>>, vector<1x32xf32>,
    %691 = vector.extract_strided_slice %664 {offsets = [13, 0], sizes = [1, 32], strides = [1, 1]} : vector<16x32xf32> to vector<1x32xf32>
    %c0_286 = arith.constant 0 : index
    %c416_287 = arith.constant 416 : index
    %692 = vector.load %arg17[%c0_286, %c416_287] : memref<1x512xf32, #tpu.memory_space<vmem>>, vector<1x32xf32>
    tpu.vector_store %arg17[%c0_286, %c416_287], %691 {strides = array<i32>} : memref<1x512xf32, #tpu.memory_space<vmem>>, vector<1x32xf32>,
    %693 = vector.extract_strided_slice %664 {offsets = [14, 0], sizes = [1, 32], strides = [1, 1]} : vector<16x32xf32> to vector<1x32xf32>
    %c0_288 = arith.constant 0 : index
    %c448_289 = arith.constant 448 : index
    %694 = vector.load %arg17[%c0_288, %c448_289] : memref<1x512xf32, #tpu.memory_space<vmem>>, vector<1x32xf32>
    tpu.vector_store %arg17[%c0_288, %c448_289], %693 {strides = array<i32>} : memref<1x512xf32, #tpu.memory_space<vmem>>, vector<1x32xf32>,
    %695 = vector.extract_strided_slice %664 {offsets = [15, 0], sizes = [1, 32], strides = [1, 1]} : vector<16x32xf32> to vector<1x32xf32>
    %c0_290 = arith.constant 0 : index
    %c480_291 = arith.constant 480 : index
    %696 = vector.load %arg17[%c0_290, %c480_291] : memref<1x512xf32, #tpu.memory_space<vmem>>, vector<1x32xf32>
    tpu.vector_store %arg17[%c0_290, %c480_291], %695 {strides = array<i32>} : memref<1x512xf32, #tpu.memory_space<vmem>>, vector<1x32xf32>,
    %c0_292 = arith.constant 0 : index
    %c0_293 = arith.constant 0 : index
    %697 = vector.load %arg17[%c0_292, %c0_293] : memref<1x512xf32, #tpu.memory_space<vmem>>, vector<1x512xf32>
    %c0_294 = arith.constant 0 : index
    %c0_295 = arith.constant 0 : index
    %698 = vector.load %arg6[%c0_294, %c0_295] : memref<1x512xf32, #tpu.memory_space<vmem>>, vector<1x512xf32>
    %c0_296 = arith.constant 0 : index
    %c0_297 = arith.constant 0 : index
    %699 = vector.load %arg7[%c0_296, %c0_297] : memref<1x512xf32, #tpu.memory_space<vmem>>, vector<1x512xf32>
    %cst_298 = arith.constant dense<0.000000e+00> : vector<1xf32>
    %700 = vector.multi_reduction <add>, %697, %cst_298 [1] : vector<1x512xf32> to vector<1xf32>
    %701 = vector.shape_cast %700 : vector<1xf32> to vector<1x1xf32>
    %cst_299 = arith.constant 5.120000e+02 : f32
    %702 = vector.broadcast %cst_299 : f32 to vector<1x1xf32>
    %703 = arith.divf %701, %702 : vector<1x1xf32>
    %704 = vector.broadcast %703 : vector<1x1xf32> to vector<1x512xf32>
    %705 = arith.subf %697, %704 : vector<1x512xf32>
    %706 = arith.mulf %705, %705 : vector<1x512xf32>
    %cst_300 = arith.constant dense<0.000000e+00> : vector<1xf32>
    %707 = vector.multi_reduction <add>, %706, %cst_300 [1] : vector<1x512xf32> to vector<1xf32>
    %708 = vector.shape_cast %707 : vector<1xf32> to vector<1x1xf32>
    %cst_301 = arith.constant 5.120000e+02 : f32
    %709 = vector.broadcast %cst_301 : f32 to vector<1x1xf32>
    %710 = arith.divf %708, %709 : vector<1x1xf32>
    %711 = vector.broadcast %703 : vector<1x1xf32> to vector<1x512xf32>
    %712 = arith.subf %697, %711 : vector<1x512xf32>
    %cst_302 = arith.constant 9.99999974E-6 : f32
    %713 = vector.broadcast %cst_302 : f32 to vector<1x1xf32>
    %714 = arith.addf %710, %713 : vector<1x1xf32>
    %715 = math.rsqrt %714 : vector<1x1xf32>
    %716 = vector.broadcast %715 : vector<1x1xf32> to vector<1x512xf32>
    %717 = arith.mulf %712, %716 : vector<1x512xf32>
    %718 = arith.mulf %717, %698 : vector<1x512xf32>
    %719 = arith.addf %718, %699 : vector<1x512xf32>
    %c0_303 = arith.constant 0 : index
    %c0_304 = arith.constant 0 : index
    %720 = vector.load %arg8[%c0_303, %c0_304] : memref<512x64xf32, #tpu.memory_space<vmem>>, vector<512x64xf32>
    %c0_305 = arith.constant 0 : index
    %c0_306 = arith.constant 0 : index
    %721 = vector.load %arg9[%c0_305, %c0_306] : memref<1x64xf32, #tpu.memory_space<vmem>>, vector<1x64xf32>
    %cst_307 = arith.constant dense<0.000000e+00> : vector<1x64xf32>
    %722 = tpu.matmul %719, %720, %cst_307 {dimension_numbers = #tpu.dot_dimension_numbers<[1], [0], [0], [1], [0, 0, 1, 1], [], []>} : vector<1x512xf32>, vector<512x64xf32>, vector<1x64xf32> -> vector<1x64xf32>
    %723 = arith.addf %722, %721 : vector<1x64xf32>
    %cst_308 = arith.constant 0.000000e+00 : f32
    %724 = vector.broadcast %cst_308 : f32 to vector<1x64xf32>
    %725 = arith.maximumf %723, %724 : vector<1x64xf32>
    %c0_309 = arith.constant 0 : index
    %c0_310 = arith.constant 0 : index
    %726 = vector.load %arg10[%c0_309, %c0_310] : memref<64x32xf32, #tpu.memory_space<vmem>>, vector<64x32xf32>
    %c0_311 = arith.constant 0 : index
    %c0_312 = arith.constant 0 : index
    %727 = vector.load %arg11[%c0_311, %c0_312] : memref<1x32xf32, #tpu.memory_space<vmem>>, vector<1x32xf32>
    %cst_313 = arith.constant dense<0.000000e+00> : vector<1x32xf32>
    %728 = tpu.matmul %725, %726, %cst_313 {dimension_numbers = #tpu.dot_dimension_numbers<[1], [0], [0], [1], [0, 0, 1, 1], [], []>} : vector<1x64xf32>, vector<64x32xf32>, vector<1x32xf32> -> vector<1x32xf32>
    %729 = arith.addf %728, %727 : vector<1x32xf32>
    %cst_314 = arith.constant 0.000000e+00 : f32
    %730 = vector.broadcast %cst_314 : f32 to vector<1x32xf32>
    %731 = arith.maximumf %729, %730 : vector<1x32xf32>
    %c0_315 = arith.constant 0 : index
    %c0_316 = arith.constant 0 : index
    %732 = vector.load %arg12[%c0_315, %c0_316] : memref<32x4xf32, #tpu.memory_space<vmem>>, vector<32x4xf32>
    %cst_317 = arith.constant dense<0.000000e+00> : vector<1x4xf32>
    %733 = tpu.matmul %731, %732, %cst_317 {dimension_numbers = #tpu.dot_dimension_numbers<[1], [0], [0], [1], [0, 0, 1, 1], [], []>} : vector<1x32xf32>, vector<32x4xf32>, vector<1x4xf32> -> vector<1x4xf32>
    %c0_318 = arith.constant 0 : index
    %c0_319 = arith.constant 0 : index
    %734 = vector.load %arg13[%c0_318, %c0_319] : memref<1x4xf32, #tpu.memory_space<vmem>>, vector<1x4xf32>
    %735 = arith.addf %733, %734 : vector<1x4xf32>
    %c0_320 = arith.constant 0 : index
    %c0_321 = arith.constant 0 : index
    %736 = vector.load %arg14[%c0_320, %c0_321] : memref<1x4xf32, #tpu.memory_space<vmem>>, vector<1x4xf32>
    %c0_322 = arith.constant 0 : index
    %c0_323 = arith.constant 0 : index
    %737 = vector.load %arg15[%c0_322, %c0_323] : memref<1x4xf32, #tpu.memory_space<vmem>>, vector<1x4xf32>
    %cst_324 = arith.constant dense<0.000000e+00> : vector<1xf32>
    %738 = vector.multi_reduction <add>, %735, %cst_324 [1] : vector<1x4xf32> to vector<1xf32>
    %739 = vector.shape_cast %738 : vector<1xf32> to vector<1x1xf32>
    %cst_325 = arith.constant 4.000000e+00 : f32
    %740 = vector.broadcast %cst_325 : f32 to vector<1x1xf32>
    %741 = arith.divf %739, %740 : vector<1x1xf32>
    %742 = vector.broadcast %741 : vector<1x1xf32> to vector<1x4xf32>
    %743 = arith.subf %735, %742 : vector<1x4xf32>
    %744 = arith.mulf %743, %743 : vector<1x4xf32>
    %cst_326 = arith.constant dense<0.000000e+00> : vector<1xf32>
    %745 = vector.multi_reduction <add>, %744, %cst_326 [1] : vector<1x4xf32> to vector<1xf32>
    %746 = vector.shape_cast %745 : vector<1xf32> to vector<1x1xf32>
    %cst_327 = arith.constant 4.000000e+00 : f32
    %747 = vector.broadcast %cst_327 : f32 to vector<1x1xf32>
    %748 = arith.divf %746, %747 : vector<1x1xf32>
    %749 = vector.broadcast %741 : vector<1x1xf32> to vector<1x4xf32>
    %750 = arith.subf %735, %749 : vector<1x4xf32>
    %cst_328 = arith.constant 9.99999974E-6 : f32
    %751 = vector.broadcast %cst_328 : f32 to vector<1x1xf32>
    %752 = arith.addf %748, %751 : vector<1x1xf32>
    %753 = math.rsqrt %752 : vector<1x1xf32>
    %754 = vector.broadcast %753 : vector<1x1xf32> to vector<1x4xf32>
    %755 = arith.mulf %750, %754 : vector<1x4xf32>
    %756 = arith.mulf %755, %736 : vector<1x4xf32>
    %757 = arith.addf %756, %737 : vector<1x4xf32>
    %cst_329 = arith.constant -6.000000e+00 : f32
    %cst_330 = arith.constant 6.000000e+00 : f32
    %758 = vector.broadcast %cst_329 : f32 to vector<1x4xf32>
    %759 = arith.maximumf %758, %757 : vector<1x4xf32>
    %760 = vector.broadcast %cst_330 : f32 to vector<1x4xf32>
    %761 = arith.minimumf %760, %759 : vector<1x4xf32>
    %762 = math.tanh %761 : vector<1x4xf32>
    %cst_331 = arith.constant 1.000000e+00 : f32
    %763 = vector.broadcast %cst_331 : f32 to vector<1x4xf32>
    %764 = arith.mulf %762, %763 : vector<1x4xf32>
    %c0_332 = arith.constant 0 : index
    %c0_333 = arith.constant 0 : index
    %c0_334 = arith.constant 0 : index
    %765 = vector.load %arg16[%c0_332, %c0_333, %c0_334] : memref<1x1x4xf32, #tpu.memory_space<vmem>>, vector<1x1x4xf32>
    %766 = vector.shape_cast %765 : vector<1x1x4xf32> to vector<1x4xf32>
    %767 = vector.shape_cast %764 : vector<1x4xf32> to vector<1x1x4xf32>
    tpu.vector_store %arg16[%c0_332, %c0_333, %c0_334], %767 {strides = array<i32>} : memref<1x1x4xf32, #tpu.memory_space<vmem>>, vector<1x1x4xf32>,
    return
  }
  func.func @transform_0(%arg0: i32) -> (i32, i32, i32) {
    %c0_i32 = arith.constant 0 : i32
    %c0_i32_0 = arith.constant 0 : i32
    %c0_i32_1 = arith.constant 0 : i32
    return %arg0, %c0_i32, %c0_i32_0 : i32, i32, i32
  }
  func.func @transform_1(%arg0: i32) -> (i32, i32) {
    %c0_i32 = arith.constant 0 : i32
    %c0_i32_0 = arith.constant 0 : i32
    %c0_i32_1 = arith.constant 0 : i32
    return %c0_i32, %c0_i32_0 : i32, i32
  }
  func.func @transform_2(%arg0: i32) -> (i32, i32) {
    %c0_i32 = arith.constant 0 : i32
    %c0_i32_0 = arith.constant 0 : i32
    %c0_i32_1 = arith.constant 0 : i32
    return %c0_i32, %c0_i32_0 : i32, i32
  }
  func.func @transform_3(%arg0: i32) -> (i32, i32) {
    %c0_i32 = arith.constant 0 : i32
    %c0_i32_0 = arith.constant 0 : i32
    %c0_i32_1 = arith.constant 0 : i32
    return %c0_i32, %c0_i32_0 : i32, i32
  }
  func.func @transform_4(%arg0: i32) -> (i32, i32) {
    %c0_i32 = arith.constant 0 : i32
    %c0_i32_0 = arith.constant 0 : i32
    %c0_i32_1 = arith.constant 0 : i32
    return %c0_i32, %c0_i32_0 : i32, i32
  }
  func.func @transform_5(%arg0: i32) -> (i32, i32) {
    %c0_i32 = arith.constant 0 : i32
    %c0_i32_0 = arith.constant 0 : i32
    %c0_i32_1 = arith.constant 0 : i32
    return %c0_i32, %c0_i32_0 : i32, i32
  }
  func.func @transform_6(%arg0: i32) -> (i32, i32) {
    %c0_i32 = arith.constant 0 : i32
    %c0_i32_0 = arith.constant 0 : i32
    %c0_i32_1 = arith.constant 0 : i32
    return %c0_i32, %c0_i32_0 : i32, i32
  }
  func.func @transform_7(%arg0: i32) -> (i32, i32) {
    %c0_i32 = arith.constant 0 : i32
    %c0_i32_0 = arith.constant 0 : i32
    %c0_i32_1 = arith.constant 0 : i32
    return %c0_i32, %c0_i32_0 : i32, i32
  }
  func.func @transform_8(%arg0: i32) -> (i32, i32) {
    %c0_i32 = arith.constant 0 : i32
    %c0_i32_0 = arith.constant 0 : i32
    %c0_i32_1 = arith.constant 0 : i32
    return %c0_i32, %c0_i32_0 : i32, i32
  }
  func.func @transform_9(%arg0: i32) -> (i32, i32) {
    %c0_i32 = arith.constant 0 : i32
    %c0_i32_0 = arith.constant 0 : i32
    %c0_i32_1 = arith.constant 0 : i32
    return %c0_i32, %c0_i32_0 : i32, i32
  }
  func.func @transform_10(%arg0: i32) -> (i32, i32) {
    %c0_i32 = arith.constant 0 : i32
    %c0_i32_0 = arith.constant 0 : i32
    %c0_i32_1 = arith.constant 0 : i32
    return %c0_i32, %c0_i32_0 : i32, i32
  }
  func.func @transform_11(%arg0: i32) -> (i32, i32) {
    %c0_i32 = arith.constant 0 : i32
    %c0_i32_0 = arith.constant 0 : i32
    %c0_i32_1 = arith.constant 0 : i32
    return %c0_i32, %c0_i32_0 : i32, i32
  }
  func.func @transform_12(%arg0: i32) -> (i32, i32) {
    %c0_i32 = arith.constant 0 : i32
    %c0_i32_0 = arith.constant 0 : i32
    %c0_i32_1 = arith.constant 0 : i32
    return %c0_i32, %c0_i32_0 : i32, i32
  }
  func.func @transform_13(%arg0: i32) -> (i32, i32) {
    %c0_i32 = arith.constant 0 : i32
    %c0_i32_0 = arith.constant 0 : i32
    %c0_i32_1 = arith.constant 0 : i32
    return %c0_i32, %c0_i32_0 : i32, i32
  }
  func.func @transform_14(%arg0: i32) -> (i32, i32) {
    %c0_i32 = arith.constant 0 : i32
    %c0_i32_0 = arith.constant 0 : i32
    %c0_i32_1 = arith.constant 0 : i32
    return %c0_i32, %c0_i32_0 : i32, i32
  }
  func.func @transform_15(%arg0: i32) -> (i32, i32, i32) {
    %c0_i32 = arith.constant 0 : i32
    %c0_i32_0 = arith.constant 0 : i32
    %c0_i32_1 = arith.constant 0 : i32
    return %arg0, %c0_i32, %c0_i32_0 : i32, i32, i32
  }
}

</mosaic_0001>

<bundles_post_ra>
// kernel: td3_cnn_policy_forward.1
= control target key start
LH: loop header
LB: loop body
LE: loop exit
PB: predicated region body
PF: predicated region fallthrough
CT: control target
= control target key end

     0   :  { %s9337_s0 = inlined_call_operand.vmem [shape: bf16[2,576,144], index: 0, kind: input, shape index: {}]   ;;  %s9338_s1 = inlined_call_operand.vmem [shape: bf16[144,64], index: 1, kind: input, shape index: {}]   ;;  %s9339_s2 = inlined_call_operand.vmem [shape: f32[1,64], index: 2, kind: input, shape index: {}]   ;;  %s9340_s3 = inlined_call_operand.vmem [shape: bf16[576,128], index: 3, kind: input, shape index: {}]   ;;  %s9341_s4 = inlined_call_operand.vmem [shape: f32[1,128], index: 4, kind: input, shape index: {}]   ;;  %s9342_s5 = inlined_call_operand.vmem [shape: f32[1,512], index: 5, kind: input, shape index: {}]   ;;  %s9343_s6 = inlined_call_operand.vmem [shape: f32[1,512], index: 6, kind: input, shape index: {}]   ;;  %s9344_s7 = inlined_call_operand.vmem [shape: f32[512,64], index: 7, kind: input, shape index: {}]   ;;  %s9345_s8 = inlined_call_operand.vmem [shape: f32[1,64], index: 8, kind: input, shape index: {}]   ;;  %s9346_s9 = inlined_call_operand.vmem [shape: f32[64,32], index: 9, kind: input, shape index: {}]   ;;  %s9347_s10 = inlined_call_operand.vmem [shape: f32[1,32], index: 10, kind: input, shape index: {}]   ;;  %s9348_s11 = inlined_call_operand.vmem [shape: f32[32,4], index: 11, kind: input, shape index: {}]   ;;  %s9349_s12 = inlined_call_operand.vmem [shape: f32[1,4], index: 12, kind: input, shape index: {}]   ;;  %s9350_s13 = inlined_call_operand.vmem [shape: f32[1,4], index: 13, kind: input, shape index: {}]   ;;  %s9351_s14 = inlined_call_operand.vmem [shape: f32[1,4], index: 14, kind: input, shape index: {}]   ;;  %s9352_s15 = inlined_call_operand.hbm [shape: f32[2,1,4], index: 15, kind: output, shape index: {}]  }
   0x1   :  { %9358 = sst [smem:[#allocation8_spill]] %s9337_s0 }
   0x2   :  { %9359 = sst [smem:[#allocation9_spill]] %s9338_s1 }
   0x3   :  { %9360 = sst [smem:[#allocation10_spill]] %s9339_s2 }
   0x4   :  { %20 = vsyncpa [#allocation4], 0 }
   0x5   :  { %22 = vsyncpa [#allocation4 + $0x1], 0  ;;  %s7532_s18 = smov 0   ;;  %s7534_s19 = smov 0  }
   0x6   :  { %s7536_s20 = smov 0   ;;  %s7538_s21 = smov 0  }
   0x7 LB: > { %9361 = sst [smem:[#allocation6_spill]] %s7436_s20  ;;  %s7553_s22 = sadd.s32 4294967295, %s7440_s21   ;;  %s7440_s21 = sphi %s7538_s21, %s9378_s21   ;;  %s7436_s20 = sphi %s7536_s20, %s9375_s20   ;;  %s7432_s19 = sphi %s7534_s19, %s9377_s19   ;;  %s7428_s18 = sphi %s7532_s18, %s9376_s18  }
   0x8   : > { %s6094_s23 = sadd.s32 4294967294, %s7440_s21   ;;  %s7557_s24 = sadd.s32 1, %s7440_s21  }
   0x9   : > { %s355_s25 = sadd.s32 1, %s7436_s20  ;;  %s352_s26 = ssub.s32 %s7440_s21, %s7557_s24 }
   0xa   : > { %p365_p0 = scmp.ne.s32.totalorder %s7436_s20, %s7432_s19  ;;  %p353_p1 = scmp.eq.s32.totalorder %s352_s26, 0 }
   0xb   : > { %p366_p2 = scmp.eq.s32.totalorder %s7553_s22, 1  ;;  %p371_p3 = scmp.ne.s32.totalorder %s7432_s19, %s7428_s18 }
   0xc   : > { %p372_p4 = scmp.eq.s32.totalorder %s6094_s23, 1  ;;  %p6097_p7 = scmp.ge.s32.totalorder %s7440_s21, 1 }
   0xd   : > { %s7568_s27 = scalar_select %p353_p1, %s7436_s20, %s355_s25  }
   0xe   : > { %p7570_p5 = por %p366_p2, %p365_p0  ;;  %p7574_p6 = por %p372_p4, %p371_p3 }
   0xf   : > { %9362 = sst [smem:[#allocation7_spill]] %s7568_s27  ;;  %p440_p8 = scmp.lt.s32.totalorder %s7440_s21, 3 }
  0x11   : > { %p441_p9 = pnand %p6097_p7, %p440_p8 }
  0x12   : > { %s9365_s1 = sld [smem:[#allocation9_spill]] (!%p441_p9)  ;;  %v7442_v1 = vmov (!%p441_p9), 0   ;;  %p487_p10 = scmp.lt.s32.totalorder (!%p441_p9), %s7553_s22, 1  ;;  %vm584_vm0 = vcmask (!%p441_p9), 130048   ;;  %v7204_v31 = vld [vmem:[%s9340_s3 + $0x8] sm:$0xff] (!%p441_p9)   ;;  %v7443_v34 = vmov (!%p441_p9), 0.0  }
  0x13   : > { %444 = sbr.rel (%p441_p9) target bundleno = 19277 (0x4b4d), region = 80  ;;  %668 = vmatprep.subr.bf16.mxu1 (!%p441_p9), %v7442_v1  ;;  %588 = vmatprep.subr.bf16.mxu0 (!%p441_p9), %v7442_v1  ;;  %s9366_s0 = sld [smem:[#allocation8_spill]] (!%p441_p9)  ;;  %vm7445_vm1 = vmmov (!%p441_p9), 0   ;;  %v7205_v37 = vld [vmem:[%s9340_s3] sm:$0xff] (!%p441_p9)   ;;  %vm5551_vm12 = vcmask (!%p441_p9), 1040384   ;;  %vm5849_vm13 = vcmask (!%p441_p9), 523264  }
  0x14   : > { %s9367_s2 = sld [smem:[#allocation10_spill]] (!%p441_p9)  ;;  %s9354_s16 = smov (!%p441_p9), 96   ;;  %vm5929_vm14 = vcmask (!%p441_p9), 261120   ;;  %vm6005_vm15 = vcmask (!%p441_p9), 24576  }
  0x15   : > { %s7448_s30 = smov (!%p441_p9), 32   ;;  %s485_s20 = sand.u32 (!%p441_p9), 1, %s7432_s19  }
  0x16   : > { %s6293_s17 = sshll.u32 (!%p441_p9), %s7553_s22, 4 }
  0x18   : > { %v7583_v0 = vld [vmem:[%s9365_s1] sm:$0xff] (!%p441_p9)   ;;  %v7593_v2 = vld [vmem:[%s9365_s1 + $0x8] sm:$0xff] (!%p441_p9)   ;;  %v7603_v3 = vld [vmem:[%s9365_s1 + $0x10] sm:$0xff] (!%p441_p9)  }
  0x19   : > { %669 = vmatpush1.bf16.msra.mxu1 (!%p441_p9), %v7583_v0  ;;  %589 = vmatpush1.bf16.msra.mxu0 (!%p441_p9), %v7583_v0  ;;  %v7615_v4 = vld [vmem:[%s9365_s1 + $0x18] sm:$0xff] (!%p441_p9)   ;;  %v7626_v7 = vld [vmem:[%s9365_s1 + $0x20] sm:$0xff] (!%p441_p9)   ;;  %v7637_v8 = vld [vmem:[%s9365_s1 + $0x28] sm:$0xff] (!%p441_p9)  }
  0x1a   : > { %670 = vmatprep.subr.bf16.mxu1 %v7442_v1  ;;  %590 = vmatprep.subr.bf16.mxu0 %v7442_v1  ;;  %s488_s25 = scalar_select %p487_p10, %s7553_s22, 1  ;;  %v7646_v9 = vld [vmem:[%s9365_s1 + $0x30] sm:$0xff]   ;;  %v7655_v10 = vld [vmem:[%s9365_s1 + $0x38] sm:$0xff]   ;;  %v7664_v11 = vld [vmem:[%s9365_s1 + $0x40] sm:$0xff]  }
  0x1b   : > { %v7677_v14 = vld [vmem:[%s9367_s2] ss:$0 sm:$0xff]  ;;  %s7451_s22 = smov [#allocation3]  }
  0x1c   : > { %s6780_s26 = smul.u32 576, %s488_s25  ;;  %s9368_s25 = smov 96  }
  0x1d   : > { %671 = vmatpush1.bf16.msra.mxu1 %v7593_v2  ;;  %591 = vmatpush1.bf16.msra.mxu0 %v7593_v2 }
  0x1e   : > { %672 = vmatprep.subr.bf16.mxu1 %v7442_v1  ;;  %592 = vmatprep.subr.bf16.mxu0 %v7442_v1  ;;  %s7610_s27 = scalar_lea.vmem %s9366_s0, %s6780_s26  ;;  %s9356_s26 = smov 112  }
  0x1f   : > { %v7200_v5 = vld [vmem:[%s7610_s27 + $0x14] ss:$8 sps:$4 sm:$0xff]   ;;  %v7203_v6 = vld [vmem:[%s7610_s27 + $0x4] ss:$8 sps:$4 sm:$0xff]   ;;  %v7198_v12 = vld [vmem:[%s7610_s27 + $0x10] ss:$8 sps:$4 sm:$0xff]  }
  0x20   : > { %6114 = vmatprep.mubr.msk.bf16.mxu1 %vm584_vm0, %v7200_v5  ;;  %6111 = vmatprep.mubr.msk.bf16.mxu0 %vm584_vm0, %v7203_v6  ;;  %v7201_v13 = vld [vmem:[%s7610_s27] ss:$8 sps:$4 sm:$0xff]   ;;  %v7206_v54 = vld [vmem:[%s7610_s27 + $0x24] ss:$8 sps:$4 sm:$0xff]   ;;  %s486_s0 = scalar_lea.vmem [#allocation3], %s485_s20 }
  0x21   : > { %673 = vmatpush1.bf16.msra.mxu1 %v7603_v3  ;;  %593 = vmatpush1.bf16.msra.mxu0 %v7603_v3  ;;  %v7208_v61 = vld [vmem:[%s7610_s27 + $0x20] ss:$8 sps:$4 sm:$0xff]   ;;  %s6039_s23 = sshll.u32 %s486_s0, 4  ;;  %s9296_s23 = int_to_ptr.vmem [resolvable:$true] %s6039_s23 }
  0x22   : > { %674 = vmatprep.subr.bf16.mxu1 %v7442_v1  ;;  %594 = vmatprep.subr.bf16.mxu0 %v7442_v1 }
  0x25   : > { %675 = vmatpush1.bf16.msra.mxu1 %v7615_v4  ;;  %595 = vmatpush1.bf16.msra.mxu0 %v7615_v4 }
  0x26   : > { %676 = vmatprep.subr.bf16.mxu1 %v7442_v1  ;;  %596 = vmatprep.subr.bf16.mxu0 %v7442_v1 }
  0x29   : > { %677 = vmatpush1.bf16.msra.mxu1 %v7626_v7  ;;  %597 = vmatpush1.bf16.msra.mxu0 %v7626_v7 }
  0x2a   : > { %678 = vmatprep.subr.bf16.mxu1 %v7442_v1  ;;  %598 = vmatprep.subr.bf16.mxu0 %v7442_v1 }
  0x2d   : > { %679 = vmatpush1.bf16.msra.mxu1 %v7637_v8  ;;  %599 = vmatpush1.bf16.msra.mxu0 %v7637_v8 }
  0x2e   : > { %680 = vmatprep.subr.bf16.mxu1 %v7442_v1  ;;  %600 = vmatprep.subr.bf16.mxu0 %v7442_v1 }
  0x31   : > { %681 = vmatpush1.bf16.msra.mxu1 %v7646_v9  ;;  %601 = vmatpush1.bf16.msra.mxu0 %v7646_v9 }
  0x32   : > { %682 = vmatprep.subr.bf16.mxu1 %v7442_v1  ;;  %602 = vmatprep.subr.bf16.mxu0 %v7442_v1 }
  0x35   : > { %683 = vmatpush1.bf16.msra.mxu1 %v7655_v10  ;;  %603 = vmatpush1.bf16.msra.mxu0 %v7655_v10 }
  0x36   : > { %684 = vmatprep.subr.bf16.mxu1 %v7442_v1  ;;  %604 = vmatprep.subr.bf16.mxu0 %v7442_v1 }
  0x39   : > { %685 = vmatpush1.bf16.msra.mxu1 %v7664_v11  ;;  %605 = vmatpush1.bf16.msra.mxu0 %v7664_v11 }
  0x3a   : > { %6452 = vmatprep.subr.bf16.mxu0 %v7443_v34  ;;  %6458 = vmatprep.subr.bf16.mxu1 %v7443_v34 }
  0x3c   : > { %701 = vmatmul.mubr.bf16.vlgmr.msra.gmra.mrb[0].mxu1 %v7198_v12  ;;  %621 = vmatmul.mubr.bf16.vlgmr.msra.gmra.mrb[0].mxu0 %v7201_v13 }
  0x3d   : > { %6453 = vmatpush3.bf16.msra.mxu0 %v7204_v31  ;;  %6454 = vmatprep.mubr.msk.bf16.mxu0 %vm7445_vm1, %v7443_v34 }
  0x3e   : > { %848 = vmatprep.subr.bf16.mxu0 %v7442_v1  ;;  %6460 = vmatprep.mubr.msk.bf16.mxu1 %vm7445_vm1, %v7443_v34 }
  0x3f   : > { %6459 = vmatpush3.bf16.msra.mxu1 %v7205_v37 }
  0x40   : > { %6464 = vmatprep.subr.bf16.mxu1 %v7443_v34 }
 0x10f   : > { %v702_v15 = vpop.f32.mrb[0].mxu1  ;;  %v622_v16 = vpop.f32.mrb[0].mxu0 }
 0x110   : > { %v703_v17 = vadd.f32 %v7677_v14, %v702_v15  ;;  %v704_v18 = vpop.f32.mrb[1].mxu1  ;;  %v623_v19 = vadd.f32 %v7677_v14, %v622_v16  ;;  %v624_v20 = vpop.f32.mrb[1].mxu0 }
 0x111   : > { %v705_v21 = vpop.f32.mrb[2].mxu1  ;;  %v625_v22 = vpop.f32.mrb[2].mxu0 }
 0x112   : > { %v706_v23 = vadd.f32 %v7677_v14, %v705_v21  ;;  %v707_v24 = vpop.f32.mrb[3].mxu1  ;;  %v629_v25 = vmax.f32 %v623_v19, 0.0  ;;  %v626_v26 = vadd.f32 %v7677_v14, %v625_v22  ;;  %v627_v27 = vpop.f32.mrb[3].mxu0  ;;  %v709_v28 = vmax.f32 %v703_v17, 0.0 }
 0x114   : > { %v710_v29 = vmax.f32 %v706_v23, 0.0  ;;  %v630_v30 = vmax.f32 %v626_v26, 0.0  ;;  %v7209_v23 = vld [vmem:[%s9340_s3 + $0x10] sm:$0xff]  }
 0x116   : > { %v6829_v32 = vpack.i.bf16 %v710_v29, %v709_v28  ;;  %v6839_v33 = vpack.i.bf16 %v630_v30, %v629_v25 }
 0x118   : > { %6830 = vrot.lane.b32.xlu0 %v6829_v32, %s9356_s26  ;;  %6840 = vrot.lane.b32.xlu1 %v6839_v33, %s9356_s26 }
 0x18a   : > { %v6831_v35 = vpop.permute.xlu0 %6830  ;;  %v6841_v36 = vpop.permute.xlu1 %6840 }
 0x18b   : > { %v6833_v38 = vunpack.i.h.bf16 %v6831_v35  ;;  %v6832_v39 = vunpack.i.l.bf16 %v6831_v35  ;;  %v6843_v40 = vunpack.i.h.bf16 %v6841_v36  ;;  %v6842_v41 = vunpack.i.l.bf16 %v6841_v36 }
 0x18d   : > { %v720_v42 = vmax.f32 %v710_v29, %v6833_v38  ;;  %v719_v43 = vmax.f32 %v709_v28, %v6832_v39  ;;  %v640_v44 = vmax.f32 %v630_v30, %v6843_v40  ;;  %v639_v45 = vmax.f32 %v629_v25, %v6842_v41  ;;  %v7210_v41 = vld [vmem:[%s7610_s27 + $0x34] ss:$8 sps:$4 sm:$0xff]  }
 0x18f   : > { %v6834_v46 = vpack.i.bf16 %v720_v42, %v719_v43  ;;  %v6849_v47 = vpack.i.bf16 %v640_v44, %v639_v45 }
 0x191   : > { %6835 = vrot.lane.b32.xlu0 %v6834_v46, %s9354_s16 }
 0x195   : > { %6850 = vrot.lane.b32.xlu0 %v6849_v47, %s9354_s16 }
 0x203   : > { %v6836_v48 = vpop.permute.xlu0 %6835 }
 0x204   : > { %v6838_v49 = vunpack.i.h.bf16 %v6836_v48  ;;  %v6837_v50 = vunpack.i.l.bf16 %v6836_v48 }
 0x206   : > { %v730_v51 = vmax.f32 %v720_v42, %v6838_v49  ;;  %v729_v52 = vmax.f32 %v719_v43, %v6837_v50  ;;  %v7212_v43 = vld [vmem:[%s7610_s27 + $0x30] ss:$8 sps:$4 sm:$0xff]  }
 0x207   : > { %v6851_v53 = vpop.permute.xlu0 %6850 }
 0x208   : > { %v731_v55 = vpack.c.bf16 %v730_v51, %v729_v52  ;;  %v6853_v56 = vunpack.i.h.bf16 %v6851_v53  ;;  %v6852_v57 = vunpack.i.l.bf16 %v6851_v53 }
 0x20a   : > { %v650_v58 = vmax.f32 %v640_v44, %v6853_v56  ;;  %v649_v59 = vmax.f32 %v639_v45, %v6852_v57  ;;  %6455 = vmatmul.mubr.msk.bf16.vlgmr.msra.gmra.mrb[4].mxu0 %vm584_vm0, %v731_v55 }
 0x20b   : > { %849 = vmatpush1.bf16.msra.mxu0 %v7583_v0  ;;  %6121 = vmatprep.mubr.msk.bf16.mxu0 %vm584_vm0, %v7206_v54  ;;  %v7213_v54 = vld [vmem:[%s9340_s3 + $0x18] sm:$0xff]  }
 0x20c   : > { %v651_v60 = vpack.c.bf16 %v650_v58, %v649_v59  ;;  %850 = vmatprep.subr.bf16.mxu0 %v7442_v1 }
 0x20e   : > { %6461 = vmatmul.mubr.msk.bf16.vlgmr.msra.gmra.mrb[4].mxu1 %vm584_vm0, %v651_v60 }
 0x20f   : > { %851 = vmatpush1.bf16.msra.mxu0 %v7593_v2  ;;  %6466 = vmatprep.mubr.msk.bf16.mxu1 %vm7445_vm1, %v7443_v34 }
 0x210   : > { %852 = vmatprep.subr.bf16.mxu0 %v7442_v1  ;;  %6465 = vmatpush3.bf16.msra.mxu1 %v7209_v23 }
 0x211   : > { %980 = vmatprep.subr.bf16.mxu1 %v7442_v1 }
 0x213   : > { %853 = vmatpush1.bf16.msra.mxu0 %v7603_v3 }
 0x214   : > { %854 = vmatprep.subr.bf16.mxu0 %v7442_v1 }
 0x217   : > { %855 = vmatpush1.bf16.msra.mxu0 %v7615_v4 }
 0x218   : > { %856 = vmatprep.subr.bf16.mxu0 %v7442_v1 }
 0x21b   : > { %857 = vmatpush1.bf16.msra.mxu0 %v7626_v7 }
 0x21c   : > { %858 = vmatprep.subr.bf16.mxu0 %v7442_v1 }
 0x21f   : > { %859 = vmatpush1.bf16.msra.mxu0 %v7637_v8 }
 0x220   : > { %860 = vmatprep.subr.bf16.mxu0 %v7442_v1 }
 0x223   : > { %861 = vmatpush1.bf16.msra.mxu0 %v7646_v9 }
 0x224   : > { %862 = vmatprep.subr.bf16.mxu0 %v7442_v1 }
 0x227   : > { %863 = vmatpush1.bf16.msra.mxu0 %v7655_v10 }
 0x228   : > { %864 = vmatprep.subr.bf16.mxu0 %v7442_v1 }
 0x22b   : > { %865 = vmatpush1.bf16.msra.mxu0 %v7664_v11 }
 0x22c   : > { %6470 = vmatprep.subr.bf16.mxu0 %v7443_v34 }
 0x22e   : > { %881 = vmatmul.mubr.bf16.vlgmr.msra.gmra.mrb[8].mxu0 %v7208_v61 }
 0x22f   : > { %6472 = vmatprep.mubr.msk.bf16.mxu0 %vm7445_vm1, %v7443_v34  ;;  %6471 = vmatpush3.bf16.msra.mxu0 %v7213_v54 }
 0x230   : > { %1112 = vmatprep.subr.bf16.mxu0 %v7442_v1 }
 0x2dd   : > { %v777_v62 = vpop.f32.mrb[4].mxu0 }
 0x2de   : > { %v6456_v63 = vpop.f32.mrb[5].mxu0 }
 0x2df   : > { %v780_v5 = vpop.f32.mrb[6].mxu0 }
 0x2e0   : > { %v6457_v6 = vpop.f32.mrb[7].mxu0 }
 0x2e1   : > { %v827_v12 = vpop.f32.mrb[4].mxu1 }
 0x2e2   : > { %v828_v13 = vadd.f32 %v827_v12, %v777_v62  ;;  %v6462_v15 = vpop.f32.mrb[5].mxu1 }
 0x2e3   : > { %v830_v16 = vpop.f32.mrb[6].mxu1 }
 0x2e4   : > { %v831_v17 = vadd.f32 %v830_v16, %v780_v5  ;;  %v6463_v18 = vpop.f32.mrb[7].mxu1 }
 0x2e5   : > { %v7214_v18 = vld [vmem:[%s7610_s27 + $0x44] ss:$8 sps:$4 sm:$0xff]  }
 0x301   : > { %v882_v19 = vpop.f32.mrb[8].mxu0 }
 0x302   : > { %v883_v20 = vadd.f32 %v7677_v14, %v882_v19  ;;  %v884_v21 = vpop.f32.mrb[9].mxu0 }
 0x303   : > { %v885_v22 = vpop.f32.mrb[10].mxu0 }
 0x304   : > { %v886_v24 = vadd.f32 %v7677_v14, %v885_v22  ;;  %v887_v25 = vpop.f32.mrb[11].mxu0  ;;  %v889_v26 = vmax.f32 %v883_v20, 0.0  ;;  %v7216_v20 = vld [vmem:[%s7610_s27 + $0x40] ss:$8 sps:$4 sm:$0xff]  }
 0x306   : > { %v890_v27 = vmax.f32 %v886_v24, 0.0 }
 0x308   : > { %v6844_v28 = vpack.i.bf16 %v890_v27, %v889_v26 }
 0x30a   : > { %6845 = vrot.lane.b32.xlu1 %v6844_v28, %s9356_s26 }
 0x37c   : > { %v6846_v29 = vpop.permute.xlu1 %6845 }
 0x37d   : > { %v6848_v30 = vunpack.i.h.bf16 %v6846_v29  ;;  %v6847_v31 = vunpack.i.l.bf16 %v6846_v29 }
 0x37f   : > { %v900_v32 = vmax.f32 %v890_v27, %v6848_v30  ;;  %v899_v33 = vmax.f32 %v889_v26, %v6847_v31  ;;  %v7217_v31 = vld [vmem:[%s9340_s3 + $0x20] sm:$0xff]  }
 0x381   : > { %v6854_v35 = vpack.i.bf16 %v900_v32, %v899_v33 }
 0x383   : > { %6855 = vrot.lane.b32.xlu1 %v6854_v35, %s9354_s16 }
 0x3f5   : > { %v6856_v36 = vpop.permute.xlu1 %6855 }
 0x3f6   : > { %v6858_v37 = vunpack.i.h.bf16 %v6856_v36  ;;  %v6857_v38 = vunpack.i.l.bf16 %v6856_v36 }
 0x3f8   : > { %v910_v39 = vmax.f32 %v900_v32, %v6858_v37  ;;  %v909_v40 = vmax.f32 %v899_v33, %v6857_v38 }
 0x3fa   : > { %v911_v42 = vpack.c.bf16 %v910_v39, %v909_v40 }
 0x3fc   : > { %6467 = vmatmul.mubr.msk.bf16.vlgmr.msra.gmra.mrb[8].mxu1 %vm584_vm0, %v911_v42 }
 0x3fd   : > { %981 = vmatpush1.bf16.msra.mxu1 %v7583_v0  ;;  %6126 = vmatprep.mubr.msk.bf16.mxu1 %vm584_vm0, %v7210_v41 }
 0x3fe   : > { %982 = vmatprep.subr.bf16.mxu1 %v7442_v1 }
 0x401   : > { %983 = vmatpush1.bf16.msra.mxu1 %v7593_v2 }
 0x402   : > { %984 = vmatprep.subr.bf16.mxu1 %v7442_v1 }
 0x405   : > { %985 = vmatpush1.bf16.msra.mxu1 %v7603_v3 }
 0x406   : > { %986 = vmatprep.subr.bf16.mxu1 %v7442_v1 }
 0x409   : > { %987 = vmatpush1.bf16.msra.mxu1 %v7615_v4 }
 0x40a   : > { %988 = vmatprep.subr.bf16.mxu1 %v7442_v1 }
 0x40d   : > { %989 = vmatpush1.bf16.msra.mxu1 %v7626_v7 }
 0x40e   : > { %990 = vmatprep.subr.bf16.mxu1 %v7442_v1 }
 0x411   : > { %991 = vmatpush1.bf16.msra.mxu1 %v7637_v8 }
 0x412   : > { %992 = vmatprep.subr.bf16.mxu1 %v7442_v1 }
 0x415   : > { %993 = vmatpush1.bf16.msra.mxu1 %v7646_v9 }
 0x416   : > { %994 = vmatprep.subr.bf16.mxu1 %v7442_v1 }
 0x419   : > { %995 = vmatpush1.bf16.msra.mxu1 %v7655_v10 }
 0x41a   : > { %996 = vmatprep.subr.bf16.mxu1 %v7442_v1 }
 0x41d   : > { %997 = vmatpush1.bf16.msra.mxu1 %v7664_v11 }
 0x41e   : > { %6476 = vmatprep.subr.bf16.mxu1 %v7443_v34 }
 0x420   : > { %1013 = vmatmul.mubr.bf16.vlgmr.msra.gmra.mrb[12].mxu1 %v7212_v43 }
 0x421   : > { %6478 = vmatprep.mubr.msk.bf16.mxu1 %vm7445_vm1, %v7443_v34  ;;  %6477 = vmatpush3.bf16.msra.mxu1 %v7217_v31 }
 0x422   : > { %1244 = vmatprep.subr.bf16.mxu1 %v7442_v1 }
 0x4cf   : > { %v957_v44 = vpop.f32.mrb[8].mxu1 }
 0x4d0   : > { %v964_v45 = vadd.f32 %v957_v44, %v828_v13  ;;  %v6468_v46 = vpop.f32.mrb[9].mxu1 }
 0x4d1   : > { %v960_v47 = vpop.f32.mrb[10].mxu1 }
 0x4d2   : > { %v965_v48 = vadd.f32 %v960_v47, %v831_v17  ;;  %v6469_v49 = vpop.f32.mrb[11].mxu1 }
 0x4d3   : > { %v7218_v49 = vld [vmem:[%s7610_s27 + $0x54] ss:$8 sps:$4 sm:$0xff]  }
 0x4f3   : > { %v1014_v50 = vpop.f32.mrb[12].mxu1 }
 0x4f4   : > { %v1015_v51 = vadd.f32 %v7677_v14, %v1014_v50  ;;  %v1016_v52 = vpop.f32.mrb[13].mxu1 }
 0x4f5   : > { %v1017_v53 = vpop.f32.mrb[14].mxu1 }
 0x4f6   : > { %v1018_v55 = vadd.f32 %v7677_v14, %v1017_v53  ;;  %v1019_v56 = vpop.f32.mrb[15].mxu1  ;;  %v1021_v57 = vmax.f32 %v1015_v51, 0.0  ;;  %v7220_v51 = vld [vmem:[%s7610_s27 + $0x50] ss:$8 sps:$4 sm:$0xff]  }
 0x4f8   : > { %v1022_v58 = vmax.f32 %v1018_v55, 0.0 }
 0x4fa   : > { %v6859_v59 = vpack.i.bf16 %v1022_v58, %v1021_v57 }
 0x4fc   : > { %6860 = vrot.lane.b32.xlu0 %v6859_v59, %s9356_s26 }
 0x56e   : > { %v6861_v60 = vpop.permute.xlu0 %6860 }
 0x56f   : > { %v6863_v61 = vunpack.i.h.bf16 %v6861_v60  ;;  %v6862_v62 = vunpack.i.l.bf16 %v6861_v60 }
 0x571   : > { %v1032_v63 = vmax.f32 %v1022_v58, %v6863_v61  ;;  %v1031_v5 = vmax.f32 %v1021_v57, %v6862_v62  ;;  %v7221_v62 = vld [vmem:[%s9340_s3 + $0x28] sm:$0xff]  }
 0x573   : > { %v6864_v6 = vpack.i.bf16 %v1032_v63, %v1031_v5 }
 0x575   : > { %6865 = vrot.lane.b32.xlu1 %v6864_v6, %s9354_s16 }
 0x5e7   : > { %v6866_v12 = vpop.permute.xlu1 %6865 }
 0x5e8   : > { %v6868_v13 = vunpack.i.h.bf16 %v6866_v12  ;;  %v6867_v15 = vunpack.i.l.bf16 %v6866_v12 }
 0x5ea   : > { %v1042_v16 = vmax.f32 %v1032_v63, %v6868_v13  ;;  %v1041_v17 = vmax.f32 %v1031_v5, %v6867_v15 }
 0x5ec   : > { %v1043_v19 = vpack.c.bf16 %v1042_v16, %v1041_v17 }
 0x5ee   : > { %6473 = vmatmul.mubr.msk.bf16.vlgmr.msra.gmra.mrb[12].mxu0 %vm584_vm0, %v1043_v19 }
 0x5ef   : > { %1113 = vmatpush1.bf16.msra.mxu0 %v7583_v0  ;;  %6131 = vmatprep.mubr.msk.bf16.mxu0 %vm584_vm0, %v7214_v18 }
 0x5f0   : > { %1114 = vmatprep.subr.bf16.mxu0 %v7442_v1 }
 0x5f3   : > { %1115 = vmatpush1.bf16.msra.mxu0 %v7593_v2 }
 0x5f4   : > { %1116 = vmatprep.subr.bf16.mxu0 %v7442_v1 }
 0x5f7   : > { %1117 = vmatpush1.bf16.msra.mxu0 %v7603_v3 }
 0x5f8   : > { %1118 = vmatprep.subr.bf16.mxu0 %v7442_v1 }
 0x5fb   : > { %1119 = vmatpush1.bf16.msra.mxu0 %v7615_v4 }
 0x5fc   : > { %1120 = vmatprep.subr.bf16.mxu0 %v7442_v1 }
 0x5ff   : > { %1121 = vmatpush1.bf16.msra.mxu0 %v7626_v7 }
 0x600   : > { %1122 = vmatprep.subr.bf16.mxu0 %v7442_v1 }
 0x603   : > { %1123 = vmatpush1.bf16.msra.mxu0 %v7637_v8 }
 0x604   : > { %1124 = vmatprep.subr.bf16.mxu0 %v7442_v1 }
 0x607   : > { %1125 = vmatpush1.bf16.msra.mxu0 %v7646_v9 }
 0x608   : > { %1126 = vmatprep.subr.bf16.mxu0 %v7442_v1 }
 0x60b   : > { %1127 = vmatpush1.bf16.msra.mxu0 %v7655_v10 }
 0x60c   : > { %1128 = vmatprep.subr.bf16.mxu0 %v7442_v1 }
 0x60f   : > { %1129 = vmatpush1.bf16.msra.mxu0 %v7664_v11 }
 0x610   : > { %6482 = vmatprep.subr.bf16.mxu0 %v7443_v34 }
 0x612   : > { %1145 = vmatmul.mubr.bf16.vlgmr.msra.gmra.mrb[16].mxu0 %v7216_v20 }
 0x613   : > { %6484 = vmatprep.mubr.msk.bf16.mxu0 %vm7445_vm1, %v7443_v34  ;;  %6483 = vmatpush3.bf16.msra.mxu0 %v7221_v62 }
 0x614   : > { %1376 = vmatprep.subr.bf16.mxu0 %v7442_v1 }
 0x6c1   : > { %v1089_v21 = vpop.f32.mrb[12].mxu0 }
 0x6c2   : > { %v1096_v22 = vadd.f32 %v1089_v21, %v964_v45  ;;  %v6474_v23 = vpop.f32.mrb[13].mxu0 }
 0x6c3   : > { %v1092_v24 = vpop.f32.mrb[14].mxu0 }
 0x6c4   : > { %v1097_v25 = vadd.f32 %v1092_v24, %v965_v48  ;;  %v6475_v26 = vpop.f32.mrb[15].mxu0 }
 0x6c5   : > { %v7222_v26 = vld [vmem:[%s7610_s27 + $0x64] ss:$8 sps:$4 sm:$0xff]  }
 0x6e5   : > { %v1146_v27 = vpop.f32.mrb[16].mxu0 }
 0x6e6   : > { %v1147_v28 = vadd.f32 %v7677_v14, %v1146_v27  ;;  %v1148_v29 = vpop.f32.mrb[17].mxu0 }
 0x6e7   : > { %v1149_v30 = vpop.f32.mrb[18].mxu0 }
 0x6e8   : > { %v1150_v32 = vadd.f32 %v7677_v14, %v1149_v30  ;;  %v1151_v33 = vpop.f32.mrb[19].mxu0  ;;  %v1153_v35 = vmax.f32 %v1147_v28, 0.0 }
 0x6e9   : > { %v7225_v33 = vld [vmem:[%s9340_s3 + $0x30] sm:$0xff]  }
 0x6ea   : > { %v1154_v36 = vmax.f32 %v1150_v32, 0.0 }
 0x6ec   : > { %v6869_v37 = vpack.i.bf16 %v1154_v36, %v1153_v35 }
 0x6ee   : > { %6870 = vrot.lane.b32.xlu0 %v6869_v37, %s9356_s26 }
 0x760   : > { %v6871_v38 = vpop.permute.xlu0 %6870 }
 0x761   : > { %v6873_v39 = vunpack.i.h.bf16 %v6871_v38  ;;  %v6872_v40 = vunpack.i.l.bf16 %v6871_v38 }
 0x763   : > { %v1164_v41 = vmax.f32 %v1154_v36, %v6873_v39  ;;  %v1163_v42 = vmax.f32 %v1153_v35, %v6872_v40 }
 0x765   : > { %v6874_v43 = vpack.i.bf16 %v1164_v41, %v1163_v42 }
 0x767   : > { %6875 = vrot.lane.b32.xlu1 %v6874_v43, %s9354_s16 }
 0x7d9   : > { %v6876_v44 = vpop.permute.xlu1 %6875 }
 0x7da   : > { %v6878_v45 = vunpack.i.h.bf16 %v6876_v44  ;;  %v6877_v46 = vunpack.i.l.bf16 %v6876_v44 }
 0x7dc   : > { %v1174_v47 = vmax.f32 %v1164_v41, %v6878_v45  ;;  %v1173_v48 = vmax.f32 %v1163_v42, %v6877_v46 }
 0x7de   : > { %v1175_v50 = vpack.c.bf16 %v1174_v47, %v1173_v48 }
 0x7e0   : > { %6479 = vmatmul.mubr.msk.bf16.vlgmr.msra.gmra.mrb[16].mxu1 %vm584_vm0, %v1175_v50 }
 0x7e1   : > { %1245 = vmatpush1.bf16.msra.mxu1 %v7583_v0  ;;  %6136 = vmatprep.mubr.msk.bf16.mxu1 %vm584_vm0, %v7218_v49 }
 0x7e2   : > { %1246 = vmatprep.subr.bf16.mxu1 %v7442_v1 }
 0x7e5   : > { %1247 = vmatpush1.bf16.msra.mxu1 %v7593_v2 }
 0x7e6   : > { %1248 = vmatprep.subr.bf16.mxu1 %v7442_v1 }
 0x7e9   : > { %1249 = vmatpush1.bf16.msra.mxu1 %v7603_v3 }
 0x7ea   : > { %1250 = vmatprep.subr.bf16.mxu1 %v7442_v1 }
 0x7ed   : > { %1251 = vmatpush1.bf16.msra.mxu1 %v7615_v4 }
 0x7ee   : > { %1252 = vmatprep.subr.bf16.mxu1 %v7442_v1 }
 0x7f1   : > { %1253 = vmatpush1.bf16.msra.mxu1 %v7626_v7 }
 0x7f2   : > { %1254 = vmatprep.subr.bf16.mxu1 %v7442_v1 }
 0x7f5   : > { %1255 = vmatpush1.bf16.msra.mxu1 %v7637_v8 }
 0x7f6   : > { %1256 = vmatprep.subr.bf16.mxu1 %v7442_v1 }
 0x7f9   : > { %1257 = vmatpush1.bf16.msra.mxu1 %v7646_v9 }
 0x7fa   : > { %1258 = vmatprep.subr.bf16.mxu1 %v7442_v1 }
 0x7fd   : > { %1259 = vmatpush1.bf16.msra.mxu1 %v7655_v10 }
 0x7fe   : > { %1260 = vmatprep.subr.bf16.mxu1 %v7442_v1 }
 0x801   : > { %1261 = vmatpush1.bf16.msra.mxu1 %v7664_v11 }
 0x802   : > { %6488 = vmatprep.subr.bf16.mxu1 %v7443_v34 }
 0x804   : > { %1277 = vmatmul.mubr.bf16.vlgmr.msra.gmra.mrb[20].mxu1 %v7220_v51  ;;  %v7226_v51 = vld [vmem:[%s7610_s27 + $0x74] ss:$8 sps:$4 sm:$0xff]  }
 0x805   : > { %6490 = vmatprep.mubr.msk.bf16.mxu1 %vm7445_vm1, %v7443_v34  ;;  %6489 = vmatpush3.bf16.msra.mxu1 %v7225_v33 }
 0x806   : > { %1508 = vmatprep.subr.bf16.mxu1 %v7442_v1 }
 0x8b3   : > { %v1221_v52 = vpop.f32.mrb[16].mxu1 }
 0x8b4   : > { %v1228_v53 = vadd.f32 %v1221_v52, %v1096_v22  ;;  %v6480_v54 = vpop.f32.mrb[17].mxu1 }
 0x8b5   : > { %v1224_v55 = vpop.f32.mrb[18].mxu1  ;;  %v7877_v54 = vld [vmem:[%s9365_s1 + $0x8] sm:$0xff]  }
 0x8b6   : > { %v1229_v56 = vadd.f32 %v1224_v55, %v1097_v25  ;;  %v6481_v57 = vpop.f32.mrb[19].mxu1  ;;  %v7884_v55 = vld [vmem:[%s9365_s1 + $0x10] sm:$0xff]  }
 0x8b7   : > { %v7898_v57 = vld [vmem:[%s9365_s1 + $0x20] sm:$0xff]  }
 0x8d7   : > { %v1278_v58 = vpop.f32.mrb[20].mxu1 }
 0x8d8   : > { %v1279_v59 = vadd.f32 %v7677_v14, %v1278_v58  ;;  %v1280_v60 = vpop.f32.mrb[21].mxu1  ;;  %v7905_v58 = vld [vmem:[%s9365_s1 + $0x28] sm:$0xff]  }
 0x8d9   : > { %v1281_v61 = vpop.f32.mrb[22].mxu1 }
 0x8da   : > { %v1282_v63 = vadd.f32 %v7677_v14, %v1281_v61  ;;  %v1283_v5 = vpop.f32.mrb[23].mxu1  ;;  %v1285_v6 = vmax.f32 %v1279_v59, 0.0  ;;  %v7228_v59 = vld [vmem:[%s7610_s27 + $0x70] ss:$8 sps:$4 sm:$0xff]  }
 0x8dc   : > { %v1286_v12 = vmax.f32 %v1282_v63, 0.0 }
 0x8de   : > { %v6879_v13 = vpack.i.bf16 %v1286_v12, %v1285_v6 }
 0x8e0   : > { %6880 = vrot.lane.b32.xlu0 %v6879_v13, %s9356_s26 }
 0x952   : > { %v6881_v15 = vpop.permute.xlu0 %6880 }
 0x953   : > { %v6883_v16 = vunpack.i.h.bf16 %v6881_v15  ;;  %v6882_v17 = vunpack.i.l.bf16 %v6881_v15 }
 0x955   : > { %v1296_v18 = vmax.f32 %v1286_v12, %v6883_v16  ;;  %v1295_v19 = vmax.f32 %v1285_v6, %v6882_v17 }
 0x957   : > { %v6884_v20 = vpack.i.bf16 %v1296_v18, %v1295_v19 }
 0x959   : > { %6885 = vrot.lane.b32.xlu1 %v6884_v20, %s9354_s16 }
 0x9cb   : > { %v6886_v21 = vpop.permute.xlu1 %6885 }
 0x9cc   : > { %v6888_v22 = vunpack.i.h.bf16 %v6886_v21  ;;  %v6887_v23 = vunpack.i.l.bf16 %v6886_v21 }
 0x9ce   : > { %v1306_v24 = vmax.f32 %v1296_v18, %v6888_v22  ;;  %v1305_v25 = vmax.f32 %v1295_v19, %v6887_v23 }
 0x9d0   : > { %v1307_v27 = vpack.c.bf16 %v1306_v24, %v1305_v25 }
 0x9d2   : > { %6485 = vmatmul.mubr.msk.bf16.vlgmr.msra.gmra.mrb[20].mxu0 %vm584_vm0, %v1307_v27 }
 0x9d3   : > { %1377 = vmatpush1.bf16.msra.mxu0 %v7583_v0  ;;  %6141 = vmatprep.mubr.msk.bf16.mxu0 %vm584_vm0, %v7222_v26  ;;  %v7224_v0 = vld [vmem:[%s7610_s27 + $0x60] ss:$8 sps:$4 sm:$0xff]  }
 0x9d4   : > { %1378 = vmatprep.subr.bf16.mxu0 %v7442_v1 }
 0x9d7   : > { %1379 = vmatpush1.bf16.msra.mxu0 %v7593_v2 }
 0x9d8   : > { %1380 = vmatprep.subr.bf16.mxu0 %v7442_v1 }
 0x9db   : > { %1381 = vmatpush1.bf16.msra.mxu0 %v7603_v3 }
 0x9dc   : > { %1382 = vmatprep.subr.bf16.mxu0 %v7442_v1 }
 0x9df   : > { %1383 = vmatpush1.bf16.msra.mxu0 %v7615_v4 }
 0x9e0   : > { %1384 = vmatprep.subr.bf16.mxu0 %v7442_v1 }
 0x9e3   : > { %1385 = vmatpush1.bf16.msra.mxu0 %v7626_v7 }
 0x9e4   : > { %1386 = vmatprep.subr.bf16.mxu0 %v7442_v1 }
 0x9e7   : > { %1387 = vmatpush1.bf16.msra.mxu0 %v7637_v8 }
 0x9e8   : > { %1388 = vmatprep.subr.bf16.mxu0 %v7442_v1 }
 0x9eb   : > { %1389 = vmatpush1.bf16.msra.mxu0 %v7646_v9 }
 0x9ec   : > { %1390 = vmatprep.subr.bf16.mxu0 %v7442_v1 }
 0x9ef   : > { %1391 = vmatpush1.bf16.msra.mxu0 %v7655_v10 }
 0x9f0   : > { %1392 = vmatprep.subr.bf16.mxu0 %v7442_v1 }
 0x9f3   : > { %1393 = vmatpush1.bf16.msra.mxu0 %v7664_v11 }
 0x9f4   : > { %6494 = vmatprep.subr.bf16.mxu0 %v7443_v34 }
 0x9f6   : > { %1409 = vmatmul.mubr.bf16.vlgmr.msra.gmra.mrb[24].mxu0 %v7224_v0 }
 0x9f7   : > { %6496 = vmatprep.mubr.msk.bf16.mxu0 %vm7445_vm1, %v7443_v34 }
 0xaa5   : > { %v1353_v2 = vpop.f32.mrb[20].mxu0 }
 0xaa6   : > { %v1360_v3 = vadd.f32 %v1353_v2, %v1228_v53  ;;  %v6486_v4 = vpop.f32.mrb[21].mxu0  ;;  %v7869_v53 = vld [vmem:[%s9365_s1] sm:$0xff]  }
 0xaa7   : > { %v1356_v7 = vpop.f32.mrb[22].mxu0  ;;  %v7230_v4 = vld [vmem:[%s7610_s27 + $0x84] ss:$8 sps:$4 sm:$0xff]  }
 0xaa8   : > { %v1361_v8 = vadd.f32 %v1356_v7, %v1229_v56  ;;  %v6487_v28 = vpop.f32.mrb[23].mxu0  ;;  %v7891_v56 = vld [vmem:[%s9365_s1 + $0x18] sm:$0xff]  }
 0xaa9   : > { %v7951_v28 = vld [vmem:[%s9365_s1 + $0x38] sm:$0xff]  }
 0xac9   : > { %v1410_v29 = vpop.f32.mrb[24].mxu0 }
 0xaca   : > { %v1411_v30 = vadd.f32 %v7677_v14, %v1410_v29  ;;  %v1412_v31 = vpop.f32.mrb[25].mxu0  ;;  %v7232_v29 = vld [vmem:[%s7610_s27 + $0x80] ss:$8 sps:$4 sm:$0xff]  }
 0xacb   : > { %v1413_v32 = vpop.f32.mrb[26].mxu0 }
 0xacc   : > { %v1414_v35 = vadd.f32 %v7677_v14, %v1413_v32  ;;  %v1415_v36 = vpop.f32.mrb[27].mxu0  ;;  %v1417_v37 = vmax.f32 %v1411_v30, 0.0  ;;  %v7959_v30 = vld [vmem:[%s9365_s1 + $0x40] sm:$0xff]  }
 0xace   : > { %v1418_v38 = vmax.f32 %v1414_v35, 0.0 }
 0xad0   : > { %v6889_v39 = vpack.i.bf16 %v1418_v38, %v1417_v37 }
 0xad2   : > { %6890 = vrot.lane.b32.xlu0 %v6889_v39, %s9356_s26 }
 0xb44   : > { %v6891_v40 = vpop.permute.xlu0 %6890 }
 0xb45   : > { %v6893_v41 = vunpack.i.h.bf16 %v6891_v40  ;;  %v6892_v42 = vunpack.i.l.bf16 %v6891_v40 }
 0xb47   : > { %v1428_v43 = vmax.f32 %v1418_v38, %v6893_v41  ;;  %v1427_v44 = vmax.f32 %v1417_v37, %v6892_v42  ;;  %v7233_v42 = vld [vmem:[%s9340_s3 + $0x40] sm:$0xff]  }
 0xb49   : > { %v6894_v45 = vpack.i.bf16 %v1428_v43, %v1427_v44 }
 0xb4b   : > { %6895 = vrot.lane.b32.xlu1 %v6894_v45, %s9354_s16  ;;  %s9369_s16 = smov 112  }
 0xbbd   : > { %v6896_v46 = vpop.permute.xlu1 %6895 }
 0xbbe   : > { %v6898_v47 = vunpack.i.h.bf16 %v6896_v46  ;;  %v6897_v48 = vunpack.i.l.bf16 %v6896_v46 }
 0xbc0   : > { %v1438_v49 = vmax.f32 %v1428_v43, %v6898_v47  ;;  %v1437_v50 = vmax.f32 %v1427_v44, %v6897_v48 }
 0xbc2   : > { %v1439_v52 = vpack.c.bf16 %v1438_v49, %v1437_v50 }
 0xbc4   : > { %6491 = vmatmul.mubr.msk.bf16.vlgmr.msra.gmra.mrb[24].mxu1 %vm584_vm0, %v1439_v52 }
 0xbc5   : > { %1509 = vmatpush1.bf16.msra.mxu1 %v7869_v53  ;;  %6146 = vmatprep.mubr.msk.bf16.mxu1 %vm584_vm0, %v7226_v51 }
 0xbc6   : > { %1510 = vmatprep.subr.bf16.mxu1 %v7442_v1 }
 0xbc9   : > { %1511 = vmatpush1.bf16.msra.mxu1 %v7877_v54 }
 0xbca   : > { %1512 = vmatprep.subr.bf16.mxu1 %v7442_v1 }
 0xbcd   : > { %1513 = vmatpush1.bf16.msra.mxu1 %v7884_v55 }
 0xbce   : > { %1514 = vmatprep.subr.bf16.mxu1 %v7442_v1 }
 0xbd1   : > { %1515 = vmatpush1.bf16.msra.mxu1 %v7891_v56 }
 0xbd2   : > { %1516 = vmatprep.subr.bf16.mxu1 %v7442_v1 }
 0xbd5   : > { %1517 = vmatpush1.bf16.msra.mxu1 %v7898_v57 }
 0xbd6   : > { %1518 = vmatprep.subr.bf16.mxu1 %v7442_v1 }
 0xbd9   : > { %1519 = vmatpush1.bf16.msra.mxu1 %v7905_v58 }
 0xbda   : > { %1520 = vmatprep.subr.bf16.mxu1 %v7442_v1 }
 0xbdd   : > { %1521 = vmatpush1.bf16.msra.mxu1 %v7646_v9 }
 0xbde   : > { %1522 = vmatprep.subr.bf16.mxu1 %v7442_v1 }
 0xbe1   : > { %1523 = vmatpush1.bf16.msra.mxu1 %v7655_v10 }
 0xbe2   : > { %1524 = vmatprep.subr.bf16.mxu1 %v7442_v1 }
 0xbe5   : > { %1525 = vmatpush1.bf16.msra.mxu1 %v7664_v11  ;;  %v7229_v11 = vld [vmem:[%s9340_s3 + $0x38] sm:$0xff]  }
 0xbe6   : > { %6500 = vmatprep.subr.bf16.mxu1 %v7443_v34  ;;  %6495 = vmatpush3.bf16.msra.mxu0 %v7229_v11 }
 0xbe7   : > { %1640 = vmatprep.subr.bf16.mxu0 %v7442_v1 }
 0xbe8   : > { %1541 = vmatmul.mubr.bf16.vlgmr.msra.gmra.mrb[28].mxu1 %v7228_v59 }
 0xbe9   : > { %6502 = vmatprep.mubr.msk.bf16.mxu1 %vm7445_vm1, %v7443_v34  ;;  %6501 = vmatpush3.bf16.msra.mxu1 %v7233_v42 }
 0xbea   : > { %1772 = vmatprep.subr.bf16.mxu1 %v7442_v1 }
 0xc97   : > { %v1485_v60 = vpop.f32.mrb[24].mxu1 }
 0xc98   : > { %v1492_v61 = vadd.f32 %v1485_v60, %v1360_v3  ;;  %v6492_v62 = vpop.f32.mrb[25].mxu1 }
 0xc99   : > { %v1488_v63 = vpop.f32.mrb[26].mxu1 }
 0xc9a   : > { %v1493_v9 = vadd.f32 %v1488_v63, %v1361_v8  ;;  %v6493_v5 = vpop.f32.mrb[27].mxu1  ;;  %v7944_v8 = vld [vmem:[%s9365_s1 + $0x30] sm:$0xff]  }
 0xc9b   : > { %v7234_v5 = vld [vmem:[%s7610_s27 + $0x94] ss:$8 sps:$4 sm:$0xff]  }
 0xcbb   : > { %v1542_v6 = vpop.f32.mrb[28].mxu1 }
 0xcbc   : > { %v1543_v10 = vadd.f32 %v7677_v14, %v1542_v6  ;;  %v1544_v12 = vpop.f32.mrb[29].mxu1 }
 0xcbd   : > { %v1545_v13 = vpop.f32.mrb[30].mxu1 }
 0xcbe   : > { %v1546_v15 = vadd.f32 %v7677_v14, %v1545_v13  ;;  %v1547_v16 = vpop.f32.mrb[31].mxu1  ;;  %v1549_v17 = vmax.f32 %v1543_v10, 0.0  ;;  %v7236_v10 = vld [vmem:[%s7610_s27 + $0x90] ss:$8 sps:$4 sm:$0xff]  }
 0xcc0   : > { %v1550_v18 = vmax.f32 %v1546_v15, 0.0 }
 0xcc2   : > { %v6899_v19 = vpack.i.bf16 %v1550_v18, %v1549_v17 }
 0xcc4   : > { %6900 = vrot.lane.b32.xlu0 %v6899_v19, %s9356_s26 }
 0xd36   : > { %v6901_v20 = vpop.permute.xlu0 %6900 }
 0xd37   : > { %v6903_v21 = vunpack.i.h.bf16 %v6901_v20  ;;  %v6902_v22 = vunpack.i.l.bf16 %v6901_v20 }
 0xd39   : > { %v1560_v23 = vmax.f32 %v1550_v18, %v6903_v21  ;;  %v1559_v24 = vmax.f32 %v1549_v17, %v6902_v22  ;;  %v7237_v22 = vld [vmem:[%s9340_s3 + $0x48] sm:$0xff]  }
 0xd3b   : > { %v6904_v25 = vpack.i.bf16 %v1560_v23, %v1559_v24 }
 0xd3d   : > { %6905 = vrot.lane.b32.xlu1 %v6904_v25, %s9368_s25 }
 0xdaf   : > { %v6906_v26 = vpop.permute.xlu1 %6905 }
 0xdb0   : > { %v6908_v27 = vunpack.i.h.bf16 %v6906_v26  ;;  %v6907_v0 = vunpack.i.l.bf16 %v6906_v26 }
 0xdb2   : > { %v1570_v2 = vmax.f32 %v1560_v23, %v6908_v27  ;;  %v1569_v3 = vmax.f32 %v1559_v24, %v6907_v0 }
 0xdb4   : > { %v1571_v7 = vpack.c.bf16 %v1570_v2, %v1569_v3 }
 0xdb6   : > { %6497 = vmatmul.mubr.msk.bf16.vlgmr.msra.gmra.mrb[28].mxu0 %vm584_vm0, %v1571_v7 }
 0xdb7   : > { %1641 = vmatpush1.bf16.msra.mxu0 %v7869_v53  ;;  %6151 = vmatprep.mubr.msk.bf16.mxu0 %vm584_vm0, %v7230_v4 }
 0xdb8   : > { %1642 = vmatprep.subr.bf16.mxu0 %v7442_v1 }
 0xdbb   : > { %1643 = vmatpush1.bf16.msra.mxu0 %v7877_v54 }
 0xdbc   : > { %1644 = vmatprep.subr.bf16.mxu0 %v7442_v1 }
 0xdbf   : > { %1645 = vmatpush1.bf16.msra.mxu0 %v7884_v55 }
 0xdc0   : > { %1646 = vmatprep.subr.bf16.mxu0 %v7442_v1 }
 0xdc3   : > { %1647 = vmatpush1.bf16.msra.mxu0 %v7891_v56 }
 0xdc4   : > { %1648 = vmatprep.subr.bf16.mxu0 %v7442_v1 }
 0xdc7   : > { %1649 = vmatpush1.bf16.msra.mxu0 %v7898_v57 }
 0xdc8   : > { %1650 = vmatprep.subr.bf16.mxu0 %v7442_v1 }
 0xdcb   : > { %1651 = vmatpush1.bf16.msra.mxu0 %v7905_v58 }
 0xdcc   : > { %1652 = vmatprep.subr.bf16.mxu0 %v7442_v1 }
 0xdcf   : > { %1653 = vmatpush1.bf16.msra.mxu0 %v7944_v8 }
 0xdd0   : > { %1654 = vmatprep.subr.bf16.mxu0 %v7442_v1 }
 0xdd3   : > { %1655 = vmatpush1.bf16.msra.mxu0 %v7951_v28 }
 0xdd4   : > { %1656 = vmatprep.subr.bf16.mxu0 %v7442_v1 }
 0xdd7   : > { %1657 = vmatpush1.bf16.msra.mxu0 %v7959_v30 }
 0xdd8   : > { %6506 = vmatprep.subr.bf16.mxu0 %v7443_v34 }
 0xdda   : > { %1673 = vmatmul.mubr.bf16.vlgmr.msra.gmra.mrb[32].mxu0 %v7232_v29 }
 0xddb   : > { %6508 = vmatprep.mubr.msk.bf16.mxu0 %vm7445_vm1, %v7443_v34  ;;  %6507 = vmatpush3.bf16.msra.mxu0 %v7237_v22 }
 0xddc   : > { %1904 = vmatprep.subr.bf16.mxu0 %v7442_v1 }
 0xe89   : > { %v1617_v31 = vpop.f32.mrb[28].mxu0 }
 0xe8a   : > { %v1624_v32 = vadd.f32 %v1617_v31, %v1492_v61  ;;  %v6498_v33 = vpop.f32.mrb[29].mxu0 }
 0xe8b   : > { %v1620_v35 = vpop.f32.mrb[30].mxu0 }
 0xe8c   : > { %v1625_v36 = vadd.f32 %v1620_v35, %v1493_v9  ;;  %v6499_v37 = vpop.f32.mrb[31].mxu0 }
 0xead   : > { %v1674_v38 = vpop.f32.mrb[32].mxu0 }
 0xeae   : > { %v1675_v39 = vadd.f32 %v7677_v14, %v1674_v38  ;;  %v1676_v40 = vpop.f32.mrb[33].mxu0  ;;  %v7240_v38 = vld [vmem:[%s7610_s27 + $0xa0] ss:$8 sps:$4 sm:$0xff]  }
 0xeaf   : > { %v1677_v41 = vpop.f32.mrb[34].mxu0 }
 0xeb0   : > { %v1678_v43 = vadd.f32 %v7677_v14, %v1677_v41  ;;  %v1679_v44 = vpop.f32.mrb[35].mxu0  ;;  %v1681_v45 = vmax.f32 %v1675_v39, 0.0 }
 0xeb2   : > { %v1682_v46 = vmax.f32 %v1678_v43, 0.0 }
 0xeb4   : > { %v6909_v47 = vpack.i.bf16 %v1682_v46, %v1681_v45 }
 0xeb6   : > { %6910 = vrot.lane.b32.xlu0 %v6909_v47, %s9369_s16 }
 0xf28   : > { %v6911_v48 = vpop.permute.xlu0 %6910 }
 0xf29   : > { %v6913_v49 = vunpack.i.h.bf16 %v6911_v48  ;;  %v6912_v50 = vunpack.i.l.bf16 %v6911_v48 }
 0xf2b   : > { %v1692_v51 = vmax.f32 %v1682_v46, %v6913_v49  ;;  %v1691_v52 = vmax.f32 %v1681_v45, %v6912_v50  ;;  %v8032_v46 = vld [vmem:[%s9367_s2] ss:$0 sm:$0xff]  ;;  %v7241_v50 = vld [vmem:[%s9340_s3 + $0x50] sm:$0xff]  }
 0xf2d   : > { %v6914_v59 = vpack.i.bf16 %v1692_v51, %v1691_v52 }
 0xf2f   : > { %6915 = vrot.lane.b32.xlu1 %v6914_v59, %s9368_s25 }
 0xfa1   : > { %v6916_v60 = vpop.permute.xlu1 %6915 }
 0xfa2   : > { %v6918_v61 = vunpack.i.h.bf16 %v6916_v60  ;;  %v6917_v62 = vunpack.i.l.bf16 %v6916_v60 }
 0xfa4   : > { %v1702_v63 = vmax.f32 %v1692_v51, %v6918_v61  ;;  %v1701_v9 = vmax.f32 %v1691_v52, %v6917_v62 }
 0xfa6   : > { %v1703_v6 = vpack.c.bf16 %v1702_v63, %v1701_v9 }
 0xfa8   : > { %6503 = vmatmul.mubr.msk.bf16.vlgmr.msra.gmra.mrb[32].mxu1 %vm584_vm0, %v1703_v6 }
 0xfa9   : > { %1773 = vmatpush1.bf16.msra.mxu1 %v7869_v53  ;;  %6156 = vmatprep.mubr.msk.bf16.mxu1 %vm584_vm0, %v7234_v5 }
 0xfaa   : > { %1774 = vmatprep.subr.bf16.mxu1 %v7442_v1 }
 0xfad   : > { %1775 = vmatpush1.bf16.msra.mxu1 %v7877_v54 }
 0xfae   : > { %1776 = vmatprep.subr.bf16.mxu1 %v7442_v1 }
 0xfb1   : > { %1777 = vmatpush1.bf16.msra.mxu1 %v7884_v55 }
 0xfb2   : > { %1778 = vmatprep.subr.bf16.mxu1 %v7442_v1 }
 0xfb5   : > { %1779 = vmatpush1.bf16.msra.mxu1 %v7891_v56 }
 0xfb6   : > { %1780 = vmatprep.subr.bf16.mxu1 %v7442_v1 }
 0xfb9   : > { %1781 = vmatpush1.bf16.msra.mxu1 %v7898_v57 }
 0xfba   : > { %1782 = vmatprep.subr.bf16.mxu1 %v7442_v1 }
 0xfbd   : > { %1783 = vmatpush1.bf16.msra.mxu1 %v7905_v58 }
 0xfbe   : > { %1784 = vmatprep.subr.bf16.mxu1 %v7442_v1 }
 0xfc1   : > { %1785 = vmatpush1.bf16.msra.mxu1 %v7944_v8 }
 0xfc2   : > { %1786 = vmatprep.subr.bf16.mxu1 %v7442_v1 }
 0xfc5   : > { %1787 = vmatpush1.bf16.msra.mxu1 %v7951_v28 }
 0xfc6   : > { %1788 = vmatprep.subr.bf16.mxu1 %v7442_v1 }
 0xfc9   : > { %1789 = vmatpush1.bf16.msra.mxu1 %v7959_v30 }
 0xfca   : > { %6512 = vmatprep.subr.bf16.mxu1 %v7443_v34 }
 0xfcc   : > { %1805 = vmatmul.mubr.bf16.vlgmr.msra.gmra.mrb[36].mxu1 %v7236_v10 }
 0xfcd   : > { %6514 = vmatprep.mubr.msk.bf16.mxu1 %vm7445_vm1, %v7443_v34  ;;  %6513 = vmatpush3.bf16.msra.mxu1 %v7241_v50 }
 0xfce   : > { %2036 = vmatprep.subr.bf16.mxu1 %v7442_v1 }
0x107b   : > { %v1749_v12 = vpop.f32.mrb[32].mxu1 }
0x107c   : > { %v1756_v13 = vadd.f32 %v1749_v12, %v1624_v32  ;;  %v6504_v11 = vpop.f32.mrb[33].mxu1 }
0x107d   : > { %v1752_v15 = vpop.f32.mrb[34].mxu1 }
0x107e   : > { %v1757_v16 = vadd.f32 %v1752_v15, %v1625_v36  ;;  %v6505_v17 = vpop.f32.mrb[35].mxu1  ;;  %v7238_v36 = vld [vmem:[%s7610_s27 + $0xa4] ss:$8 sps:$4 sm:$0xff]  }
0x107f   : > { %v7242_v17 = vld [vmem:[%s7610_s27 + $0xb4] ss:$8 sps:$4 sm:$0xff]  }
0x109f   : > { %v1806_v18 = vpop.f32.mrb[36].mxu1 }
0x10a0   : > { %v1807_v19 = vadd.f32 %v7677_v14, %v1806_v18  ;;  %v1808_v20 = vpop.f32.mrb[37].mxu1 }
0x10a1   : > { %v1809_v21 = vpop.f32.mrb[38].mxu1 }
0x10a2   : > { %v1810_v23 = vadd.f32 %v7677_v14, %v1809_v21  ;;  %v1811_v24 = vpop.f32.mrb[39].mxu1  ;;  %v1813_v25 = vmax.f32 %v1807_v19, 0.0  ;;  %v7244_v19 = vld [vmem:[%s7610_s27 + $0xb0] ss:$8 sps:$4 sm:$0xff]  }
0x10a4   : > { %v1814_v26 = vmax.f32 %v1810_v23, 0.0 }
0x10a6   : > { %v6919_v27 = vpack.i.bf16 %v1814_v26, %v1813_v25 }
0x10a8   : > { %6920 = vrot.lane.b32.xlu0 %v6919_v27, %s9369_s16 }
0x111a   : > { %v6921_v0 = vpop.permute.xlu0 %6920 }
0x111b   : > { %v6923_v2 = vunpack.i.h.bf16 %v6921_v0  ;;  %v6922_v3 = vunpack.i.l.bf16 %v6921_v0 }
0x111d   : > { %v1824_v4 = vmax.f32 %v1814_v26, %v6923_v2  ;;  %v1823_v7 = vmax.f32 %v1813_v25, %v6922_v3  ;;  %v7245_v3 = vld [vmem:[%s9340_s3 + $0x58] sm:$0xff]  }
0x111f   : > { %v6924_v29 = vpack.i.bf16 %v1824_v4, %v1823_v7 }
0x1121   : > { %6925 = vrot.lane.b32.xlu1 %v6924_v29, %s9368_s25 }
0x1193   : > { %v6926_v31 = vpop.permute.xlu1 %6925 }
0x1194   : > { %v6928_v14 = vunpack.i.h.bf16 %v6926_v31  ;;  %v6927_v32 = vunpack.i.l.bf16 %v6926_v31 }
0x1196   : > { %v1834_v33 = vmax.f32 %v1824_v4, %v6928_v14  ;;  %v1833_v35 = vmax.f32 %v1823_v7, %v6927_v32 }
0x1198   : > { %v1835_v37 = vpack.c.bf16 %v1834_v33, %v1833_v35 }
0x119a   : > { %6509 = vmatmul.mubr.msk.bf16.vlgmr.msra.gmra.mrb[36].mxu0 %vm584_vm0, %v1835_v37 }
0x119b   : > { %1905 = vmatpush1.bf16.msra.mxu0 %v7869_v53  ;;  %6161 = vmatprep.mubr.msk.bf16.mxu0 %vm584_vm0, %v7238_v36 }
0x119c   : > { %1906 = vmatprep.subr.bf16.mxu0 %v7442_v1 }
0x119f   : > { %1907 = vmatpush1.bf16.msra.mxu0 %v7877_v54 }
0x11a0   : > { %1908 = vmatprep.subr.bf16.mxu0 %v7442_v1 }
0x11a3   : > { %1909 = vmatpush1.bf16.msra.mxu0 %v7884_v55 }
0x11a4   : > { %1910 = vmatprep.subr.bf16.mxu0 %v7442_v1 }
0x11a7   : > { %1911 = vmatpush1.bf16.msra.mxu0 %v7891_v56 }
0x11a8   : > { %1912 = vmatprep.subr.bf16.mxu0 %v7442_v1 }
0x11ab   : > { %1913 = vmatpush1.bf16.msra.mxu0 %v7898_v57 }
0x11ac   : > { %1914 = vmatprep.subr.bf16.mxu0 %v7442_v1 }
0x11af   : > { %1915 = vmatpush1.bf16.msra.mxu0 %v7905_v58 }
0x11b0   : > { %1916 = vmatprep.subr.bf16.mxu0 %v7442_v1 }
0x11b3   : > { %1917 = vmatpush1.bf16.msra.mxu0 %v7944_v8 }
0x11b4   : > { %1918 = vmatprep.subr.bf16.mxu0 %v7442_v1 }
0x11b7   : > { %1919 = vmatpush1.bf16.msra.mxu0 %v7951_v28 }
0x11b8   : > { %1920 = vmatprep.subr.bf16.mxu0 %v7442_v1 }
0x11bb   : > { %1921 = vmatpush1.bf16.msra.mxu0 %v7959_v30 }
0x11bc   : > { %6518 = vmatprep.subr.bf16.mxu0 %v7443_v34 }
0x11be   : > { %1937 = vmatmul.mubr.bf16.vlgmr.msra.gmra.mrb[40].mxu0 %v7240_v38 }
0x11bf   : > { %6520 = vmatprep.mubr.msk.bf16.mxu0 %vm7445_vm1, %v7443_v34  ;;  %6519 = vmatpush3.bf16.msra.mxu0 %v7245_v3 }
0x11c0   : > { %2168 = vmatprep.subr.bf16.mxu0 %v7442_v1 }
0x126d   : > { %v1881_v39 = vpop.f32.mrb[36].mxu0 }
0x126e   : > { %v1888_v40 = vadd.f32 %v1881_v39, %v1756_v13  ;;  %v6510_v41 = vpop.f32.mrb[37].mxu0 }
0x126f   : > { %v1884_v42 = vpop.f32.mrb[38].mxu0 }
0x1270   : > { %v1889_v43 = vadd.f32 %v1884_v42, %v1757_v16  ;;  %v6511_v44 = vpop.f32.mrb[39].mxu0 }
0x1271   : > { %v7246_v44 = vld [vmem:[%s7610_s27 + $0xc4] ss:$8 sps:$4 sm:$0xff]  }
0x1291   : > { %v1938_v45 = vpop.f32.mrb[40].mxu0 }
0x1292   : > { %v1939_v47 = vadd.f32 %v8032_v46, %v1938_v45  ;;  %v1940_v48 = vpop.f32.mrb[41].mxu0 }
0x1293   : > { %v1941_v49 = vpop.f32.mrb[42].mxu0 }
0x1294   : > { %v1942_v51 = vadd.f32 %v8032_v46, %v1941_v49  ;;  %v1943_v52 = vpop.f32.mrb[43].mxu0  ;;  %v1945_v59 = vmax.f32 %v1939_v47, 0.0  ;;  %v7248_v47 = vld [vmem:[%s7610_s27 + $0xc0] ss:$8 sps:$4 sm:$0xff]  }
0x1296   : > { %v1946_v60 = vmax.f32 %v1942_v51, 0.0 }
0x1298   : > { %v6929_v61 = vpack.i.bf16 %v1946_v60, %v1945_v59 }
0x129a   : > { %6930 = vrot.lane.b32.xlu0 %v6929_v61, %s9369_s16 }
0x130c   : > { %v6931_v62 = vpop.permute.xlu0 %6930 }
0x130d   : > { %v6933_v63 = vunpack.i.h.bf16 %v6931_v62  ;;  %v6932_v9 = vunpack.i.l.bf16 %v6931_v62 }
0x130f   : > { %v1956_v5 = vmax.f32 %v1946_v60, %v6933_v63  ;;  %v1955_v6 = vmax.f32 %v1945_v59, %v6932_v9  ;;  %v7249_v9 = vld [vmem:[%s9340_s3 + $0x60] sm:$0xff]  }
0x1311   : > { %v6934_v10 = vpack.i.bf16 %v1956_v5, %v1955_v6 }
0x1313   : > { %6935 = vrot.lane.b32.xlu1 %v6934_v10, %s9368_s25 }
0x1385   : > { %v6936_v12 = vpop.permute.xlu1 %6935 }
0x1386   : > { %v6938_v13 = vunpack.i.h.bf16 %v6936_v12  ;;  %v6937_v11 = vunpack.i.l.bf16 %v6936_v12 }
0x1388   : > { %v1966_v15 = vmax.f32 %v1956_v5, %v6938_v13  ;;  %v1965_v16 = vmax.f32 %v1955_v6, %v6937_v11 }
0x138a   : > { %v1967_v18 = vpack.c.bf16 %v1966_v15, %v1965_v16 }
0x138c   : > { %6515 = vmatmul.mubr.msk.bf16.vlgmr.msra.gmra.mrb[40].mxu1 %vm584_vm0, %v1967_v18 }
0x138d   : > { %2037 = vmatpush1.bf16.msra.mxu1 %v7869_v53  ;;  %6166 = vmatprep.mubr.msk.bf16.mxu1 %vm584_vm0, %v7242_v17 }
0x138e   : > { %2038 = vmatprep.subr.bf16.mxu1 %v7442_v1 }
0x1391   : > { %2039 = vmatpush1.bf16.msra.mxu1 %v7877_v54 }
0x1392   : > { %2040 = vmatprep.subr.bf16.mxu1 %v7442_v1 }
0x1395   : > { %2041 = vmatpush1.bf16.msra.mxu1 %v7884_v55 }
0x1396   : > { %2042 = vmatprep.subr.bf16.mxu1 %v7442_v1 }
0x1399   : > { %2043 = vmatpush1.bf16.msra.mxu1 %v7891_v56 }
0x139a   : > { %2044 = vmatprep.subr.bf16.mxu1 %v7442_v1 }
0x139d   : > { %2045 = vmatpush1.bf16.msra.mxu1 %v7898_v57 }
0x139e   : > { %2046 = vmatprep.subr.bf16.mxu1 %v7442_v1 }
0x13a1   : > { %2047 = vmatpush1.bf16.msra.mxu1 %v7905_v58 }
0x13a2   : > { %2048 = vmatprep.subr.bf16.mxu1 %v7442_v1 }
0x13a5   : > { %2049 = vmatpush1.bf16.msra.mxu1 %v7944_v8 }
0x13a6   : > { %2050 = vmatprep.subr.bf16.mxu1 %v7442_v1 }
0x13a9   : > { %2051 = vmatpush1.bf16.msra.mxu1 %v7951_v28 }
0x13aa   : > { %2052 = vmatprep.subr.bf16.mxu1 %v7442_v1 }
0x13ad   : > { %2053 = vmatpush1.bf16.msra.mxu1 %v7959_v30 }
0x13ae   : > { %6524 = vmatprep.subr.bf16.mxu1 %v7443_v34 }
0x13b0   : > { %2069 = vmatmul.mubr.bf16.vlgmr.msra.gmra.mrb[44].mxu1 %v7244_v19 }
0x13b1   : > { %6526 = vmatprep.mubr.msk.bf16.mxu1 %vm7445_vm1, %v7443_v34  ;;  %6525 = vmatpush3.bf16.msra.mxu1 %v7249_v9 }
0x13b2   : > { %2300 = vmatprep.subr.bf16.mxu1 %v7442_v1 }
0x145f   : > { %v2013_v20 = vpop.f32.mrb[40].mxu1 }
0x1460   : > { %v2020_v21 = vadd.f32 %v2013_v20, %v1888_v40  ;;  %v6516_v22 = vpop.f32.mrb[41].mxu1 }
0x1461   : > { %v2016_v23 = vpop.f32.mrb[42].mxu1 }
0x1462   : > { %v2021_v24 = vadd.f32 %v2016_v23, %v1889_v43  ;;  %v6517_v25 = vpop.f32.mrb[43].mxu1 }
0x1463   : > { %v7250_v25 = vld [vmem:[%s7610_s27 + $0xd4] ss:$8 sps:$4 sm:$0xff]  }
0x1483   : > { %v2070_v26 = vpop.f32.mrb[44].mxu1 }
0x1484   : > { %v2071_v27 = vadd.f32 %v8032_v46, %v2070_v26  ;;  %v2072_v0 = vpop.f32.mrb[45].mxu1 }
0x1485   : > { %v2073_v2 = vpop.f32.mrb[46].mxu1 }
0x1486   : > { %v2074_v4 = vadd.f32 %v8032_v46, %v2073_v2  ;;  %v2075_v7 = vpop.f32.mrb[47].mxu1  ;;  %v2077_v29 = vmax.f32 %v2071_v27, 0.0  ;;  %v7252_v27 = vld [vmem:[%s7610_s27 + $0xd0] ss:$8 sps:$4 sm:$0xff]  }
0x1488   : > { %v2078_v31 = vmax.f32 %v2074_v4, 0.0 }
0x148a   : > { %v6939_v14 = vpack.i.bf16 %v2078_v31, %v2077_v29 }
0x148c   : > { %6940 = vrot.lane.b32.xlu0 %v6939_v14, %s9369_s16 }
0x14fe   : > { %v6941_v32 = vpop.permute.xlu0 %6940 }
0x14ff   : > { %v6943_v33 = vunpack.i.h.bf16 %v6941_v32  ;;  %v6942_v35 = vunpack.i.l.bf16 %v6941_v32 }
0x1501   : > { %v2088_v36 = vmax.f32 %v2078_v31, %v6943_v33  ;;  %v2087_v37 = vmax.f32 %v2077_v29, %v6942_v35  ;;  %v7253_v35 = vld [vmem:[%s9340_s3 + $0x68] sm:$0xff]  }
0x1503   : > { %v6944_v38 = vpack.i.bf16 %v2088_v36, %v2087_v37 }
0x1505   : > { %6945 = vrot.lane.b32.xlu1 %v6944_v38, %s9368_s25 }
0x1577   : > { %v6946_v39 = vpop.permute.xlu1 %6945 }
0x1578   : > { %v6948_v40 = vunpack.i.h.bf16 %v6946_v39  ;;  %v6947_v41 = vunpack.i.l.bf16 %v6946_v39 }
0x157a   : > { %v2098_v42 = vmax.f32 %v2088_v36, %v6948_v40  ;;  %v2097_v43 = vmax.f32 %v2087_v37, %v6947_v41 }
0x157c   : > { %v2099_v45 = vpack.c.bf16 %v2098_v42, %v2097_v43 }
0x157e   : > { %6521 = vmatmul.mubr.msk.bf16.vlgmr.msra.gmra.mrb[44].mxu0 %vm584_vm0, %v2099_v45 }
0x157f   : > { %2169 = vmatpush1.bf16.msra.mxu0 %v7869_v53  ;;  %6171 = vmatprep.mubr.msk.bf16.mxu0 %vm584_vm0, %v7246_v44 }
0x1580   : > { %2170 = vmatprep.subr.bf16.mxu0 %v7442_v1 }
0x1583   : > { %2171 = vmatpush1.bf16.msra.mxu0 %v7877_v54 }
0x1584   : > { %2172 = vmatprep.subr.bf16.mxu0 %v7442_v1 }
0x1587   : > { %2173 = vmatpush1.bf16.msra.mxu0 %v7884_v55 }
0x1588   : > { %2174 = vmatprep.subr.bf16.mxu0 %v7442_v1 }
0x158b   : > { %2175 = vmatpush1.bf16.msra.mxu0 %v7891_v56 }
0x158c   : > { %2176 = vmatprep.subr.bf16.mxu0 %v7442_v1 }
0x158f   : > { %2177 = vmatpush1.bf16.msra.mxu0 %v7898_v57 }
0x1590   : > { %2178 = vmatprep.subr.bf16.mxu0 %v7442_v1 }
0x1593   : > { %2179 = vmatpush1.bf16.msra.mxu0 %v7905_v58 }
0x1594   : > { %2180 = vmatprep.subr.bf16.mxu0 %v7442_v1 }
0x1597   : > { %2181 = vmatpush1.bf16.msra.mxu0 %v7944_v8 }
0x1598   : > { %2182 = vmatprep.subr.bf16.mxu0 %v7442_v1 }
0x159b   : > { %2183 = vmatpush1.bf16.msra.mxu0 %v7951_v28 }
0x159c   : > { %2184 = vmatprep.subr.bf16.mxu0 %v7442_v1 }
0x159f   : > { %2185 = vmatpush1.bf16.msra.mxu0 %v7959_v30 }
0x15a0   : > { %6530 = vmatprep.subr.bf16.mxu0 %v7443_v34 }
0x15a2   : > { %2201 = vmatmul.mubr.bf16.vlgmr.msra.gmra.mrb[48].mxu0 %v7248_v47 }
0x15a3   : > { %6532 = vmatprep.mubr.msk.bf16.mxu0 %vm7445_vm1, %v7443_v34  ;;  %6531 = vmatpush3.bf16.msra.mxu0 %v7253_v35 }
0x15a4   : > { %2432 = vmatprep.subr.bf16.mxu0 %v7442_v1 }
0x1651   : > { %v2145_v48 = vpop.f32.mrb[44].mxu0 }
0x1652   : > { %v2152_v49 = vadd.f32 %v2145_v48, %v2020_v21  ;;  %v6522_v50 = vpop.f32.mrb[45].mxu0 }
0x1653   : > { %v2148_v51 = vpop.f32.mrb[46].mxu0 }
0x1654   : > { %v2153_v52 = vadd.f32 %v2148_v51, %v2021_v24  ;;  %v6523_v59 = vpop.f32.mrb[47].mxu0 }
0x1655   : > { %v7254_v59 = vld [vmem:[%s7610_s27 + $0xe4] ss:$8 sps:$4 sm:$0xff]  }
0x1675   : > { %v2202_v60 = vpop.f32.mrb[48].mxu0 }
0x1676   : > { %v2203_v61 = vadd.f32 %v8032_v46, %v2202_v60  ;;  %v2204_v62 = vpop.f32.mrb[49].mxu0 }
0x1677   : > { %v2205_v63 = vpop.f32.mrb[50].mxu0 }
0x1678   : > { %v2206_v5 = vadd.f32 %v8032_v46, %v2205_v63  ;;  %v2207_v6 = vpop.f32.mrb[51].mxu0  ;;  %v2209_v10 = vmax.f32 %v2203_v61, 0.0  ;;  %v7256_v61 = vld [vmem:[%s7610_s27 + $0xe0] ss:$8 sps:$4 sm:$0xff]  }
0x167a   : > { %v2210_v12 = vmax.f32 %v2206_v5, 0.0 }
0x167c   : > { %v6949_v13 = vpack.i.bf16 %v2210_v12, %v2209_v10 }
0x167e   : > { %6950 = vrot.lane.b32.xlu0 %v6949_v13, %s9369_s16 }
0x16f0   : > { %v6951_v11 = vpop.permute.xlu0 %6950 }
0x16f1   : > { %v6953_v15 = vunpack.i.h.bf16 %v6951_v11  ;;  %v6952_v16 = vunpack.i.l.bf16 %v6951_v11 }
0x16f3   : > { %v2220_v17 = vmax.f32 %v2210_v12, %v6953_v15  ;;  %v2219_v18 = vmax.f32 %v2209_v10, %v6952_v16  ;;  %v7257_v16 = vld [vmem:[%s9340_s3 + $0x70] sm:$0xff]  }
0x16f5   : > { %v6954_v19 = vpack.i.bf16 %v2220_v17, %v2219_v18 }
0x16f7   : > { %6955 = vrot.lane.b32.xlu1 %v6954_v19, %s9368_s25 }
0x1769   : > { %v6956_v20 = vpop.permute.xlu1 %6955 }
0x176a   : > { %v6958_v21 = vunpack.i.h.bf16 %v6956_v20  ;;  %v6957_v22 = vunpack.i.l.bf16 %v6956_v20 }
0x176c   : > { %v2230_v23 = vmax.f32 %v2220_v17, %v6958_v21  ;;  %v2229_v24 = vmax.f32 %v2219_v18, %v6957_v22 }
0x176e   : > { %v2231_v26 = vpack.c.bf16 %v2230_v23, %v2229_v24 }
0x1770   : > { %6527 = vmatmul.mubr.msk.bf16.vlgmr.msra.gmra.mrb[48].mxu1 %vm584_vm0, %v2231_v26 }
0x1771   : > { %2301 = vmatpush1.bf16.msra.mxu1 %v7869_v53  ;;  %6176 = vmatprep.mubr.msk.bf16.mxu1 %vm584_vm0, %v7250_v25 }
0x1772   : > { %2302 = vmatprep.subr.bf16.mxu1 %v7442_v1 }
0x1775   : > { %2303 = vmatpush1.bf16.msra.mxu1 %v7877_v54 }
0x1776   : > { %2304 = vmatprep.subr.bf16.mxu1 %v7442_v1 }
0x1779   : > { %2305 = vmatpush1.bf16.msra.mxu1 %v7884_v55 }
0x177a   : > { %2306 = vmatprep.subr.bf16.mxu1 %v7442_v1 }
0x177d   : > { %2307 = vmatpush1.bf16.msra.mxu1 %v7891_v56 }
0x177e   : > { %2308 = vmatprep.subr.bf16.mxu1 %v7442_v1 }
0x1781   : > { %2309 = vmatpush1.bf16.msra.mxu1 %v7898_v57 }
0x1782   : > { %2310 = vmatprep.subr.bf16.mxu1 %v7442_v1 }
0x1785   : > { %2311 = vmatpush1.bf16.msra.mxu1 %v7905_v58 }
0x1786   : > { %2312 = vmatprep.subr.bf16.mxu1 %v7442_v1 }
0x1789   : > { %2313 = vmatpush1.bf16.msra.mxu1 %v7944_v8 }
0x178a   : > { %2314 = vmatprep.subr.bf16.mxu1 %v7442_v1 }
0x178d   : > { %2315 = vmatpush1.bf16.msra.mxu1 %v7951_v28 }
0x178e   : > { %2316 = vmatprep.subr.bf16.mxu1 %v7442_v1 }
0x1791   : > { %2317 = vmatpush1.bf16.msra.mxu1 %v7959_v30 }
0x1792   : > { %6536 = vmatprep.subr.bf16.mxu1 %v7443_v34 }
0x1794   : > { %2333 = vmatmul.mubr.bf16.vlgmr.msra.gmra.mrb[52].mxu1 %v7252_v27 }
0x1795   : > { %6538 = vmatprep.mubr.msk.bf16.mxu1 %vm7445_vm1, %v7443_v34  ;;  %6537 = vmatpush3.bf16.msra.mxu1 %v7257_v16 }
0x1796   : > { %2564 = vmatprep.subr.bf16.mxu1 %v7442_v1 }
0x1843   : > { %v2277_v0 = vpop.f32.mrb[48].mxu1 }
0x1844   : > { %v2284_v2 = vadd.f32 %v2277_v0, %v2152_v49  ;;  %v6528_v3 = vpop.f32.mrb[49].mxu1 }
0x1845   : > { %v2280_v4 = vpop.f32.mrb[50].mxu1 }
0x1846   : > { %v2285_v7 = vadd.f32 %v2280_v4, %v2153_v52  ;;  %v6529_v29 = vpop.f32.mrb[51].mxu1 }
0x1847   : > { %v7258_v29 = vld [vmem:[%s7610_s27 + $0xf4] ss:$8 sps:$4 sm:$0xff]  }
0x1867   : > { %v2334_v31 = vpop.f32.mrb[52].mxu1 }
0x1868   : > { %v2335_v14 = vadd.f32 %v8032_v46, %v2334_v31  ;;  %v2336_v32 = vpop.f32.mrb[53].mxu1 }
0x1869   : > { %v2337_v33 = vpop.f32.mrb[54].mxu1 }
0x186a   : > { %v2338_v36 = vadd.f32 %v8032_v46, %v2337_v33  ;;  %v2339_v37 = vpop.f32.mrb[55].mxu1  ;;  %v2341_v38 = vmax.f32 %v2335_v14, 0.0  ;;  %v7260_v14 = vld [vmem:[%s7610_s27 + $0xf0] ss:$8 sps:$4 sm:$0xff]  }
0x186c   : > { %v2342_v39 = vmax.f32 %v2338_v36, 0.0 }
0x186e   : > { %v6959_v40 = vpack.i.bf16 %v2342_v39, %v2341_v38 }
0x1870   : > { %6960 = vrot.lane.b32.xlu0 %v6959_v40, %s9369_s16 }
0x18e2   : > { %v6961_v41 = vpop.permute.xlu0 %6960 }
0x18e3   : > { %v6963_v42 = vunpack.i.h.bf16 %v6961_v41  ;;  %v6962_v43 = vunpack.i.l.bf16 %v6961_v41 }
0x18e5   : > { %v2352_v44 = vmax.f32 %v2342_v39, %v6963_v42  ;;  %v2351_v45 = vmax.f32 %v2341_v38, %v6962_v43  ;;  %v7261_v43 = vld [vmem:[%s9340_s3 + $0x78] sm:$0xff]  }
0x18e7   : > { %v6964_v47 = vpack.i.bf16 %v2352_v44, %v2351_v45 }
0x18e9   : > { %6965 = vrot.lane.b32.xlu1 %v6964_v47, %s9368_s25 }
0x195b   : > { %v6966_v48 = vpop.permute.xlu1 %6965 }
0x195c   : > { %v6968_v49 = vunpack.i.h.bf16 %v6966_v48  ;;  %v6967_v50 = vunpack.i.l.bf16 %v6966_v48 }
0x195e   : > { %v2362_v51 = vmax.f32 %v2352_v44, %v6968_v49  ;;  %v2361_v52 = vmax.f32 %v2351_v45, %v6967_v50 }
0x1960   : > { %v2363_v60 = vpack.c.bf16 %v2362_v51, %v2361_v52 }
0x1962   : > { %6533 = vmatmul.mubr.msk.bf16.vlgmr.msra.gmra.mrb[52].mxu0 %vm584_vm0, %v2363_v60 }
0x1963   : > { %2433 = vmatpush1.bf16.msra.mxu0 %v7869_v53  ;;  %6181 = vmatprep.mubr.msk.bf16.mxu0 %vm584_vm0, %v7254_v59 }
0x1964   : > { %2434 = vmatprep.subr.bf16.mxu0 %v7442_v1 }
0x1967   : > { %2435 = vmatpush1.bf16.msra.mxu0 %v7877_v54 }
0x1968   : > { %2436 = vmatprep.subr.bf16.mxu0 %v7442_v1 }
0x196b   : > { %2437 = vmatpush1.bf16.msra.mxu0 %v7884_v55 }
0x196c   : > { %2438 = vmatprep.subr.bf16.mxu0 %v7442_v1 }
0x196f   : > { %2439 = vmatpush1.bf16.msra.mxu0 %v7891_v56 }
0x1970   : > { %2440 = vmatprep.subr.bf16.mxu0 %v7442_v1 }
0x1973   : > { %2441 = vmatpush1.bf16.msra.mxu0 %v7898_v57 }
0x1974   : > { %2442 = vmatprep.subr.bf16.mxu0 %v7442_v1 }
0x1977   : > { %2443 = vmatpush1.bf16.msra.mxu0 %v7905_v58 }
0x1978   : > { %2444 = vmatprep.subr.bf16.mxu0 %v7442_v1 }
0x197b   : > { %2445 = vmatpush1.bf16.msra.mxu0 %v7944_v8 }
0x197c   : > { %2446 = vmatprep.subr.bf16.mxu0 %v7442_v1 }
0x197f   : > { %2447 = vmatpush1.bf16.msra.mxu0 %v7951_v28 }
0x1980   : > { %2448 = vmatprep.subr.bf16.mxu0 %v7442_v1 }
0x1983   : > { %2449 = vmatpush1.bf16.msra.mxu0 %v7959_v30 }
0x1984   : > { %6542 = vmatprep.subr.bf16.mxu0 %v7443_v34 }
0x1986   : > { %2465 = vmatmul.mubr.bf16.vlgmr.msra.gmra.mrb[56].mxu0 %v7256_v61 }
0x1987   : > { %6544 = vmatprep.mubr.msk.bf16.mxu0 %vm7445_vm1, %v7443_v34  ;;  %6543 = vmatpush3.bf16.msra.mxu0 %v7261_v43 }
0x1988   : > { %2696 = vmatprep.subr.bf16.mxu0 %v7442_v1 }
0x1a35   : > { %v2409_v62 = vpop.f32.mrb[52].mxu0 }
0x1a36   : > { %v2416_v63 = vadd.f32 %v2409_v62, %v2284_v2  ;;  %v6534_v9 = vpop.f32.mrb[53].mxu0 }
0x1a37   : > { %v2412_v5 = vpop.f32.mrb[54].mxu0 }
0x1a38   : > { %v2417_v6 = vadd.f32 %v2412_v5, %v2285_v7  ;;  %v6535_v10 = vpop.f32.mrb[55].mxu0 }
0x1a39   : > { %v7262_v10 = vld [vmem:[%s7610_s27 + $0x104] ss:$8 sps:$4 sm:$0xff]  }
0x1a59   : > { %v2466_v12 = vpop.f32.mrb[56].mxu0 }
0x1a5a   : > { %v2467_v13 = vadd.f32 %v8032_v46, %v2466_v12  ;;  %v2468_v11 = vpop.f32.mrb[57].mxu0 }
0x1a5b   : > { %v2469_v15 = vpop.f32.mrb[58].mxu0 }
0x1a5c   : > { %v2470_v17 = vadd.f32 %v8032_v46, %v2469_v15  ;;  %v2471_v18 = vpop.f32.mrb[59].mxu0  ;;  %v2473_v19 = vmax.f32 %v2467_v13, 0.0 }
0x1a5d   : > { %v7265_v18 = vld [vmem:[%s9340_s3 + $0x80] sm:$0xff]  }
0x1a5e   : > { %v2474_v20 = vmax.f32 %v2470_v17, 0.0 }
0x1a60   : > { %v6969_v21 = vpack.i.bf16 %v2474_v20, %v2473_v19 }
0x1a62   : > { %6970 = vrot.lane.b32.xlu0 %v6969_v21, %s9369_s16 }
0x1ad4   : > { %v6971_v22 = vpop.permute.xlu0 %6970 }
0x1ad5   : > { %v6973_v23 = vunpack.i.h.bf16 %v6971_v22  ;;  %v6972_v24 = vunpack.i.l.bf16 %v6971_v22 }
0x1ad7   : > { %v2484_v25 = vmax.f32 %v2474_v20, %v6973_v23  ;;  %v2483_v26 = vmax.f32 %v2473_v19, %v6972_v24 }
0x1ad9   : > { %v6974_v27 = vpack.i.bf16 %v2484_v25, %v2483_v26 }
0x1adb   : > { %6975 = vrot.lane.b32.xlu1 %v6974_v27, %s9368_s25 }
0x1b4d   : > { %v6976_v0 = vpop.permute.xlu1 %6975 }
0x1b4e   : > { %v6978_v2 = vunpack.i.h.bf16 %v6976_v0  ;;  %v6977_v3 = vunpack.i.l.bf16 %v6976_v0 }
0x1b50   : > { %v2494_v4 = vmax.f32 %v2484_v25, %v6978_v2  ;;  %v2493_v7 = vmax.f32 %v2483_v26, %v6977_v3 }
0x1b52   : > { %v2495_v31 = vpack.c.bf16 %v2494_v4, %v2493_v7 }
0x1b54   : > { %6539 = vmatmul.mubr.msk.bf16.vlgmr.msra.gmra.mrb[56].mxu1 %vm584_vm0, %v2495_v31 }
0x1b55   : > { %2565 = vmatpush1.bf16.msra.mxu1 %v7869_v53  ;;  %6186 = vmatprep.mubr.msk.bf16.mxu1 %vm584_vm0, %v7258_v29 }
0x1b56   : > { %2566 = vmatprep.subr.bf16.mxu1 %v7442_v1 }
0x1b59   : > { %2567 = vmatpush1.bf16.msra.mxu1 %v7877_v54 }
0x1b5a   : > { %2568 = vmatprep.subr.bf16.mxu1 %v7442_v1 }
0x1b5d   : > { %2569 = vmatpush1.bf16.msra.mxu1 %v7884_v55 }
0x1b5e   : > { %2570 = vmatprep.subr.bf16.mxu1 %v7442_v1 }
0x1b61   : > { %2571 = vmatpush1.bf16.msra.mxu1 %v7891_v56 }
0x1b62   : > { %2572 = vmatprep.subr.bf16.mxu1 %v7442_v1 }
0x1b65   : > { %2573 = vmatpush1.bf16.msra.mxu1 %v7898_v57 }
0x1b66   : > { %2574 = vmatprep.subr.bf16.mxu1 %v7442_v1 }
0x1b69   : > { %2575 = vmatpush1.bf16.msra.mxu1 %v7905_v58 }
0x1b6a   : > { %2576 = vmatprep.subr.bf16.mxu1 %v7442_v1 }
0x1b6d   : > { %2577 = vmatpush1.bf16.msra.mxu1 %v7944_v8 }
0x1b6e   : > { %2578 = vmatprep.subr.bf16.mxu1 %v7442_v1 }
0x1b71   : > { %2579 = vmatpush1.bf16.msra.mxu1 %v7951_v28 }
0x1b72   : > { %2580 = vmatprep.subr.bf16.mxu1 %v7442_v1 }
0x1b75   : > { %2581 = vmatpush1.bf16.msra.mxu1 %v7959_v30 }
0x1b76   : > { %6548 = vmatprep.subr.bf16.mxu1 %v7443_v34 }
0x1b78   : > { %2597 = vmatmul.mubr.bf16.vlgmr.msra.gmra.mrb[60].mxu1 %v7260_v14  ;;  %v7266_v14 = vld [vmem:[%s7610_s27 + $0x114] ss:$8 sps:$4 sm:$0xff]  }
0x1b79   : > { %6550 = vmatprep.mubr.msk.bf16.mxu1 %vm7445_vm1, %v7443_v34  ;;  %6549 = vmatpush3.bf16.msra.mxu1 %v7265_v18 }
0x1b7a   : > { %2828 = vmatprep.subr.bf16.mxu1 %v7442_v1 }
0x1c27   : > { %v2541_v32 = vpop.f32.mrb[56].mxu1 }
0x1c28   : > { %v2548_v33 = vadd.f32 %v2541_v32, %v2416_v63  ;;  %v6540_v35 = vpop.f32.mrb[57].mxu1 }
0x1c29   : > { %v2544_v36 = vpop.f32.mrb[58].mxu1  ;;  %v8247_v35 = vld [vmem:[%s9365_s1 + $0x8] sm:$0xff]  }
0x1c2a   : > { %v2549_v37 = vadd.f32 %v2544_v36, %v2417_v6  ;;  %v6541_v38 = vpop.f32.mrb[59].mxu1  ;;  %v8254_v36 = vld [vmem:[%s9365_s1 + $0x10] sm:$0xff]  }
0x1c2b   : > { %v8268_v38 = vld [vmem:[%s9365_s1 + $0x20] sm:$0xff]  }
0x1c4b   : > { %v2598_v39 = vpop.f32.mrb[60].mxu1 }
0x1c4c   : > { %v2599_v40 = vadd.f32 %v8032_v46, %v2598_v39  ;;  %v2600_v41 = vpop.f32.mrb[61].mxu1  ;;  %v8275_v39 = vld [vmem:[%s9365_s1 + $0x28] sm:$0xff]  }
0x1c4d   : > { %v2601_v42 = vpop.f32.mrb[62].mxu1 }
0x1c4e   : > { %v2602_v44 = vadd.f32 %v8032_v46, %v2601_v42  ;;  %v2603_v45 = vpop.f32.mrb[63].mxu1  ;;  %v2605_v47 = vmax.f32 %v2599_v40, 0.0  ;;  %v7268_v40 = vld [vmem:[%s7610_s27 + $0x110] ss:$8 sps:$4 sm:$0xff]  }
0x1c50   : > { %v2606_v48 = vmax.f32 %v2602_v44, 0.0 }
0x1c52   : > { %v6979_v49 = vpack.i.bf16 %v2606_v48, %v2605_v47 }
0x1c54   : > { %6980 = vrot.lane.b32.xlu0 %v6979_v49, %s9369_s16 }
0x1cc6   : > { %v6981_v50 = vpop.permute.xlu0 %6980 }
0x1cc7   : > { %v6983_v51 = vunpack.i.h.bf16 %v6981_v50  ;;  %v6982_v52 = vunpack.i.l.bf16 %v6981_v50 }
0x1cc9   : > { %v2616_v59 = vmax.f32 %v2606_v48, %v6983_v51  ;;  %v2615_v60 = vmax.f32 %v2605_v47, %v6982_v52 }
0x1ccb   : > { %v6984_v61 = vpack.i.bf16 %v2616_v59, %v2615_v60 }
0x1ccd   : > { %6985 = vrot.lane.b32.xlu1 %v6984_v61, %s9368_s25 }
0x1d3f   : > { %v6986_v62 = vpop.permute.xlu1 %6985 }
0x1d40   : > { %v6988_v63 = vunpack.i.h.bf16 %v6986_v62  ;;  %v6987_v9 = vunpack.i.l.bf16 %v6986_v62 }
0x1d42   : > { %v2626_v5 = vmax.f32 %v2616_v59, %v6988_v63  ;;  %v2625_v6 = vmax.f32 %v2615_v60, %v6987_v9 }
0x1d44   : > { %v2627_v12 = vpack.c.bf16 %v2626_v5, %v2625_v6 }
0x1d46   : > { %6545 = vmatmul.mubr.msk.bf16.vlgmr.msra.gmra.mrb[60].mxu0 %vm584_vm0, %v2627_v12 }
0x1d47   : > { %2697 = vmatpush1.bf16.msra.mxu0 %v7869_v53  ;;  %6191 = vmatprep.mubr.msk.bf16.mxu0 %vm584_vm0, %v7262_v10  ;;  %v7264_v53 = vld [vmem:[%s7610_s27 + $0x100] ss:$8 sps:$4 sm:$0xff]  }
0x1d48   : > { %2698 = vmatprep.subr.bf16.mxu0 %v7442_v1 }
0x1d4b   : > { %2699 = vmatpush1.bf16.msra.mxu0 %v7877_v54 }
0x1d4c   : > { %2700 = vmatprep.subr.bf16.mxu0 %v7442_v1 }
0x1d4f   : > { %2701 = vmatpush1.bf16.msra.mxu0 %v7884_v55 }
0x1d50   : > { %2702 = vmatprep.subr.bf16.mxu0 %v7442_v1 }
0x1d53   : > { %2703 = vmatpush1.bf16.msra.mxu0 %v7891_v56 }
0x1d54   : > { %2704 = vmatprep.subr.bf16.mxu0 %v7442_v1 }
0x1d57   : > { %2705 = vmatpush1.bf16.msra.mxu0 %v7898_v57 }
0x1d58   : > { %2706 = vmatprep.subr.bf16.mxu0 %v7442_v1 }
0x1d5b   : > { %2707 = vmatpush1.bf16.msra.mxu0 %v7905_v58 }
0x1d5c   : > { %2708 = vmatprep.subr.bf16.mxu0 %v7442_v1 }
0x1d5f   : > { %2709 = vmatpush1.bf16.msra.mxu0 %v7944_v8 }
0x1d60   : > { %2710 = vmatprep.subr.bf16.mxu0 %v7442_v1 }
0x1d63   : > { %2711 = vmatpush1.bf16.msra.mxu0 %v7951_v28 }
0x1d64   : > { %2712 = vmatprep.subr.bf16.mxu0 %v7442_v1 }
0x1d67   : > { %2713 = vmatpush1.bf16.msra.mxu0 %v7959_v30 }
0x1d68   : > { %6554 = vmatprep.subr.bf16.mxu0 %v7443_v34 }
0x1d6a   : > { %2729 = vmatmul.mubr.bf16.vlgmr.msra.gmra.mrb[64].mxu0 %v7264_v53 }
0x1d6b   : > { %6556 = vmatprep.mubr.msk.bf16.mxu0 %vm7445_vm1, %v7443_v34 }
0x1e19   : > { %v2673_v54 = vpop.f32.mrb[60].mxu0 }
0x1e1a   : > { %v2680_v55 = vadd.f32 %v2673_v54, %v2548_v33  ;;  %v6546_v56 = vpop.f32.mrb[61].mxu0  ;;  %v8239_v33 = vld [vmem:[%s9365_s1] sm:$0xff]  }
0x1e1b   : > { %v2676_v57 = vpop.f32.mrb[62].mxu0  ;;  %v7270_v56 = vld [vmem:[%s7610_s27 + $0x124] ss:$8 sps:$4 sm:$0xff]  }
0x1e1c   : > { %v2681_v58 = vadd.f32 %v2676_v57, %v2549_v37  ;;  %v6547_v13 = vpop.f32.mrb[63].mxu0  ;;  %v8261_v37 = vld [vmem:[%s9365_s1 + $0x18] sm:$0xff]  }
0x1e1d   : > { %v8321_v13 = vld [vmem:[%s9365_s1 + $0x38] sm:$0xff]  }
0x1e3d   : > { %v2730_v11 = vpop.f32.mrb[64].mxu0 }
0x1e3e   : > { %v2731_v15 = vadd.f32 %v8032_v46, %v2730_v11  ;;  %v2732_v16 = vpop.f32.mrb[65].mxu0  ;;  %v7272_v11 = vld [vmem:[%s7610_s27 + $0x120] ss:$8 sps:$4 sm:$0xff]  }
0x1e3f   : > { %v2733_v17 = vpop.f32.mrb[66].mxu0 }
0x1e40   : > { %v2734_v19 = vadd.f32 %v8032_v46, %v2733_v17  ;;  %v2735_v20 = vpop.f32.mrb[67].mxu0  ;;  %v2737_v21 = vmax.f32 %v2731_v15, 0.0  ;;  %v8329_v15 = vld [vmem:[%s9365_s1 + $0x40] sm:$0xff]  }
0x1e42   : > { %v2738_v22 = vmax.f32 %v2734_v19, 0.0 }
0x1e44   : > { %v6989_v23 = vpack.i.bf16 %v2738_v22, %v2737_v21 }
0x1e46   : > { %6990 = vrot.lane.b32.xlu0 %v6989_v23, %s9369_s16 }
0x1eb8   : > { %v6991_v24 = vpop.permute.xlu0 %6990 }
0x1eb9   : > { %v6993_v25 = vunpack.i.h.bf16 %v6991_v24  ;;  %v6992_v26 = vunpack.i.l.bf16 %v6991_v24 }
0x1ebb   : > { %v2748_v27 = vmax.f32 %v2738_v22, %v6993_v25  ;;  %v2747_v0 = vmax.f32 %v2737_v21, %v6992_v26  ;;  %v7273_v26 = vld [vmem:[%s9340_s3 + $0x90] sm:$0xff]  }
0x1ebd   : > { %v6994_v2 = vpack.i.bf16 %v2748_v27, %v2747_v0 }
0x1ebf   : > { %6995 = vrot.lane.b32.xlu1 %v6994_v2, %s9368_s25 }
0x1f31   : > { %v6996_v3 = vpop.permute.xlu1 %6995 }
0x1f32   : > { %v6998_v4 = vunpack.i.h.bf16 %v6996_v3  ;;  %v6997_v7 = vunpack.i.l.bf16 %v6996_v3 }
0x1f34   : > { %v2758_v29 = vmax.f32 %v2748_v27, %v6998_v4  ;;  %v2757_v31 = vmax.f32 %v2747_v0, %v6997_v7 }
0x1f36   : > { %v2759_v32 = vpack.c.bf16 %v2758_v29, %v2757_v31 }
0x1f38   : > { %6551 = vmatmul.mubr.msk.bf16.vlgmr.msra.gmra.mrb[64].mxu1 %vm584_vm0, %v2759_v32 }
0x1f39   : > { %2829 = vmatpush1.bf16.msra.mxu1 %v8239_v33  ;;  %6196 = vmatprep.mubr.msk.bf16.mxu1 %vm584_vm0, %v7266_v14 }
0x1f3a   : > { %2830 = vmatprep.subr.bf16.mxu1 %v7442_v1 }
0x1f3d   : > { %2831 = vmatpush1.bf16.msra.mxu1 %v8247_v35 }
0x1f3e   : > { %2832 = vmatprep.subr.bf16.mxu1 %v7442_v1 }
0x1f41   : > { %2833 = vmatpush1.bf16.msra.mxu1 %v8254_v36 }
0x1f42   : > { %2834 = vmatprep.subr.bf16.mxu1 %v7442_v1 }
0x1f45   : > { %2835 = vmatpush1.bf16.msra.mxu1 %v8261_v37 }
0x1f46   : > { %2836 = vmatprep.subr.bf16.mxu1 %v7442_v1 }
0x1f49   : > { %2837 = vmatpush1.bf16.msra.mxu1 %v8268_v38 }
0x1f4a   : > { %2838 = vmatprep.subr.bf16.mxu1 %v7442_v1 }
0x1f4d   : > { %2839 = vmatpush1.bf16.msra.mxu1 %v8275_v39 }
0x1f4e   : > { %2840 = vmatprep.subr.bf16.mxu1 %v7442_v1 }
0x1f51   : > { %2841 = vmatpush1.bf16.msra.mxu1 %v7944_v8 }
0x1f52   : > { %2842 = vmatprep.subr.bf16.mxu1 %v7442_v1 }
0x1f55   : > { %2843 = vmatpush1.bf16.msra.mxu1 %v7951_v28 }
0x1f56   : > { %2844 = vmatprep.subr.bf16.mxu1 %v7442_v1 }
0x1f59   : > { %2845 = vmatpush1.bf16.msra.mxu1 %v7959_v30  ;;  %v7269_v30 = vld [vmem:[%s9340_s3 + $0x88] sm:$0xff]  }
0x1f5a   : > { %6560 = vmatprep.subr.bf16.mxu1 %v7443_v34  ;;  %6555 = vmatpush3.bf16.msra.mxu0 %v7269_v30 }
0x1f5b   : > { %2960 = vmatprep.subr.bf16.mxu0 %v7442_v1 }
0x1f5c   : > { %2861 = vmatmul.mubr.bf16.vlgmr.msra.gmra.mrb[68].mxu1 %v7268_v40 }
0x1f5d   : > { %6562 = vmatprep.mubr.msk.bf16.mxu1 %vm7445_vm1, %v7443_v34  ;;  %6561 = vmatpush3.bf16.msra.mxu1 %v7273_v26 }
0x1f5e   : > { %3092 = vmatprep.subr.bf16.mxu1 %v7442_v1 }
0x200b   : > { %v2805_v41 = vpop.f32.mrb[64].mxu1 }
0x200c   : > { %v2812_v42 = vadd.f32 %v2805_v41, %v2680_v55  ;;  %v6552_v43 = vpop.f32.mrb[65].mxu1 }
0x200d   : > { %v2808_v44 = vpop.f32.mrb[66].mxu1 }
0x200e   : > { %v2813_v8 = vadd.f32 %v2808_v44, %v2681_v58  ;;  %v6553_v45 = vpop.f32.mrb[67].mxu1  ;;  %v8314_v58 = vld [vmem:[%s9365_s1 + $0x30] sm:$0xff]  }
0x200f   : > { %v7274_v45 = vld [vmem:[%s7610_s27 + $0x134] ss:$8 sps:$4 sm:$0xff]  }
0x202f   : > { %v2862_v47 = vpop.f32.mrb[68].mxu1 }
0x2030   : > { %v2863_v28 = vadd.f32 %v8032_v46, %v2862_v47  ;;  %v2864_v48 = vpop.f32.mrb[69].mxu1 }
0x2031   : > { %v2865_v49 = vpop.f32.mrb[70].mxu1 }
0x2032   : > { %v2866_v50 = vadd.f32 %v8032_v46, %v2865_v49  ;;  %v2867_v51 = vpop.f32.mrb[71].mxu1  ;;  %v2869_v52 = vmax.f32 %v2863_v28, 0.0  ;;  %v7276_v28 = vld [vmem:[%s7610_s27 + $0x130] ss:$8 sps:$4 sm:$0xff]  }
0x2034   : > { %v2870_v59 = vmax.f32 %v2866_v50, 0.0 }
0x2036   : > { %v6999_v60 = vpack.i.bf16 %v2870_v59, %v2869_v52 }
0x2038   : > { %7000 = vrot.lane.b32.xlu0 %v6999_v60, %s9369_s16 }
0x20aa   : > { %v7001_v61 = vpop.permute.xlu0 %7000 }
0x20ab   : > { %v7003_v62 = vunpack.i.h.bf16 %v7001_v61  ;;  %v7002_v63 = vunpack.i.l.bf16 %v7001_v61 }
0x20ad   : > { %v2880_v9 = vmax.f32 %v2870_v59, %v7003_v62  ;;  %v2879_v5 = vmax.f32 %v2869_v52, %v7002_v63  ;;  %v7277_v63 = vld [vmem:[%s9340_s3 + $0x98] sm:$0xff]  }
0x20af   : > { %v7004_v6 = vpack.i.bf16 %v2880_v9, %v2879_v5 }
0x20b1   : > { %7005 = vrot.lane.b32.xlu1 %v7004_v6, %s9368_s25 }
0x2123   : > { %v7006_v10 = vpop.permute.xlu1 %7005 }
0x2124   : > { %v7008_v12 = vunpack.i.h.bf16 %v7006_v10  ;;  %v7007_v53 = vunpack.i.l.bf16 %v7006_v10 }
0x2126   : > { %v2890_v54 = vmax.f32 %v2880_v9, %v7008_v12  ;;  %v2889_v55 = vmax.f32 %v2879_v5, %v7007_v53 }
0x2128   : > { %v2891_v57 = vpack.c.bf16 %v2890_v54, %v2889_v55 }
0x212a   : > { %6557 = vmatmul.mubr.msk.bf16.vlgmr.msra.gmra.mrb[68].mxu0 %vm584_vm0, %v2891_v57 }
0x212b   : > { %2961 = vmatpush1.bf16.msra.mxu0 %v8239_v33  ;;  %6201 = vmatprep.mubr.msk.bf16.mxu0 %vm584_vm0, %v7270_v56 }
0x212c   : > { %2962 = vmatprep.subr.bf16.mxu0 %v7442_v1 }
0x212f   : > { %2963 = vmatpush1.bf16.msra.mxu0 %v8247_v35 }
0x2130   : > { %2964 = vmatprep.subr.bf16.mxu0 %v7442_v1 }
0x2133   : > { %2965 = vmatpush1.bf16.msra.mxu0 %v8254_v36 }
0x2134   : > { %2966 = vmatprep.subr.bf16.mxu0 %v7442_v1 }
0x2137   : > { %2967 = vmatpush1.bf16.msra.mxu0 %v8261_v37 }
0x2138   : > { %2968 = vmatprep.subr.bf16.mxu0 %v7442_v1 }
0x213b   : > { %2969 = vmatpush1.bf16.msra.mxu0 %v8268_v38 }
0x213c   : > { %2970 = vmatprep.subr.bf16.mxu0 %v7442_v1 }
0x213f   : > { %2971 = vmatpush1.bf16.msra.mxu0 %v8275_v39 }
0x2140   : > { %2972 = vmatprep.subr.bf16.mxu0 %v7442_v1 }
0x2143   : > { %2973 = vmatpush1.bf16.msra.mxu0 %v8314_v58 }
0x2144   : > { %2974 = vmatprep.subr.bf16.mxu0 %v7442_v1 }
0x2147   : > { %2975 = vmatpush1.bf16.msra.mxu0 %v8321_v13 }
0x2148   : > { %2976 = vmatprep.subr.bf16.mxu0 %v7442_v1 }
0x214b   : > { %2977 = vmatpush1.bf16.msra.mxu0 %v8329_v15 }
0x214c   : > { %6566 = vmatprep.subr.bf16.mxu0 %v7443_v34 }
0x214e   : > { %2993 = vmatmul.mubr.bf16.vlgmr.msra.gmra.mrb[72].mxu0 %v7272_v11 }
0x214f   : > { %6568 = vmatprep.mubr.msk.bf16.mxu0 %vm7445_vm1, %v7443_v34  ;;  %6567 = vmatpush3.bf16.msra.mxu0 %v7277_v63 }
0x2150   : > { %3224 = vmatprep.subr.bf16.mxu0 %v7442_v1 }
0x21fd   : > { %v2937_v16 = vpop.f32.mrb[68].mxu0 }
0x21fe   : > { %v2944_v17 = vadd.f32 %v2937_v16, %v2812_v42  ;;  %v6558_v18 = vpop.f32.mrb[69].mxu0 }
0x21ff   : > { %v2940_v19 = vpop.f32.mrb[70].mxu0 }
0x2200   : > { %v2945_v20 = vadd.f32 %v2940_v19, %v2813_v8  ;;  %v6559_v21 = vpop.f32.mrb[71].mxu0 }
0x2221   : > { %v2994_v22 = vpop.f32.mrb[72].mxu0 }
0x2222   : > { %v2995_v23 = vadd.f32 %v8032_v46, %v2994_v22  ;;  %v2996_v24 = vpop.f32.mrb[73].mxu0  ;;  %v7280_v22 = vld [vmem:[%s7610_s27 + $0x140] ss:$8 sps:$4 sm:$0xff]  }
0x2223   : > { %v2997_v25 = vpop.f32.mrb[74].mxu0 }
0x2224   : > { %v2998_v27 = vadd.f32 %v8032_v46, %v2997_v25  ;;  %v2999_v0 = vpop.f32.mrb[75].mxu0  ;;  %v3001_v2 = vmax.f32 %v2995_v23, 0.0 }
0x2226   : > { %v3002_v3 = vmax.f32 %v2998_v27, 0.0 }
0x2228   : > { %v7009_v4 = vpack.i.bf16 %v3002_v3, %v3001_v2 }
0x222a   : > { %7010 = vrot.lane.b32.xlu0 %v7009_v4, %s9369_s16 }
0x229c   : > { %v7011_v7 = vpop.permute.xlu0 %7010 }
0x229d   : > { %v7013_v29 = vunpack.i.h.bf16 %v7011_v7  ;;  %v7012_v31 = vunpack.i.l.bf16 %v7011_v7 }
0x229f   : > { %v3012_v14 = vmax.f32 %v3002_v3, %v7013_v29  ;;  %v3011_v32 = vmax.f32 %v3001_v2, %v7012_v31  ;;  %v8402_v3 = vld [vmem:[%s9367_s2] ss:$0 sm:$0xff] }
0x22a0   : > { %v7281_v31 = vld [vmem:[%s9340_s3 + $0xa0] sm:$0xff]  }
0x22a1   : > { %v7014_v40 = vpack.i.bf16 %v3012_v14, %v3011_v32 }
0x22a3   : > { %7015 = vrot.lane.b32.xlu1 %v7014_v40, %s9368_s25 }
0x2315   : > { %v7016_v41 = vpop.permute.xlu1 %7015 }
0x2316   : > { %v7018_v42 = vunpack.i.h.bf16 %v7016_v41  ;;  %v7017_v43 = vunpack.i.l.bf16 %v7016_v41 }
0x2318   : > { %v3022_v44 = vmax.f32 %v3012_v14, %v7018_v42  ;;  %v3021_v8 = vmax.f32 %v3011_v32, %v7017_v43 }
0x231a   : > { %v3023_v47 = vpack.c.bf16 %v3022_v44, %v3021_v8 }
0x231c   : > { %6563 = vmatmul.mubr.msk.bf16.vlgmr.msra.gmra.mrb[72].mxu1 %vm584_vm0, %v3023_v47 }
0x231d   : > { %3093 = vmatpush1.bf16.msra.mxu1 %v8239_v33  ;;  %6206 = vmatprep.mubr.msk.bf16.mxu1 %vm584_vm0, %v7274_v45 }
0x231e   : > { %3094 = vmatprep.subr.bf16.mxu1 %v7442_v1 }
0x2321   : > { %3095 = vmatpush1.bf16.msra.mxu1 %v8247_v35 }
0x2322   : > { %3096 = vmatprep.subr.bf16.mxu1 %v7442_v1 }
0x2325   : > { %3097 = vmatpush1.bf16.msra.mxu1 %v8254_v36 }
0x2326   : > { %3098 = vmatprep.subr.bf16.mxu1 %v7442_v1 }
0x2329   : > { %3099 = vmatpush1.bf16.msra.mxu1 %v8261_v37 }
0x232a   : > { %3100 = vmatprep.subr.bf16.mxu1 %v7442_v1 }
0x232d   : > { %3101 = vmatpush1.bf16.msra.mxu1 %v8268_v38 }
0x232e   : > { %3102 = vmatprep.subr.bf16.mxu1 %v7442_v1 }
0x2331   : > { %3103 = vmatpush1.bf16.msra.mxu1 %v8275_v39 }
0x2332   : > { %3104 = vmatprep.subr.bf16.mxu1 %v7442_v1 }
0x2335   : > { %3105 = vmatpush1.bf16.msra.mxu1 %v8314_v58 }
0x2336   : > { %3106 = vmatprep.subr.bf16.mxu1 %v7442_v1 }
0x2339   : > { %3107 = vmatpush1.bf16.msra.mxu1 %v8321_v13 }
0x233a   : > { %3108 = vmatprep.subr.bf16.mxu1 %v7442_v1 }
0x233d   : > { %3109 = vmatpush1.bf16.msra.mxu1 %v8329_v15 }
0x233e   : > { %6572 = vmatprep.subr.bf16.mxu1 %v7443_v34 }
0x2340   : > { %3125 = vmatmul.mubr.bf16.vlgmr.msra.gmra.mrb[76].mxu1 %v7276_v28 }
0x2341   : > { %6574 = vmatprep.mubr.msk.bf16.mxu1 %vm7445_vm1, %v7443_v34  ;;  %6573 = vmatpush3.bf16.msra.mxu1 %v7281_v31 }
0x2342   : > { %3356 = vmatprep.subr.bf16.mxu1 %v7442_v1 }
0x23ef   : > { %v3069_v48 = vpop.f32.mrb[72].mxu1 }
0x23f0   : > { %v3076_v49 = vadd.f32 %v3069_v48, %v2944_v17  ;;  %v6564_v30 = vpop.f32.mrb[73].mxu1 }
0x23f1   : > { %v3072_v50 = vpop.f32.mrb[74].mxu1 }
0x23f2   : > { %v3077_v51 = vadd.f32 %v3072_v50, %v2945_v20  ;;  %v6565_v52 = vpop.f32.mrb[75].mxu1  ;;  %v7278_v20 = vld [vmem:[%s7610_s27 + $0x144] ss:$8 sps:$4 sm:$0xff]  }
0x23f3   : > { %v7282_v52 = vld [vmem:[%s7610_s27 + $0x154] ss:$8 sps:$4 sm:$0xff]  }
0x2413   : > { %v3126_v59 = vpop.f32.mrb[76].mxu1 }
0x2414   : > { %v3127_v60 = vadd.f32 %v8032_v46, %v3126_v59  ;;  %v3128_v61 = vpop.f32.mrb[77].mxu1 }
0x2415   : > { %v3129_v62 = vpop.f32.mrb[78].mxu1 }
0x2416   : > { %v3130_v9 = vadd.f32 %v8032_v46, %v3129_v62  ;;  %v3131_v5 = vpop.f32.mrb[79].mxu1  ;;  %v3133_v6 = vmax.f32 %v3127_v60, 0.0  ;;  %v7284_v60 = vld [vmem:[%s7610_s27 + $0x150] ss:$8 sps:$4 sm:$0xff]  }
0x2418   : > { %v3134_v10 = vmax.f32 %v3130_v9, 0.0 }
0x241a   : > { %v7019_v12 = vpack.i.bf16 %v3134_v10, %v3133_v6 }
0x241c   : > { %7020 = vrot.lane.b32.xlu0 %v7019_v12, %s9369_s16 }
0x248e   : > { %v7021_v53 = vpop.permute.xlu0 %7020 }
0x248f   : > { %v7023_v54 = vunpack.i.h.bf16 %v7021_v53  ;;  %v7022_v55 = vunpack.i.l.bf16 %v7021_v53 }
0x2491   : > { %v3144_v56 = vmax.f32 %v3134_v10, %v7023_v54  ;;  %v3143_v57 = vmax.f32 %v3133_v6, %v7022_v55  ;;  %v7285_v55 = vld [vmem:[%s9340_s3 + $0xa8] sm:$0xff]  }
0x2493   : > { %v7024_v11 = vpack.i.bf16 %v3144_v56, %v3143_v57 }
0x2495   : > { %7025 = vrot.lane.b32.xlu1 %v7024_v11, %s9368_s25 }
0x2507   : > { %v7026_v16 = vpop.permute.xlu1 %7025 }
0x2508   : > { %v7028_v46 = vunpack.i.h.bf16 %v7026_v16  ;;  %v7027_v17 = vunpack.i.l.bf16 %v7026_v16 }
0x250a   : > { %v3154_v18 = vmax.f32 %v3144_v56, %v7028_v46  ;;  %v3153_v19 = vmax.f32 %v3143_v57, %v7027_v17 }
0x250c   : > { %v3155_v21 = vpack.c.bf16 %v3154_v18, %v3153_v19 }
0x250e   : > { %6569 = vmatmul.mubr.msk.bf16.vlgmr.msra.gmra.mrb[76].mxu0 %vm584_vm0, %v3155_v21 }
0x250f   : > { %3225 = vmatpush1.bf16.msra.mxu0 %v8239_v33  ;;  %6211 = vmatprep.mubr.msk.bf16.mxu0 %vm584_vm0, %v7278_v20 }
0x2510   : > { %3226 = vmatprep.subr.bf16.mxu0 %v7442_v1 }
0x2513   : > { %3227 = vmatpush1.bf16.msra.mxu0 %v8247_v35 }
0x2514   : > { %3228 = vmatprep.subr.bf16.mxu0 %v7442_v1 }
0x2517   : > { %3229 = vmatpush1.bf16.msra.mxu0 %v8254_v36 }
0x2518   : > { %3230 = vmatprep.subr.bf16.mxu0 %v7442_v1 }
0x251b   : > { %3231 = vmatpush1.bf16.msra.mxu0 %v8261_v37 }
0x251c   : > { %3232 = vmatprep.subr.bf16.mxu0 %v7442_v1 }
0x251f   : > { %3233 = vmatpush1.bf16.msra.mxu0 %v8268_v38 }
0x2520   : > { %3234 = vmatprep.subr.bf16.mxu0 %v7442_v1 }
0x2523   : > { %3235 = vmatpush1.bf16.msra.mxu0 %v8275_v39 }
0x2524   : > { %3236 = vmatprep.subr.bf16.mxu0 %v7442_v1 }
0x2527   : > { %3237 = vmatpush1.bf16.msra.mxu0 %v8314_v58 }
0x2528   : > { %3238 = vmatprep.subr.bf16.mxu0 %v7442_v1 }
0x252b   : > { %3239 = vmatpush1.bf16.msra.mxu0 %v8321_v13 }
0x252c   : > { %3240 = vmatprep.subr.bf16.mxu0 %v7442_v1 }
0x252f   : > { %3241 = vmatpush1.bf16.msra.mxu0 %v8329_v15 }
0x2530   : > { %6578 = vmatprep.subr.bf16.mxu0 %v7443_v34 }
0x2532   : > { %3257 = vmatmul.mubr.bf16.vlgmr.msra.gmra.mrb[80].mxu0 %v7280_v22 }
0x2533   : > { %6580 = vmatprep.mubr.msk.bf16.mxu0 %vm7445_vm1, %v7443_v34  ;;  %6579 = vmatpush3.bf16.msra.mxu0 %v7285_v55 }
0x2534   : > { %3488 = vmatprep.subr.bf16.mxu0 %v7442_v1 }
0x25e1   : > { %v3201_v23 = vpop.f32.mrb[76].mxu0 }
0x25e2   : > { %v3208_v24 = vadd.f32 %v3201_v23, %v3076_v49  ;;  %v6570_v25 = vpop.f32.mrb[77].mxu0 }
0x25e3   : > { %v3204_v26 = vpop.f32.mrb[78].mxu0 }
0x25e4   : > { %v3209_v27 = vadd.f32 %v3204_v26, %v3077_v51  ;;  %v6571_v0 = vpop.f32.mrb[79].mxu0 }
0x25e5   : > { %v7286_v0 = vld [vmem:[%s7610_s27 + $0x164] ss:$8 sps:$4 sm:$0xff]  }
0x2605   : > { %v3258_v2 = vpop.f32.mrb[80].mxu0 }
0x2606   : > { %v3259_v4 = vadd.f32 %v8402_v3, %v3258_v2  ;;  %v3260_v7 = vpop.f32.mrb[81].mxu0 }
0x2607   : > { %v3261_v29 = vpop.f32.mrb[82].mxu0 }
0x2608   : > { %v3262_v14 = vadd.f32 %v8402_v3, %v3261_v29  ;;  %v3263_v32 = vpop.f32.mrb[83].mxu0  ;;  %v3265_v40 = vmax.f32 %v3259_v4, 0.0  ;;  %v7288_v4 = vld [vmem:[%s7610_s27 + $0x160] ss:$8 sps:$4 sm:$0xff]  }
0x260a   : > { %v3266_v41 = vmax.f32 %v3262_v14, 0.0 }
0x260c   : > { %v7029_v42 = vpack.i.bf16 %v3266_v41, %v3265_v40 }
0x260e   : > { %7030 = vrot.lane.b32.xlu0 %v7029_v42, %s9369_s16 }
0x2680   : > { %v7031_v43 = vpop.permute.xlu0 %7030 }
0x2681   : > { %v7033_v44 = vunpack.i.h.bf16 %v7031_v43  ;;  %v7032_v8 = vunpack.i.l.bf16 %v7031_v43 }
0x2683   : > { %v3276_v45 = vmax.f32 %v3266_v41, %v7033_v44  ;;  %v3275_v47 = vmax.f32 %v3265_v40, %v7032_v8  ;;  %v7289_v8 = vld [vmem:[%s9340_s3 + $0xb0] sm:$0xff]  }
0x2685   : > { %v7034_v28 = vpack.i.bf16 %v3276_v45, %v3275_v47 }
0x2687   : > { %7035 = vrot.lane.b32.xlu1 %v7034_v28, %s9368_s25 }
0x26f9   : > { %v7036_v48 = vpop.permute.xlu1 %7035 }
0x26fa   : > { %v7038_v49 = vunpack.i.h.bf16 %v7036_v48  ;;  %v7037_v30 = vunpack.i.l.bf16 %v7036_v48 }
0x26fc   : > { %v3286_v50 = vmax.f32 %v3276_v45, %v7038_v49  ;;  %v3285_v51 = vmax.f32 %v3275_v47, %v7037_v30 }
0x26fe   : > { %v3287_v59 = vpack.c.bf16 %v3286_v50, %v3285_v51 }
0x2700   : > { %6575 = vmatmul.mubr.msk.bf16.vlgmr.msra.gmra.mrb[80].mxu1 %vm584_vm0, %v3287_v59 }
0x2701   : > { %3357 = vmatpush1.bf16.msra.mxu1 %v8239_v33  ;;  %6216 = vmatprep.mubr.msk.bf16.mxu1 %vm584_vm0, %v7282_v52 }
0x2702   : > { %3358 = vmatprep.subr.bf16.mxu1 %v7442_v1 }
0x2705   : > { %3359 = vmatpush1.bf16.msra.mxu1 %v8247_v35 }
0x2706   : > { %3360 = vmatprep.subr.bf16.mxu1 %v7442_v1 }
0x2709   : > { %3361 = vmatpush1.bf16.msra.mxu1 %v8254_v36 }
0x270a   : > { %3362 = vmatprep.subr.bf16.mxu1 %v7442_v1 }
0x270d   : > { %3363 = vmatpush1.bf16.msra.mxu1 %v8261_v37 }
0x270e   : > { %3364 = vmatprep.subr.bf16.mxu1 %v7442_v1 }
0x2711   : > { %3365 = vmatpush1.bf16.msra.mxu1 %v8268_v38 }
0x2712   : > { %3366 = vmatprep.subr.bf16.mxu1 %v7442_v1 }
0x2715   : > { %3367 = vmatpush1.bf16.msra.mxu1 %v8275_v39 }
0x2716   : > { %3368 = vmatprep.subr.bf16.mxu1 %v7442_v1 }
0x2719   : > { %3369 = vmatpush1.bf16.msra.mxu1 %v8314_v58 }
0x271a   : > { %3370 = vmatprep.subr.bf16.mxu1 %v7442_v1 }
0x271d   : > { %3371 = vmatpush1.bf16.msra.mxu1 %v8321_v13 }
0x271e   : > { %3372 = vmatprep.subr.bf16.mxu1 %v7442_v1 }
0x2721   : > { %3373 = vmatpush1.bf16.msra.mxu1 %v8329_v15 }
0x2722   : > { %6584 = vmatprep.subr.bf16.mxu1 %v7443_v34 }
0x2724   : > { %3389 = vmatmul.mubr.bf16.vlgmr.msra.gmra.mrb[84].mxu1 %v7284_v60 }
0x2725   : > { %6586 = vmatprep.mubr.msk.bf16.mxu1 %vm7445_vm1, %v7443_v34  ;;  %6585 = vmatpush3.bf16.msra.mxu1 %v7289_v8 }
0x2726   : > { %3620 = vmatprep.subr.bf16.mxu1 %v7442_v1 }
0x27d3   : > { %v3333_v61 = vpop.f32.mrb[80].mxu1 }
0x27d4   : > { %v3340_v62 = vadd.f32 %v3333_v61, %v3208_v24  ;;  %v6576_v63 = vpop.f32.mrb[81].mxu1 }
0x27d5   : > { %v3336_v9 = vpop.f32.mrb[82].mxu1 }
0x27d6   : > { %v3341_v5 = vadd.f32 %v3336_v9, %v3209_v27  ;;  %v6577_v6 = vpop.f32.mrb[83].mxu1 }
0x27d7   : > { %v7290_v6 = vld [vmem:[%s7610_s27 + $0x174] ss:$8 sps:$4 sm:$0xff]  }
0x27f7   : > { %v3390_v10 = vpop.f32.mrb[84].mxu1 }
0x27f8   : > { %v3391_v12 = vadd.f32 %v8402_v3, %v3390_v10  ;;  %v3392_v53 = vpop.f32.mrb[85].mxu1 }
0x27f9   : > { %v3393_v54 = vpop.f32.mrb[86].mxu1 }
0x27fa   : > { %v3394_v56 = vadd.f32 %v8402_v3, %v3393_v54  ;;  %v3395_v57 = vpop.f32.mrb[87].mxu1  ;;  %v3397_v11 = vmax.f32 %v3391_v12, 0.0  ;;  %v7292_v12 = vld [vmem:[%s7610_s27 + $0x170] ss:$8 sps:$4 sm:$0xff]  }
0x27fc   : > { %v3398_v16 = vmax.f32 %v3394_v56, 0.0 }
0x27fe   : > { %v7039_v46 = vpack.i.bf16 %v3398_v16, %v3397_v11 }
0x2800   : > { %7040 = vrot.lane.b32.xlu0 %v7039_v46, %s9369_s16 }
0x2872   : > { %v7041_v17 = vpop.permute.xlu0 %7040 }
0x2873   : > { %v7043_v18 = vunpack.i.h.bf16 %v7041_v17  ;;  %v7042_v19 = vunpack.i.l.bf16 %v7041_v17 }
0x2875   : > { %v3408_v20 = vmax.f32 %v3398_v16, %v7043_v18  ;;  %v3407_v21 = vmax.f32 %v3397_v11, %v7042_v19  ;;  %v7293_v19 = vld [vmem:[%s9340_s3 + $0xb8] sm:$0xff]  }
0x2877   : > { %v7044_v22 = vpack.i.bf16 %v3408_v20, %v3407_v21 }
0x2879   : > { %7045 = vrot.lane.b32.xlu1 %v7044_v22, %s9368_s25 }
0x28eb   : > { %v7046_v23 = vpop.permute.xlu1 %7045 }
0x28ec   : > { %v7048_v24 = vunpack.i.h.bf16 %v7046_v23  ;;  %v7047_v25 = vunpack.i.l.bf16 %v7046_v23 }
0x28ee   : > { %v3418_v26 = vmax.f32 %v3408_v20, %v7048_v24  ;;  %v3417_v27 = vmax.f32 %v3407_v21, %v7047_v25 }
0x28f0   : > { %v3419_v2 = vpack.c.bf16 %v3418_v26, %v3417_v27 }
0x28f2   : > { %6581 = vmatmul.mubr.msk.bf16.vlgmr.msra.gmra.mrb[84].mxu0 %vm584_vm0, %v3419_v2 }
0x28f3   : > { %3489 = vmatpush1.bf16.msra.mxu0 %v8239_v33  ;;  %6221 = vmatprep.mubr.msk.bf16.mxu0 %vm584_vm0, %v7286_v0 }
0x28f4   : > { %3490 = vmatprep.subr.bf16.mxu0 %v7442_v1 }
0x28f7   : > { %3491 = vmatpush1.bf16.msra.mxu0 %v8247_v35 }
0x28f8   : > { %3492 = vmatprep.subr.bf16.mxu0 %v7442_v1 }
0x28fb   : > { %3493 = vmatpush1.bf16.msra.mxu0 %v8254_v36 }
0x28fc   : > { %3494 = vmatprep.subr.bf16.mxu0 %v7442_v1 }
0x28ff   : > { %3495 = vmatpush1.bf16.msra.mxu0 %v8261_v37 }
0x2900   : > { %3496 = vmatprep.subr.bf16.mxu0 %v7442_v1 }
0x2903   : > { %3497 = vmatpush1.bf16.msra.mxu0 %v8268_v38 }
0x2904   : > { %3498 = vmatprep.subr.bf16.mxu0 %v7442_v1 }
0x2907   : > { %3499 = vmatpush1.bf16.msra.mxu0 %v8275_v39 }
0x2908   : > { %3500 = vmatprep.subr.bf16.mxu0 %v7442_v1 }
0x290b   : > { %3501 = vmatpush1.bf16.msra.mxu0 %v8314_v58 }
0x290c   : > { %3502 = vmatprep.subr.bf16.mxu0 %v7442_v1 }
0x290f   : > { %3503 = vmatpush1.bf16.msra.mxu0 %v8321_v13 }
0x2910   : > { %3504 = vmatprep.subr.bf16.mxu0 %v7442_v1 }
0x2913   : > { %3505 = vmatpush1.bf16.msra.mxu0 %v8329_v15 }
0x2914   : > { %6590 = vmatprep.subr.bf16.mxu0 %v7443_v34 }
0x2916   : > { %3521 = vmatmul.mubr.bf16.vlgmr.msra.gmra.mrb[88].mxu0 %v7288_v4 }
0x2917   : > { %6592 = vmatprep.mubr.msk.bf16.mxu0 %vm7445_vm1, %v7443_v34  ;;  %6591 = vmatpush3.bf16.msra.mxu0 %v7293_v19 }
0x2918   : > { %3752 = vmatprep.subr.bf16.mxu0 %v7442_v1 }
0x29c5   : > { %v3465_v7 = vpop.f32.mrb[84].mxu0 }
0x29c6   : > { %v3472_v29 = vadd.f32 %v3465_v7, %v3340_v62  ;;  %v6582_v31 = vpop.f32.mrb[85].mxu0 }
0x29c7   : > { %v3468_v14 = vpop.f32.mrb[86].mxu0 }
0x29c8   : > { %v3473_v32 = vadd.f32 %v3468_v14, %v3341_v5  ;;  %v6583_v40 = vpop.f32.mrb[87].mxu0 }
0x29c9   : > { %v7294_v40 = vld [vmem:[%s7610_s27 + $0x184] ss:$8 sps:$4 sm:$0xff]  }
0x29e9   : > { %v3522_v41 = vpop.f32.mrb[88].mxu0 }
0x29ea   : > { %v3523_v42 = vadd.f32 %v8402_v3, %v3522_v41  ;;  %v3524_v43 = vpop.f32.mrb[89].mxu0 }
0x29eb   : > { %v3525_v44 = vpop.f32.mrb[90].mxu0 }
0x29ec   : > { %v3526_v45 = vadd.f32 %v8402_v3, %v3525_v44  ;;  %v3527_v47 = vpop.f32.mrb[91].mxu0  ;;  %v3529_v28 = vmax.f32 %v3523_v42, 0.0  ;;  %v7296_v42 = vld [vmem:[%s7610_s27 + $0x180] ss:$8 sps:$4 sm:$0xff]  }
0x29ee   : > { %v3530_v48 = vmax.f32 %v3526_v45, 0.0 }
0x29f0   : > { %v7049_v49 = vpack.i.bf16 %v3530_v48, %v3529_v28 }
0x29f2   : > { %7050 = vrot.lane.b32.xlu0 %v7049_v49, %s9369_s16 }
0x2a64   : > { %v7051_v30 = vpop.permute.xlu0 %7050 }
0x2a65   : > { %v7053_v50 = vunpack.i.h.bf16 %v7051_v30  ;;  %v7052_v51 = vunpack.i.l.bf16 %v7051_v30 }
0x2a67   : > { %v3540_v52 = vmax.f32 %v3530_v48, %v7053_v50  ;;  %v3539_v59 = vmax.f32 %v3529_v28, %v7052_v51  ;;  %v7297_v51 = vld [vmem:[%s9340_s3 + $0xc0] sm:$0xff]  }
0x2a69   : > { %v7054_v60 = vpack.i.bf16 %v3540_v52, %v3539_v59 }
0x2a6b   : > { %7055 = vrot.lane.b32.xlu1 %v7054_v60, %s9368_s25 }
0x2add   : > { %v7056_v61 = vpop.permute.xlu1 %7055 }
0x2ade   : > { %v7058_v62 = vunpack.i.h.bf16 %v7056_v61  ;;  %v7057_v63 = vunpack.i.l.bf16 %v7056_v61 }
0x2ae0   : > { %v3550_v9 = vmax.f32 %v3540_v52, %v7058_v62  ;;  %v3549_v5 = vmax.f32 %v3539_v59, %v7057_v63 }
0x2ae2   : > { %v3551_v10 = vpack.c.bf16 %v3550_v9, %v3549_v5 }
0x2ae4   : > { %6587 = vmatmul.mubr.msk.bf16.vlgmr.msra.gmra.mrb[88].mxu1 %vm584_vm0, %v3551_v10 }
0x2ae5   : > { %3621 = vmatpush1.bf16.msra.mxu1 %v8239_v33  ;;  %6226 = vmatprep.mubr.msk.bf16.mxu1 %vm584_vm0, %v7290_v6 }
0x2ae6   : > { %3622 = vmatprep.subr.bf16.mxu1 %v7442_v1 }
0x2ae9   : > { %3623 = vmatpush1.bf16.msra.mxu1 %v8247_v35 }
0x2aea   : > { %3624 = vmatprep.subr.bf16.mxu1 %v7442_v1 }
0x2aed   : > { %3625 = vmatpush1.bf16.msra.mxu1 %v8254_v36 }
0x2aee   : > { %3626 = vmatprep.subr.bf16.mxu1 %v7442_v1 }
0x2af1   : > { %3627 = vmatpush1.bf16.msra.mxu1 %v8261_v37 }
0x2af2   : > { %3628 = vmatprep.subr.bf16.mxu1 %v7442_v1 }
0x2af5   : > { %3629 = vmatpush1.bf16.msra.mxu1 %v8268_v38 }
0x2af6   : > { %3630 = vmatprep.subr.bf16.mxu1 %v7442_v1 }
0x2af9   : > { %3631 = vmatpush1.bf16.msra.mxu1 %v8275_v39 }
0x2afa   : > { %3632 = vmatprep.subr.bf16.mxu1 %v7442_v1 }
0x2afd   : > { %3633 = vmatpush1.bf16.msra.mxu1 %v8314_v58 }
0x2afe   : > { %3634 = vmatprep.subr.bf16.mxu1 %v7442_v1 }
0x2b01   : > { %3635 = vmatpush1.bf16.msra.mxu1 %v8321_v13 }
0x2b02   : > { %3636 = vmatprep.subr.bf16.mxu1 %v7442_v1 }
0x2b05   : > { %3637 = vmatpush1.bf16.msra.mxu1 %v8329_v15 }
0x2b06   : > { %6596 = vmatprep.subr.bf16.mxu1 %v7443_v34 }
0x2b08   : > { %3653 = vmatmul.mubr.bf16.vlgmr.msra.gmra.mrb[92].mxu1 %v7292_v12 }
0x2b09   : > { %6598 = vmatprep.mubr.msk.bf16.mxu1 %vm7445_vm1, %v7443_v34  ;;  %6597 = vmatpush3.bf16.msra.mxu1 %v7297_v51 }
0x2b0a   : > { %3884 = vmatprep.subr.bf16.mxu1 %v7442_v1 }
0x2bb7   : > { %v3597_v53 = vpop.f32.mrb[88].mxu1 }
0x2bb8   : > { %v3604_v54 = vadd.f32 %v3597_v53, %v3472_v29  ;;  %v6588_v55 = vpop.f32.mrb[89].mxu1 }
0x2bb9   : > { %v3600_v56 = vpop.f32.mrb[90].mxu1 }
0x2bba   : > { %v3605_v57 = vadd.f32 %v3600_v56, %v3473_v32  ;;  %v6589_v11 = vpop.f32.mrb[91].mxu1 }
0x2bbb   : > { %v7298_v11 = vld [vmem:[%s7610_s27 + $0x194] ss:$8 sps:$4 sm:$0xff]  }
0x2bdb   : > { %v3654_v16 = vpop.f32.mrb[92].mxu1 }
0x2bdc   : > { %v3655_v46 = vadd.f32 %v8402_v3, %v3654_v16  ;;  %v3656_v17 = vpop.f32.mrb[93].mxu1 }
0x2bdd   : > { %v3657_v18 = vpop.f32.mrb[94].mxu1 }
0x2bde   : > { %v3658_v20 = vadd.f32 %v8402_v3, %v3657_v18  ;;  %v3659_v21 = vpop.f32.mrb[95].mxu1  ;;  %v3661_v22 = vmax.f32 %v3655_v46, 0.0  ;;  %v7300_v46 = vld [vmem:[%s7610_s27 + $0x190] ss:$8 sps:$4 sm:$0xff]  }
0x2be0   : > { %v3662_v23 = vmax.f32 %v3658_v20, 0.0 }
0x2be2   : > { %v7059_v24 = vpack.i.bf16 %v3662_v23, %v3661_v22 }
0x2be4   : > { %7060 = vrot.lane.b32.xlu0 %v7059_v24, %s9369_s16 }
0x2c56   : > { %v7061_v25 = vpop.permute.xlu0 %7060 }
0x2c57   : > { %v7063_v26 = vunpack.i.h.bf16 %v7061_v25  ;;  %v7062_v27 = vunpack.i.l.bf16 %v7061_v25 }
0x2c59   : > { %v3672_v0 = vmax.f32 %v3662_v23, %v7063_v26  ;;  %v3671_v2 = vmax.f32 %v3661_v22, %v7062_v27  ;;  %v7301_v27 = vld [vmem:[%s9340_s3 + $0xc8] sm:$0xff]  }
0x2c5b   : > { %v7064_v4 = vpack.i.bf16 %v3672_v0, %v3671_v2 }
0x2c5d   : > { %7065 = vrot.lane.b32.xlu1 %v7064_v4, %s9368_s25 }
0x2ccf   : > { %v7066_v7 = vpop.permute.xlu1 %7065 }
0x2cd0   : > { %v7068_v29 = vunpack.i.h.bf16 %v7066_v7  ;;  %v7067_v31 = vunpack.i.l.bf16 %v7066_v7 }
0x2cd2   : > { %v3682_v14 = vmax.f32 %v3672_v0, %v7068_v29  ;;  %v3681_v32 = vmax.f32 %v3671_v2, %v7067_v31 }
0x2cd4   : > { %v3683_v41 = vpack.c.bf16 %v3682_v14, %v3681_v32 }
0x2cd6   : > { %6593 = vmatmul.mubr.msk.bf16.vlgmr.msra.gmra.mrb[92].mxu0 %vm584_vm0, %v3683_v41 }
0x2cd7   : > { %3753 = vmatpush1.bf16.msra.mxu0 %v8239_v33  ;;  %6231 = vmatprep.mubr.msk.bf16.mxu0 %vm584_vm0, %v7294_v40 }
0x2cd8   : > { %3754 = vmatprep.subr.bf16.mxu0 %v7442_v1 }
0x2cdb   : > { %3755 = vmatpush1.bf16.msra.mxu0 %v8247_v35 }
0x2cdc   : > { %3756 = vmatprep.subr.bf16.mxu0 %v7442_v1 }
0x2cdf   : > { %3757 = vmatpush1.bf16.msra.mxu0 %v8254_v36 }
0x2ce0   : > { %3758 = vmatprep.subr.bf16.mxu0 %v7442_v1 }
0x2ce3   : > { %3759 = vmatpush1.bf16.msra.mxu0 %v8261_v37 }
0x2ce4   : > { %3760 = vmatprep.subr.bf16.mxu0 %v7442_v1 }
0x2ce7   : > { %3761 = vmatpush1.bf16.msra.mxu0 %v8268_v38 }
0x2ce8   : > { %3762 = vmatprep.subr.bf16.mxu0 %v7442_v1 }
0x2ceb   : > { %3763 = vmatpush1.bf16.msra.mxu0 %v8275_v39 }
0x2cec   : > { %3764 = vmatprep.subr.bf16.mxu0 %v7442_v1 }
0x2cef   : > { %3765 = vmatpush1.bf16.msra.mxu0 %v8314_v58 }
0x2cf0   : > { %3766 = vmatprep.subr.bf16.mxu0 %v7442_v1 }
0x2cf3   : > { %3767 = vmatpush1.bf16.msra.mxu0 %v8321_v13 }
0x2cf4   : > { %3768 = vmatprep.subr.bf16.mxu0 %v7442_v1 }
0x2cf7   : > { %3769 = vmatpush1.bf16.msra.mxu0 %v8329_v15 }
0x2cf8   : > { %6602 = vmatprep.subr.bf16.mxu0 %v7443_v34 }
0x2cfa   : > { %3785 = vmatmul.mubr.bf16.vlgmr.msra.gmra.mrb[96].mxu0 %v7296_v42 }
0x2cfb   : > { %6604 = vmatprep.mubr.msk.bf16.mxu0 %vm7445_vm1, %v7443_v34  ;;  %6603 = vmatpush3.bf16.msra.mxu0 %v7301_v27 }
0x2cfc   : > { %4016 = vmatprep.subr.bf16.mxu0 %v7442_v1 }
0x2da9   : > { %v3729_v43 = vpop.f32.mrb[92].mxu0 }
0x2daa   : > { %v3736_v44 = vadd.f32 %v3729_v43, %v3604_v54  ;;  %v6594_v8 = vpop.f32.mrb[93].mxu0 }
0x2dab   : > { %v3732_v45 = vpop.f32.mrb[94].mxu0 }
0x2dac   : > { %v3737_v47 = vadd.f32 %v3732_v45, %v3605_v57  ;;  %v6595_v28 = vpop.f32.mrb[95].mxu0 }
0x2dad   : > { %v7302_v28 = vld [vmem:[%s7610_s27 + $0x1a4] ss:$8 sps:$4 sm:$0xff]  }
0x2dcd   : > { %v3786_v48 = vpop.f32.mrb[96].mxu0 }
0x2dce   : > { %v3787_v49 = vadd.f32 %v8402_v3, %v3786_v48  ;;  %v3788_v30 = vpop.f32.mrb[97].mxu0 }
0x2dcf   : > { %v3789_v50 = vpop.f32.mrb[98].mxu0 }
0x2dd0   : > { %v3790_v52 = vadd.f32 %v8402_v3, %v3789_v50  ;;  %v3791_v59 = vpop.f32.mrb[99].mxu0  ;;  %v3793_v60 = vmax.f32 %v3787_v49, 0.0 }
0x2dd1   : > { %v7305_v59 = vld [vmem:[%s9340_s3 + $0xd0] sm:$0xff]  }
0x2dd2   : > { %v3794_v61 = vmax.f32 %v3790_v52, 0.0 }
0x2dd4   : > { %v7069_v62 = vpack.i.bf16 %v3794_v61, %v3793_v60 }
0x2dd6   : > { %7070 = vrot.lane.b32.xlu0 %v7069_v62, %s9369_s16 }
0x2e48   : > { %v7071_v63 = vpop.permute.xlu0 %7070 }
0x2e49   : > { %v7073_v9 = vunpack.i.h.bf16 %v7071_v63  ;;  %v7072_v5 = vunpack.i.l.bf16 %v7071_v63 }
0x2e4b   : > { %v3804_v6 = vmax.f32 %v3794_v61, %v7073_v9  ;;  %v3803_v10 = vmax.f32 %v3793_v60, %v7072_v5 }
0x2e4d   : > { %v7074_v12 = vpack.i.bf16 %v3804_v6, %v3803_v10 }
0x2e4f   : > { %7075 = vrot.lane.b32.xlu1 %v7074_v12, %s9368_s25 }
0x2ec1   : > { %v7076_v53 = vpop.permute.xlu1 %7075 }
0x2ec2   : > { %v7078_v54 = vunpack.i.h.bf16 %v7076_v53  ;;  %v7077_v55 = vunpack.i.l.bf16 %v7076_v53 }
0x2ec4   : > { %v3814_v56 = vmax.f32 %v3804_v6, %v7078_v54  ;;  %v3813_v57 = vmax.f32 %v3803_v10, %v7077_v55 }
0x2ec6   : > { %v3815_v16 = vpack.c.bf16 %v3814_v56, %v3813_v57 }
0x2ec8   : > { %6599 = vmatmul.mubr.msk.bf16.vlgmr.msra.gmra.mrb[96].mxu1 %vm584_vm0, %v3815_v16 }
0x2ec9   : > { %3885 = vmatpush1.bf16.msra.mxu1 %v8239_v33  ;;  %6236 = vmatprep.mubr.msk.bf16.mxu1 %vm584_vm0, %v7298_v11 }
0x2eca   : > { %3886 = vmatprep.subr.bf16.mxu1 %v7442_v1 }
0x2ecd   : > { %3887 = vmatpush1.bf16.msra.mxu1 %v8247_v35 }
0x2ece   : > { %3888 = vmatprep.subr.bf16.mxu1 %v7442_v1 }
0x2ed1   : > { %3889 = vmatpush1.bf16.msra.mxu1 %v8254_v36 }
0x2ed2   : > { %3890 = vmatprep.subr.bf16.mxu1 %v7442_v1 }
0x2ed5   : > { %3891 = vmatpush1.bf16.msra.mxu1 %v8261_v37 }
0x2ed6   : > { %3892 = vmatprep.subr.bf16.mxu1 %v7442_v1 }
0x2ed9   : > { %3893 = vmatpush1.bf16.msra.mxu1 %v8268_v38 }
0x2eda   : > { %3894 = vmatprep.subr.bf16.mxu1 %v7442_v1 }
0x2edd   : > { %3895 = vmatpush1.bf16.msra.mxu1 %v8275_v39 }
0x2ede   : > { %3896 = vmatprep.subr.bf16.mxu1 %v7442_v1 }
0x2ee1   : > { %3897 = vmatpush1.bf16.msra.mxu1 %v8314_v58 }
0x2ee2   : > { %3898 = vmatprep.subr.bf16.mxu1 %v7442_v1 }
0x2ee5   : > { %3899 = vmatpush1.bf16.msra.mxu1 %v8321_v13 }
0x2ee6   : > { %3900 = vmatprep.subr.bf16.mxu1 %v7442_v1 }
0x2ee9   : > { %3901 = vmatpush1.bf16.msra.mxu1 %v8329_v15 }
0x2eea   : > { %6608 = vmatprep.subr.bf16.mxu1 %v7443_v34 }
0x2eec   : > { %3917 = vmatmul.mubr.bf16.vlgmr.msra.gmra.mrb[100].mxu1 %v7300_v46  ;;  %v7306_v46 = vld [vmem:[%s7610_s27 + $0x1b4] ss:$8 sps:$4 sm:$0xff]  }
0x2eed   : > { %6610 = vmatprep.mubr.msk.bf16.mxu1 %vm7445_vm1, %v7443_v34  ;;  %6609 = vmatpush3.bf16.msra.mxu1 %v7305_v59 }
0x2eee   : > { %4148 = vmatprep.subr.bf16.mxu1 %v7442_v1 }
0x2f9b   : > { %v3861_v17 = vpop.f32.mrb[96].mxu1 }
0x2f9c   : > { %v3868_v18 = vadd.f32 %v3861_v17, %v3736_v44  ;;  %v6600_v19 = vpop.f32.mrb[97].mxu1 }
0x2f9d   : > { %v3864_v20 = vpop.f32.mrb[98].mxu1  ;;  %v8617_v19 = vld [vmem:[%s9365_s1 + $0x8] sm:$0xff]  }
0x2f9e   : > { %v3869_v21 = vadd.f32 %v3864_v20, %v3737_v47  ;;  %v6601_v22 = vpop.f32.mrb[99].mxu1  ;;  %v8624_v20 = vld [vmem:[%s9365_s1 + $0x10] sm:$0xff]  }
0x2f9f   : > { %v8638_v22 = vld [vmem:[%s9365_s1 + $0x20] sm:$0xff]  }
0x2fbf   : > { %v3918_v23 = vpop.f32.mrb[100].mxu1 }
0x2fc0   : > { %v3919_v24 = vadd.f32 %v8402_v3, %v3918_v23  ;;  %v3920_v25 = vpop.f32.mrb[101].mxu1  ;;  %v8645_v23 = vld [vmem:[%s9365_s1 + $0x28] sm:$0xff]  }
0x2fc1   : > { %v3921_v26 = vpop.f32.mrb[102].mxu1 }
0x2fc2   : > { %v3922_v0 = vadd.f32 %v8402_v3, %v3921_v26  ;;  %v3923_v2 = vpop.f32.mrb[103].mxu1  ;;  %v3925_v4 = vmax.f32 %v3919_v24, 0.0  ;;  %v7308_v24 = vld [vmem:[%s7610_s27 + $0x1b0] ss:$8 sps:$4 sm:$0xff]  }
0x2fc4   : > { %v3926_v7 = vmax.f32 %v3922_v0, 0.0 }
0x2fc6   : > { %v7079_v29 = vpack.i.bf16 %v3926_v7, %v3925_v4 }
0x2fc8   : > { %7080 = vrot.lane.b32.xlu0 %v7079_v29, %s9369_s16 }
0x303a   : > { %v7081_v31 = vpop.permute.xlu0 %7080 }
0x303b   : > { %v7083_v14 = vunpack.i.h.bf16 %v7081_v31  ;;  %v7082_v32 = vunpack.i.l.bf16 %v7081_v31 }
0x303d   : > { %v3936_v40 = vmax.f32 %v3926_v7, %v7083_v14  ;;  %v3935_v41 = vmax.f32 %v3925_v4, %v7082_v32 }
0x303f   : > { %v7084_v42 = vpack.i.bf16 %v3936_v40, %v3935_v41 }
0x3041   : > { %7085 = vrot.lane.b32.xlu1 %v7084_v42, %s9368_s25 }
0x30b3   : > { %v7086_v43 = vpop.permute.xlu1 %7085 }
0x30b4   : > { %v7088_v44 = vunpack.i.h.bf16 %v7086_v43  ;;  %v7087_v8 = vunpack.i.l.bf16 %v7086_v43 }
0x30b6   : > { %v3946_v45 = vmax.f32 %v3936_v40, %v7088_v44  ;;  %v3945_v47 = vmax.f32 %v3935_v41, %v7087_v8 }
0x30b8   : > { %v3947_v48 = vpack.c.bf16 %v3946_v45, %v3945_v47 }
0x30ba   : > { %6605 = vmatmul.mubr.msk.bf16.vlgmr.msra.gmra.mrb[100].mxu0 %vm584_vm0, %v3947_v48 }
0x30bb   : > { %4017 = vmatpush1.bf16.msra.mxu0 %v8239_v33  ;;  %6241 = vmatprep.mubr.msk.bf16.mxu0 %vm584_vm0, %v7302_v28  ;;  %v7304_v33 = vld [vmem:[%s7610_s27 + $0x1a0] ss:$8 sps:$4 sm:$0xff]  }
0x30bc   : > { %4018 = vmatprep.subr.bf16.mxu0 %v7442_v1 }
0x30bf   : > { %4019 = vmatpush1.bf16.msra.mxu0 %v8247_v35 }
0x30c0   : > { %4020 = vmatprep.subr.bf16.mxu0 %v7442_v1 }
0x30c3   : > { %4021 = vmatpush1.bf16.msra.mxu0 %v8254_v36 }
0x30c4   : > { %4022 = vmatprep.subr.bf16.mxu0 %v7442_v1 }
0x30c7   : > { %4023 = vmatpush1.bf16.msra.mxu0 %v8261_v37 }
0x30c8   : > { %4024 = vmatprep.subr.bf16.mxu0 %v7442_v1 }
0x30cb   : > { %4025 = vmatpush1.bf16.msra.mxu0 %v8268_v38 }
0x30cc   : > { %4026 = vmatprep.subr.bf16.mxu0 %v7442_v1 }
0x30cf   : > { %4027 = vmatpush1.bf16.msra.mxu0 %v8275_v39 }
0x30d0   : > { %4028 = vmatprep.subr.bf16.mxu0 %v7442_v1 }
0x30d3   : > { %4029 = vmatpush1.bf16.msra.mxu0 %v8314_v58 }
0x30d4   : > { %4030 = vmatprep.subr.bf16.mxu0 %v7442_v1 }
0x30d7   : > { %4031 = vmatpush1.bf16.msra.mxu0 %v8321_v13 }
0x30d8   : > { %4032 = vmatprep.subr.bf16.mxu0 %v7442_v1 }
0x30db   : > { %4033 = vmatpush1.bf16.msra.mxu0 %v8329_v15 }
0x30dc   : > { %6614 = vmatprep.subr.bf16.mxu0 %v7443_v34 }
0x30de   : > { %4049 = vmatmul.mubr.bf16.vlgmr.msra.gmra.mrb[104].mxu0 %v7304_v33 }
0x30df   : > { %6616 = vmatprep.mubr.msk.bf16.mxu0 %vm7445_vm1, %v7443_v34 }
0x318d   : > { %v3993_v35 = vpop.f32.mrb[100].mxu0 }
0x318e   : > { %v4000_v36 = vadd.f32 %v3993_v35, %v3868_v18  ;;  %v6606_v37 = vpop.f32.mrb[101].mxu0  ;;  %v8609_v18 = vld [vmem:[%s9365_s1] sm:$0xff]  }
0x318f   : > { %v3996_v38 = vpop.f32.mrb[102].mxu0  ;;  %v7310_v37 = vld [vmem:[%s7610_s27 + $0x1c4] ss:$8 sps:$4 sm:$0xff]  }
0x3190   : > { %v4001_v39 = vadd.f32 %v3996_v38, %v3869_v21  ;;  %v6607_v49 = vpop.f32.mrb[103].mxu0  ;;  %v8631_v21 = vld [vmem:[%s9365_s1 + $0x18] sm:$0xff]  }
0x3191   : > { %v8691_v49 = vld [vmem:[%s9365_s1 + $0x38] sm:$0xff]  }
0x31b1   : > { %v4050_v30 = vpop.f32.mrb[104].mxu0 }
0x31b2   : > { %v4051_v50 = vadd.f32 %v8402_v3, %v4050_v30  ;;  %v4052_v51 = vpop.f32.mrb[105].mxu0  ;;  %v7312_v30 = vld [vmem:[%s7610_s27 + $0x1c0] ss:$8 sps:$4 sm:$0xff]  }
0x31b3   : > { %v4053_v52 = vpop.f32.mrb[106].mxu0 }
0x31b4   : > { %v4054_v60 = vadd.f32 %v8402_v3, %v4053_v52  ;;  %v4055_v61 = vpop.f32.mrb[107].mxu0  ;;  %v4057_v62 = vmax.f32 %v4051_v50, 0.0  ;;  %v8699_v50 = vld [vmem:[%s9365_s1 + $0x40] sm:$0xff]  }
0x31b6   : > { %v4058_v63 = vmax.f32 %v4054_v60, 0.0 }
0x31b8   : > { %v7089_v9 = vpack.i.bf16 %v4058_v63, %v4057_v62 }
0x31ba   : > { %7090 = vrot.lane.b32.xlu0 %v7089_v9, %s9369_s16 }
0x322c   : > { %v7091_v5 = vpop.permute.xlu0 %7090 }
0x322d   : > { %v7093_v6 = vunpack.i.h.bf16 %v7091_v5  ;;  %v7092_v10 = vunpack.i.l.bf16 %v7091_v5 }
0x322f   : > { %v4068_v12 = vmax.f32 %v4058_v63, %v7093_v6  ;;  %v4067_v53 = vmax.f32 %v4057_v62, %v7092_v10  ;;  %v7313_v10 = vld [vmem:[%s9340_s3 + $0xe0] sm:$0xff]  }
0x3231   : > { %v7094_v54 = vpack.i.bf16 %v4068_v12, %v4067_v53 }
0x3233   : > { %7095 = vrot.lane.b32.xlu1 %v7094_v54, %s9368_s25 }
0x32a5   : > { %v7096_v55 = vpop.permute.xlu1 %7095 }
0x32a6   : > { %v7098_v56 = vunpack.i.h.bf16 %v7096_v55  ;;  %v7097_v57 = vunpack.i.l.bf16 %v7096_v55 }
0x32a8   : > { %v4078_v11 = vmax.f32 %v4068_v12, %v7098_v56  ;;  %v4077_v16 = vmax.f32 %v4067_v53, %v7097_v57 }
0x32aa   : > { %v4079_v17 = vpack.c.bf16 %v4078_v11, %v4077_v16 }
0x32ac   : > { %6611 = vmatmul.mubr.msk.bf16.vlgmr.msra.gmra.mrb[104].mxu1 %vm584_vm0, %v4079_v17 }
0x32ad   : > { %4149 = vmatpush1.bf16.msra.mxu1 %v8609_v18  ;;  %6246 = vmatprep.mubr.msk.bf16.mxu1 %vm584_vm0, %v7306_v46 }
0x32ae   : > { %4150 = vmatprep.subr.bf16.mxu1 %v7442_v1 }
0x32b1   : > { %4151 = vmatpush1.bf16.msra.mxu1 %v8617_v19 }
0x32b2   : > { %4152 = vmatprep.subr.bf16.mxu1 %v7442_v1 }
0x32b5   : > { %4153 = vmatpush1.bf16.msra.mxu1 %v8624_v20 }
0x32b6   : > { %4154 = vmatprep.subr.bf16.mxu1 %v7442_v1 }
0x32b9   : > { %4155 = vmatpush1.bf16.msra.mxu1 %v8631_v21 }
0x32ba   : > { %4156 = vmatprep.subr.bf16.mxu1 %v7442_v1 }
0x32bd   : > { %4157 = vmatpush1.bf16.msra.mxu1 %v8638_v22 }
0x32be   : > { %4158 = vmatprep.subr.bf16.mxu1 %v7442_v1 }
0x32c1   : > { %4159 = vmatpush1.bf16.msra.mxu1 %v8645_v23 }
0x32c2   : > { %4160 = vmatprep.subr.bf16.mxu1 %v7442_v1 }
0x32c5   : > { %4161 = vmatpush1.bf16.msra.mxu1 %v8314_v58 }
0x32c6   : > { %4162 = vmatprep.subr.bf16.mxu1 %v7442_v1 }
0x32c9   : > { %4163 = vmatpush1.bf16.msra.mxu1 %v8321_v13 }
0x32ca   : > { %4164 = vmatprep.subr.bf16.mxu1 %v7442_v1 }
0x32cd   : > { %4165 = vmatpush1.bf16.msra.mxu1 %v8329_v15  ;;  %v7309_v15 = vld [vmem:[%s9340_s3 + $0xd8] sm:$0xff]  }
0x32ce   : > { %6620 = vmatprep.subr.bf16.mxu1 %v7443_v34  ;;  %6615 = vmatpush3.bf16.msra.mxu0 %v7309_v15 }
0x32cf   : > { %4280 = vmatprep.subr.bf16.mxu0 %v7442_v1 }
0x32d0   : > { %4181 = vmatmul.mubr.bf16.vlgmr.msra.gmra.mrb[108].mxu1 %v7308_v24 }
0x32d1   : > { %6622 = vmatprep.mubr.msk.bf16.mxu1 %vm7445_vm1, %v7443_v34  ;;  %6621 = vmatpush3.bf16.msra.mxu1 %v7313_v10 }
0x32d2   : > { %4412 = vmatprep.subr.bf16.mxu1 %v7442_v1 }
0x337f   : > { %v4125_v25 = vpop.f32.mrb[104].mxu1 }
0x3380   : > { %v4132_v26 = vadd.f32 %v4125_v25, %v4000_v36  ;;  %v6612_v27 = vpop.f32.mrb[105].mxu1 }
0x3381   : > { %v4128_v0 = vpop.f32.mrb[106].mxu1 }
0x3382   : > { %v4133_v58 = vadd.f32 %v4128_v0, %v4001_v39  ;;  %v6613_v2 = vpop.f32.mrb[107].mxu1  ;;  %v8684_v39 = vld [vmem:[%s9365_s1 + $0x30] sm:$0xff]   ;;  %s9294_s1 = scalar_lea.hbm %s9352_s15, %s6293_s17 }
0x3383   : > { %v7314_v2 = vld [vmem:[%s7610_s27 + $0x1d4] ss:$8 sps:$4 sm:$0xff]  }
0x33a3   : > { %v4182_v4 = vpop.f32.mrb[108].mxu1 }
0x33a4   : > { %v4183_v13 = vadd.f32 %v8402_v3, %v4182_v4  ;;  %v4184_v7 = vpop.f32.mrb[109].mxu1 }
0x33a5   : > { %v4185_v29 = vpop.f32.mrb[110].mxu1 }
0x33a6   : > { %v4186_v31 = vadd.f32 %v8402_v3, %v4185_v29  ;;  %v4187_v14 = vpop.f32.mrb[111].mxu1  ;;  %v4189_v32 = vmax.f32 %v4183_v13, 0.0  ;;  %v7316_v13 = vld [vmem:[%s7610_s27 + $0x1d0] ss:$8 sps:$4 sm:$0xff]  }
0x33a8   : > { %v4190_v40 = vmax.f32 %v4186_v31, 0.0 }
0x33aa   : > { %v7099_v41 = vpack.i.bf16 %v4190_v40, %v4189_v32 }
0x33ac   : > { %7100 = vrot.lane.b32.xlu0 %v7099_v41, %s9369_s16 }
0x341e   : > { %v7101_v42 = vpop.permute.xlu0 %7100 }
0x341f   : > { %v7103_v43 = vunpack.i.h.bf16 %v7101_v42  ;;  %v7102_v44 = vunpack.i.l.bf16 %v7101_v42 }
0x3421   : > { %v4200_v8 = vmax.f32 %v4190_v40, %v7103_v43  ;;  %v4199_v45 = vmax.f32 %v4189_v32, %v7102_v44  ;;  %v7317_v44 = vld [vmem:[%s9340_s3 + $0xe8] sm:$0xff]  }
0x3423   : > { %v7104_v47 = vpack.i.bf16 %v4200_v8, %v4199_v45 }
0x3425   : > { %7105 = vrot.lane.b32.xlu1 %v7104_v47, %s9368_s25 }
0x3497   : > { %v7106_v28 = vpop.permute.xlu1 %7105 }
0x3498   : > { %v7108_v48 = vunpack.i.h.bf16 %v7106_v28  ;;  %v7107_v33 = vunpack.i.l.bf16 %v7106_v28 }
0x349a   : > { %v4210_v35 = vmax.f32 %v4200_v8, %v7108_v48  ;;  %v4209_v36 = vmax.f32 %v4199_v45, %v7107_v33 }
0x349c   : > { %v4211_v38 = vpack.c.bf16 %v4210_v35, %v4209_v36 }
0x349e   : > { %6617 = vmatmul.mubr.msk.bf16.vlgmr.msra.gmra.mrb[108].mxu0 %vm584_vm0, %v4211_v38 }
0x349f   : > { %4281 = vmatpush1.bf16.msra.mxu0 %v8609_v18  ;;  %6251 = vmatprep.mubr.msk.bf16.mxu0 %vm584_vm0, %v7310_v37 }
0x34a0   : > { %4282 = vmatprep.subr.bf16.mxu0 %v7442_v1 }
0x34a3   : > { %4283 = vmatpush1.bf16.msra.mxu0 %v8617_v19 }
0x34a4   : > { %4284 = vmatprep.subr.bf16.mxu0 %v7442_v1 }
0x34a7   : > { %4285 = vmatpush1.bf16.msra.mxu0 %v8624_v20 }
0x34a8   : > { %4286 = vmatprep.subr.bf16.mxu0 %v7442_v1 }
0x34ab   : > { %4287 = vmatpush1.bf16.msra.mxu0 %v8631_v21 }
0x34ac   : > { %4288 = vmatprep.subr.bf16.mxu0 %v7442_v1 }
0x34af   : > { %4289 = vmatpush1.bf16.msra.mxu0 %v8638_v22 }
0x34b0   : > { %4290 = vmatprep.subr.bf16.mxu0 %v7442_v1 }
0x34b3   : > { %4291 = vmatpush1.bf16.msra.mxu0 %v8645_v23 }
0x34b4   : > { %4292 = vmatprep.subr.bf16.mxu0 %v7442_v1 }
0x34b7   : > { %4293 = vmatpush1.bf16.msra.mxu0 %v8684_v39 }
0x34b8   : > { %4294 = vmatprep.subr.bf16.mxu0 %v7442_v1 }
0x34bb   : > { %4295 = vmatpush1.bf16.msra.mxu0 %v8691_v49 }
0x34bc   : > { %4296 = vmatprep.subr.bf16.mxu0 %v7442_v1 }
0x34bf   : > { %4297 = vmatpush1.bf16.msra.mxu0 %v8699_v50 }
0x34c0   : > { %6626 = vmatprep.subr.bf16.mxu0 %v7443_v34 }
0x34c2   : > { %4313 = vmatmul.mubr.bf16.vlgmr.msra.gmra.mrb[112].mxu0 %v7312_v30 }
0x34c3   : > { %6628 = vmatprep.mubr.msk.bf16.mxu0 %vm7445_vm1, %v7443_v34  ;;  %6627 = vmatpush3.bf16.msra.mxu0 %v7317_v44 }
0x34c4   : > { %4544 = vmatprep.subr.bf16.mxu0 %v7442_v1 }
0x3571   : > { %v4257_v51 = vpop.f32.mrb[108].mxu0 }
0x3572   : > { %v4264_v52 = vadd.f32 %v4257_v51, %v4132_v26  ;;  %v6618_v59 = vpop.f32.mrb[109].mxu0 }
0x3573   : > { %v4260_v60 = vpop.f32.mrb[110].mxu0 }
0x3574   : > { %v4265_v61 = vadd.f32 %v4260_v60, %v4133_v58  ;;  %v6619_v62 = vpop.f32.mrb[111].mxu0 }
0x3595   : > { %v4314_v63 = vpop.f32.mrb[112].mxu0 }
0x3596   : > { %v4315_v9 = vadd.f32 %v8402_v3, %v4314_v63  ;;  %v4316_v5 = vpop.f32.mrb[113].mxu0  ;;  %v7320_v63 = vld [vmem:[%s7610_s27 + $0x1e0] ss:$8 sps:$4 sm:$0xff]  }
0x3597   : > { %v4317_v6 = vpop.f32.mrb[114].mxu0 }
0x3598   : > { %v4318_v12 = vadd.f32 %v8402_v3, %v4317_v6  ;;  %v4319_v53 = vpop.f32.mrb[115].mxu0  ;;  %v4321_v54 = vmax.f32 %v4315_v9, 0.0 }
0x359a   : > { %v4322_v55 = vmax.f32 %v4318_v12, 0.0 }
0x359c   : > { %v7109_v56 = vpack.i.bf16 %v4322_v55, %v4321_v54 }
0x359e   : > { %7110 = vrot.lane.b32.xlu0 %v7109_v56, %s9369_s16 }
0x3610   : > { %v7111_v57 = vpop.permute.xlu0 %7110 }
0x3611   : > { %v7113_v11 = vunpack.i.h.bf16 %v7111_v57  ;;  %v7112_v16 = vunpack.i.l.bf16 %v7111_v57 }
0x3613   : > { %v4332_v46 = vmax.f32 %v4322_v55, %v7113_v11  ;;  %v4331_v17 = vmax.f32 %v4321_v54, %v7112_v16  ;;  %v8772_v55 = vld [vmem:[%s9367_s2] ss:$0 sm:$0xff]  ;;  %v7321_v16 = vld [vmem:[%s9340_s3 + $0xf0] sm:$0xff]   ;;  %s7378_s2 = scalar_lea.vmem %s9296_s23, 16 }
0x3614   : > { %p7379_p11 = scmp.ne.s32.totalorder %s9296_s23, %s7378_s2 }
0x3615   : > { %v7114_v24 = vpack.i.bf16 %v4332_v46, %v4331_v17 }
0x3616   : > { %p7380_p12 = pnand %p7379_p11, %p7570_p5 }
0x3617   : > { %7115 = vrot.lane.b32.xlu1 %v7114_v24, %s9368_s25 }
0x3618   : > { %p7381_p13 = pneg %p7380_p12 }
0x3689   : > { %v7116_v25 = vpop.permute.xlu1 %7115 }
0x368a   : > { %v7118_v26 = vunpack.i.h.bf16 %v7116_v25  ;;  %v7117_v27 = vunpack.i.l.bf16 %v7116_v25 }
0x368c   : > { %v4342_v0 = vmax.f32 %v4332_v46, %v7118_v26  ;;  %v4341_v58 = vmax.f32 %v4331_v17, %v7117_v27 }
0x368e   : > { %v4343_v4 = vpack.c.bf16 %v4342_v0, %v4341_v58 }
0x3690   : > { %6623 = vmatmul.mubr.msk.bf16.vlgmr.msra.gmra.mrb[112].mxu1 %vm584_vm0, %v4343_v4 }
0x3691   : > { %4413 = vmatpush1.bf16.msra.mxu1 %v8609_v18  ;;  %6256 = vmatprep.mubr.msk.bf16.mxu1 %vm584_vm0, %v7314_v2 }
0x3692   : > { %4414 = vmatprep.subr.bf16.mxu1 %v7442_v1 }
0x3695   : > { %4415 = vmatpush1.bf16.msra.mxu1 %v8617_v19 }
0x3696   : > { %4416 = vmatprep.subr.bf16.mxu1 %v7442_v1 }
0x3699   : > { %4417 = vmatpush1.bf16.msra.mxu1 %v8624_v20 }
0x369a   : > { %4418 = vmatprep.subr.bf16.mxu1 %v7442_v1 }
0x369d   : > { %4419 = vmatpush1.bf16.msra.mxu1 %v8631_v21 }
0x369e   : > { %4420 = vmatprep.subr.bf16.mxu1 %v7442_v1 }
0x36a1   : > { %4421 = vmatpush1.bf16.msra.mxu1 %v8638_v22 }
0x36a2   : > { %4422 = vmatprep.subr.bf16.mxu1 %v7442_v1 }
0x36a5   : > { %4423 = vmatpush1.bf16.msra.mxu1 %v8645_v23 }
0x36a6   : > { %4424 = vmatprep.subr.bf16.mxu1 %v7442_v1 }
0x36a9   : > { %4425 = vmatpush1.bf16.msra.mxu1 %v8684_v39 }
0x36aa   : > { %4426 = vmatprep.subr.bf16.mxu1 %v7442_v1 }
0x36ad   : > { %4427 = vmatpush1.bf16.msra.mxu1 %v8691_v49 }
0x36ae   : > { %4428 = vmatprep.subr.bf16.mxu1 %v7442_v1 }
0x36b1   : > { %4429 = vmatpush1.bf16.msra.mxu1 %v8699_v50 }
0x36b2   : > { %6632 = vmatprep.subr.bf16.mxu1 %v7443_v34 }
0x36b4   : > { %4445 = vmatmul.mubr.bf16.vlgmr.msra.gmra.mrb[116].mxu1 %v7316_v13 }
0x36b5   : > { %6634 = vmatprep.mubr.msk.bf16.mxu1 %vm7445_vm1, %v7443_v34  ;;  %6633 = vmatpush3.bf16.msra.mxu1 %v7321_v16 }
0x36b6   : > { %4676 = vmatprep.subr.bf16.mxu1 %v7442_v1 }
0x3763   : > { %v4389_v7 = vpop.f32.mrb[112].mxu1 }
0x3764   : > { %v4396_v29 = vadd.f32 %v4389_v7, %v4264_v52  ;;  %v6624_v15 = vpop.f32.mrb[113].mxu1 }
0x3765   : > { %v4392_v31 = vpop.f32.mrb[114].mxu1 }
0x3766   : > { %v4397_v14 = vadd.f32 %v4392_v31, %v4265_v61  ;;  %v6625_v32 = vpop.f32.mrb[115].mxu1  ;;  %v7318_v61 = vld [vmem:[%s7610_s27 + $0x1e4] ss:$8 sps:$4 sm:$0xff]  }
0x3767   : > { %v7322_v32 = vld [vmem:[%s7610_s27 + $0x1f4] ss:$8 sps:$4 sm:$0xff]  }
0x3787   : > { %v4446_v40 = vpop.f32.mrb[116].mxu1 }
0x3788   : > { %v4447_v41 = vadd.f32 %v8402_v3, %v4446_v40  ;;  %v4448_v42 = vpop.f32.mrb[117].mxu1 }
0x3789   : > { %v4449_v43 = vpop.f32.mrb[118].mxu1 }
0x378a   : > { %v4450_v8 = vadd.f32 %v8402_v3, %v4449_v43  ;;  %v4451_v45 = vpop.f32.mrb[119].mxu1  ;;  %v4453_v47 = vmax.f32 %v4447_v41, 0.0  ;;  %v7324_v41 = vld [vmem:[%s7610_s27 + $0x1f0] ss:$8 sps:$4 sm:$0xff]  }
0x378c   : > { %v4454_v28 = vmax.f32 %v4450_v8, 0.0 }
0x378e   : > { %v7119_v48 = vpack.i.bf16 %v4454_v28, %v4453_v47 }
0x3790   : > { %7120 = vrot.lane.b32.xlu0 %v7119_v48, %s9369_s16 }
0x3802   : > { %v7121_v33 = vpop.permute.xlu0 %7120 }
0x3803   : > { %v7123_v35 = vunpack.i.h.bf16 %v7121_v33  ;;  %v7122_v36 = vunpack.i.l.bf16 %v7121_v33 }
0x3805   : > { %v4464_v37 = vmax.f32 %v4454_v28, %v7123_v35  ;;  %v4463_v38 = vmax.f32 %v4453_v47, %v7122_v36  ;;  %v7325_v36 = vld [vmem:[%s9340_s3 + $0xf8] sm:$0xff]  }
0x3807   : > { %v7124_v30 = vpack.i.bf16 %v4464_v37, %v4463_v38 }
0x3809   : > { %7125 = vrot.lane.b32.xlu1 %v7124_v30, %s9368_s25 }
0x387b   : > { %v7126_v51 = vpop.permute.xlu1 %7125 }
0x387c   : > { %v7128_v3 = vunpack.i.h.bf16 %v7126_v51  ;;  %v7127_v52 = vunpack.i.l.bf16 %v7126_v51 }
0x387e   : > { %v4474_v59 = vmax.f32 %v4464_v37, %v7128_v3  ;;  %v4473_v60 = vmax.f32 %v4463_v38, %v7127_v52 }
0x3880   : > { %v4475_v62 = vpack.c.bf16 %v4474_v59, %v4473_v60 }
0x3882   : > { %6629 = vmatmul.mubr.msk.bf16.vlgmr.msra.gmra.mrb[116].mxu0 %vm584_vm0, %v4475_v62 }
0x3883   : > { %4545 = vmatpush1.bf16.msra.mxu0 %v8609_v18  ;;  %6261 = vmatprep.mubr.msk.bf16.mxu0 %vm584_vm0, %v7318_v61 }
0x3884   : > { %4546 = vmatprep.subr.bf16.mxu0 %v7442_v1 }
0x3887   : > { %4547 = vmatpush1.bf16.msra.mxu0 %v8617_v19 }
0x3888   : > { %4548 = vmatprep.subr.bf16.mxu0 %v7442_v1 }
0x388b   : > { %4549 = vmatpush1.bf16.msra.mxu0 %v8624_v20 }
0x388c   : > { %4550 = vmatprep.subr.bf16.mxu0 %v7442_v1 }
0x388f   : > { %4551 = vmatpush1.bf16.msra.mxu0 %v8631_v21 }
0x3890   : > { %4552 = vmatprep.subr.bf16.mxu0 %v7442_v1 }
0x3893   : > { %4553 = vmatpush1.bf16.msra.mxu0 %v8638_v22 }
0x3894   : > { %4554 = vmatprep.subr.bf16.mxu0 %v7442_v1 }
0x3897   : > { %4555 = vmatpush1.bf16.msra.mxu0 %v8645_v23 }
0x3898   : > { %4556 = vmatprep.subr.bf16.mxu0 %v7442_v1 }
0x389b   : > { %4557 = vmatpush1.bf16.msra.mxu0 %v8684_v39 }
0x389c   : > { %4558 = vmatprep.subr.bf16.mxu0 %v7442_v1 }
0x389f   : > { %4559 = vmatpush1.bf16.msra.mxu0 %v8691_v49 }
0x38a0   : > { %4560 = vmatprep.subr.bf16.mxu0 %v7442_v1 }
0x38a3   : > { %4561 = vmatpush1.bf16.msra.mxu0 %v8699_v50 }
0x38a4   : > { %6638 = vmatprep.subr.bf16.mxu0 %v7443_v34 }
0x38a6   : > { %4577 = vmatmul.mubr.bf16.vlgmr.msra.gmra.mrb[120].mxu0 %v7320_v63 }
0x38a7   : > { %6640 = vmatprep.mubr.msk.bf16.mxu0 %vm7445_vm1, %v7443_v34  ;;  %6639 = vmatpush3.bf16.msra.mxu0 %v7325_v36 }
0x38a8   : > { %4808 = vmatprep.subr.bf16.mxu0 %v7442_v1 }
0x3955   : > { %v4521_v9 = vpop.f32.mrb[116].mxu0 }
0x3956   : > { %v4528_v5 = vadd.f32 %v4521_v9, %v4396_v29  ;;  %v6630_v6 = vpop.f32.mrb[117].mxu0 }
0x3957   : > { %v4524_v10 = vpop.f32.mrb[118].mxu0 }
0x3958   : > { %v4529_v12 = vadd.f32 %v4524_v10, %v4397_v14  ;;  %v6631_v53 = vpop.f32.mrb[119].mxu0 }
0x3959   : > { %v7326_v53 = vld [vmem:[%s7610_s27 + $0x204] ss:$8 sps:$4 sm:$0xff]  }
0x3979   : > { %v4578_v54 = vpop.f32.mrb[120].mxu0 }
0x397a   : > { %v4579_v56 = vadd.f32 %v8772_v55, %v4578_v54  ;;  %v4580_v57 = vpop.f32.mrb[121].mxu0 }
0x397b   : > { %v4581_v11 = vpop.f32.mrb[122].mxu0 }
0x397c   : > { %v4582_v46 = vadd.f32 %v8772_v55, %v4581_v11  ;;  %v4583_v17 = vpop.f32.mrb[123].mxu0  ;;  %v4585_v24 = vmax.f32 %v4579_v56, 0.0  ;;  %v7328_v56 = vld [vmem:[%s7610_s27 + $0x200] ss:$8 sps:$4 sm:$0xff]  }
0x397e   : > { %v4586_v25 = vmax.f32 %v4582_v46, 0.0 }
0x3980   : > { %v7129_v26 = vpack.i.bf16 %v4586_v25, %v4585_v24 }
0x3982   : > { %7130 = vrot.lane.b32.xlu0 %v7129_v26, %s9369_s16 }
0x39f4   : > { %v7131_v27 = vpop.permute.xlu0 %7130 }
0x39f5   : > { %v7133_v0 = vunpack.i.h.bf16 %v7131_v27  ;;  %v7132_v58 = vunpack.i.l.bf16 %v7131_v27 }
0x39f7   : > { %v4596_v2 = vmax.f32 %v4586_v25, %v7133_v0  ;;  %v4595_v4 = vmax.f32 %v4585_v24, %v7132_v58  ;;  %v7329_v58 = vld [vmem:[%s9340_s3 + $0x100] sm:$0xff]  }
0x39f9   : > { %v7134_v13 = vpack.i.bf16 %v4596_v2, %v4595_v4 }
0x39fb   : > { %7135 = vrot.lane.b32.xlu1 %v7134_v13, %s9368_s25 }
0x3a6d   : > { %v7136_v7 = vpop.permute.xlu1 %7135 }
0x3a6e   : > { %v7138_v29 = vunpack.i.h.bf16 %v7136_v7  ;;  %v7137_v15 = vunpack.i.l.bf16 %v7136_v7 }
0x3a70   : > { %v4606_v31 = vmax.f32 %v4596_v2, %v7138_v29  ;;  %v4605_v14 = vmax.f32 %v4595_v4, %v7137_v15 }
0x3a72   : > { %v4607_v40 = vpack.c.bf16 %v4606_v31, %v4605_v14 }
0x3a74   : > { %6635 = vmatmul.mubr.msk.bf16.vlgmr.msra.gmra.mrb[120].mxu1 %vm584_vm0, %v4607_v40 }
0x3a75   : > { %4677 = vmatpush1.bf16.msra.mxu1 %v8609_v18  ;;  %6266 = vmatprep.mubr.msk.bf16.mxu1 %vm584_vm0, %v7322_v32 }
0x3a76   : > { %4678 = vmatprep.subr.bf16.mxu1 %v7442_v1 }
0x3a79   : > { %4679 = vmatpush1.bf16.msra.mxu1 %v8617_v19 }
0x3a7a   : > { %4680 = vmatprep.subr.bf16.mxu1 %v7442_v1 }
0x3a7d   : > { %4681 = vmatpush1.bf16.msra.mxu1 %v8624_v20 }
0x3a7e   : > { %4682 = vmatprep.subr.bf16.mxu1 %v7442_v1 }
0x3a81   : > { %4683 = vmatpush1.bf16.msra.mxu1 %v8631_v21 }
0x3a82   : > { %4684 = vmatprep.subr.bf16.mxu1 %v7442_v1 }
0x3a85   : > { %4685 = vmatpush1.bf16.msra.mxu1 %v8638_v22 }
0x3a86   : > { %4686 = vmatprep.subr.bf16.mxu1 %v7442_v1 }
0x3a89   : > { %4687 = vmatpush1.bf16.msra.mxu1 %v8645_v23 }
0x3a8a   : > { %4688 = vmatprep.subr.bf16.mxu1 %v7442_v1 }
0x3a8d   : > { %4689 = vmatpush1.bf16.msra.mxu1 %v8684_v39 }
0x3a8e   : > { %4690 = vmatprep.subr.bf16.mxu1 %v7442_v1 }
0x3a91   : > { %4691 = vmatpush1.bf16.msra.mxu1 %v8691_v49 }
0x3a92   : > { %4692 = vmatprep.subr.bf16.mxu1 %v7442_v1 }
0x3a95   : > { %4693 = vmatpush1.bf16.msra.mxu1 %v8699_v50 }
0x3a96   : > { %6644 = vmatprep.subr.bf16.mxu1 %v7443_v34 }
0x3a98   : > { %4709 = vmatmul.mubr.bf16.vlgmr.msra.gmra.mrb[124].mxu1 %v7324_v41 }
0x3a99   : > { %6646 = vmatprep.mubr.msk.bf16.mxu1 %vm7445_vm1, %v7443_v34  ;;  %6645 = vmatpush3.bf16.msra.mxu1 %v7329_v58 }
0x3a9a   : > { %4940 = vmatprep.subr.bf16.mxu1 %v7442_v1 }
0x3b47   : > { %v4653_v42 = vpop.f32.mrb[120].mxu1 }
0x3b48   : > { %v4660_v43 = vadd.f32 %v4653_v42, %v4528_v5  ;;  %v6636_v44 = vpop.f32.mrb[121].mxu1 }
0x3b49   : > { %v4656_v8 = vpop.f32.mrb[122].mxu1 }
0x3b4a   : > { %v4661_v45 = vadd.f32 %v4656_v8, %v4529_v12  ;;  %v6637_v47 = vpop.f32.mrb[123].mxu1 }
0x3b4b   : > { %v7330_v47 = vld [vmem:[%s7610_s27 + $0x214] ss:$8 sps:$4 sm:$0xff]  }
0x3b6b   : > { %v4710_v28 = vpop.f32.mrb[124].mxu1 }
0x3b6c   : > { %v4711_v48 = vadd.f32 %v8772_v55, %v4710_v28  ;;  %v4712_v33 = vpop.f32.mrb[125].mxu1 }
0x3b6d   : > { %v4713_v35 = vpop.f32.mrb[126].mxu1 }
0x3b6e   : > { %v4714_v37 = vadd.f32 %v8772_v55, %v4713_v35  ;;  %v4715_v38 = vpop.f32.mrb[127].mxu1  ;;  %v4717_v30 = vmax.f32 %v4711_v48, 0.0  ;;  %v7332_v48 = vld [vmem:[%s7610_s27 + $0x210] ss:$8 sps:$4 sm:$0xff]  }
0x3b70   : > { %v4718_v51 = vmax.f32 %v4714_v37, 0.0 }
0x3b72   : > { %v7139_v3 = vpack.i.bf16 %v4718_v51, %v4717_v30 }
0x3b74   : > { %7140 = vrot.lane.b32.xlu0 %v7139_v3, %s9369_s16 }
0x3be6   : > { %v7141_v52 = vpop.permute.xlu0 %7140 }
0x3be7   : > { %v7143_v59 = vunpack.i.h.bf16 %v7141_v52  ;;  %v7142_v60 = vunpack.i.l.bf16 %v7141_v52 }
0x3be9   : > { %v4728_v61 = vmax.f32 %v4718_v51, %v7143_v59  ;;  %v4727_v62 = vmax.f32 %v4717_v30, %v7142_v60  ;;  %v7333_v60 = vld [vmem:[%s9340_s3 + $0x108] sm:$0xff]  }
0x3beb   : > { %v7144_v63 = vpack.i.bf16 %v4728_v61, %v4727_v62 }
0x3bed   : > { %7145 = vrot.lane.b32.xlu1 %v7144_v63, %s9368_s25 }
0x3c5f   : > { %v7146_v9 = vpop.permute.xlu1 %7145 }
0x3c60   : > { %v7148_v5 = vunpack.i.h.bf16 %v7146_v9  ;;  %v7147_v6 = vunpack.i.l.bf16 %v7146_v9 }
0x3c62   : > { %v4738_v10 = vmax.f32 %v4728_v61, %v7148_v5  ;;  %v4737_v12 = vmax.f32 %v4727_v62, %v7147_v6 }
0x3c64   : > { %v4739_v54 = vpack.c.bf16 %v4738_v10, %v4737_v12 }
0x3c66   : > { %6641 = vmatmul.mubr.msk.bf16.vlgmr.msra.gmra.mrb[124].mxu0 %vm584_vm0, %v4739_v54 }
0x3c67   : > { %4809 = vmatpush1.bf16.msra.mxu0 %v8609_v18  ;;  %6271 = vmatprep.mubr.msk.bf16.mxu0 %vm584_vm0, %v7326_v53 }
0x3c68   : > { %4810 = vmatprep.subr.bf16.mxu0 %v7442_v1 }
0x3c6b   : > { %4811 = vmatpush1.bf16.msra.mxu0 %v8617_v19 }
0x3c6c   : > { %4812 = vmatprep.subr.bf16.mxu0 %v7442_v1 }
0x3c6f   : > { %4813 = vmatpush1.bf16.msra.mxu0 %v8624_v20 }
0x3c70   : > { %4814 = vmatprep.subr.bf16.mxu0 %v7442_v1 }
0x3c73   : > { %4815 = vmatpush1.bf16.msra.mxu0 %v8631_v21 }
0x3c74   : > { %4816 = vmatprep.subr.bf16.mxu0 %v7442_v1 }
0x3c77   : > { %4817 = vmatpush1.bf16.msra.mxu0 %v8638_v22 }
0x3c78   : > { %4818 = vmatprep.subr.bf16.mxu0 %v7442_v1 }
0x3c7b   : > { %4819 = vmatpush1.bf16.msra.mxu0 %v8645_v23 }
0x3c7c   : > { %4820 = vmatprep.subr.bf16.mxu0 %v7442_v1 }
0x3c7f   : > { %4821 = vmatpush1.bf16.msra.mxu0 %v8684_v39 }
0x3c80   : > { %4822 = vmatprep.subr.bf16.mxu0 %v7442_v1 }
0x3c83   : > { %4823 = vmatpush1.bf16.msra.mxu0 %v8691_v49 }
0x3c84   : > { %4824 = vmatprep.subr.bf16.mxu0 %v7442_v1 }
0x3c87   : > { %4825 = vmatpush1.bf16.msra.mxu0 %v8699_v50 }
0x3c88   : > { %6650 = vmatprep.subr.bf16.mxu0 %v7443_v34 }
0x3c8a   : > { %4841 = vmatmul.mubr.bf16.vlgmr.msra.gmra.mrb[128].mxu0 %v7328_v56 }
0x3c8b   : > { %6652 = vmatprep.mubr.msk.bf16.mxu0 %vm7445_vm1, %v7443_v34  ;;  %6651 = vmatpush3.bf16.msra.mxu0 %v7333_v60 }
0x3c8c   : > { %5072 = vmatprep.subr.bf16.mxu0 %v7442_v1 }
0x3d39   : > { %v4785_v57 = vpop.f32.mrb[124].mxu0 }
0x3d3a   : > { %v4792_v11 = vadd.f32 %v4785_v57, %v4660_v43  ;;  %v6642_v16 = vpop.f32.mrb[125].mxu0 }
0x3d3b   : > { %v4788_v46 = vpop.f32.mrb[126].mxu0 }
0x3d3c   : > { %v4793_v17 = vadd.f32 %v4788_v46, %v4661_v45  ;;  %v6643_v24 = vpop.f32.mrb[127].mxu0 }
0x3d3d   : > { %v7334_v24 = vld [vmem:[%s7610_s27 + $0x224] ss:$8 sps:$4 sm:$0xff]  }
0x3d5d   : > { %v4842_v25 = vpop.f32.mrb[128].mxu0 }
0x3d5e   : > { %v4843_v26 = vadd.f32 %v8772_v55, %v4842_v25  ;;  %v4844_v27 = vpop.f32.mrb[129].mxu0 }
0x3d5f   : > { %v4845_v0 = vpop.f32.mrb[130].mxu0 }
0x3d60   : > { %v4846_v2 = vadd.f32 %v8772_v55, %v4845_v0  ;;  %v4847_v4 = vpop.f32.mrb[131].mxu0  ;;  %v4849_v13 = vmax.f32 %v4843_v26, 0.0  ;;  %v7336_v26 = vld [vmem:[%s7610_s27 + $0x220] ss:$8 sps:$4 sm:$0xff]  }
0x3d62   : > { %v4850_v7 = vmax.f32 %v4846_v2, 0.0 }
0x3d64   : > { %v7149_v29 = vpack.i.bf16 %v4850_v7, %v4849_v13 }
0x3d66   : > { %7150 = vrot.lane.b32.xlu0 %v7149_v29, %s9369_s16 }
0x3dd8   : > { %v7151_v15 = vpop.permute.xlu0 %7150 }
0x3dd9   : > { %v7153_v31 = vunpack.i.h.bf16 %v7151_v15  ;;  %v7152_v14 = vunpack.i.l.bf16 %v7151_v15 }
0x3ddb   : > { %v4860_v32 = vmax.f32 %v4850_v7, %v7153_v31  ;;  %v4859_v40 = vmax.f32 %v4849_v13, %v7152_v14  ;;  %v7337_v14 = vld [vmem:[%s9340_s3 + $0x110] sm:$0xff]  }
0x3ddd   : > { %v7154_v41 = vpack.i.bf16 %v4860_v32, %v4859_v40 }
0x3ddf   : > { %7155 = vrot.lane.b32.xlu1 %v7154_v41, %s9368_s25 }
0x3e51   : > { %v7156_v42 = vpop.permute.xlu1 %7155 }
0x3e52   : > { %v7158_v43 = vunpack.i.h.bf16 %v7156_v42  ;;  %v7157_v44 = vunpack.i.l.bf16 %v7156_v42 }
0x3e54   : > { %v4870_v8 = vmax.f32 %v4860_v32, %v7158_v43  ;;  %v4869_v45 = vmax.f32 %v4859_v40, %v7157_v44 }
0x3e56   : > { %v4871_v28 = vpack.c.bf16 %v4870_v8, %v4869_v45 }
0x3e58   : > { %6647 = vmatmul.mubr.msk.bf16.vlgmr.msra.gmra.mrb[128].mxu1 %vm584_vm0, %v4871_v28 }
0x3e59   : > { %4941 = vmatpush1.bf16.msra.mxu1 %v8609_v18  ;;  %6276 = vmatprep.mubr.msk.bf16.mxu1 %vm584_vm0, %v7330_v47 }
0x3e5a   : > { %4942 = vmatprep.subr.bf16.mxu1 %v7442_v1 }
0x3e5d   : > { %4943 = vmatpush1.bf16.msra.mxu1 %v8617_v19 }
0x3e5e   : > { %4944 = vmatprep.subr.bf16.mxu1 %v7442_v1 }
0x3e61   : > { %4945 = vmatpush1.bf16.msra.mxu1 %v8624_v20 }
0x3e62   : > { %4946 = vmatprep.subr.bf16.mxu1 %v7442_v1 }
0x3e65   : > { %4947 = vmatpush1.bf16.msra.mxu1 %v8631_v21 }
0x3e66   : > { %4948 = vmatprep.subr.bf16.mxu1 %v7442_v1 }
0x3e69   : > { %4949 = vmatpush1.bf16.msra.mxu1 %v8638_v22 }
0x3e6a   : > { %4950 = vmatprep.subr.bf16.mxu1 %v7442_v1 }
0x3e6d   : > { %4951 = vmatpush1.bf16.msra.mxu1 %v8645_v23 }
0x3e6e   : > { %4952 = vmatprep.subr.bf16.mxu1 %v7442_v1 }
0x3e71   : > { %4953 = vmatpush1.bf16.msra.mxu1 %v8684_v39 }
0x3e72   : > { %4954 = vmatprep.subr.bf16.mxu1 %v7442_v1 }
0x3e75   : > { %4955 = vmatpush1.bf16.msra.mxu1 %v8691_v49 }
0x3e76   : > { %4956 = vmatprep.subr.bf16.mxu1 %v7442_v1 }
0x3e79   : > { %4957 = vmatpush1.bf16.msra.mxu1 %v8699_v50 }
0x3e7a   : > { %6656 = vmatprep.subr.bf16.mxu1 %v7443_v34 }
0x3e7c   : > { %4973 = vmatmul.mubr.bf16.vlgmr.msra.gmra.mrb[132].mxu1 %v7332_v48 }
0x3e7d   : > { %6658 = vmatprep.mubr.msk.bf16.mxu1 %vm7445_vm1, %v7443_v34  ;;  %6657 = vmatpush3.bf16.msra.mxu1 %v7337_v14 }
0x3e7e   : > { %5204 = vmatprep.subr.bf16.mxu1 %v7442_v1 }
0x3f2b   : > { %v4917_v33 = vpop.f32.mrb[128].mxu1 }
0x3f2c   : > { %v4924_v35 = vadd.f32 %v4917_v33, %v4792_v11  ;;  %v6648_v36 = vpop.f32.mrb[129].mxu1 }
0x3f2d   : > { %v4920_v37 = vpop.f32.mrb[130].mxu1 }
0x3f2e   : > { %v4925_v38 = vadd.f32 %v4920_v37, %v4793_v17  ;;  %v6649_v30 = vpop.f32.mrb[131].mxu1 }
0x3f2f   : > { %v7338_v30 = vld [vmem:[%s7610_s27 + $0x234] ss:$8 sps:$4 sm:$0xff]  }
0x3f4f   : > { %v4974_v51 = vpop.f32.mrb[132].mxu1 }
0x3f50   : > { %v4975_v3 = vadd.f32 %v8772_v55, %v4974_v51  ;;  %v4976_v52 = vpop.f32.mrb[133].mxu1 }
0x3f51   : > { %v4977_v59 = vpop.f32.mrb[134].mxu1 }
0x3f52   : > { %v4978_v61 = vadd.f32 %v8772_v55, %v4977_v59  ;;  %v4979_v62 = vpop.f32.mrb[135].mxu1  ;;  %v4981_v63 = vmax.f32 %v4975_v3, 0.0 }
0x3f54   : > { %v4982_v9 = vmax.f32 %v4978_v61, 0.0 }
0x3f56   : > { %v7159_v5 = vpack.i.bf16 %v4982_v9, %v4981_v63 }
0x3f58   : > { %7160 = vrot.lane.b32.xlu0 %v7159_v5, %s9369_s16 }
0x3fca   : > { %v7161_v6 = vpop.permute.xlu0 %7160 }
0x3fcb   : > { %v7163_v10 = vunpack.i.h.bf16 %v7161_v6  ;;  %v7162_v12 = vunpack.i.l.bf16 %v7161_v6 }
0x3fcd   : > { %v4992_v53 = vmax.f32 %v4982_v9, %v7163_v10  ;;  %v4991_v54 = vmax.f32 %v4981_v63, %v7162_v12 }
0x3fcf   : > { %v7164_v56 = vpack.i.bf16 %v4992_v53, %v4991_v54 }
0x3fd1   : > { %7165 = vrot.lane.b32.xlu1 %v7164_v56, %s9368_s25 }
0x4043   : > { %v7166_v57 = vpop.permute.xlu1 %7165 }
0x4044   : > { %v7168_v11 = vunpack.i.h.bf16 %v7166_v57  ;;  %v7167_v16 = vunpack.i.l.bf16 %v7166_v57 }
0x4046   : > { %v5002_v46 = vmax.f32 %v4992_v53, %v7168_v11  ;;  %v5001_v17 = vmax.f32 %v4991_v54, %v7167_v16 }
0x4048   : > { %v5003_v25 = vpack.c.bf16 %v5002_v46, %v5001_v17  ;;  %v6289_v46 = vld [vmem:[%s9341_s4] ss:$0 sm:$0xff] }
0x404a   : > { %6653 = vmatmul.mubr.msk.bf16.vlgmr.msra.gmra.mrb[132].mxu0 %vm584_vm0, %v5003_v25 }
0x404b   : > { %5073 = vmatpush1.bf16.msra.mxu0 %v8609_v18  ;;  %6281 = vmatprep.mubr.msk.bf16.mxu0 %vm584_vm0, %v7334_v24 }
0x404c   : > { %5074 = vmatprep.subr.bf16.mxu0 %v7442_v1 }
0x404f   : > { %5075 = vmatpush1.bf16.msra.mxu0 %v8617_v19 }
0x4050   : > { %5076 = vmatprep.subr.bf16.mxu0 %v7442_v1 }
0x4053   : > { %5077 = vmatpush1.bf16.msra.mxu0 %v8624_v20 }
0x4054   : > { %5078 = vmatprep.subr.bf16.mxu0 %v7442_v1 }
0x4057   : > { %5079 = vmatpush1.bf16.msra.mxu0 %v8631_v21 }
0x4058   : > { %5080 = vmatprep.subr.bf16.mxu0 %v7442_v1 }
0x405b   : > { %5081 = vmatpush1.bf16.msra.mxu0 %v8638_v22 }
0x405c   : > { %5082 = vmatprep.subr.bf16.mxu0 %v7442_v1 }
0x405f   : > { %5083 = vmatpush1.bf16.msra.mxu0 %v8645_v23 }
0x4060   : > { %5084 = vmatprep.subr.bf16.mxu0 %v7442_v1 }
0x4063   : > { %5085 = vmatpush1.bf16.msra.mxu0 %v8684_v39 }
0x4064   : > { %5086 = vmatprep.subr.bf16.mxu0 %v7442_v1 }
0x4067   : > { %5087 = vmatpush1.bf16.msra.mxu0 %v8691_v49 }
0x4068   : > { %5088 = vmatprep.subr.bf16.mxu0 %v7442_v1 }
0x406b   : > { %5089 = vmatpush1.bf16.msra.mxu0 %v8699_v50 }
0x406c   : > { %6662 = vmatprep.subr.bf16.mxu0 %v7443_v34 }
0x406e   : > { %5105 = vmatmul.mubr.bf16.vlgmr.msra.gmra.mrb[136].mxu0 %v7336_v26 }
0x406f   : > { %6664 = vmatprep.mubr.msk.bf16.mxu0 %vm7445_vm1, %v7443_v34 }
0x411d   : > { %v5049_v27 = vpop.f32.mrb[132].mxu0 }
0x411e   : > { %v5056_v0 = vadd.f32 %v5049_v27, %v4924_v35  ;;  %v6654_v58 = vpop.f32.mrb[133].mxu0 }
0x411f   : > { %v5052_v2 = vpop.f32.mrb[134].mxu0 }
0x4120   : > { %v5057_v4 = vadd.f32 %v5052_v2, %v4925_v38  ;;  %v6655_v13 = vpop.f32.mrb[135].mxu0 }
0x4141   : > { %v5106_v7 = vpop.f32.mrb[136].mxu0 }
0x4142   : > { %v5107_v29 = vadd.f32 %v8772_v55, %v5106_v7  ;;  %v5108_v15 = vpop.f32.mrb[137].mxu0 }
0x4143   : > { %v5109_v31 = vpop.f32.mrb[138].mxu0  ;;  %v7449_v15 = vmov 1966171168  }
0x4144   : > { %v5110_v32 = vadd.f32 %v8772_v55, %v5109_v31  ;;  %v5111_v40 = vpop.f32.mrb[139].mxu0  ;;  %v5113_v41 = vmax.f32 %v5107_v29, 0.0  ;;  %v5360_v29 = vlaneseq  ;;  %v5367_v31 = vunpack.c.l.s4 %v7449_v15 }
0x4146   : > { %v5114_v42 = vmax.f32 %v5110_v32, 0.0  ;;  %vm8953_vm2 = vcmp.lt.s32.totalorder %v5360_v29, 32  ;;  %vm5391_vm3 = vcmp.ge.s32.totalorder %v5360_v29, 32  ;;  %vm5392_vm4 = vcmp.lt.s32.totalorder %v5360_v29, 64 }
0x4147   : > { %vm5393_vm5 = vmand %vm5391_vm3, %vm5392_vm4  ;;  %vm5399_vm6 = vcmp.ge.s32.totalorder %v5360_v29, 64  ;;  %vm5400_vm7 = vcmp.lt.s32.totalorder %v5360_v29, 96  ;;  %vm5407_vm9 = vcmp.ge.s32.totalorder %v5360_v29, 96  ;;  %vm5408_vm10 = vcmp.lt.s32.totalorder %v5360_v29, 128 }
0x4148   : > { %v7169_v43 = vpack.i.bf16 %v5114_v42, %v5113_v41  ;;  %vm8981_vm8 = vmand %vm5399_vm6, %vm5400_vm7 }
0x4149   : > { %vm5409_vm11 = vmand %vm5407_vm9, %vm5408_vm10 }
0x414a   : > { %7170 = vrot.lane.b32.xlu0 %v7169_v43, %s9369_s16 }
0x41bc   : > { %v7171_v44 = vpop.permute.xlu0 %7170 }
0x41bd   : > { %v7173_v8 = vunpack.i.h.bf16 %v7171_v44  ;;  %v7172_v45 = vunpack.i.l.bf16 %v7171_v44 }
0x41bf   : > { %v5124_v47 = vmax.f32 %v5114_v42, %v7173_v8  ;;  %v5123_v28 = vmax.f32 %v5113_v41, %v7172_v45  ;;  %v5368_v41 = vunpack.c.0.s8 %v5367_v31  ;;  %v8949_v42 = vshrl.u32 %v5360_v29, 7 }
0x41c1   : > { %v7174_v48 = vpack.i.bf16 %v5124_v47, %v5123_v28 }
0x41c3   : > { %7175 = vrot.lane.b32.xlu1 %v7174_v48, %s9368_s25 }
0x4235   : > { %v7176_v33 = vpop.permute.xlu1 %7175 }
0x4236   : > { %v7178_v35 = vunpack.i.h.bf16 %v7176_v33  ;;  %v7177_v36 = vunpack.i.l.bf16 %v7176_v33 }
0x4238   : > { %v5134_v37 = vmax.f32 %v5124_v47, %v7178_v35  ;;  %v5133_v38 = vmax.f32 %v5123_v28, %v7177_v36  ;;  %v5371_v28 = vsub.s32 %v5368_v41, %v8949_v42  ;;  %v5662_v35 = vld [vmem:[%s9344_s7 + $0x188] sm:$0xff] }
0x423a   : > { %v5135_v51 = vpack.c.bf16 %v5134_v37, %v5133_v38 }
0x423c   : > { %6659 = vmatmul.mubr.msk.bf16.vlgmr.msra.gmra.mrb[136].mxu1 %vm584_vm0, %v5135_v51 }
0x423d   : > { %5205 = vmatpush1.bf16.msra.mxu1 %v8609_v18  ;;  %6286 = vmatprep.mubr.msk.bf16.mxu1 %vm584_vm0, %v7338_v30  ;;  %v7340_v18 = vld [vmem:[%s7610_s27 + $0x230] ss:$8 sps:$4 sm:$0xff]  }
0x423e   : > { %5206 = vmatprep.subr.bf16.mxu1 %v7442_v1 }
0x4241   : > { %5207 = vmatpush1.bf16.msra.mxu1 %v8617_v19 }
0x4242   : > { %5208 = vmatprep.subr.bf16.mxu1 %v7442_v1 }
0x4245   : > { %5209 = vmatpush1.bf16.msra.mxu1 %v8624_v20 }
0x4246   : > { %5210 = vmatprep.subr.bf16.mxu1 %v7442_v1 }
0x4249   : > { %5211 = vmatpush1.bf16.msra.mxu1 %v8631_v21 }
0x424a   : > { %5212 = vmatprep.subr.bf16.mxu1 %v7442_v1 }
0x424d   : > { %5213 = vmatpush1.bf16.msra.mxu1 %v8638_v22 }
0x424e   : > { %5214 = vmatprep.subr.bf16.mxu1 %v7442_v1 }
0x4251   : > { %5215 = vmatpush1.bf16.msra.mxu1 %v8645_v23 }
0x4252   : > { %5216 = vmatprep.subr.bf16.mxu1 %v7442_v1 }
0x4255   : > { %5217 = vmatpush1.bf16.msra.mxu1 %v8684_v39 }
0x4256   : > { %5218 = vmatprep.subr.bf16.mxu1 %v7442_v1 }
0x4259   : > { %5219 = vmatpush1.bf16.msra.mxu1 %v8691_v49  ;;  %v7341_v49 = vld [vmem:[%s9340_s3 + $0x118] sm:$0xff]  }
0x425a   : > { %5220 = vmatprep.subr.bf16.mxu1 %v7442_v1  ;;  %6663 = vmatpush3.bf16.msra.mxu0 %v7341_v49 }
0x425d   : > { %5221 = vmatpush1.bf16.msra.mxu1 %v8699_v50 }
0x4260   : > { %5237 = vmatmul.mubr.bf16.vlgmr.msra.gmra.mrb[140].mxu1 %v7340_v18 }
0x430f   : > { %v5181_v19 = vpop.f32.mrb[136].mxu1 }
0x4310   : > { %v5188_v20 = vadd.f32 %v5181_v19, %v5056_v0  ;;  %v6660_v21 = vpop.f32.mrb[137].mxu1 }
0x4311   : > { %v5184_v22 = vpop.f32.mrb[138].mxu1 }
0x4312   : > { %v5189_v3 = vadd.f32 %v5184_v22, %v5057_v4  ;;  %v6661_v23 = vpop.f32.mrb[139].mxu1 }
0x4333   : > { %v5238_v52 = vpop.f32.mrb[140].mxu1 }
0x4334   : > { %v5239_v59 = vadd.f32 %v8772_v55, %v5238_v52  ;;  %v5240_v39 = vpop.f32.mrb[141].mxu1 }
0x4335   : > { %v5241_v60 = vpop.f32.mrb[142].mxu1 }
0x4336   : > { %v5242_v1 = vadd.f32 %v8772_v55, %v5241_v60  ;;  %v5243_v61 = vpop.f32.mrb[143].mxu1  ;;  %v5245_v50 = vmax.f32 %v5239_v59, 0.0 }
0x4338   : > { %v5246_v62 = vmax.f32 %v5242_v1, 0.0 }
0x433a   : > { %v7179_v63 = vpack.i.bf16 %v5246_v62, %v5245_v50 }
0x433c   : > { %7180 = vrot.lane.b32.xlu0 %v7179_v63, %s9369_s16  ;;  %s7447_s16 = smov 64  }
0x43ae   : > { %v7181_v9 = vpop.permute.xlu0 %7180 }
0x43af   : > { %v7183_v5 = vunpack.i.h.bf16 %v7181_v9  ;;  %v7182_v6 = vunpack.i.l.bf16 %v7181_v9 }
0x43b1   : > { %v5256_v10 = vmax.f32 %v5246_v62, %v7183_v5  ;;  %v5255_v12 = vmax.f32 %v5245_v50, %v7182_v6 }
0x43b3   : > { %v7184_v53 = vpack.i.bf16 %v5256_v10, %v5255_v12 }
0x43b5   : > { %7185 = vrot.lane.b32.xlu1 %v7184_v53, %s9368_s25 }
0x4427   : > { %v7186_v54 = vpop.permute.xlu1 %7185 }
0x4428   : > { %v7188_v56 = vunpack.i.h.bf16 %v7186_v54  ;;  %v7187_v57 = vunpack.i.l.bf16 %v7186_v54 }
0x442a   : > { %v5266_v11 = vmax.f32 %v5256_v10, %v7188_v56  ;;  %v5265_v55 = vmax.f32 %v5255_v12, %v7187_v57 }
0x442c   : > { %v5267_v16 = vpack.c.bf16 %v5266_v11, %v5265_v55 }
0x442e   : > { %6665 = vmatmul.mubr.msk.bf16.vlgmr.msra.gmra.mrb[140].mxu0 %vm584_vm0, %v5267_v16 }
0x4501   : > { %v5313_v17 = vpop.f32.mrb[140].mxu0 }
0x4502   : > { %v5320_v24 = vadd.f32 %v5313_v17, %v5188_v20  ;;  %v6666_v25 = vpop.f32.mrb[141].mxu0 }
0x4503   : > { %v5316_v26 = vpop.f32.mrb[142].mxu0 }
0x4504   : > { %v5328_v27 = vadd.f32 %v6289_v46, %v5320_v24  ;;  %v5321_v0 = vadd.f32 %v5316_v26, %v5189_v3  ;;  %v6667_v58 = vpop.f32.mrb[143].mxu0 }
0x4506   : > { %v5330_v2 = vmax.f32 %v5328_v27, 0.0  ;;  %v5329_v4 = vadd.f32 %v6289_v46, %v5321_v0 }
0x4508   : > { %v5331_v13 = vmax.f32 %v5329_v4, 0.0  ;;  %5334 = vrot.lane.b32.xlu0 %v5330_v2, %s9368_s25  ;;  %v8999_v4 = vsub.s32 1, %v8949_v42 }
0x450a   : > { %5336 = vrot.lane.b32.xlu1 %v5331_v13, %s9368_s25 }
0x450c   : > { %5342 = vrot.lane.b32.xlu0 %v5330_v2, %s7447_s16 }
0x450e   : > { %5344 = vrot.lane.b32.xlu1 %v5331_v13, %s7447_s16 }
0x4510   : > { %5350 = vrot.lane.b32.xlu0 %v5330_v2, %s7448_s30 }
0x4512   : > { %5352 = vrot.lane.b32.xlu1 %v5331_v13, %s7448_s30 }
0x457a   : > { %v5335_v7 = vpop.permute.xlu0 %5334 }
0x457b   : > { %v5340_v40 = vadd.f32 %v5335_v7, %v5330_v2  ;;  %v8996_v2 = vsub.s32 0, %v8949_v42  ;;  %v9005_v7 = vsub.s32 3, %v8949_v42 }
0x457c   : > { %v5337_v14 = vpop.permute.xlu1 %5336 }
0x457d   : > { %v5341_v44 = vadd.f32 %v5337_v14, %v5331_v13  ;;  %v9002_v13 = vsub.s32 2, %v8949_v42 }
0x457e   : > { %v5343_v32 = vpop.permute.xlu0 %5342 }
0x457f   : > { %v5348_v8 = vadd.f32 %v5343_v32, %v5340_v40 }
0x4580   : > { %v5345_v43 = vpop.permute.xlu1 %5344 }
0x4581   : > { %v5349_v47 = vadd.f32 %v5345_v43, %v5341_v44 }
0x4582   : > { %v5351_v45 = vpop.permute.xlu0 %5350 }
0x4583   : > { %v5356_v48 = vadd.f32 %v5351_v45, %v5348_v8 }
0x4584   : > { %v5353_v33 = vpop.permute.xlu1 %5352 }
0x4585   : > { %v5358_v36 = vmul.f32 0.25, %v5356_v48  ;;  %v5357_v37 = vadd.f32 %v5353_v33, %v5349_v47  ;;  %v5629_v47 = vld [vmem:[%s9344_s7 + $0x80] sm:$0xff] }
0x4586   : > { %v5661_v48 = vld [vmem:[%s9344_s7 + $0x180] sm:$0xff] }
0x4587   : > { %v5372_v38 = vrot.slane %v5358_v36, %v5371_v28  ;;  %v5411_v30 = vcombine.high %v5358_v36, %v5358_v36  ;;  %v5359_v51 = vmul.f32 0.25, %v5357_v37  ;;  %5364 = vst.msk [vmem:[#allocation2] sm:$0x1] %vm8953_vm2, %v5358_v36  ;;  %v5613_v36 = vld [vmem:[%s9344_s7] sm:$0xff]  ;;  %v5614_v37 = vld [vmem:[%s9344_s7 + $0x8] sm:$0xff] }
0x4589   : > { %v5418_v18 = vrot.slane %v5411_v30, %v5371_v28  ;;  %v5488_v19 = vcombine.high %v5359_v51, %v5359_v51  ;;  %v5373_v20 = vcombine.high %v5372_v38, %v5372_v38  ;;  %5450 = vst.msk [vmem:[#allocation2 + $0x2] sm:$0x1] %vm8953_vm2, %v5359_v51  ;;  %v5458_v21 = vrot.slane %v5359_v51, %v5371_v28  ;;  %v5645_v51 = vld [vmem:[%s9344_s7 + $0x100] sm:$0xff] }
0x458a   : > { %v5380_v22 = vrot.slane %v5372_v38, %v5371_v28  ;;  %v6730_v38 = vpack.c.bf16 %v5662_v35, %v5661_v48  ;;  %v6700_v30 = vpack.c.bf16 %v5614_v37, %v5613_v36  ;;  %v5651_v48 = vld [vmem:[%s9344_s7 + $0x130] sm:$0xff]  ;;  %v5637_v36 = vld [vmem:[%s9344_s7 + $0xc0] sm:$0xff]  ;;  %v5638_v37 = vld [vmem:[%s9344_s7 + $0xc8] sm:$0xff] }
0x458b   : > { %v5495_v3 = vrot.slane %v5488_v19, %v5371_v28  ;;  %v5387_v23 = vrot.slane %v5373_v20, %v5371_v28  ;;  %v5428_v52 = vcombine.high %v5418_v18, %v5418_v18  ;;  %v5425_v59 = vrot.slane %v5418_v18, %v5371_v28  ;;  %v5646_v18 = vld [vmem:[%s9344_s7 + $0x108] sm:$0xff]  ;;  %v5631_v19 = vld [vmem:[%s9344_s7 + $0x90] sm:$0xff] }
0x458c   : > { %v5395_v49 = vcombine.high %v5380_v22, %v5380_v22  ;;  %v5459_v1 = vcombine.high %v5458_v21, %v5458_v21  ;;  %v5466_v63 = vrot.slane %v5458_v21, %v5371_v28  ;;  %v6732_v20 = vpack.c.bf16 %v5646_v18, %v5645_v51  ;;  %v5632_v21 = vld [vmem:[%s9344_s7 + $0x98] sm:$0xff]  ;;  %v5663_v22 = vld [vmem:[%s9344_s7 + $0x190] sm:$0xff]  ;;  %6731 = vmatprep.subr.bf16.mxu1 %v6730_v38  ;;  %v5669_v38 = vld [vmem:[%s9344_s7 + $0x1c0] sm:$0xff] }
0x458d   : > { %5388 = vrot.lane.b32.xlu0 %v5387_v23, %s7448_s30  ;;  %v5435_v39 = vrot.slane %v5428_v52, %v5371_v28  ;;  %v5502_v60 = vrot.slane %v5495_v3, %v5371_v28  ;;  %5427 = vst.msk [vmem:[#allocation2 + $0x1] sm:$0x1] %vm8953_vm2, %v5425_v59  ;;  %v5440_v61 = vcombine.high %v5425_v59, %v5425_v59  ;;  %v5615_v59 = vld [vmem:[%s9344_s7 + $0x10] sm:$0xff]  ;;  %v5670_v51 = vld [vmem:[%s9344_s7 + $0x1c8] sm:$0xff]  ;;  %v5621_v18 = vld [vmem:[%s9344_s7 + $0x40] sm:$0xff] }
0x458e   : > { %v5505_v50 = vcombine.high %v5495_v3, %v5495_v3  ;;  %v5473_v62 = vrot.slane %v5459_v1, %v5371_v28  ;;  %v5478_v5 = vcombine.high %v5466_v63, %v5466_v63  ;;  %v5403_v10 = vcombine.high %v5387_v23, %v5387_v23  ;;  %v5664_v3 = vld [vmem:[%s9344_s7 + $0x198] sm:$0xff]  ;;  %6733 = vmatpush3.bf16.msra.mxu1 %v6732_v20 }
0x458f   : > { %5436 = vrot.lane.b32.xlu1 %v5435_v39, %s7448_s30  ;;  %5504 = vst.msk [vmem:[#allocation2 + $0x3] sm:$0x1] %vm8953_vm2, %v5502_v60  ;;  %v5517_v6 = vcombine.high %v5502_v60, %v5502_v60  ;;  %v5445_v12 = vcombine.high %v5435_v39, %v5435_v39  ;;  %v6702_v23 = vpack.c.bf16 %v5632_v21, %v5631_v19  ;;  %v5616_v39 = vld [vmem:[%s9344_s7 + $0x18] sm:$0xff]  ;;  %v5647_v60 = vld [vmem:[%s9344_s7 + $0x110] sm:$0xff]  ;;  %v5622_v19 = vld [vmem:[%s9344_s7 + $0x48] sm:$0xff] }
0x4590   : > { %v5512_v9 = vrot.slane %v5505_v50, %v5371_v28  ;;  %v5483_v53 = vcombine.high %v5473_v62, %v5473_v62  ;;  %v5630_v28 = vld [vmem:[%s9344_s7 + $0x88] sm:$0xff]  ;;  %v6734_v52 = vpack.c.bf16 %v5664_v3, %v5663_v22  ;;  %v5648_v1 = vld [vmem:[%s9344_s7 + $0x118] sm:$0xff]  ;;  %v6746_v20 = vpack.c.bf16 %v5670_v51, %v5669_v38  ;;  %v5653_v22 = vld [vmem:[%s9344_s7 + $0x140] sm:$0xff] }
0x4591   : > { %5396 = vrot.lane.b32.xlu0 %v5395_v49, %s7447_s16  ;;  %v6698_v33 = vpack.c.bf16 %v5630_v28, %v5629_v47  ;;  %v6704_v49 = vpack.c.bf16 %v5616_v39, %v5615_v59  ;;  %v6716_v21 = vpack.c.bf16 %v5622_v19, %v5621_v18  ;;  %v5654_v3 = vld [vmem:[%s9344_s7 + $0x148] sm:$0xff]  ;;  %v5640_v59 = vld [vmem:[%s9344_s7 + $0xd8] sm:$0xff]  ;;  %v5671_v39 = vld [vmem:[%s9344_s7 + $0x1d0] sm:$0xff] }
0x4592   : > { %v5522_v54 = vcombine.high %v5512_v9, %v5512_v9  ;;  %6735 = vmatprep.subr.bf16.mxu1 %v6734_v52  ;;  %v5639_v52 = vld [vmem:[%s9344_s7 + $0xd0] sm:$0xff] }
0x4593   : > { %5441 = vrot.lane.b32.xlu1 %v5440_v61, %s7447_s16  ;;  %6699 = vmatprep.subr.bf16.mxu0 %v6698_v33  ;;  %v6736_v61 = vpack.c.bf16 %v5648_v1, %v5647_v60  ;;  %v5652_v33 = vld [vmem:[%s9344_s7 + $0x138] sm:$0xff]  ;;  %v6718_v60 = vpack.c.bf16 %v5640_v59, %v5639_v52  ;;  %v5623_v1 = vld [vmem:[%s9344_s7 + $0x50] sm:$0xff]  ;;  %v5925_v52 = vld [vmem:[%s9348_s11 + $0x8] sm:$0xff] }
0x4594   : > { %6701 = vmatpush3.bf16.msra.mxu0 %v6700_v30  ;;  %v6744_v35 = vpack.c.bf16 %v5652_v33, %v5651_v48  ;;  %v6714_v30 = vpack.c.bf16 %v5638_v37, %v5637_v36  ;;  %v5529_v33 = vld [vmem:[%s9343_s6] sm:$0xf]  ;;  %v5841_v37 = vld [vmem:[%s9346_s9 + $0x8] sm:$0xff] }
0x4595   : > { %5474 = vrot.lane.b32.xlu0 %v5473_v62, %s7448_s30  ;;  %6703 = vmatprep.subr.bf16.mxu0 %v6702_v23  ;;  %v6748_v23 = vpack.c.bf16 %v5654_v3, %v5653_v22  ;;  %v5840_v36 = vld [vmem:[%s9346_s9] sm:$0xff]  ;;  %v5846_v22 = vld [vmem:[%s9346_s9 + $0x30] sm:$0xff] }
0x4596   : > { %6737 = vmatpush3.bf16.msra.mxu1 %v6736_v61  ;;  %v5624_v61 = vld [vmem:[%s9344_s7 + $0x58] sm:$0xff] }
0x4597   : > { %5513 = vrot.lane.b32.xlu1 %v5512_v9, %s7448_s30  ;;  %s7382_s30 = sshll.u32 %s7451_s22, 4  ;;  %s7383_s30 = int_to_ptr.vmem [resolvable:$false] %s7382_s30 }
0x4598   : > { %6705 = vmatpush3.bf16.msra.mxu0 %v6704_v49  ;;  %v5672_v49 = vld [vmem:[%s9344_s7 + $0x1d8] sm:$0xff]  ;;  %p7385_p0 = scmp.lt.s32.totalorder %s9296_s23, %s7383_s30 }
0x4599   : > { %5479 = vrot.lane.b32.xlu0 %v5478_v5, %s7447_s16 }
0x459b   : > { %5518 = vrot.lane.b32.xlu1 %v5517_v6, %s7447_s16  ;;  %s6027_s16 = scalar_lea.sflag [#allocation4], %s485_s20 }
0x459d   : > { %5404 = vrot.lane.b32.xlu0 %v5403_v10, %s9368_s25 }
0x459f   : > { %5446 = vrot.lane.b32.xlu1 %v5445_v12, %s9368_s25 }
0x45a1   : > { %5484 = vrot.lane.b32.xlu0 %v5483_v53, %s9368_s25 }
0x45a3   : > { %5523 = vrot.lane.b32.xlu1 %v5522_v54, %s9368_s25  ;;  %s7384_s25 = scalar_lea.vmem %s7383_s30, 32 }
0x45a4   : > { %p7386_p1 = scmp.lt.s32.totalorder %s7384_s25, %s7378_s2 }
0x45a6   : > { %p7387_p2 = por %p7386_p1, %p7385_p0 }
0x45a8   : > { %p7388_p3 = pnand %p7387_p2, %p7381_p13 }
0x45ff   : > { %v5389_v56 = vpop.permute.xlu0 %5388 }
0x4600   : > { %5394 = vst.msk [vmem:[#allocation2] sm:$0x1] %vm5393_vm5, %v5389_v56 }
0x4601   : > { %v5437_v57 = vpop.permute.xlu1 %5436 }
0x4602   : > { %5439 = vst.msk [vmem:[#allocation2 + $0x1] sm:$0x1] %vm5393_vm5, %v5437_v57 }
0x4603   : > { %v5397_v55 = vpop.permute.xlu0 %5396 }
0x4604   : > { %5402 = vst.msk [vmem:[#allocation2] sm:$0x1] %vm8981_vm8, %v5397_v55 }
0x4605   : > { %v5442_v16 = vpop.permute.xlu1 %5441 }
0x4606   : > { %5444 = vst.msk [vmem:[#allocation2 + $0x1] sm:$0x1] %vm8981_vm8, %v5442_v16 }
0x4607   : > { %v5475_v46 = vpop.permute.xlu0 %5474 }
0x4608   : > { %5477 = vst.msk [vmem:[#allocation2 + $0x2] sm:$0x1] %vm5393_vm5, %v5475_v46 }
0x4609   : > { %v5514_v17 = vpop.permute.xlu1 %5513 }
0x460a   : > { %5516 = vst.msk [vmem:[#allocation2 + $0x3] sm:$0x1] %vm5393_vm5, %v5514_v17  ;;  %v5633_v17 = vld [vmem:[%s9344_s7 + $0xa0] sm:$0xff] }
0x460b   : > { %v5480_v24 = vpop.permute.xlu0 %5479 }
0x460c   : > { %5482 = vst.msk [vmem:[#allocation2 + $0x2] sm:$0x1] %vm8981_vm8, %v5480_v24  ;;  %v5634_v24 = vld [vmem:[%s9344_s7 + $0xa8] sm:$0xff] }
0x460d   : > { %v5519_v25 = vpop.permute.xlu1 %5518 }
0x460e   : > { %5521 = vst.msk [vmem:[#allocation2 + $0x3] sm:$0x1] %vm8981_vm8, %v5519_v25  ;;  %v5665_v25 = vld [vmem:[%s9344_s7 + $0x1a0] sm:$0xff] }
0x460f   : > { %v5405_v26 = vpop.permute.xlu0 %5404 }
0x4610   : > { %5410 = vst.msk [vmem:[#allocation2] sm:$0x1] %vm5409_vm11, %v5405_v26  ;;  %v6706_v26 = vpack.c.bf16 %v5634_v24, %v5633_v17  ;;  %v5658_v17 = vld [vmem:[%s9344_s7 + $0x168] sm:$0xff]  ;;  %v5643_v24 = vld [vmem:[%s9344_s7 + $0xf0] sm:$0xff] }
0x4611   : > { %v5447_v27 = vpop.permute.xlu1 %5446 }
0x4612   : > { %5449 = vst.msk [vmem:[#allocation2 + $0x1] sm:$0x1] %vm5409_vm11, %v5447_v27  ;;  %v5666_v27 = vld [vmem:[%s9344_s7 + $0x1a8] sm:$0xff]  ;;  %6707 = vmatprep.subr.bf16.mxu0 %v6706_v26  ;;  %v5644_v26 = vld [vmem:[%s9344_s7 + $0xf8] sm:$0xff] }
0x4613   : > { %v5485_v0 = vpop.permute.xlu0 %5484 }
0x4614   : > { %5487 = vst.msk [vmem:[#allocation2 + $0x2] sm:$0x1] %vm5409_vm11, %v5485_v0  ;;  %v5617_v0 = vld [vmem:[%s9344_s7 + $0x20] sm:$0xff] }
0x4615   : > { %v5524_v58 = vpop.permute.xlu1 %5523 }
0x4616   : > { %5526 = vst.msk [vmem:[#allocation2 + $0x3] sm:$0x1] %vm5409_vm11, %v5524_v58  ;;  %v5618_v58 = vld [vmem:[%s9344_s7 + $0x28] sm:$0xff] }
0x461d   : > { %v5527_v29 = vld [vmem:[#allocation2] sm:$0xf] }
0x461e   : > { %v5534_v15 = vrot.slane %v5527_v29, %v8996_v2  ;;  %v5538_v31 = vrot.slane %v5527_v29, %v8999_v4  ;;  %v5542_v14 = vrot.slane %v5527_v29, %v9002_v13  ;;  %v5546_v32 = vrot.slane %v5527_v29, %v9005_v7 }
0x4620   : > { %v5552_v40 = vsel %vm5551_vm12, %v5534_v15, 0.0  ;;  %v5553_v41 = vsel %vm5551_vm12, %v5538_v31, 0.0  ;;  %v5555_v44 = vsel %vm5551_vm12, %v5542_v14, 0.0  ;;  %v5557_v42 = vsel %vm5551_vm12, %v5546_v32, 0.0  ;;  %v5649_v31 = vld [vmem:[%s9344_s7 + $0x120] sm:$0xff]  ;;  %v5650_v14 = vld [vmem:[%s9344_s7 + $0x128] sm:$0xff] }
0x4621   : > { %v5554_v43 = vadd.f32 %v5553_v41, %v5552_v40  ;;  %v6708_v15 = vpack.c.bf16 %v5618_v58, %v5617_v0  ;;  %v6740_v32 = vpack.c.bf16 %v5650_v14, %v5649_v31  ;;  %v5635_v40 = vld [vmem:[%s9344_s7 + $0xb0] sm:$0xff]  ;;  %v5636_v41 = vld [vmem:[%s9344_s7 + $0xb8] sm:$0xff]  ;;  %v6726_v58 = vpack.c.bf16 %v5644_v26, %v5643_v24 }
0x4622   : > { %v5676_v0 = vld [vmem:[%s9344_s7 + $0x1f8] sm:$0xff]  ;;  %v5659_v14 = vld [vmem:[%s9344_s7 + $0x170] sm:$0xff] }
0x4623   : > { %v5556_v8 = vadd.f32 %v5555_v44, %v5554_v43  ;;  %6709 = vmatpush3.bf16.msra.mxu0 %v6708_v15  ;;  %v5667_v43 = vld [vmem:[%s9344_s7 + $0x1b0] sm:$0xff]  ;;  %v6710_v44 = vpack.c.bf16 %v5636_v41, %v5635_v40  ;;  %v5628_v31 = vld [vmem:[%s9344_s7 + $0x78] sm:$0xff] }
0x4624   : > { %v5627_v15 = vld [vmem:[%s9344_s7 + $0x70] sm:$0xff]  ;;  %v5660_v40 = vld [vmem:[%s9344_s7 + $0x178] sm:$0xff] }
0x4625   : > { %v5558_v45 = vadd.f32 %v5557_v42, %v5556_v8  ;;  %v5668_v8 = vld [vmem:[%s9344_s7 + $0x1b8] sm:$0xff]  ;;  %v5619_v42 = vld [vmem:[%s9344_s7 + $0x30] sm:$0xff]  ;;  %6711 = vmatprep.subr.bf16.mxu0 %v6710_v44  ;;  %v6760_v41 = vpack.c.bf16 %v5660_v40, %v5659_v14  ;;  %v6003_v40 = vld [vmem:[%s9350_s13] sm:$0x1] }
0x4626   : > { %v6742_v47 = vpack.c.bf16 %v5668_v8, %v5667_v43  ;;  %v7450_v43 = vmov 0.0|0.0  }
0x4627   : > { %5559 = vadd.xlane.f32.xlu0 %v5558_v45  ;;  %v5620_v45 = vld [vmem:[%s9344_s7 + $0x38] sm:$0xff] }
0x4628   : > { %v6712_v28 = vpack.c.bf16 %v5620_v45, %v5619_v42 }
0x462a   : > { %6713 = vmatpush3.bf16.msra.mxu0 %v6712_v28  ;;  %v5528_v28 = vld [vmem:[%s9342_s5] sm:$0xf] }
0x462b   : > { %6715 = vmatprep.subr.bf16.mxu0 %v6714_v30  ;;  %v6763_v30 = vpack.c.bf16 %v5841_v37, %v5840_v36 }
0x462e   : > { %6717 = vmatpush3.bf16.msra.mxu0 %v6716_v21  ;;  %v5843_v21 = vld [vmem:[%s9346_s9 + $0x18] sm:$0xff] }
0x462f   : > { %6719 = vmatprep.subr.bf16.mxu0 %v6718_v60 }
0x46b4   : > { %v5560_v50 = vpop.xlane.xlu0 %5559 }
0x46b5   : > { %v5562_v62 = vmul.f32 0.001953125, %v5560_v50  ;;  %v6750_v50 = vpack.c.bf16 %v5672_v49, %v5671_v39  ;;  %v5677_v49 = vld [vmem:[%s9345_s8] sm:$0x1] }
0x46b7   : > { %v5567_v63 = vrot.slane %v5562_v62, %v8996_v2  ;;  %v6720_v62 = vpack.c.bf16 %v5624_v61, %v5623_v1 }
0x46b9   : > { %v9064_v9 = vsub.f32 %v5527_v29, %v5567_v63  ;;  %v6738_v29 = vpack.c.bf16 %v5666_v27, %v5665_v25  ;;  %v5655_v63 = vld [vmem:[%s9344_s7 + $0x150] sm:$0xff]  ;;  %6721 = vmatpush3.bf16.msra.mxu0 %v6720_v62 }
0x46ba   : > { %v5675_v27 = vld [vmem:[%s9344_s7 + $0x1f0] sm:$0xff] }
0x46bb   : > { %v5570_v5 = vmul.f32 %v9064_v9, %v9064_v9  ;;  %6739 = vmatprep.subr.bf16.mxu1 %v6738_v29  ;;  %v6758_v29 = vpack.c.bf16 %v5676_v0, %v5675_v27 }
0x46bc   : > { %6741 = vmatpush3.bf16.msra.mxu1 %v6740_v32  ;;  %v6728_v32 = vpack.c.bf16 %v5628_v31, %v5627_v15 }
0x46bd   : > { %v5575_v6 = vrot.slane %v5570_v5, %v8996_v2  ;;  %v5579_v10 = vrot.slane %v5570_v5, %v8999_v4  ;;  %v5583_v12 = vrot.slane %v5570_v5, %v9002_v13  ;;  %v5587_v53 = vrot.slane %v5570_v5, %v9005_v7  ;;  %6743 = vmatprep.subr.bf16.mxu1 %v6742_v47  ;;  %v5656_v5 = vld [vmem:[%s9344_s7 + $0x158] sm:$0xff] }
0x46bf   : > { %v5592_v54 = vsel %vm5551_vm12, %v5575_v6, 0.0  ;;  %v5593_v56 = vsel %vm5551_vm12, %v5579_v10, 0.0  ;;  %v5595_v11 = vsel %vm5551_vm12, %v5583_v12, 0.0  ;;  %v5597_v16 = vsel %vm5551_vm12, %v5587_v53, 0.0  ;;  %v5641_v10 = vld [vmem:[%s9344_s7 + $0xe0] sm:$0xff]  ;;  %v5642_v12 = vld [vmem:[%s9344_s7 + $0xe8] sm:$0xff] }
0x46c0   : > { %v5594_v57 = vadd.f32 %v5593_v56, %v5592_v54  ;;  %6745 = vmatpush3.bf16.msra.mxu1 %v6744_v35  ;;  %v6752_v6 = vpack.c.bf16 %v5656_v5, %v5655_v63  ;;  %v5673_v53 = vld [vmem:[%s9344_s7 + $0x1e0] sm:$0xff]  ;;  %v6722_v54 = vpack.c.bf16 %v5642_v12, %v5641_v10  ;;  %v5674_v56 = vld [vmem:[%s9344_s7 + $0x1e8] sm:$0xff]  ;;  %v5926_v10 = vld [vmem:[%s9348_s11 + $0x10] sm:$0xff] }
0x46c1   : > { %6747 = vmatprep.subr.bf16.mxu1 %v6746_v20  ;;  %v5842_v20 = vld [vmem:[%s9346_s9 + $0x10] sm:$0xff]  ;;  %v5927_v12 = vld [vmem:[%s9348_s11 + $0x18] sm:$0xff] }
0x46c2   : > { %v5596_v55 = vadd.f32 %v5595_v11, %v5594_v57  ;;  %v5625_v57 = vld [vmem:[%s9344_s7 + $0x60] sm:$0xff]  ;;  %v5626_v11 = vld [vmem:[%s9344_s7 + $0x68] sm:$0xff]  ;;  %6723 = vmatprep.subr.bf16.mxu0 %v6722_v54 }
0x46c3   : > { %v5848_v54 = vld [vmem:[%s9347_s10] sm:$0x1] }
0x46c4   : > { %v5598_v46 = vadd.f32 %v5597_v16, %v5596_v55  ;;  %6749 = vmatpush3.bf16.msra.mxu1 %v6748_v23  ;;  %v6754_v55 = vpack.c.bf16 %v5674_v56, %v5673_v53  ;;  %v6724_v16 = vpack.c.bf16 %v5626_v11, %v5625_v57  ;;  %v5924_v23 = vld [vmem:[%s9348_s11] sm:$0xff]  ;;  %v6778_v53 = vpack.c.bf16 %v5927_v12, %v5926_v10 }
0x46c5   : > { %6751 = vmatprep.subr.bf16.mxu1 %v6750_v50  ;;  %v6775_v59 = vpack.c.bf16 %v5925_v52, %v5924_v23 }
0x46c6   : > { %5599 = vadd.xlane.f32.xlu1 %v5598_v46  ;;  %v5657_v46 = vld [vmem:[%s9344_s7 + $0x160] sm:$0xff]  ;;  %6725 = vmatpush3.bf16.msra.mxu0 %v6724_v16 }
0x46c7   : > { %v6756_v25 = vpack.c.bf16 %v5658_v17, %v5657_v46  ;;  %6727 = vmatprep.subr.bf16.mxu0 %v6726_v58  ;;  %v5928_v16 = vld [vmem:[%s9349_s12] sm:$0x1] }
0x46c8   : > { %6753 = vmatpush3.bf16.msra.mxu1 %v6752_v6 }
0x46c9   : > { %6755 = vmatprep.subr.bf16.mxu1 %v6754_v55 }
0x46ca   : > { %6729 = vmatpush3.bf16.msra.mxu0 %v6728_v32 }
0x46cb   : > { %6762 = vmatprep.subr.bf16.mxu0 %v7450_v43 }
0x46cc   : > { %6757 = vmatpush3.bf16.msra.mxu1 %v6756_v25 }
0x46cd   : > { %6759 = vmatprep.subr.bf16.mxu1 %v6758_v29 }
0x46d0   : > { %6761 = vmatpush3.bf16.msra.mxu1 %v6760_v41 }
0x46d1   : > { %6774 = vmatprep.subr.bf16.mxu1 %v7450_v43 }
0x4753   : > { %v5600_v44 = vpop.xlane.xlu1 %5599 }
0x4754   : > { %v5601_v8 = vmul.f32 0.001953125, %v5600_v44 }
0x4756   : > { %v5602_v42 = vadd.f32 1e-05, %v5601_v8 }
0x4758   : > { %7342 = vrsqrt.f32 %v5602_v42 }
0x4762   : > { %v7343_v45 = vpop.eup %7342 }
0x4763   : > { %v5608_v47 = vrot.slane %v7343_v45, %v8996_v2 }
0x4765   : > { %v5610_v48 = vmul.f32 %v5608_v47, %v9064_v9 }
0x4767   : > { %v5611_v35 = vmul.f32 %v5610_v48, %v5528_v28 }
0x4769   : > { %v5612_v38 = vadd.f32 %v5611_v35, %v5529_v33 }
0x476b   : > { %v5686_v51 = vrot.slane %v5612_v38, %v8999_v4  ;;  %v5694_v18 = vrot.slane %v5612_v38, %v9005_v7  ;;  %v5682_v9 = vrot.slane %v5612_v38, %v8996_v2  ;;  %v5690_v19 = vrot.slane %v5612_v38, %v9002_v13  ;;  %v5844_v2 = vld [vmem:[%s9346_s9 + $0x20] sm:$0xff]  ;;  %v5845_v13 = vld [vmem:[%s9346_s9 + $0x28] sm:$0xff] }
0x476c   : > { %v6766_v4 = vpack.c.bf16 %v5843_v21, %v5842_v20  ;;  %v6769_v7 = vpack.c.bf16 %v5845_v13, %v5844_v2 }
0x476d   : > { %5763 = vmatprep.mubr.f32.mxu0 %v5686_v51  ;;  %5833 = vmatprep.mubr.f32.mxu1 %v5694_v18 }
0x476e   : > { %5764 = vmatmul.mubr.f32.vlgmr.msra.gmra.mrb[144].mxu0 %v5682_v9  ;;  %5834 = vmatmul.mubr.f32.vlgmr.msra.gmra.mrb[144].mxu1 %v5690_v19 }
0x476f   : > { %6764 = vmatpush3.bf16.msra.mxu0 %v6763_v30  ;;  %6684 = vmatprep.mubr.msk.f32.mxu0 %vm7445_vm1, %v7443_v34 }
0x4770   : > { %6765 = vmatprep.subr.bf16.mxu0 %v7450_v43  ;;  %6695 = vmatprep.mubr.msk.f32.mxu1 %vm7445_vm1, %v7443_v34  ;;  %v5847_v34 = vld [vmem:[%s9346_s9 + $0x38] sm:$0xff] }
0x4771   : > { %v6772_v3 = vpack.c.bf16 %v5847_v34, %v5846_v22  ;;  %6776 = vmatpush3.bf16.msra.mxu1 %v6775_v59 }
0x4772   : > { %6777 = vmatprep.subr.bf16.mxu1 %v7450_v43 }
0x4773   : > { %6767 = vmatpush3.bf16.msra.mxu0 %v6766_v4 }
0x4774   : > { %6768 = vmatprep.subr.bf16.mxu0 %v7450_v43 }
0x4775   : > { %6779 = vmatpush3.bf16.msra.mxu1 %v6778_v53 }
0x4777   : > { %6770 = vmatpush3.bf16.msra.mxu0 %v6769_v7 }
0x4778   : > { %6771 = vmatprep.subr.bf16.mxu0 %v7450_v43  ;;  %v6004_v43 = vld [vmem:[%s9351_s14] sm:$0x1] }
0x477b   : > { %6773 = vmatpush3.bf16.msra.mxu0 %v6772_v3 }
0x4841   : > { %v6400_v39 = vpop.f32.mrb[144].mxu0  ;;  %v6435_v60 = vpop.f32.mrb[144].mxu1 }
0x4842   : > { %v6401_v1 = vpop.f32.mrb[145].mxu0  ;;  %v6436_v61 = vpop.f32.mrb[145].mxu1 }
0x4843   : > { %v6402_v50 = vadd.f32 %v6401_v1, %v6400_v39  ;;  %v6437_v62 = vadd.f32 %v6436_v61, %v6435_v60 }
0x4845   : > { %v5766_v63 = vadd.f32 %v6402_v50, %v5677_v49 }
0x4847   : > { %v5836_v5 = vadd.f32 %v6437_v62, %v5766_v63 }
0x4849   : > { %v5839_v6 = vmax.f32 %v5836_v5, 0.0 }
0x484b   : > { %6685 = vmatmul.mubr.msk.f32.vlgmr.msra.gmra.mrb[146].mxu0 %vm5849_vm13, %v5839_v6 }
0x491e   : > { %v5919_v56 = vpop.f32.mrb[146].mxu0 }
0x491f   : > { %v5920_v57 = vadd.f32 %v5919_v56, %v5848_v54  ;;  %v6686_v11 = vpop.f32.mrb[147].mxu0 }
0x4921   : > { %v5923_v55 = vmax.f32 %v5920_v57, 0.0 }
0x4923   : > { %6696 = vmatmul.mubr.msk.f32.vlgmr.msra.gmra.mrb[146].mxu1 %vm5929_vm14, %v5923_v55 }
0x49f6   : > { %v5999_v46 = vpop.f32.mrb[146].mxu1 }
0x49f7   : > { %v6000_v17 = vadd.f32 %v5999_v46, %v5928_v16  ;;  %v6697_v24 = vpop.f32.mrb[147].mxu1 }
0x49f9   : > { %v6006_v25 = vsel %vm6005_vm15, %v6000_v17, 0.0 }
0x49fa   : > { %6007 = vadd.xlane.f32.xlu0 %v6006_v25 }
0x4a87   : > { %v6008_v26 = vpop.xlane.xlu0 %6007 }
0x4a88   : > { %v6010_v27 = vmul.f32 0.25, %v6008_v26 }
0x4a8a   : > { %v6011_v0 = vsub.f32 %v6000_v17, %v6010_v27 }
0x4a8c   : > { %v6012_v58 = vmul.f32 %v6011_v0, %v6011_v0 }
0x4a8e   : > { %v6013_v29 = vsel %vm6005_vm15, %v6012_v58, 0.0 }
0x4a8f   : > { %6014 = vadd.xlane.f32.xlu0 %v6013_v29 }
0x4b1c   : > { %v6015_v15 = vpop.xlane.xlu0 %6014 }
0x4b1d   : > { %v6016_v31 = vmul.f32 0.25, %v6015_v15 }
0x4b1f   : > { %v6017_v14 = vadd.f32 1e-05, %v6016_v31 }
0x4b21   : > { %7344 = vrsqrt.f32 %v6017_v14 }
0x4b2b   : > { %v7345_v32 = vpop.eup %7344 }
0x4b2c   : > { %v6019_v41 = vmul.f32 %v7345_v32, %v6011_v0 }
0x4b2e   : > { %v6020_v44 = vmul.f32 %v6019_v41, %v6003_v40 }
0x4b30   : > { %v6021_v8 = vadd.f32 %v6020_v44, %v6004_v43 }
0x4b32   : > { %v6292_v42 = vclamps-f32 %v6021_v8, 6.0 }
0x4b34   : > { %7346 = vtanh.f32 %v6292_v42 }
0x4b3e   : > { %v7347_v45 = vpop.eup %7346 }
0x4b3f   : > { %6025 = vst.msk [vmem:[%s486_s0] sm:$0x1] %vm6005_vm15, %v7347_v45 }
0x4b40   : > { %7391 = shalt.err (!%p7388_p3)
}
0x4b41   : > { %s7392_s20 = scalar_lea.hbm %s9294_s1, 16  ;;  %s7396_s27 = scalar_lea.hbm %s9352_s15, 32 }
0x4b42   : > { %p7393_p4 = scmp.ne.s32.totalorder %s9294_s1, %s7392_s20  ;;  %p7397_p9 = scmp.lt.u32.totalorder %s9294_s1, %s9352_s15 }
0x4b43   : > { %p7398_p10 = scmp.lt.u32.totalorder %s7396_s27, %s7392_s20  ;;  %p7400_p12 = scmp.lt.u32.totalorder %s7392_s20, %s9294_s1 }
0x4b44   : > { %p7394_p7 = pnand %p7393_p4, %p7570_p5 }
0x4b45   : > { %p7399_p11 = por %p7398_p10, %p7397_p9 }
0x4b46   : > { %p7395_p8 = pneg %p7394_p7 }
0x4b47   : > { %p7401_p13 = por %p7400_p12, %p7399_p11 }
0x4b49   : > { %p7402_p0 = pnand %p7401_p13, %p7395_p8 }
0x4b4b   : > { %7405 = shalt.err (!%p7402_p0)
}
0x4b4c   : > { %6781 = dma.vmem_to_hbm [thread:$0]  (%p7570_p5), %s9296_s23, 16, %s9294_s1, %s6027_s16  }
0x4b4d PF: > { %p6787_p1 = scmp.ge.s32.totalorder %s7440_s21, 2  ;;  %s6051_s2 = sand.u32 1, %s7428_s18  }
0x4b4e   : > { %s6052_s30 = scalar_lea.sflag [#allocation4], %s6051_s2 }
0x4b4f   : > { %p6784_p2 = pnand %p6787_p1, %p7574_p6 }
0x4b51   : > { %7423 = dma.done.wait (!%p6784_p2), %s6052_s30, 16  }
0x4b52   : > { %7425 = vsyncadd (!%p6784_p2), %s6052_s30, 4294967280  ;;  %s9374_s25 = sld [smem:[#allocation6_spill]]  ;;  %s9375_s20 = sld [smem:[#allocation7_spill]] }
0x4b53   : > { %p25_p3 = scmp.ge.s32.totalorder %s7557_s24, 4   ;;  %s9376_s18 = smov %s7432_s19 }
0x4b54   : > { %s9378_s21 = smov %s7557_s24 }
0x4b55   :  { %27 = sbr.rel (!%p25_p3) target bundleno = 7 (0x7), region = 115 }
0x4b58   : > { %s9377_s19 = smov %s9374_s25 }
0x4b5c   :  { %6056 = vsyncpa [#allocation4], 1 }
0x4b5d   :  { %6058 = vsyncpa [#allocation4 + $0x1], 1 }

</bundles_post_ra>
